<compile_context>
chip_gen: v5e
topology: v5e:2x2
jax: 0.10.0
libtpu: 0.0.40
codegen_flags: <defaults>
</compile_context>

<pallas_src>
import functools

import numpy as np
import jax
import jax.numpy as jnp
from jax import lax
from jax.experimental import pallas as pl
from jax.experimental.pallas import tpu as pltpu

LN_EPS = 1e-6
BN_EPS = 1e-5


# ----------------------------------------------------------------------------
# Fused per-block Pallas kernel
# ----------------------------------------------------------------------------

def _block_kernel(x_ref, dw1w_ref, dw2w_ref, dwbw_ref, cvec_ref, wbcdt_ref,
                  avec_ref, whz_ref, wout_ref, fw1_ref, fb1_ref, fw2_ref,
                  out_ref, h_ref, cbuf_ref, sbuf_ref,
                  *, H, W, S, d_inner, eps):
    """Whole EfficientViMBlock for one batch element; activations stay in VMEM.

    x_ref / out_ref: (L, C) token-major.  h_ref: (S, C) (transposed, lane-dense).
    cbuf_ref: (L + 2*PAD, C)   VMEM staging buffer for the C-channel dwconvs.
    sbuf_ref: (L + 2*PAD, 3S)  VMEM staging buffer for the fused BCdt dwconv.
    """
    L = H * W
    PAD = W + 1                      # covers the largest tap offset |(di-1)*W + (dj-1)|
    C = x_ref.shape[1]
    S3 = 3 * S
    bf16 = jnp.bfloat16

    # packed per-channel constants (9, C)
    ln_w = cvec_ref[0:1, :]
    ln_b = cvec_ref[1:2, :]
    sh1 = cvec_ref[2:3, :]
    sh2 = cvec_ref[3:4, :]
    a0 = cvec_ref[4:5, :]
    a1 = cvec_ref[5:6, :]
    a2 = cvec_ref[6:7, :]
    a3 = cvec_ref[7:8, :]
    fb2 = cvec_ref[8:9, :]

    # Only the border rows of the staging buffers must be zero; the middle L
    # rows are rewritten before every use.  (Do NOT gate this on program_id==0:
    # under megacore "parallel" sharding core 1 never runs b==0.)
    zc = jnp.zeros((PAD, C), jnp.float32)
    zs = jnp.zeros((PAD, S3), jnp.float32)
    cbuf_ref[0:PAD, :] = zc
    cbuf_ref[PAD + L:PAD + L + PAD, :] = zc
    sbuf_ref[0:PAD, :] = zs
    sbuf_ref[PAD + L:PAD + L + PAD, :] = zs

    # 3x3 tap validity masks in token space (token l = h*W + w), built ONCE and
    # reused by all three depthwise convs.
    l_ids = lax.broadcasted_iota(jnp.int32, (L, 1), 0)
    if W & (W - 1) == 0:
        w_ids = jnp.bitwise_and(l_ids, W - 1)
    else:
        w_ids = l_ids % W
    hf = [(l_ids >= W).astype(jnp.float32), None,
          (l_ids < (H - 1) * W).astype(jnp.float32)]
    wf = [(w_ids >= 1).astype(jnp.float32), None,
          (w_ids <= W - 2).astype(jnp.float32)]
    masks = [[None] * 3 for _ in range(3)]
    for di in range(3):
        for dj in range(3):
            if di == 1 and dj == 1:
                masks[di][dj] = None
            elif di == 1:
                masks[di][dj] = wf[dj]
            elif dj == 1:
                masks[di][dj] = hf[di]
            else:
                masks[di][dj] = hf[di] * wf[dj]

    def dw3x3(buf_ref, w_ref, ncol):
        """Depthwise 3x3 conv of the data staged in buf_ref[PAD:PAD+L, :].

        Taps are shifted (L, ncol) windows of the zero-padded staging buffer;
        per-channel weights are rows 3*di + dj of w_ref (BN scale folded).
        """
        acc = jnp.zeros((L, ncol), jnp.float32)
        for di in range(3):
            for dj in range(3):
                off = (di - 1) * W + (dj - 1)
                tap = buf_ref[PAD + off:PAD + off + L, :]
                m = masks[di][dj]
                if m is not None:
                    tap = tap * m
                k = 3 * di + dj
                acc = acc + tap * w_ref[k:k + 1, :]
        return acc

    # ---- dwconv1 (+ folded BN) + alpha0 residual blend -----------------------
    x = x_ref[...]                                           # (L, C) f32
    cbuf_ref[PAD:PAD + L, :] = x
    y1 = dw3x3(cbuf_ref, dw1w_ref, C) + sh1
    x1 = x + a0 * (y1 - x)

    # ---- LayerNorm over channels (per token), f32 statistics ------------------
    mu = jnp.mean(x1, axis=1, keepdims=True)
    xc = x1 - mu
    var = jnp.mean(xc * xc, axis=1, keepdims=True)
    xn = xc * lax.rsqrt(var + eps) * ln_w + ln_b
    xn_bf = xn.astype(bf16)                                  # reused for 2 matmuls

    # ---- fused BCdt projection (L, 3S) + single depthwise 3x3 ------------------
    bcdt = jnp.dot(xn_bf, wbcdt_ref[...],
                   preferred_element_type=jnp.float32)       # (L, 3S)
    sbuf_ref[PAD:PAD + L, :] = bcdt
    bcdt_c = dw3x3(sbuf_ref, dwbw_ref, S3)                   # (L, 3S) f32
    bm = bcdt_c[:, 0:S]
    cm = bcdt_c[:, S:2 * S]
    dt = bcdt_c[:, 2 * S:3 * S]

    # ---- softmax over tokens + HSM-SSD state mix (kept in (S, .) orientation) --
    logits = dt + avec_ref[0:1, :]                           # + A, f32
    m = jnp.max(logits, axis=0, keepdims=True)
    e = jnp.exp(logits - m)
    a_soft = e / jnp.sum(e, axis=0, keepdims=True)           # softmax over L
    ab = a_soft * bm                                         # (L, S) f32

    # (S, C) = ab^T @ xn  (only the small (L,S) operand gets relaid out)
    h_state_t = lax.dot_general(ab.astype(bf16), xn_bf,
                                (((0,), (0,)), ((), ())),
                                preferred_element_type=jnp.float32)      # (S, C)
    hz_t = jnp.dot(h_state_t.astype(bf16), whz_ref[...],
                   preferred_element_type=jnp.float32)       # (S, 2*d_inner)
    h1 = hz_t[:, :d_inner]
    z = hz_t[:, d_inner:]
    d_val = avec_ref[1:2, 0:1]                               # scalar D
    hm = h1 * (z * jax.nn.sigmoid(z) + d_val)                # h1 * (silu(z) + D), f32
    hp_t = jnp.dot(hm.astype(bf16), wout_ref[...],
                   preferred_element_type=jnp.float32)       # (S, C)
    h_ref[...] = hp_t                                        # lane-dense (S, C) store

    y = jnp.dot(cm.astype(bf16), hp_t.astype(bf16),
                preferred_element_type=jnp.float32)          # (L, C), plain matmul
    x2 = x1 + a1 * (y - x1)

    # ---- dwconv2 (+ folded BN) + alpha2 residual blend -------------------------
    cbuf_ref[PAD:PAD + L, :] = x2
    y2 = dw3x3(cbuf_ref, dw2w_ref, C) + sh2
    x3 = x2 + a2 * (y2 - x2)

    # ---- FFN (1x1 + BN + ReLU, 1x1 + BN; scales folded) + alpha3 blend ---------
    t = jnp.maximum(
        jnp.dot(x3.astype(bf16), fw1_ref[...],
                preferred_element_type=jnp.float32) + fb1_ref[...],
        0.0)
    f = jnp.dot(t.astype(bf16), fw2_ref[...],
                preferred_element_type=jnp.float32) + fb2
    out_ref[...] = x3 + a3 * (f - x3)


# ----------------------------------------------------------------------------
# Wrappers
# ----------------------------------------------------------------------------

def efficientvim_block(x_tok, prep, H, W):
    """x_tok: (B, L, C) token-major.  Returns (x_out (B,L,C), h_T (B,S,C))."""
    B, L, C = x_tok.shape
    S = prep["avec"].shape[1]
    d_inner = prep["wout"].shape[0]
    hidden = prep["ffn_w1"].shape[1]
    PAD = W + 1

    kernel = functools.partial(_block_kernel, H=H, W=W, S=S,
                               d_inner=d_inner, eps=LN_EPS)

    def const(shape):
        return pl.BlockSpec(shape, lambda b: (0,) * len(shape))

    out, h_t = pl.pallas_call(
        kernel,
        out_shape=(jax.ShapeDtypeStruct((B, L, C), jnp.float32),
                   jax.ShapeDtypeStruct((B, S, C), jnp.float32)),
        grid=(B,),
        in_specs=[
            pl.BlockSpec((None, L, C), lambda b: (b, 0, 0)),  # x tokens
            const((9, C)),               # dwconv1 weights (BN scale folded), f32
            const((9, C)),               # dwconv2 weights (BN scale folded), f32
            const((9, 3 * S)),           # fused BCdt depthwise weights, f32
            const((9, C)),               # packed per-channel constants, f32
            const((C, 3 * S)),           # BCdt projection weights, bf16
            const((2, S)),               # [A ; D], f32
            const((C, 2 * d_inner)),     # hz_proj weight (transposed), bf16
            const((d_inner, C)),         # out_proj weight (transposed), bf16
            const((C, hidden)),          # FFN w1 (BN scale folded), bf16
            const((1, hidden)),          # FFN b1, f32
            const((hidden, C)),          # FFN w2 (BN scale folded), bf16
        ],
        out_specs=(pl.BlockSpec((None, L, C), lambda b: (b, 0, 0)),
                   pl.BlockSpec((None, S, C), lambda b: (b, 0, 0))),
        scratch_shapes=[pltpu.VMEM((L + 2 * PAD, C), jnp.float32),
                        pltpu.VMEM((L + 2 * PAD, 3 * S), jnp.float32)],
        compiler_params=pltpu.CompilerParams(
            dimension_semantics=("parallel",),
            vmem_limit_bytes=32 * 1024 * 1024),
    )(x_tok, prep["dw1_w"], prep["dw2_w"], prep["dwb_w"], prep["cvec"],
      prep["wbcdt"], prep["avec"], prep["whz"], prep["wout"],
      prep["ffn_w1"], prep["ffn_b1"], prep["ffn_w2"])
    return out, h_t


def efficientvim_stage(x_nchw, prepared_blocks):
    """Stage forward: NCHW in, (x, x_out, h) out (downsample=None)."""
    B, C, H, W = x_nchw.shape
    L = H * W
    x_tok = jnp.transpose(x_nchw, (0, 2, 3, 1)).reshape(B, L, C)
    h_t = None
    for prep in prepared_blocks:
        x_tok, h_t = efficientvim_block(x_tok, prep, H, W)
    x_out = jnp.transpose(x_tok.reshape(B, H, W, C), (0, 3, 1, 2))
    h = jnp.transpose(h_t, (0, 2, 1))       # only the last block's h is needed
    return x_out, x_out, h


# ----------------------------------------------------------------------------
# Parameter initialization (raw, deterministic) and kernel-ready prep
# ----------------------------------------------------------------------------

def _bn_affine(key, c):
    k1, k2, k3, k4 = jax.random.split(key, 4)
    gamma = 1.0 + 0.1 * jax.random.normal(k1, (c,))
    beta = 0.1 * jax.random.normal(k2, (c,))
    mean = 0.1 * jax.random.normal(k3, (c,))
    var = jax.random.uniform(k4, (c,), minval=0.5, maxval=1.5)
    scale = gamma / jnp.sqrt(var + BN_EPS)
    shift = beta - mean * scale
    return (scale.reshape(1, c).astype(jnp.float32),
            shift.reshape(1, c).astype(jnp.float32))


def _conv_w(key, shape, fan_in):
    return (jax.random.normal(key, shape) / np.sqrt(fan_in)).astype(jnp.float32)


def init_block_params(key, dim, mlp_ratio=4.0, ssd_expand=1, state_dim=64):
    d_inner = int(ssd_expand * dim)
    hidden = int(dim * mlp_ratio)
    s3 = 3 * state_dim
    k = jax.random.split(key, 16)
    dw1_scale, dw1_shift = _bn_affine(k[1], dim)
    dw2_scale, dw2_shift = _bn_affine(k[10], dim)
    ffn_s1, ffn_b1 = _bn_affine(k[12], hidden)
    ffn_s2, ffn_b2 = _bn_affine(k[14], dim)
    return dict(
        dw1_w=_conv_w(k[0], (3, 3, dim), 9), dw1_scale=dw1_scale, dw1_shift=dw1_shift,
        ln_w=(1.0 + 0.1 * jax.random.normal(k[2], (1, dim))).astype(jnp.float32),
        ln_b=(0.1 * jax.random.normal(k[3], (1, dim))).astype(jnp.float32),
        wbcdt_T=_conv_w(k[4], (dim, s3), dim),          # BCdt_proj (1x1 conv), transposed
        dwb_w=_conv_w(k[5], (3, 3, s3), 9),             # HSMSSD depthwise (no norm)
        A=jax.random.uniform(k[6], (1, state_dim), jnp.float32, 1.0, 16.0),
        D=jnp.ones((1, 1), jnp.float32),
        whz=_conv_w(k[7], (2 * d_inner, dim), dim),     # hz_proj (1x1 conv)
        wout=_conv_w(k[8], (dim, d_inner), d_inner),    # out_proj (1x1 conv)
        alpha=1e-4 * jnp.ones((4, dim), jnp.float32),
        dw2_w=_conv_w(k[9], (3, 3, dim), 9), dw2_scale=dw2_scale, dw2_shift=dw2_shift,
        ffn_w1_T=_conv_w(k[11], (dim, hidden), dim), ffn_s1=ffn_s1, ffn_b1=ffn_b1,
        ffn_w2_T=_conv_w(k[13], (hidden, dim), hidden), ffn_s2=ffn_s2, ffn_b2=ffn_b2,
    )


def prepare_block_params(p):
    """One-time host transform: fold BN scales into weights, pack constants,
    store MXU operand weights in bf16 (f32 accumulation in-kernel)."""
    C = p["ln_w"].shape[1]
    S = p["A"].shape[1]
    s3 = 3 * S
    bf16 = jnp.bfloat16
    alpha = jax.nn.sigmoid(p["alpha"])                                    # (4, C)

    dw1_w = (p["dw1_w"] * p["dw1_scale"][0]).reshape(9, C)
    dw2_w = (p["dw2_w"] * p["dw2_scale"][0]).reshape(9, C)
    dwb_w = p["dwb_w"].reshape(9, s3)                                      # fused groups

    cvec = jnp.concatenate([p["ln_w"], p["ln_b"], p["dw1_shift"], p["dw2_shift"],
                            alpha, p["ffn_b2"]], axis=0).astype(jnp.float32)   # (9, C)
    avec = jnp.concatenate([p["A"], jnp.broadcast_to(p["D"], (1, S))],
                           axis=0).astype(jnp.float32)                         # (2, S)

    return dict(
        dw1_w=dw1_w, dw2_w=dw2_w, dwb_w=dwb_w, cvec=cvec, avec=avec,
        wbcdt=p["wbcdt_T"].astype(bf16),                   # (C, 3S)
        whz=jnp.transpose(p["whz"]).astype(bf16),          # (C, 2*d_inner)
        wout=jnp.transpose(p["wout"]).astype(bf16),        # (d_inner, C)
        ffn_w1=(p["ffn_w1_T"] * p["ffn_s1"]).astype(bf16),  # (C, hidden)
        ffn_b1=p["ffn_b1"].astype(jnp.float32),            # (1, hidden)
        ffn_w2=(p["ffn_w2_T"] * p["ffn_s2"]).astype(bf16),  # (hidden, C)
    )


# ----------------------------------------------------------------------------
# Pure-JAX reference (original unfused math, full f32) for correctness checking
# ----------------------------------------------------------------------------

_HI = lax.Precision.HIGHEST


def _ref_dwconv_bn_blend(x, w, scale, shift, alpha):
    B, H, W, C = x.shape
    xpad = jnp.pad(x, ((0, 0), (1, 1), (1, 1), (0, 0)))
    acc = jnp.zeros_like(x)
    for di in range(3):
        for dj in range(3):
            acc = acc + xpad[:, di:di + H, dj:dj + W, :] * w[di, dj, :]
    return (1 - alpha) * x + alpha * (acc * scale + shift)


def _ref_block(x_nhwc, p):
    B, H, W, C = x_nhwc.shape
    L = H * W
    S = p["A"].shape[1]
    alpha = jax.nn.sigmoid(p["alpha"])
    a0, a1, a2, a3 = alpha[0:1], alpha[1:2], alpha[2:3], alpha[3:4]
    x1 = _ref_dwconv_bn_blend(x_nhwc, p["dw1_w"], p["dw1_scale"], p["dw1_shift"], a0)
    xf = x1.reshape(B, L, C)
    mu = xf.mean(-1, keepdims=True)
    var = ((xf - mu) ** 2).mean(-1, keepdims=True)
    xn = (xf - mu) / jnp.sqrt(var + LN_EPS) * p["ln_w"] + p["ln_b"]
    bcdt = jnp.einsum("blc,ck->blk", xn, p["wbcdt_T"], precision=_HI)
    s3 = 3 * S
    bcdt_c = _ref_dwconv_bn_blend(bcdt.reshape(B, H, W, s3), p["dwb_w"],
                                  jnp.ones((1, s3)), jnp.zeros((1, s3)), jnp.ones((1, s3)))
    bcdt_c = bcdt_c.reshape(B, L, s3)
    bm, cm, dtm = bcdt_c[..., :S], bcdt_c[..., S:2 * S], bcdt_c[..., 2 * S:]
    a_soft = jax.nn.softmax(dtm + p["A"][None], axis=1)       # softmax over L
    ab = a_soft * bm
    h = jnp.einsum("blc,bls->bcs", xn, ab, precision=_HI)
    hz = jnp.einsum("kc,bcs->bks", p["whz"], h, precision=_HI)
    di = p["wout"].shape[1]
    h1, z = hz[:, :di], hz[:, di:]
    hm = h1 * (z * jax.nn.sigmoid(z)) + h1 * p["D"][0, 0]
    hp = jnp.einsum("cd,bds->bcs", p["wout"], hm, precision=_HI)
    y = jnp.einsum("bls,bcs->blc", cm, hp, precision=_HI)
    x2 = (1 - a1) * xf + a1 * y
    x3 = _ref_dwconv_bn_blend(x2.reshape(B, H, W, C), p["dw2_w"],
                              p["dw2_scale"], p["dw2_shift"], a2)
    xf3 = x3.reshape(B, L, C)
    t = jnp.maximum(jnp.einsum("blc,ck->blk", xf3, p["ffn_w1_T"], precision=_HI)
                    * p["ffn_s1"] + p["ffn_b1"], 0.0)
    f = jnp.einsum("blk,kc->blc", t, p["ffn_w2_T"], precision=_HI) * p["ffn_s2"] + p["ffn_b2"]
    x4 = (1 - a3) * xf3 + a3 * f
    return x4.reshape(B, H, W, C), hp


def _ref_stage(x_nhwc, params):
    h = None
    for p in params:
        x_nhwc, h = _ref_block(x_nhwc, p)
    return x_nhwc, x_nhwc, h


# ----------------------------------------------------------------------------

if __name__ == "__main__":
    # C=128 / state_dim=64 keep the last (lane) dim full-width while staying small.
    B, C, H, W = 2, 128, 8, 8
    depth = 2
    state_dim = 64
    mlp_ratio = 4.0
    ssd_expand = 1

    root = jax.random.PRNGKey(0)
    kx, kp = jax.random.split(root)
    x_nchw = jax.random.normal(kx, (B, C, H, W), dtype=jnp.float32)

    blk_keys = jax.random.split(kp, depth)
    raw_params = [init_block_params(k, C, mlp_ratio, ssd_expand, state_dim)
                  for k in blk_keys]
    prepared = [prepare_block_params(p) for p in raw_params]

    stage_fn = jax.jit(efficientvim_stage)
    x_final, x_out, h = stage_fn(x_nchw, prepared)
    x_final = jax.block_until_ready(x_final)
    h = jax.block_until_ready(h)

    # Correctness check against the pure-JAX reference (original unfused math,
    # f32 everywhere).  The kernel uses bf16 MXU operands with f32 accumulation,
    # so the tolerance is set to cover bf16 input rounding through two blocks.
    x_nhwc = jnp.transpose(x_nchw, (0, 2, 3, 1))
    xr_nhwc, _, hr = _ref_stage(x_nhwc, raw_params)
    xr_nchw = jnp.transpose(xr_nhwc, (0, 3, 1, 2))
    np.testing.assert_allclose(np.asarray(x_final), np.asarray(xr_nchw),
                               rtol=5e-2, atol=3e-2)
    np.testing.assert_allclose(np.asarray(h), np.asarray(hr),
                               rtol=5e-2, atol=1e-2)

    print("KERNEL_OK")
</pallas_src>

<mosaic_0001>
module attributes {stable_mosaic.version = 11 : i64} {
  func.func @_block_kernel(%arg0: i32, %arg1: memref<1x64x128xf32, #tpu.memory_space<vmem>>, %arg2: memref<9x128xf32, #tpu.memory_space<vmem>>, %arg3: memref<9x128xf32, #tpu.memory_space<vmem>>, %arg4: memref<9x192xf32, #tpu.memory_space<vmem>>, %arg5: memref<9x128xf32, #tpu.memory_space<vmem>>, %arg6: memref<128x192xbf16, #tpu.memory_space<vmem>>, %arg7: memref<2x64xf32, #tpu.memory_space<vmem>>, %arg8: memref<128x256xbf16, #tpu.memory_space<vmem>>, %arg9: memref<128x128xbf16, #tpu.memory_space<vmem>>, %arg10: memref<128x512xbf16, #tpu.memory_space<vmem>>, %arg11: memref<1x512xf32, #tpu.memory_space<vmem>>, %arg12: memref<512x128xbf16, #tpu.memory_space<vmem>>, %arg13: memref<1x64x128xf32, #tpu.memory_space<vmem>>, %arg14: memref<1x64x128xf32, #tpu.memory_space<vmem>>, %arg15: memref<82x128xf32, #tpu.memory_space<vmem>>, %arg16: memref<82x192xf32, #tpu.memory_space<vmem>>) attributes {dimension_semantics = [#tpu.dimension_semantics<parallel>], iteration_bounds = array<i64: 2>, scalar_prefetch = 0 : i64, scratch_operands = 2 : i64, tpu.core_type = #tpu.core_type<tc>, window_params = [{transform_indices = @transform_0, window_bounds = array<i64: 1, 64, 128>}, {pipeline_mode = #tpu.pipeline_mode<synchronous>, transform_indices = @transform_1, window_bounds = array<i64: 9, 128>}, {pipeline_mode = #tpu.pipeline_mode<synchronous>, transform_indices = @transform_2, window_bounds = array<i64: 9, 128>}, {pipeline_mode = #tpu.pipeline_mode<synchronous>, transform_indices = @transform_3, window_bounds = array<i64: 9, 192>}, {pipeline_mode = #tpu.pipeline_mode<synchronous>, transform_indices = @transform_4, window_bounds = array<i64: 9, 128>}, {pipeline_mode = #tpu.pipeline_mode<synchronous>, transform_indices = @transform_5, window_bounds = array<i64: 128, 192>}, {pipeline_mode = #tpu.pipeline_mode<synchronous>, transform_indices = @transform_6, window_bounds = array<i64: 2, 64>}, {pipeline_mode = #tpu.pipeline_mode<synchronous>, transform_indices = @transform_7, window_bounds = array<i64: 128, 256>}, {pipeline_mode = #tpu.pipeline_mode<synchronous>, transform_indices = @transform_8, window_bounds = array<i64: 128, 128>}, {pipeline_mode = #tpu.pipeline_mode<synchronous>, transform_indices = @transform_9, window_bounds = array<i64: 128, 512>}, {pipeline_mode = #tpu.pipeline_mode<synchronous>, transform_indices = @transform_10, window_bounds = array<i64: 1, 512>}, {pipeline_mode = #tpu.pipeline_mode<synchronous>, transform_indices = @transform_11, window_bounds = array<i64: 512, 128>}, {transform_indices = @transform_12, window_bounds = array<i64: 1, 64, 128>}, {transform_indices = @transform_13, window_bounds = array<i64: 1, 64, 128>}]} {
    %c0 = arith.constant 0 : index
    %c0_0 = arith.constant 0 : index
    %0 = vector.load %arg5[%c0, %c0_0] : memref<9x128xf32, #tpu.memory_space<vmem>>, vector<1x128xf32>
    %c1 = arith.constant 1 : index
    %c0_1 = arith.constant 0 : index
    %1 = vector.load %arg5[%c1, %c0_1] : memref<9x128xf32, #tpu.memory_space<vmem>>, vector<1x128xf32>
    %c2 = arith.constant 2 : index
    %c0_2 = arith.constant 0 : index
    %2 = vector.load %arg5[%c2, %c0_2] : memref<9x128xf32, #tpu.memory_space<vmem>>, vector<1x128xf32>
    %c3 = arith.constant 3 : index
    %c0_3 = arith.constant 0 : index
    %3 = vector.load %arg5[%c3, %c0_3] : memref<9x128xf32, #tpu.memory_space<vmem>>, vector<1x128xf32>
    %c4 = arith.constant 4 : index
    %c0_4 = arith.constant 0 : index
    %4 = vector.load %arg5[%c4, %c0_4] : memref<9x128xf32, #tpu.memory_space<vmem>>, vector<1x128xf32>
    %c5 = arith.constant 5 : index
    %c0_5 = arith.constant 0 : index
    %5 = vector.load %arg5[%c5, %c0_5] : memref<9x128xf32, #tpu.memory_space<vmem>>, vector<1x128xf32>
    %c6 = arith.constant 6 : index
    %c0_6 = arith.constant 0 : index
    %6 = vector.load %arg5[%c6, %c0_6] : memref<9x128xf32, #tpu.memory_space<vmem>>, vector<1x128xf32>
    %c7 = arith.constant 7 : index
    %c0_7 = arith.constant 0 : index
    %7 = vector.load %arg5[%c7, %c0_7] : memref<9x128xf32, #tpu.memory_space<vmem>>, vector<1x128xf32>
    %c8 = arith.constant 8 : index
    %c0_8 = arith.constant 0 : index
    %8 = vector.load %arg5[%c8, %c0_8] : memref<9x128xf32, #tpu.memory_space<vmem>>, vector<1x128xf32>
    %cst = arith.constant 0.000000e+00 : f32
    %9 = vector.broadcast %cst : f32 to vector<9x128xf32>
    %cst_9 = arith.constant 0.000000e+00 : f32
    %10 = vector.broadcast %cst_9 : f32 to vector<9x192xf32>
    %c0_10 = arith.constant 0 : index
    %c0_11 = arith.constant 0 : index
    %11 = vector.load %arg15[%c0_10, %c0_11] : memref<82x128xf32, #tpu.memory_space<vmem>>, vector<9x128xf32>
    tpu.vector_store %arg15[%c0_10, %c0_11], %9 {strides = array<i32>} : memref<82x128xf32, #tpu.memory_space<vmem>>, vector<9x128xf32>,
    %c73 = arith.constant 73 : index
    %c0_12 = arith.constant 0 : index
    %12 = vector.load %arg15[%c73, %c0_12] : memref<82x128xf32, #tpu.memory_space<vmem>>, vector<9x128xf32>
    tpu.vector_store %arg15[%c73, %c0_12], %9 {strides = array<i32>} : memref<82x128xf32, #tpu.memory_space<vmem>>, vector<9x128xf32>,
    %c0_13 = arith.constant 0 : index
    %c0_14 = arith.constant 0 : index
    %13 = vector.load %arg16[%c0_13, %c0_14] : memref<82x192xf32, #tpu.memory_space<vmem>>, vector<9x192xf32>
    tpu.vector_store %arg16[%c0_13, %c0_14], %10 {strides = array<i32>} : memref<82x192xf32, #tpu.memory_space<vmem>>, vector<9x192xf32>,
    %c73_15 = arith.constant 73 : index
    %c0_16 = arith.constant 0 : index
    %14 = vector.load %arg16[%c73_15, %c0_16] : memref<82x192xf32, #tpu.memory_space<vmem>>, vector<9x192xf32>
    tpu.vector_store %arg16[%c73_15, %c0_16], %10 {strides = array<i32>} : memref<82x192xf32, #tpu.memory_space<vmem>>, vector<9x192xf32>,
    %15 = tpu.iota {dimensions = array<i32: 0>} : vector<64x1xi32>
    %c7_i32 = arith.constant 7 : i32
    %16 = vector.broadcast %c7_i32 : i32 to vector<64x1xi32>
    %17 = arith.andi %15, %16 : vector<64x1xi32>
    %c8_i32 = arith.constant 8 : i32
    %18 = vector.broadcast %c8_i32 : i32 to vector<64x1xi32>
    %19 = arith.cmpi sge, %15, %18 : vector<64x1xi32>
    %20 = arith.extui %19 : vector<64x1xi1> to vector<64x1xi32>
    %21 = arith.sitofp %20 : vector<64x1xi32> to vector<64x1xf32>
    %c56_i32 = arith.constant 56 : i32
    %22 = vector.broadcast %c56_i32 : i32 to vector<64x1xi32>
    %23 = arith.cmpi slt, %15, %22 : vector<64x1xi32>
    %24 = arith.extui %23 : vector<64x1xi1> to vector<64x1xi32>
    %25 = arith.sitofp %24 : vector<64x1xi32> to vector<64x1xf32>
    %c1_i32 = arith.constant 1 : i32
    %26 = vector.broadcast %c1_i32 : i32 to vector<64x1xi32>
    %27 = arith.cmpi sge, %17, %26 : vector<64x1xi32>
    %28 = arith.extui %27 : vector<64x1xi1> to vector<64x1xi32>
    %29 = arith.sitofp %28 : vector<64x1xi32> to vector<64x1xf32>
    %c6_i32 = arith.constant 6 : i32
    %30 = vector.broadcast %c6_i32 : i32 to vector<64x1xi32>
    %31 = arith.cmpi sle, %17, %30 : vector<64x1xi32>
    %32 = arith.extui %31 : vector<64x1xi1> to vector<64x1xi32>
    %33 = arith.sitofp %32 : vector<64x1xi32> to vector<64x1xf32>
    %34 = arith.mulf %21, %29 : vector<64x1xf32>
    %35 = arith.mulf %21, %33 : vector<64x1xf32>
    %36 = arith.mulf %25, %29 : vector<64x1xf32>
    %37 = arith.mulf %25, %33 : vector<64x1xf32>
    %c0_17 = arith.constant 0 : index
    %c0_18 = arith.constant 0 : index
    %c0_19 = arith.constant 0 : index
    %38 = vector.load %arg1[%c0_17, %c0_18, %c0_19] : memref<1x64x128xf32, #tpu.memory_space<vmem>>, vector<1x64x128xf32>
    %39 = vector.shape_cast %38 : vector<1x64x128xf32> to vector<64x128xf32>
    %c9 = arith.constant 9 : index
    %c0_20 = arith.constant 0 : index
    %40 = vector.load %arg15[%c9, %c0_20] : memref<82x128xf32, #tpu.memory_space<vmem>>, vector<64x128xf32>
    tpu.vector_store %arg15[%c9, %c0_20], %39 {strides = array<i32>} : memref<82x128xf32, #tpu.memory_space<vmem>>, vector<64x128xf32>,
    %cst_21 = arith.constant 0.000000e+00 : f32
    %41 = vector.broadcast %cst_21 : f32 to vector<64x128xf32>
    %c0_22 = arith.constant 0 : index
    %c0_23 = arith.constant 0 : index
    %42 = vector.load %arg15[%c0_22, %c0_23] : memref<82x128xf32, #tpu.memory_space<vmem>>, vector<64x128xf32>
    %43 = vector.broadcast %34 : vector<64x1xf32> to vector<64x128xf32>
    %44 = arith.mulf %42, %43 : vector<64x128xf32>
    %c0_24 = arith.constant 0 : index
    %c0_25 = arith.constant 0 : index
    %45 = vector.load %arg2[%c0_24, %c0_25] : memref<9x128xf32, #tpu.memory_space<vmem>>, vector<1x128xf32>
    %46 = vector.broadcast %45 : vector<1x128xf32> to vector<64x128xf32>
    %47 = arith.mulf %44, %46 : vector<64x128xf32>
    %48 = arith.addf %41, %47 : vector<64x128xf32>
    %c1_26 = arith.constant 1 : index
    %c0_27 = arith.constant 0 : index
    %49 = vector.load %arg15[%c1_26, %c0_27] : memref<82x128xf32, #tpu.memory_space<vmem>>, vector<64x128xf32>
    %50 = vector.broadcast %21 : vector<64x1xf32> to vector<64x128xf32>
    %51 = arith.mulf %49, %50 : vector<64x128xf32>
    %c1_28 = arith.constant 1 : index
    %c0_29 = arith.constant 0 : index
    %52 = vector.load %arg2[%c1_28, %c0_29] : memref<9x128xf32, #tpu.memory_space<vmem>>, vector<1x128xf32>
    %53 = vector.broadcast %52 : vector<1x128xf32> to vector<64x128xf32>
    %54 = arith.mulf %51, %53 : vector<64x128xf32>
    %55 = arith.addf %48, %54 : vector<64x128xf32>
    %c2_30 = arith.constant 2 : index
    %c0_31 = arith.constant 0 : index
    %56 = vector.load %arg15[%c2_30, %c0_31] : memref<82x128xf32, #tpu.memory_space<vmem>>, vector<64x128xf32>
    %57 = vector.broadcast %35 : vector<64x1xf32> to vector<64x128xf32>
    %58 = arith.mulf %56, %57 : vector<64x128xf32>
    %c2_32 = arith.constant 2 : index
    %c0_33 = arith.constant 0 : index
    %59 = vector.load %arg2[%c2_32, %c0_33] : memref<9x128xf32, #tpu.memory_space<vmem>>, vector<1x128xf32>
    %60 = vector.broadcast %59 : vector<1x128xf32> to vector<64x128xf32>
    %61 = arith.mulf %58, %60 : vector<64x128xf32>
    %62 = arith.addf %55, %61 : vector<64x128xf32>
    %c8_34 = arith.constant 8 : index
    %c0_35 = arith.constant 0 : index
    %63 = vector.load %arg15[%c8_34, %c0_35] : memref<82x128xf32, #tpu.memory_space<vmem>>, vector<64x128xf32>
    %64 = vector.broadcast %29 : vector<64x1xf32> to vector<64x128xf32>
    %65 = arith.mulf %63, %64 : vector<64x128xf32>
    %c3_36 = arith.constant 3 : index
    %c0_37 = arith.constant 0 : index
    %66 = vector.load %arg2[%c3_36, %c0_37] : memref<9x128xf32, #tpu.memory_space<vmem>>, vector<1x128xf32>
    %67 = vector.broadcast %66 : vector<1x128xf32> to vector<64x128xf32>
    %68 = arith.mulf %65, %67 : vector<64x128xf32>
    %69 = arith.addf %62, %68 : vector<64x128xf32>
    %c9_38 = arith.constant 9 : index
    %c0_39 = arith.constant 0 : index
    %70 = vector.load %arg15[%c9_38, %c0_39] : memref<82x128xf32, #tpu.memory_space<vmem>>, vector<64x128xf32>
    %c4_40 = arith.constant 4 : index
    %c0_41 = arith.constant 0 : index
    %71 = vector.load %arg2[%c4_40, %c0_41] : memref<9x128xf32, #tpu.memory_space<vmem>>, vector<1x128xf32>
    %72 = vector.broadcast %71 : vector<1x128xf32> to vector<64x128xf32>
    %73 = arith.mulf %70, %72 : vector<64x128xf32>
    %74 = arith.addf %69, %73 : vector<64x128xf32>
    %c10 = arith.constant 10 : index
    %c0_42 = arith.constant 0 : index
    %75 = vector.load %arg15[%c10, %c0_42] : memref<82x128xf32, #tpu.memory_space<vmem>>, vector<64x128xf32>
    %76 = vector.broadcast %33 : vector<64x1xf32> to vector<64x128xf32>
    %77 = arith.mulf %75, %76 : vector<64x128xf32>
    %c5_43 = arith.constant 5 : index
    %c0_44 = arith.constant 0 : index
    %78 = vector.load %arg2[%c5_43, %c0_44] : memref<9x128xf32, #tpu.memory_space<vmem>>, vector<1x128xf32>
    %79 = vector.broadcast %78 : vector<1x128xf32> to vector<64x128xf32>
    %80 = arith.mulf %77, %79 : vector<64x128xf32>
    %81 = arith.addf %74, %80 : vector<64x128xf32>
    %c16 = arith.constant 16 : index
    %c0_45 = arith.constant 0 : index
    %82 = vector.load %arg15[%c16, %c0_45] : memref<82x128xf32, #tpu.memory_space<vmem>>, vector<64x128xf32>
    %83 = vector.broadcast %36 : vector<64x1xf32> to vector<64x128xf32>
    %84 = arith.mulf %82, %83 : vector<64x128xf32>
    %c6_46 = arith.constant 6 : index
    %c0_47 = arith.constant 0 : index
    %85 = vector.load %arg2[%c6_46, %c0_47] : memref<9x128xf32, #tpu.memory_space<vmem>>, vector<1x128xf32>
    %86 = vector.broadcast %85 : vector<1x128xf32> to vector<64x128xf32>
    %87 = arith.mulf %84, %86 : vector<64x128xf32>
    %88 = arith.addf %81, %87 : vector<64x128xf32>
    %c17 = arith.constant 17 : index
    %c0_48 = arith.constant 0 : index
    %89 = vector.load %arg15[%c17, %c0_48] : memref<82x128xf32, #tpu.memory_space<vmem>>, vector<64x128xf32>
    %90 = vector.broadcast %25 : vector<64x1xf32> to vector<64x128xf32>
    %91 = arith.mulf %89, %90 : vector<64x128xf32>
    %c7_49 = arith.constant 7 : index
    %c0_50 = arith.constant 0 : index
    %92 = vector.load %arg2[%c7_49, %c0_50] : memref<9x128xf32, #tpu.memory_space<vmem>>, vector<1x128xf32>
    %93 = vector.broadcast %92 : vector<1x128xf32> to vector<64x128xf32>
    %94 = arith.mulf %91, %93 : vector<64x128xf32>
    %95 = arith.addf %88, %94 : vector<64x128xf32>
    %c18 = arith.constant 18 : index
    %c0_51 = arith.constant 0 : index
    %96 = vector.load %arg15[%c18, %c0_51] : memref<82x128xf32, #tpu.memory_space<vmem>>, vector<64x128xf32>
    %97 = vector.broadcast %37 : vector<64x1xf32> to vector<64x128xf32>
    %98 = arith.mulf %96, %97 : vector<64x128xf32>
    %c8_52 = arith.constant 8 : index
    %c0_53 = arith.constant 0 : index
    %99 = vector.load %arg2[%c8_52, %c0_53] : memref<9x128xf32, #tpu.memory_space<vmem>>, vector<1x128xf32>
    %100 = vector.broadcast %99 : vector<1x128xf32> to vector<64x128xf32>
    %101 = arith.mulf %98, %100 : vector<64x128xf32>
    %102 = arith.addf %95, %101 : vector<64x128xf32>
    %103 = vector.broadcast %2 : vector<1x128xf32> to vector<64x128xf32>
    %104 = arith.addf %102, %103 : vector<64x128xf32>
    %105 = arith.subf %104, %39 : vector<64x128xf32>
    %106 = vector.broadcast %4 : vector<1x128xf32> to vector<64x128xf32>
    %107 = arith.mulf %106, %105 : vector<64x128xf32>
    %108 = arith.addf %39, %107 : vector<64x128xf32>
    %cst_54 = arith.constant dense<0.000000e+00> : vector<64xf32>
    %109 = vector.multi_reduction <add>, %108, %cst_54 [1] : vector<64x128xf32> to vector<64xf32>
    %110 = vector.shape_cast %109 : vector<64xf32> to vector<64x1xf32>
    %cst_55 = arith.constant 1.280000e+02 : f32
    %111 = vector.broadcast %cst_55 : f32 to vector<64x1xf32>
    %112 = arith.divf %110, %111 : vector<64x1xf32>
    %113 = vector.broadcast %112 : vector<64x1xf32> to vector<64x128xf32>
    %114 = arith.subf %108, %113 : vector<64x128xf32>
    %115 = arith.mulf %114, %114 : vector<64x128xf32>
    %cst_56 = arith.constant dense<0.000000e+00> : vector<64xf32>
    %116 = vector.multi_reduction <add>, %115, %cst_56 [1] : vector<64x128xf32> to vector<64xf32>
    %117 = vector.shape_cast %116 : vector<64xf32> to vector<64x1xf32>
    %cst_57 = arith.constant 1.280000e+02 : f32
    %118 = vector.broadcast %cst_57 : f32 to vector<64x1xf32>
    %119 = arith.divf %117, %118 : vector<64x1xf32>
    %cst_58 = arith.constant 9.99999997E-7 : f32
    %120 = vector.broadcast %cst_58 : f32 to vector<64x1xf32>
    %121 = arith.addf %119, %120 : vector<64x1xf32>
    %122 = math.rsqrt %121 : vector<64x1xf32>
    %123 = vector.broadcast %122 : vector<64x1xf32> to vector<64x128xf32>
    %124 = arith.mulf %114, %123 : vector<64x128xf32>
    %125 = vector.broadcast %0 : vector<1x128xf32> to vector<64x128xf32>
    %126 = arith.mulf %124, %125 : vector<64x128xf32>
    %127 = vector.broadcast %1 : vector<1x128xf32> to vector<64x128xf32>
    %128 = arith.addf %126, %127 : vector<64x128xf32>
    %129 = arith.truncf %128 : vector<64x128xf32> to vector<64x128xbf16>
    %c0_59 = arith.constant 0 : index
    %c0_60 = arith.constant 0 : index
    %130 = vector.load %arg6[%c0_59, %c0_60] : memref<128x192xbf16, #tpu.memory_space<vmem>>, vector<128x192xbf16>
    %cst_61 = arith.constant dense<0.000000e+00> : vector<64x192xf32>
    %131 = tpu.matmul %129, %130, %cst_61 {dimension_numbers = #tpu.dot_dimension_numbers<[1], [0], [0], [1], [0, 0, 1, 1], [], []>} : vector<64x128xbf16>, vector<128x192xbf16>, vector<64x192xf32> -> vector<64x192xf32>
    %c9_62 = arith.constant 9 : index
    %c0_63 = arith.constant 0 : index
    %132 = vector.load %arg16[%c9_62, %c0_63] : memref<82x192xf32, #tpu.memory_space<vmem>>, vector<64x192xf32>
    tpu.vector_store %arg16[%c9_62, %c0_63], %131 {strides = array<i32>} : memref<82x192xf32, #tpu.memory_space<vmem>>, vector<64x192xf32>,
    %cst_64 = arith.constant 0.000000e+00 : f32
    %133 = vector.broadcast %cst_64 : f32 to vector<64x192xf32>
    %c0_65 = arith.constant 0 : index
    %c0_66 = arith.constant 0 : index
    %134 = vector.load %arg16[%c0_65, %c0_66] : memref<82x192xf32, #tpu.memory_space<vmem>>, vector<64x192xf32>
    %135 = vector.broadcast %34 : vector<64x1xf32> to vector<64x192xf32>
    %136 = arith.mulf %134, %135 : vector<64x192xf32>
    %c0_67 = arith.constant 0 : index
    %c0_68 = arith.constant 0 : index
    %137 = vector.load %arg4[%c0_67, %c0_68] : memref<9x192xf32, #tpu.memory_space<vmem>>, vector<1x192xf32>
    %138 = vector.broadcast %137 : vector<1x192xf32> to vector<64x192xf32>
    %139 = arith.mulf %136, %138 : vector<64x192xf32>
    %140 = arith.addf %133, %139 : vector<64x192xf32>
    %c1_69 = arith.constant 1 : index
    %c0_70 = arith.constant 0 : index
    %141 = vector.load %arg16[%c1_69, %c0_70] : memref<82x192xf32, #tpu.memory_space<vmem>>, vector<64x192xf32>
    %142 = vector.broadcast %21 : vector<64x1xf32> to vector<64x192xf32>
    %143 = arith.mulf %141, %142 : vector<64x192xf32>
    %c1_71 = arith.constant 1 : index
    %c0_72 = arith.constant 0 : index
    %144 = vector.load %arg4[%c1_71, %c0_72] : memref<9x192xf32, #tpu.memory_space<vmem>>, vector<1x192xf32>
    %145 = vector.broadcast %144 : vector<1x192xf32> to vector<64x192xf32>
    %146 = arith.mulf %143, %145 : vector<64x192xf32>
    %147 = arith.addf %140, %146 : vector<64x192xf32>
    %c2_73 = arith.constant 2 : index
    %c0_74 = arith.constant 0 : index
    %148 = vector.load %arg16[%c2_73, %c0_74] : memref<82x192xf32, #tpu.memory_space<vmem>>, vector<64x192xf32>
    %149 = vector.broadcast %35 : vector<64x1xf32> to vector<64x192xf32>
    %150 = arith.mulf %148, %149 : vector<64x192xf32>
    %c2_75 = arith.constant 2 : index
    %c0_76 = arith.constant 0 : index
    %151 = vector.load %arg4[%c2_75, %c0_76] : memref<9x192xf32, #tpu.memory_space<vmem>>, vector<1x192xf32>
    %152 = vector.broadcast %151 : vector<1x192xf32> to vector<64x192xf32>
    %153 = arith.mulf %150, %152 : vector<64x192xf32>
    %154 = arith.addf %147, %153 : vector<64x192xf32>
    %c8_77 = arith.constant 8 : index
    %c0_78 = arith.constant 0 : index
    %155 = vector.load %arg16[%c8_77, %c0_78] : memref<82x192xf32, #tpu.memory_space<vmem>>, vector<64x192xf32>
    %156 = vector.broadcast %29 : vector<64x1xf32> to vector<64x192xf32>
    %157 = arith.mulf %155, %156 : vector<64x192xf32>
    %c3_79 = arith.constant 3 : index
    %c0_80 = arith.constant 0 : index
    %158 = vector.load %arg4[%c3_79, %c0_80] : memref<9x192xf32, #tpu.memory_space<vmem>>, vector<1x192xf32>
    %159 = vector.broadcast %158 : vector<1x192xf32> to vector<64x192xf32>
    %160 = arith.mulf %157, %159 : vector<64x192xf32>
    %161 = arith.addf %154, %160 : vector<64x192xf32>
    %c9_81 = arith.constant 9 : index
    %c0_82 = arith.constant 0 : index
    %162 = vector.load %arg16[%c9_81, %c0_82] : memref<82x192xf32, #tpu.memory_space<vmem>>, vector<64x192xf32>
    %c4_83 = arith.constant 4 : index
    %c0_84 = arith.constant 0 : index
    %163 = vector.load %arg4[%c4_83, %c0_84] : memref<9x192xf32, #tpu.memory_space<vmem>>, vector<1x192xf32>
    %164 = vector.broadcast %163 : vector<1x192xf32> to vector<64x192xf32>
    %165 = arith.mulf %162, %164 : vector<64x192xf32>
    %166 = arith.addf %161, %165 : vector<64x192xf32>
    %c10_85 = arith.constant 10 : index
    %c0_86 = arith.constant 0 : index
    %167 = vector.load %arg16[%c10_85, %c0_86] : memref<82x192xf32, #tpu.memory_space<vmem>>, vector<64x192xf32>
    %168 = vector.broadcast %33 : vector<64x1xf32> to vector<64x192xf32>
    %169 = arith.mulf %167, %168 : vector<64x192xf32>
    %c5_87 = arith.constant 5 : index
    %c0_88 = arith.constant 0 : index
    %170 = vector.load %arg4[%c5_87, %c0_88] : memref<9x192xf32, #tpu.memory_space<vmem>>, vector<1x192xf32>
    %171 = vector.broadcast %170 : vector<1x192xf32> to vector<64x192xf32>
    %172 = arith.mulf %169, %171 : vector<64x192xf32>
    %173 = arith.addf %166, %172 : vector<64x192xf32>
    %c16_89 = arith.constant 16 : index
    %c0_90 = arith.constant 0 : index
    %174 = vector.load %arg16[%c16_89, %c0_90] : memref<82x192xf32, #tpu.memory_space<vmem>>, vector<64x192xf32>
    %175 = vector.broadcast %36 : vector<64x1xf32> to vector<64x192xf32>
    %176 = arith.mulf %174, %175 : vector<64x192xf32>
    %c6_91 = arith.constant 6 : index
    %c0_92 = arith.constant 0 : index
    %177 = vector.load %arg4[%c6_91, %c0_92] : memref<9x192xf32, #tpu.memory_space<vmem>>, vector<1x192xf32>
    %178 = vector.broadcast %177 : vector<1x192xf32> to vector<64x192xf32>
    %179 = arith.mulf %176, %178 : vector<64x192xf32>
    %180 = arith.addf %173, %179 : vector<64x192xf32>
    %c17_93 = arith.constant 17 : index
    %c0_94 = arith.constant 0 : index
    %181 = vector.load %arg16[%c17_93, %c0_94] : memref<82x192xf32, #tpu.memory_space<vmem>>, vector<64x192xf32>
    %182 = vector.broadcast %25 : vector<64x1xf32> to vector<64x192xf32>
    %183 = arith.mulf %181, %182 : vector<64x192xf32>
    %c7_95 = arith.constant 7 : index
    %c0_96 = arith.constant 0 : index
    %184 = vector.load %arg4[%c7_95, %c0_96] : memref<9x192xf32, #tpu.memory_space<vmem>>, vector<1x192xf32>
    %185 = vector.broadcast %184 : vector<1x192xf32> to vector<64x192xf32>
    %186 = arith.mulf %183, %185 : vector<64x192xf32>
    %187 = arith.addf %180, %186 : vector<64x192xf32>
    %c18_97 = arith.constant 18 : index
    %c0_98 = arith.constant 0 : index
    %188 = vector.load %arg16[%c18_97, %c0_98] : memref<82x192xf32, #tpu.memory_space<vmem>>, vector<64x192xf32>
    %189 = vector.broadcast %37 : vector<64x1xf32> to vector<64x192xf32>
    %190 = arith.mulf %188, %189 : vector<64x192xf32>
    %c8_99 = arith.constant 8 : index
    %c0_100 = arith.constant 0 : index
    %191 = vector.load %arg4[%c8_99, %c0_100] : memref<9x192xf32, #tpu.memory_space<vmem>>, vector<1x192xf32>
    %192 = vector.broadcast %191 : vector<1x192xf32> to vector<64x192xf32>
    %193 = arith.mulf %190, %192 : vector<64x192xf32>
    %194 = arith.addf %187, %193 : vector<64x192xf32>
    %195 = vector.extract_strided_slice %194 {offsets = [0, 0], sizes = [64, 64], strides = [1, 1]} : vector<64x192xf32> to vector<64x64xf32>
    %196 = vector.extract_strided_slice %194 {offsets = [0, 64], sizes = [64, 64], strides = [1, 1]} : vector<64x192xf32> to vector<64x64xf32>
    %197 = vector.extract_strided_slice %194 {offsets = [0, 128], sizes = [64, 64], strides = [1, 1]} : vector<64x192xf32> to vector<64x64xf32>
    %c0_101 = arith.constant 0 : index
    %c0_102 = arith.constant 0 : index
    %198 = vector.load %arg7[%c0_101, %c0_102] : memref<2x64xf32, #tpu.memory_space<vmem>>, vector<1x64xf32>
    %199 = vector.broadcast %198 : vector<1x64xf32> to vector<64x64xf32>
    %200 = arith.addf %197, %199 : vector<64x64xf32>
    %cst_103 = arith.constant dense<0xFF800000> : vector<64xf32>
    %201 = vector.multi_reduction <maximumf>, %200, %cst_103 [0] : vector<64x64xf32> to vector<64xf32>
    %202 = vector.shape_cast %201 : vector<64xf32> to vector<1x64xf32>
    %203 = vector.broadcast %202 : vector<1x64xf32> to vector<64x64xf32>
    %204 = arith.subf %200, %203 : vector<64x64xf32>
    %205 = math.exp %204 : vector<64x64xf32>
    %cst_104 = arith.constant dense<0.000000e+00> : vector<64xf32>
    %206 = vector.multi_reduction <add>, %205, %cst_104 [0] : vector<64x64xf32> to vector<64xf32>
    %207 = vector.shape_cast %206 : vector<64xf32> to vector<1x64xf32>
    %208 = vector.broadcast %207 : vector<1x64xf32> to vector<64x64xf32>
    %209 = arith.divf %205, %208 : vector<64x64xf32>
    %210 = arith.mulf %209, %195 : vector<64x64xf32>
    %211 = arith.truncf %210 : vector<64x64xf32> to vector<64x64xbf16>
    %cst_105 = arith.constant dense<0.000000e+00> : vector<64x128xf32>
    %212 = tpu.matmul %211, %129, %cst_105 {dimension_numbers = #tpu.dot_dimension_numbers<[0], [0], [1], [1], [0, 1, 1, 1], [], []>} : vector<64x64xbf16>, vector<64x128xbf16>, vector<64x128xf32> -> vector<64x128xf32>
    %213 = arith.truncf %212 : vector<64x128xf32> to vector<64x128xbf16>
    %c0_106 = arith.constant 0 : index
    %c0_107 = arith.constant 0 : index
    %214 = vector.load %arg8[%c0_106, %c0_107] : memref<128x256xbf16, #tpu.memory_space<vmem>>, vector<128x256xbf16>
    %cst_108 = arith.constant dense<0.000000e+00> : vector<64x256xf32>
    %215 = tpu.matmul %213, %214, %cst_108 {dimension_numbers = #tpu.dot_dimension_numbers<[1], [0], [0], [1], [0, 0, 1, 1], [], []>} : vector<64x128xbf16>, vector<128x256xbf16>, vector<64x256xf32> -> vector<64x256xf32>
    %216 = vector.extract_strided_slice %215 {offsets = [0, 0], sizes = [64, 128], strides = [1, 1]} : vector<64x256xf32> to vector<64x128xf32>
    %217 = vector.extract_strided_slice %215 {offsets = [0, 128], sizes = [64, 128], strides = [1, 1]} : vector<64x256xf32> to vector<64x128xf32>
    %c1_109 = arith.constant 1 : index
    %c0_110 = arith.constant 0 : index
    %218 = vector.load %arg7[%c1_109, %c0_110] : memref<2x64xf32, #tpu.memory_space<vmem>>, vector<1x1xf32>
    %219 = arith.negf %217 : vector<64x128xf32>
    %220 = math.exp %219 : vector<64x128xf32>
    %cst_111 = arith.constant 1.000000e+00 : f32
    %221 = vector.broadcast %cst_111 : f32 to vector<64x128xf32>
    %222 = arith.addf %221, %220 : vector<64x128xf32>
    %223 = arith.divf %221, %222 : vector<64x128xf32>
    %224 = arith.mulf %217, %223 : vector<64x128xf32>
    %225 = vector.broadcast %218 : vector<1x1xf32> to vector<64x128xf32>
    %226 = arith.addf %224, %225 : vector<64x128xf32>
    %227 = arith.mulf %216, %226 : vector<64x128xf32>
    %228 = arith.truncf %227 : vector<64x128xf32> to vector<64x128xbf16>
    %c0_112 = arith.constant 0 : index
    %c0_113 = arith.constant 0 : index
    %229 = vector.load %arg9[%c0_112, %c0_113] : memref<128x128xbf16, #tpu.memory_space<vmem>>, vector<128x128xbf16>
    %cst_114 = arith.constant dense<0.000000e+00> : vector<64x128xf32>
    %230 = tpu.matmul %228, %229, %cst_114 {dimension_numbers = #tpu.dot_dimension_numbers<[1], [0], [0], [1], [0, 0, 1, 1], [], []>} : vector<64x128xbf16>, vector<128x128xbf16>, vector<64x128xf32> -> vector<64x128xf32>
    %c0_115 = arith.constant 0 : index
    %c0_116 = arith.constant 0 : index
    %c0_117 = arith.constant 0 : index
    %231 = vector.load %arg14[%c0_115, %c0_116, %c0_117] : memref<1x64x128xf32, #tpu.memory_space<vmem>>, vector<1x64x128xf32>
    %232 = vector.shape_cast %231 : vector<1x64x128xf32> to vector<64x128xf32>
    %233 = vector.shape_cast %230 : vector<64x128xf32> to vector<1x64x128xf32>
    tpu.vector_store %arg14[%c0_115, %c0_116, %c0_117], %233 {strides = array<i32>} : memref<1x64x128xf32, #tpu.memory_space<vmem>>, vector<1x64x128xf32>,
    %234 = arith.truncf %196 : vector<64x64xf32> to vector<64x64xbf16>
    %235 = arith.truncf %230 : vector<64x128xf32> to vector<64x128xbf16>
    %cst_118 = arith.constant dense<0.000000e+00> : vector<64x128xf32>
    %236 = tpu.matmul %234, %235, %cst_118 {dimension_numbers = #tpu.dot_dimension_numbers<[1], [0], [0], [1], [0, 0, 1, 1], [], []>} : vector<64x64xbf16>, vector<64x128xbf16>, vector<64x128xf32> -> vector<64x128xf32>
    %237 = arith.subf %236, %108 : vector<64x128xf32>
    %238 = vector.broadcast %5 : vector<1x128xf32> to vector<64x128xf32>
    %239 = arith.mulf %238, %237 : vector<64x128xf32>
    %240 = arith.addf %108, %239 : vector<64x128xf32>
    %c9_119 = arith.constant 9 : index
    %c0_120 = arith.constant 0 : index
    %241 = vector.load %arg15[%c9_119, %c0_120] : memref<82x128xf32, #tpu.memory_space<vmem>>, vector<64x128xf32>
    tpu.vector_store %arg15[%c9_119, %c0_120], %240 {strides = array<i32>} : memref<82x128xf32, #tpu.memory_space<vmem>>, vector<64x128xf32>,
    %cst_121 = arith.constant 0.000000e+00 : f32
    %242 = vector.broadcast %cst_121 : f32 to vector<64x128xf32>
    %c0_122 = arith.constant 0 : index
    %c0_123 = arith.constant 0 : index
    %243 = vector.load %arg15[%c0_122, %c0_123] : memref<82x128xf32, #tpu.memory_space<vmem>>, vector<64x128xf32>
    %244 = vector.broadcast %34 : vector<64x1xf32> to vector<64x128xf32>
    %245 = arith.mulf %243, %244 : vector<64x128xf32>
    %c0_124 = arith.constant 0 : index
    %c0_125 = arith.constant 0 : index
    %246 = vector.load %arg3[%c0_124, %c0_125] : memref<9x128xf32, #tpu.memory_space<vmem>>, vector<1x128xf32>
    %247 = vector.broadcast %246 : vector<1x128xf32> to vector<64x128xf32>
    %248 = arith.mulf %245, %247 : vector<64x128xf32>
    %249 = arith.addf %242, %248 : vector<64x128xf32>
    %c1_126 = arith.constant 1 : index
    %c0_127 = arith.constant 0 : index
    %250 = vector.load %arg15[%c1_126, %c0_127] : memref<82x128xf32, #tpu.memory_space<vmem>>, vector<64x128xf32>
    %251 = vector.broadcast %21 : vector<64x1xf32> to vector<64x128xf32>
    %252 = arith.mulf %250, %251 : vector<64x128xf32>
    %c1_128 = arith.constant 1 : index
    %c0_129 = arith.constant 0 : index
    %253 = vector.load %arg3[%c1_128, %c0_129] : memref<9x128xf32, #tpu.memory_space<vmem>>, vector<1x128xf32>
    %254 = vector.broadcast %253 : vector<1x128xf32> to vector<64x128xf32>
    %255 = arith.mulf %252, %254 : vector<64x128xf32>
    %256 = arith.addf %249, %255 : vector<64x128xf32>
    %c2_130 = arith.constant 2 : index
    %c0_131 = arith.constant 0 : index
    %257 = vector.load %arg15[%c2_130, %c0_131] : memref<82x128xf32, #tpu.memory_space<vmem>>, vector<64x128xf32>
    %258 = vector.broadcast %35 : vector<64x1xf32> to vector<64x128xf32>
    %259 = arith.mulf %257, %258 : vector<64x128xf32>
    %c2_132 = arith.constant 2 : index
    %c0_133 = arith.constant 0 : index
    %260 = vector.load %arg3[%c2_132, %c0_133] : memref<9x128xf32, #tpu.memory_space<vmem>>, vector<1x128xf32>
    %261 = vector.broadcast %260 : vector<1x128xf32> to vector<64x128xf32>
    %262 = arith.mulf %259, %261 : vector<64x128xf32>
    %263 = arith.addf %256, %262 : vector<64x128xf32>
    %c8_134 = arith.constant 8 : index
    %c0_135 = arith.constant 0 : index
    %264 = vector.load %arg15[%c8_134, %c0_135] : memref<82x128xf32, #tpu.memory_space<vmem>>, vector<64x128xf32>
    %265 = vector.broadcast %29 : vector<64x1xf32> to vector<64x128xf32>
    %266 = arith.mulf %264, %265 : vector<64x128xf32>
    %c3_136 = arith.constant 3 : index
    %c0_137 = arith.constant 0 : index
    %267 = vector.load %arg3[%c3_136, %c0_137] : memref<9x128xf32, #tpu.memory_space<vmem>>, vector<1x128xf32>
    %268 = vector.broadcast %267 : vector<1x128xf32> to vector<64x128xf32>
    %269 = arith.mulf %266, %268 : vector<64x128xf32>
    %270 = arith.addf %263, %269 : vector<64x128xf32>
    %c9_138 = arith.constant 9 : index
    %c0_139 = arith.constant 0 : index
    %271 = vector.load %arg15[%c9_138, %c0_139] : memref<82x128xf32, #tpu.memory_space<vmem>>, vector<64x128xf32>
    %c4_140 = arith.constant 4 : index
    %c0_141 = arith.constant 0 : index
    %272 = vector.load %arg3[%c4_140, %c0_141] : memref<9x128xf32, #tpu.memory_space<vmem>>, vector<1x128xf32>
    %273 = vector.broadcast %272 : vector<1x128xf32> to vector<64x128xf32>
    %274 = arith.mulf %271, %273 : vector<64x128xf32>
    %275 = arith.addf %270, %274 : vector<64x128xf32>
    %c10_142 = arith.constant 10 : index
    %c0_143 = arith.constant 0 : index
    %276 = vector.load %arg15[%c10_142, %c0_143] : memref<82x128xf32, #tpu.memory_space<vmem>>, vector<64x128xf32>
    %277 = vector.broadcast %33 : vector<64x1xf32> to vector<64x128xf32>
    %278 = arith.mulf %276, %277 : vector<64x128xf32>
    %c5_144 = arith.constant 5 : index
    %c0_145 = arith.constant 0 : index
    %279 = vector.load %arg3[%c5_144, %c0_145] : memref<9x128xf32, #tpu.memory_space<vmem>>, vector<1x128xf32>
    %280 = vector.broadcast %279 : vector<1x128xf32> to vector<64x128xf32>
    %281 = arith.mulf %278, %280 : vector<64x128xf32>
    %282 = arith.addf %275, %281 : vector<64x128xf32>
    %c16_146 = arith.constant 16 : index
    %c0_147 = arith.constant 0 : index
    %283 = vector.load %arg15[%c16_146, %c0_147] : memref<82x128xf32, #tpu.memory_space<vmem>>, vector<64x128xf32>
    %284 = vector.broadcast %36 : vector<64x1xf32> to vector<64x128xf32>
    %285 = arith.mulf %283, %284 : vector<64x128xf32>
    %c6_148 = arith.constant 6 : index
    %c0_149 = arith.constant 0 : index
    %286 = vector.load %arg3[%c6_148, %c0_149] : memref<9x128xf32, #tpu.memory_space<vmem>>, vector<1x128xf32>
    %287 = vector.broadcast %286 : vector<1x128xf32> to vector<64x128xf32>
    %288 = arith.mulf %285, %287 : vector<64x128xf32>
    %289 = arith.addf %282, %288 : vector<64x128xf32>
    %c17_150 = arith.constant 17 : index
    %c0_151 = arith.constant 0 : index
    %290 = vector.load %arg15[%c17_150, %c0_151] : memref<82x128xf32, #tpu.memory_space<vmem>>, vector<64x128xf32>
    %291 = vector.broadcast %25 : vector<64x1xf32> to vector<64x128xf32>
    %292 = arith.mulf %290, %291 : vector<64x128xf32>
    %c7_152 = arith.constant 7 : index
    %c0_153 = arith.constant 0 : index
    %293 = vector.load %arg3[%c7_152, %c0_153] : memref<9x128xf32, #tpu.memory_space<vmem>>, vector<1x128xf32>
    %294 = vector.broadcast %293 : vector<1x128xf32> to vector<64x128xf32>
    %295 = arith.mulf %292, %294 : vector<64x128xf32>
    %296 = arith.addf %289, %295 : vector<64x128xf32>
    %c18_154 = arith.constant 18 : index
    %c0_155 = arith.constant 0 : index
    %297 = vector.load %arg15[%c18_154, %c0_155] : memref<82x128xf32, #tpu.memory_space<vmem>>, vector<64x128xf32>
    %298 = vector.broadcast %37 : vector<64x1xf32> to vector<64x128xf32>
    %299 = arith.mulf %297, %298 : vector<64x128xf32>
    %c8_156 = arith.constant 8 : index
    %c0_157 = arith.constant 0 : index
    %300 = vector.load %arg3[%c8_156, %c0_157] : memref<9x128xf32, #tpu.memory_space<vmem>>, vector<1x128xf32>
    %301 = vector.broadcast %300 : vector<1x128xf32> to vector<64x128xf32>
    %302 = arith.mulf %299, %301 : vector<64x128xf32>
    %303 = arith.addf %296, %302 : vector<64x128xf32>
    %304 = vector.broadcast %3 : vector<1x128xf32> to vector<64x128xf32>
    %305 = arith.addf %303, %304 : vector<64x128xf32>
    %306 = arith.subf %305, %240 : vector<64x128xf32>
    %307 = vector.broadcast %6 : vector<1x128xf32> to vector<64x128xf32>
    %308 = arith.mulf %307, %306 : vector<64x128xf32>
    %309 = arith.addf %240, %308 : vector<64x128xf32>
    %310 = arith.truncf %309 : vector<64x128xf32> to vector<64x128xbf16>
    %c0_158 = arith.constant 0 : index
    %c0_159 = arith.constant 0 : index
    %311 = vector.load %arg10[%c0_158, %c0_159] : memref<128x512xbf16, #tpu.memory_space<vmem>>, vector<128x512xbf16>
    %cst_160 = arith.constant dense<0.000000e+00> : vector<64x512xf32>
    %312 = tpu.matmul %310, %311, %cst_160 {dimension_numbers = #tpu.dot_dimension_numbers<[1], [0], [0], [1], [0, 0, 1, 1], [], []>} : vector<64x128xbf16>, vector<128x512xbf16>, vector<64x512xf32> -> vector<64x512xf32>
    %c0_161 = arith.constant 0 : index
    %c0_162 = arith.constant 0 : index
    %313 = vector.load %arg11[%c0_161, %c0_162] : memref<1x512xf32, #tpu.memory_space<vmem>>, vector<1x512xf32>
    %314 = vector.broadcast %313 : vector<1x512xf32> to vector<64x512xf32>
    %315 = arith.addf %312, %314 : vector<64x512xf32>
    %cst_163 = arith.constant 0.000000e+00 : f32
    %316 = vector.broadcast %cst_163 : f32 to vector<64x512xf32>
    %317 = arith.maximumf %315, %316 : vector<64x512xf32>
    %318 = arith.truncf %317 : vector<64x512xf32> to vector<64x512xbf16>
    %c0_164 = arith.constant 0 : index
    %c0_165 = arith.constant 0 : index
    %319 = vector.load %arg12[%c0_164, %c0_165] : memref<512x128xbf16, #tpu.memory_space<vmem>>, vector<512x128xbf16>
    %cst_166 = arith.constant dense<0.000000e+00> : vector<64x128xf32>
    %320 = tpu.matmul %318, %319, %cst_166 {dimension_numbers = #tpu.dot_dimension_numbers<[1], [0], [0], [1], [0, 0, 1, 1], [], []>} : vector<64x512xbf16>, vector<512x128xbf16>, vector<64x128xf32> -> vector<64x128xf32>
    %321 = vector.broadcast %8 : vector<1x128xf32> to vector<64x128xf32>
    %322 = arith.addf %320, %321 : vector<64x128xf32>
    %323 = arith.subf %322, %309 : vector<64x128xf32>
    %324 = vector.broadcast %7 : vector<1x128xf32> to vector<64x128xf32>
    %325 = arith.mulf %324, %323 : vector<64x128xf32>
    %326 = arith.addf %309, %325 : vector<64x128xf32>
    %c0_167 = arith.constant 0 : index
    %c0_168 = arith.constant 0 : index
    %c0_169 = arith.constant 0 : index
    %327 = vector.load %arg13[%c0_167, %c0_168, %c0_169] : memref<1x64x128xf32, #tpu.memory_space<vmem>>, vector<1x64x128xf32>
    %328 = vector.shape_cast %327 : vector<1x64x128xf32> to vector<64x128xf32>
    %329 = vector.shape_cast %326 : vector<64x128xf32> to vector<1x64x128xf32>
    tpu.vector_store %arg13[%c0_167, %c0_168, %c0_169], %329 {strides = array<i32>} : memref<1x64x128xf32, #tpu.memory_space<vmem>>, vector<1x64x128xf32>,
    return
  }
  func.func @transform_0(%arg0: i32) -> (i32, i32, i32) {
    %c0_i32 = arith.constant 0 : i32
    %c0_i32_0 = arith.constant 0 : i32
    %c0_i32_1 = arith.constant 0 : i32
    return %arg0, %c0_i32, %c0_i32_0 : i32, i32, i32
  }
  func.func @transform_1(%arg0: i32) -> (i32, i32) {
    %c0_i32 = arith.constant 0 : i32
    %c0_i32_0 = arith.constant 0 : i32
    %c0_i32_1 = arith.constant 0 : i32
    return %c0_i32, %c0_i32_0 : i32, i32
  }
  func.func @transform_2(%arg0: i32) -> (i32, i32) {
    %c0_i32 = arith.constant 0 : i32
    %c0_i32_0 = arith.constant 0 : i32
    %c0_i32_1 = arith.constant 0 : i32
    return %c0_i32, %c0_i32_0 : i32, i32
  }
  func.func @transform_3(%arg0: i32) -> (i32, i32) {
    %c0_i32 = arith.constant 0 : i32
    %c0_i32_0 = arith.constant 0 : i32
    %c0_i32_1 = arith.constant 0 : i32
    return %c0_i32, %c0_i32_0 : i32, i32
  }
  func.func @transform_4(%arg0: i32) -> (i32, i32) {
    %c0_i32 = arith.constant 0 : i32
    %c0_i32_0 = arith.constant 0 : i32
    %c0_i32_1 = arith.constant 0 : i32
    return %c0_i32, %c0_i32_0 : i32, i32
  }
  func.func @transform_5(%arg0: i32) -> (i32, i32) {
    %c0_i32 = arith.constant 0 : i32
    %c0_i32_0 = arith.constant 0 : i32
    %c0_i32_1 = arith.constant 0 : i32
    return %c0_i32, %c0_i32_0 : i32, i32
  }
  func.func @transform_6(%arg0: i32) -> (i32, i32) {
    %c0_i32 = arith.constant 0 : i32
    %c0_i32_0 = arith.constant 0 : i32
    %c0_i32_1 = arith.constant 0 : i32
    return %c0_i32, %c0_i32_0 : i32, i32
  }
  func.func @transform_7(%arg0: i32) -> (i32, i32) {
    %c0_i32 = arith.constant 0 : i32
    %c0_i32_0 = arith.constant 0 : i32
    %c0_i32_1 = arith.constant 0 : i32
    return %c0_i32, %c0_i32_0 : i32, i32
  }
  func.func @transform_8(%arg0: i32) -> (i32, i32) {
    %c0_i32 = arith.constant 0 : i32
    %c0_i32_0 = arith.constant 0 : i32
    %c0_i32_1 = arith.constant 0 : i32
    return %c0_i32, %c0_i32_0 : i32, i32
  }
  func.func @transform_9(%arg0: i32) -> (i32, i32) {
    %c0_i32 = arith.constant 0 : i32
    %c0_i32_0 = arith.constant 0 : i32
    %c0_i32_1 = arith.constant 0 : i32
    return %c0_i32, %c0_i32_0 : i32, i32
  }
  func.func @transform_10(%arg0: i32) -> (i32, i32) {
    %c0_i32 = arith.constant 0 : i32
    %c0_i32_0 = arith.constant 0 : i32
    %c0_i32_1 = arith.constant 0 : i32
    return %c0_i32, %c0_i32_0 : i32, i32
  }
  func.func @transform_11(%arg0: i32) -> (i32, i32) {
    %c0_i32 = arith.constant 0 : i32
    %c0_i32_0 = arith.constant 0 : i32
    %c0_i32_1 = arith.constant 0 : i32
    return %c0_i32, %c0_i32_0 : i32, i32
  }
  func.func @transform_12(%arg0: i32) -> (i32, i32, i32) {
    %c0_i32 = arith.constant 0 : i32
    %c0_i32_0 = arith.constant 0 : i32
    %c0_i32_1 = arith.constant 0 : i32
    return %arg0, %c0_i32, %c0_i32_0 : i32, i32, i32
  }
  func.func @transform_13(%arg0: i32) -> (i32, i32, i32) {
    %c0_i32 = arith.constant 0 : i32
    %c0_i32_0 = arith.constant 0 : i32
    %c0_i32_1 = arith.constant 0 : i32
    return %arg0, %c0_i32, %c0_i32_0 : i32, i32, i32
  }
}

module attributes {stable_mosaic.version = 11 : i64} {
  func.func @_block_kernel(%arg0: i32, %arg1: memref<1x64x128xf32, #tpu.memory_space<vmem>>, %arg2: memref<9x128xf32, #tpu.memory_space<vmem>>, %arg3: memref<9x128xf32, #tpu.memory_space<vmem>>, %arg4: memref<9x192xf32, #tpu.memory_space<vmem>>, %arg5: memref<9x128xf32, #tpu.memory_space<vmem>>, %arg6: memref<128x192xbf16, #tpu.memory_space<vmem>>, %arg7: memref<2x64xf32, #tpu.memory_space<vmem>>, %arg8: memref<128x256xbf16, #tpu.memory_space<vmem>>, %arg9: memref<128x128xbf16, #tpu.memory_space<vmem>>, %arg10: memref<128x512xbf16, #tpu.memory_space<vmem>>, %arg11: memref<1x512xf32, #tpu.memory_space<vmem>>, %arg12: memref<512x128xbf16, #tpu.memory_space<vmem>>, %arg13: memref<1x64x128xf32, #tpu.memory_space<vmem>>, %arg14: memref<1x64x128xf32, #tpu.memory_space<vmem>>, %arg15: memref<82x128xf32, #tpu.memory_space<vmem>>, %arg16: memref<82x192xf32, #tpu.memory_space<vmem>>) attributes {dimension_semantics = [#tpu.dimension_semantics<parallel>], iteration_bounds = array<i64: 2>, scalar_prefetch = 0 : i64, scratch_operands = 2 : i64, tpu.core_type = #tpu.core_type<tc>, window_params = [{transform_indices = @transform_0, window_bounds = array<i64: 1, 64, 128>}, {pipeline_mode = #tpu.pipeline_mode<synchronous>, transform_indices = @transform_1, window_bounds = array<i64: 9, 128>}, {pipeline_mode = #tpu.pipeline_mode<synchronous>, transform_indices = @transform_2, window_bounds = array<i64: 9, 128>}, {pipeline_mode = #tpu.pipeline_mode<synchronous>, transform_indices = @transform_3, window_bounds = array<i64: 9, 192>}, {pipeline_mode = #tpu.pipeline_mode<synchronous>, transform_indices = @transform_4, window_bounds = array<i64: 9, 128>}, {pipeline_mode = #tpu.pipeline_mode<synchronous>, transform_indices = @transform_5, window_bounds = array<i64: 128, 192>}, {pipeline_mode = #tpu.pipeline_mode<synchronous>, transform_indices = @transform_6, window_bounds = array<i64: 2, 64>}, {pipeline_mode = #tpu.pipeline_mode<synchronous>, transform_indices = @transform_7, window_bounds = array<i64: 128, 256>}, {pipeline_mode = #tpu.pipeline_mode<synchronous>, transform_indices = @transform_8, window_bounds = array<i64: 128, 128>}, {pipeline_mode = #tpu.pipeline_mode<synchronous>, transform_indices = @transform_9, window_bounds = array<i64: 128, 512>}, {pipeline_mode = #tpu.pipeline_mode<synchronous>, transform_indices = @transform_10, window_bounds = array<i64: 1, 512>}, {pipeline_mode = #tpu.pipeline_mode<synchronous>, transform_indices = @transform_11, window_bounds = array<i64: 512, 128>}, {transform_indices = @transform_12, window_bounds = array<i64: 1, 64, 128>}, {transform_indices = @transform_13, window_bounds = array<i64: 1, 64, 128>}]} {
    %c0 = arith.constant 0 : index
    %c0_0 = arith.constant 0 : index
    %0 = vector.load %arg5[%c0, %c0_0] : memref<9x128xf32, #tpu.memory_space<vmem>>, vector<1x128xf32>
    %c1 = arith.constant 1 : index
    %c0_1 = arith.constant 0 : index
    %1 = vector.load %arg5[%c1, %c0_1] : memref<9x128xf32, #tpu.memory_space<vmem>>, vector<1x128xf32>
    %c2 = arith.constant 2 : index
    %c0_2 = arith.constant 0 : index
    %2 = vector.load %arg5[%c2, %c0_2] : memref<9x128xf32, #tpu.memory_space<vmem>>, vector<1x128xf32>
    %c3 = arith.constant 3 : index
    %c0_3 = arith.constant 0 : index
    %3 = vector.load %arg5[%c3, %c0_3] : memref<9x128xf32, #tpu.memory_space<vmem>>, vector<1x128xf32>
    %c4 = arith.constant 4 : index
    %c0_4 = arith.constant 0 : index
    %4 = vector.load %arg5[%c4, %c0_4] : memref<9x128xf32, #tpu.memory_space<vmem>>, vector<1x128xf32>
    %c5 = arith.constant 5 : index
    %c0_5 = arith.constant 0 : index
    %5 = vector.load %arg5[%c5, %c0_5] : memref<9x128xf32, #tpu.memory_space<vmem>>, vector<1x128xf32>
    %c6 = arith.constant 6 : index
    %c0_6 = arith.constant 0 : index
    %6 = vector.load %arg5[%c6, %c0_6] : memref<9x128xf32, #tpu.memory_space<vmem>>, vector<1x128xf32>
    %c7 = arith.constant 7 : index
    %c0_7 = arith.constant 0 : index
    %7 = vector.load %arg5[%c7, %c0_7] : memref<9x128xf32, #tpu.memory_space<vmem>>, vector<1x128xf32>
    %c8 = arith.constant 8 : index
    %c0_8 = arith.constant 0 : index
    %8 = vector.load %arg5[%c8, %c0_8] : memref<9x128xf32, #tpu.memory_space<vmem>>, vector<1x128xf32>
    %cst = arith.constant 0.000000e+00 : f32
    %9 = vector.broadcast %cst : f32 to vector<9x128xf32>
    %cst_9 = arith.constant 0.000000e+00 : f32
    %10 = vector.broadcast %cst_9 : f32 to vector<9x192xf32>
    %c0_10 = arith.constant 0 : index
    %c0_11 = arith.constant 0 : index
    %11 = vector.load %arg15[%c0_10, %c0_11] : memref<82x128xf32, #tpu.memory_space<vmem>>, vector<9x128xf32>
    tpu.vector_store %arg15[%c0_10, %c0_11], %9 {strides = array<i32>} : memref<82x128xf32, #tpu.memory_space<vmem>>, vector<9x128xf32>,
    %c73 = arith.constant 73 : index
    %c0_12 = arith.constant 0 : index
    %12 = vector.load %arg15[%c73, %c0_12] : memref<82x128xf32, #tpu.memory_space<vmem>>, vector<9x128xf32>
    tpu.vector_store %arg15[%c73, %c0_12], %9 {strides = array<i32>} : memref<82x128xf32, #tpu.memory_space<vmem>>, vector<9x128xf32>,
    %c0_13 = arith.constant 0 : index
    %c0_14 = arith.constant 0 : index
    %13 = vector.load %arg16[%c0_13, %c0_14] : memref<82x192xf32, #tpu.memory_space<vmem>>, vector<9x192xf32>
    tpu.vector_store %arg16[%c0_13, %c0_14], %10 {strides = array<i32>} : memref<82x192xf32, #tpu.memory_space<vmem>>, vector<9x192xf32>,
    %c73_15 = arith.constant 73 : index
    %c0_16 = arith.constant 0 : index
    %14 = vector.load %arg16[%c73_15, %c0_16] : memref<82x192xf32, #tpu.memory_space<vmem>>, vector<9x192xf32>
    tpu.vector_store %arg16[%c73_15, %c0_16], %10 {strides = array<i32>} : memref<82x192xf32, #tpu.memory_space<vmem>>, vector<9x192xf32>,
    %15 = tpu.iota {dimensions = array<i32: 0>} : vector<64x1xi32>
    %c7_i32 = arith.constant 7 : i32
    %16 = vector.broadcast %c7_i32 : i32 to vector<64x1xi32>
    %17 = arith.andi %15, %16 : vector<64x1xi32>
    %c8_i32 = arith.constant 8 : i32
    %18 = vector.broadcast %c8_i32 : i32 to vector<64x1xi32>
    %19 = arith.cmpi sge, %15, %18 : vector<64x1xi32>
    %20 = arith.extui %19 : vector<64x1xi1> to vector<64x1xi32>
    %21 = arith.sitofp %20 : vector<64x1xi32> to vector<64x1xf32>
    %c56_i32 = arith.constant 56 : i32
    %22 = vector.broadcast %c56_i32 : i32 to vector<64x1xi32>
    %23 = arith.cmpi slt, %15, %22 : vector<64x1xi32>
    %24 = arith.extui %23 : vector<64x1xi1> to vector<64x1xi32>
    %25 = arith.sitofp %24 : vector<64x1xi32> to vector<64x1xf32>
    %c1_i32 = arith.constant 1 : i32
    %26 = vector.broadcast %c1_i32 : i32 to vector<64x1xi32>
    %27 = arith.cmpi sge, %17, %26 : vector<64x1xi32>
    %28 = arith.extui %27 : vector<64x1xi1> to vector<64x1xi32>
    %29 = arith.sitofp %28 : vector<64x1xi32> to vector<64x1xf32>
    %c6_i32 = arith.constant 6 : i32
    %30 = vector.broadcast %c6_i32 : i32 to vector<64x1xi32>
    %31 = arith.cmpi sle, %17, %30 : vector<64x1xi32>
    %32 = arith.extui %31 : vector<64x1xi1> to vector<64x1xi32>
    %33 = arith.sitofp %32 : vector<64x1xi32> to vector<64x1xf32>
    %34 = arith.mulf %21, %29 : vector<64x1xf32>
    %35 = arith.mulf %21, %33 : vector<64x1xf32>
    %36 = arith.mulf %25, %29 : vector<64x1xf32>
    %37 = arith.mulf %25, %33 : vector<64x1xf32>
    %c0_17 = arith.constant 0 : index
    %c0_18 = arith.constant 0 : index
    %c0_19 = arith.constant 0 : index
    %38 = vector.load %arg1[%c0_17, %c0_18, %c0_19] : memref<1x64x128xf32, #tpu.memory_space<vmem>>, vector<1x64x128xf32>
    %39 = vector.shape_cast %38 : vector<1x64x128xf32> to vector<64x128xf32>
    %c9 = arith.constant 9 : index
    %c0_20 = arith.constant 0 : index
    %40 = vector.load %arg15[%c9, %c0_20] : memref<82x128xf32, #tpu.memory_space<vmem>>, vector<64x128xf32>
    tpu.vector_store %arg15[%c9, %c0_20], %39 {strides = array<i32>} : memref<82x128xf32, #tpu.memory_space<vmem>>, vector<64x128xf32>,
    %cst_21 = arith.constant 0.000000e+00 : f32
    %41 = vector.broadcast %cst_21 : f32 to vector<64x128xf32>
    %c0_22 = arith.constant 0 : index
    %c0_23 = arith.constant 0 : index
    %42 = vector.load %arg15[%c0_22, %c0_23] : memref<82x128xf32, #tpu.memory_space<vmem>>, vector<64x128xf32>
    %43 = vector.broadcast %34 : vector<64x1xf32> to vector<64x128xf32>
    %44 = arith.mulf %42, %43 : vector<64x128xf32>
    %c0_24 = arith.constant 0 : index
    %c0_25 = arith.constant 0 : index
    %45 = vector.load %arg2[%c0_24, %c0_25] : memref<9x128xf32, #tpu.memory_space<vmem>>, vector<1x128xf32>
    %46 = vector.broadcast %45 : vector<1x128xf32> to vector<64x128xf32>
    %47 = arith.mulf %44, %46 : vector<64x128xf32>
    %48 = arith.addf %41, %47 : vector<64x128xf32>
    %c1_26 = arith.constant 1 : index
    %c0_27 = arith.constant 0 : index
    %49 = vector.load %arg15[%c1_26, %c0_27] : memref<82x128xf32, #tpu.memory_space<vmem>>, vector<64x128xf32>
    %50 = vector.broadcast %21 : vector<64x1xf32> to vector<64x128xf32>
    %51 = arith.mulf %49, %50 : vector<64x128xf32>
    %c1_28 = arith.constant 1 : index
    %c0_29 = arith.constant 0 : index
    %52 = vector.load %arg2[%c1_28, %c0_29] : memref<9x128xf32, #tpu.memory_space<vmem>>, vector<1x128xf32>
    %53 = vector.broadcast %52 : vector<1x128xf32> to vector<64x128xf32>
    %54 = arith.mulf %51, %53 : vector<64x128xf32>
    %55 = arith.addf %48, %54 : vector<64x128xf32>
    %c2_30 = arith.constant 2 : index
    %c0_31 = arith.constant 0 : index
    %56 = vector.load %arg15[%c2_30, %c0_31] : memref<82x128xf32, #tpu.memory_space<vmem>>, vector<64x128xf32>
    %57 = vector.broadcast %35 : vector<64x1xf32> to vector<64x128xf32>
    %58 = arith.mulf %56, %57 : vector<64x128xf32>
    %c2_32 = arith.constant 2 : index
    %c0_33 = arith.constant 0 : index
    %59 = vector.load %arg2[%c2_32, %c0_33] : memref<9x128xf32, #tpu.memory_space<vmem>>, vector<1x128xf32>
    %60 = vector.broadcast %59 : vector<1x128xf32> to vector<64x128xf32>
    %61 = arith.mulf %58, %60 : vector<64x128xf32>
    %62 = arith.addf %55, %61 : vector<64x128xf32>
    %c8_34 = arith.constant 8 : index
    %c0_35 = arith.constant 0 : index
    %63 = vector.load %arg15[%c8_34, %c0_35] : memref<82x128xf32, #tpu.memory_space<vmem>>, vector<64x128xf32>
    %64 = vector.broadcast %29 : vector<64x1xf32> to vector<64x128xf32>
    %65 = arith.mulf %63, %64 : vector<64x128xf32>
    %c3_36 = arith.constant 3 : index
    %c0_37 = arith.constant 0 : index
    %66 = vector.load %arg2[%c3_36, %c0_37] : memref<9x128xf32, #tpu.memory_space<vmem>>, vector<1x128xf32>
    %67 = vector.broadcast %66 : vector<1x128xf32> to vector<64x128xf32>
    %68 = arith.mulf %65, %67 : vector<64x128xf32>
    %69 = arith.addf %62, %68 : vector<64x128xf32>
    %c9_38 = arith.constant 9 : index
    %c0_39 = arith.constant 0 : index
    %70 = vector.load %arg15[%c9_38, %c0_39] : memref<82x128xf32, #tpu.memory_space<vmem>>, vector<64x128xf32>
    %c4_40 = arith.constant 4 : index
    %c0_41 = arith.constant 0 : index
    %71 = vector.load %arg2[%c4_40, %c0_41] : memref<9x128xf32, #tpu.memory_space<vmem>>, vector<1x128xf32>
    %72 = vector.broadcast %71 : vector<1x128xf32> to vector<64x128xf32>
    %73 = arith.mulf %70, %72 : vector<64x128xf32>
    %74 = arith.addf %69, %73 : vector<64x128xf32>
    %c10 = arith.constant 10 : index
    %c0_42 = arith.constant 0 : index
    %75 = vector.load %arg15[%c10, %c0_42] : memref<82x128xf32, #tpu.memory_space<vmem>>, vector<64x128xf32>
    %76 = vector.broadcast %33 : vector<64x1xf32> to vector<64x128xf32>
    %77 = arith.mulf %75, %76 : vector<64x128xf32>
    %c5_43 = arith.constant 5 : index
    %c0_44 = arith.constant 0 : index
    %78 = vector.load %arg2[%c5_43, %c0_44] : memref<9x128xf32, #tpu.memory_space<vmem>>, vector<1x128xf32>
    %79 = vector.broadcast %78 : vector<1x128xf32> to vector<64x128xf32>
    %80 = arith.mulf %77, %79 : vector<64x128xf32>
    %81 = arith.addf %74, %80 : vector<64x128xf32>
    %c16 = arith.constant 16 : index
    %c0_45 = arith.constant 0 : index
    %82 = vector.load %arg15[%c16, %c0_45] : memref<82x128xf32, #tpu.memory_space<vmem>>, vector<64x128xf32>
    %83 = vector.broadcast %36 : vector<64x1xf32> to vector<64x128xf32>
    %84 = arith.mulf %82, %83 : vector<64x128xf32>
    %c6_46 = arith.constant 6 : index
    %c0_47 = arith.constant 0 : index
    %85 = vector.load %arg2[%c6_46, %c0_47] : memref<9x128xf32, #tpu.memory_space<vmem>>, vector<1x128xf32>
    %86 = vector.broadcast %85 : vector<1x128xf32> to vector<64x128xf32>
    %87 = arith.mulf %84, %86 : vector<64x128xf32>
    %88 = arith.addf %81, %87 : vector<64x128xf32>
    %c17 = arith.constant 17 : index
    %c0_48 = arith.constant 0 : index
    %89 = vector.load %arg15[%c17, %c0_48] : memref<82x128xf32, #tpu.memory_space<vmem>>, vector<64x128xf32>
    %90 = vector.broadcast %25 : vector<64x1xf32> to vector<64x128xf32>
    %91 = arith.mulf %89, %90 : vector<64x128xf32>
    %c7_49 = arith.constant 7 : index
    %c0_50 = arith.constant 0 : index
    %92 = vector.load %arg2[%c7_49, %c0_50] : memref<9x128xf32, #tpu.memory_space<vmem>>, vector<1x128xf32>
    %93 = vector.broadcast %92 : vector<1x128xf32> to vector<64x128xf32>
    %94 = arith.mulf %91, %93 : vector<64x128xf32>
    %95 = arith.addf %88, %94 : vector<64x128xf32>
    %c18 = arith.constant 18 : index
    %c0_51 = arith.constant 0 : index
    %96 = vector.load %arg15[%c18, %c0_51] : memref<82x128xf32, #tpu.memory_space<vmem>>, vector<64x128xf32>
    %97 = vector.broadcast %37 : vector<64x1xf32> to vector<64x128xf32>
    %98 = arith.mulf %96, %97 : vector<64x128xf32>
    %c8_52 = arith.constant 8 : index
    %c0_53 = arith.constant 0 : index
    %99 = vector.load %arg2[%c8_52, %c0_53] : memref<9x128xf32, #tpu.memory_space<vmem>>, vector<1x128xf32>
    %100 = vector.broadcast %99 : vector<1x128xf32> to vector<64x128xf32>
    %101 = arith.mulf %98, %100 : vector<64x128xf32>
    %102 = arith.addf %95, %101 : vector<64x128xf32>
    %103 = vector.broadcast %2 : vector<1x128xf32> to vector<64x128xf32>
    %104 = arith.addf %102, %103 : vector<64x128xf32>
    %105 = arith.subf %104, %39 : vector<64x128xf32>
    %106 = vector.broadcast %4 : vector<1x128xf32> to vector<64x128xf32>
    %107 = arith.mulf %106, %105 : vector<64x128xf32>
    %108 = arith.addf %39, %107 : vector<64x128xf32>
    %cst_54 = arith.constant dense<0.000000e+00> : vector<64xf32>
    %109 = vector.multi_reduction <add>, %108, %cst_54 [1] : vector<64x128xf32> to vector<64xf32>
    %110 = vector.shape_cast %109 : vector<64xf32> to vector<64x1xf32>
    %cst_55 = arith.constant 1.280000e+02 : f32
    %111 = vector.broadcast %cst_55 : f32 to vector<64x1xf32>
    %112 = arith.divf %110, %111 : vector<64x1xf32>
    %113 = vector.broadcast %112 : vector<64x1xf32> to vector<64x128xf32>
    %114 = arith.subf %108, %113 : vector<64x128xf32>
    %115 = arith.mulf %114, %114 : vector<64x128xf32>
    %cst_56 = arith.constant dense<0.000000e+00> : vector<64xf32>
    %116 = vector.multi_reduction <add>, %115, %cst_56 [1] : vector<64x128xf32> to vector<64xf32>
    %117 = vector.shape_cast %116 : vector<64xf32> to vector<64x1xf32>
    %cst_57 = arith.constant 1.280000e+02 : f32
    %118 = vector.broadcast %cst_57 : f32 to vector<64x1xf32>
    %119 = arith.divf %117, %118 : vector<64x1xf32>
    %cst_58 = arith.constant 9.99999997E-7 : f32
    %120 = vector.broadcast %cst_58 : f32 to vector<64x1xf32>
    %121 = arith.addf %119, %120 : vector<64x1xf32>
    %122 = math.rsqrt %121 : vector<64x1xf32>
    %123 = vector.broadcast %122 : vector<64x1xf32> to vector<64x128xf32>
    %124 = arith.mulf %114, %123 : vector<64x128xf32>
    %125 = vector.broadcast %0 : vector<1x128xf32> to vector<64x128xf32>
    %126 = arith.mulf %124, %125 : vector<64x128xf32>
    %127 = vector.broadcast %1 : vector<1x128xf32> to vector<64x128xf32>
    %128 = arith.addf %126, %127 : vector<64x128xf32>
    %129 = arith.truncf %128 : vector<64x128xf32> to vector<64x128xbf16>
    %c0_59 = arith.constant 0 : index
    %c0_60 = arith.constant 0 : index
    %130 = vector.load %arg6[%c0_59, %c0_60] : memref<128x192xbf16, #tpu.memory_space<vmem>>, vector<128x192xbf16>
    %cst_61 = arith.constant dense<0.000000e+00> : vector<64x192xf32>
    %131 = tpu.matmul %129, %130, %cst_61 {dimension_numbers = #tpu.dot_dimension_numbers<[1], [0], [0], [1], [0, 0, 1, 1], [], []>} : vector<64x128xbf16>, vector<128x192xbf16>, vector<64x192xf32> -> vector<64x192xf32>
    %c9_62 = arith.constant 9 : index
    %c0_63 = arith.constant 0 : index
    %132 = vector.load %arg16[%c9_62, %c0_63] : memref<82x192xf32, #tpu.memory_space<vmem>>, vector<64x192xf32>
    tpu.vector_store %arg16[%c9_62, %c0_63], %131 {strides = array<i32>} : memref<82x192xf32, #tpu.memory_space<vmem>>, vector<64x192xf32>,
    %cst_64 = arith.constant 0.000000e+00 : f32
    %133 = vector.broadcast %cst_64 : f32 to vector<64x192xf32>
    %c0_65 = arith.constant 0 : index
    %c0_66 = arith.constant 0 : index
    %134 = vector.load %arg16[%c0_65, %c0_66] : memref<82x192xf32, #tpu.memory_space<vmem>>, vector<64x192xf32>
    %135 = vector.broadcast %34 : vector<64x1xf32> to vector<64x192xf32>
    %136 = arith.mulf %134, %135 : vector<64x192xf32>
    %c0_67 = arith.constant 0 : index
    %c0_68 = arith.constant 0 : index
    %137 = vector.load %arg4[%c0_67, %c0_68] : memref<9x192xf32, #tpu.memory_space<vmem>>, vector<1x192xf32>
    %138 = vector.broadcast %137 : vector<1x192xf32> to vector<64x192xf32>
    %139 = arith.mulf %136, %138 : vector<64x192xf32>
    %140 = arith.addf %133, %139 : vector<64x192xf32>
    %c1_69 = arith.constant 1 : index
    %c0_70 = arith.constant 0 : index
    %141 = vector.load %arg16[%c1_69, %c0_70] : memref<82x192xf32, #tpu.memory_space<vmem>>, vector<64x192xf32>
    %142 = vector.broadcast %21 : vector<64x1xf32> to vector<64x192xf32>
    %143 = arith.mulf %141, %142 : vector<64x192xf32>
    %c1_71 = arith.constant 1 : index
    %c0_72 = arith.constant 0 : index
    %144 = vector.load %arg4[%c1_71, %c0_72] : memref<9x192xf32, #tpu.memory_space<vmem>>, vector<1x192xf32>
    %145 = vector.broadcast %144 : vector<1x192xf32> to vector<64x192xf32>
    %146 = arith.mulf %143, %145 : vector<64x192xf32>
    %147 = arith.addf %140, %146 : vector<64x192xf32>
    %c2_73 = arith.constant 2 : index
    %c0_74 = arith.constant 0 : index
    %148 = vector.load %arg16[%c2_73, %c0_74] : memref<82x192xf32, #tpu.memory_space<vmem>>, vector<64x192xf32>
    %149 = vector.broadcast %35 : vector<64x1xf32> to vector<64x192xf32>
    %150 = arith.mulf %148, %149 : vector<64x192xf32>
    %c2_75 = arith.constant 2 : index
    %c0_76 = arith.constant 0 : index
    %151 = vector.load %arg4[%c2_75, %c0_76] : memref<9x192xf32, #tpu.memory_space<vmem>>, vector<1x192xf32>
    %152 = vector.broadcast %151 : vector<1x192xf32> to vector<64x192xf32>
    %153 = arith.mulf %150, %152 : vector<64x192xf32>
    %154 = arith.addf %147, %153 : vector<64x192xf32>
    %c8_77 = arith.constant 8 : index
    %c0_78 = arith.constant 0 : index
    %155 = vector.load %arg16[%c8_77, %c0_78] : memref<82x192xf32, #tpu.memory_space<vmem>>, vector<64x192xf32>
    %156 = vector.broadcast %29 : vector<64x1xf32> to vector<64x192xf32>
    %157 = arith.mulf %155, %156 : vector<64x192xf32>
    %c3_79 = arith.constant 3 : index
    %c0_80 = arith.constant 0 : index
    %158 = vector.load %arg4[%c3_79, %c0_80] : memref<9x192xf32, #tpu.memory_space<vmem>>, vector<1x192xf32>
    %159 = vector.broadcast %158 : vector<1x192xf32> to vector<64x192xf32>
    %160 = arith.mulf %157, %159 : vector<64x192xf32>
    %161 = arith.addf %154, %160 : vector<64x192xf32>
    %c9_81 = arith.constant 9 : index
    %c0_82 = arith.constant 0 : index
    %162 = vector.load %arg16[%c9_81, %c0_82] : memref<82x192xf32, #tpu.memory_space<vmem>>, vector<64x192xf32>
    %c4_83 = arith.constant 4 : index
    %c0_84 = arith.constant 0 : index
    %163 = vector.load %arg4[%c4_83, %c0_84] : memref<9x192xf32, #tpu.memory_space<vmem>>, vector<1x192xf32>
    %164 = vector.broadcast %163 : vector<1x192xf32> to vector<64x192xf32>
    %165 = arith.mulf %162, %164 : vector<64x192xf32>
    %166 = arith.addf %161, %165 : vector<64x192xf32>
    %c10_85 = arith.constant 10 : index
    %c0_86 = arith.constant 0 : index
    %167 = vector.load %arg16[%c10_85, %c0_86] : memref<82x192xf32, #tpu.memory_space<vmem>>, vector<64x192xf32>
    %168 = vector.broadcast %33 : vector<64x1xf32> to vector<64x192xf32>
    %169 = arith.mulf %167, %168 : vector<64x192xf32>
    %c5_87 = arith.constant 5 : index
    %c0_88 = arith.constant 0 : index
    %170 = vector.load %arg4[%c5_87, %c0_88] : memref<9x192xf32, #tpu.memory_space<vmem>>, vector<1x192xf32>
    %171 = vector.broadcast %170 : vector<1x192xf32> to vector<64x192xf32>
    %172 = arith.mulf %169, %171 : vector<64x192xf32>
    %173 = arith.addf %166, %172 : vector<64x192xf32>
    %c16_89 = arith.constant 16 : index
    %c0_90 = arith.constant 0 : index
    %174 = vector.load %arg16[%c16_89, %c0_90] : memref<82x192xf32, #tpu.memory_space<vmem>>, vector<64x192xf32>
    %175 = vector.broadcast %36 : vector<64x1xf32> to vector<64x192xf32>
    %176 = arith.mulf %174, %175 : vector<64x192xf32>
    %c6_91 = arith.constant 6 : index
    %c0_92 = arith.constant 0 : index
    %177 = vector.load %arg4[%c6_91, %c0_92] : memref<9x192xf32, #tpu.memory_space<vmem>>, vector<1x192xf32>
    %178 = vector.broadcast %177 : vector<1x192xf32> to vector<64x192xf32>
    %179 = arith.mulf %176, %178 : vector<64x192xf32>
    %180 = arith.addf %173, %179 : vector<64x192xf32>
    %c17_93 = arith.constant 17 : index
    %c0_94 = arith.constant 0 : index
    %181 = vector.load %arg16[%c17_93, %c0_94] : memref<82x192xf32, #tpu.memory_space<vmem>>, vector<64x192xf32>
    %182 = vector.broadcast %25 : vector<64x1xf32> to vector<64x192xf32>
    %183 = arith.mulf %181, %182 : vector<64x192xf32>
    %c7_95 = arith.constant 7 : index
    %c0_96 = arith.constant 0 : index
    %184 = vector.load %arg4[%c7_95, %c0_96] : memref<9x192xf32, #tpu.memory_space<vmem>>, vector<1x192xf32>
    %185 = vector.broadcast %184 : vector<1x192xf32> to vector<64x192xf32>
    %186 = arith.mulf %183, %185 : vector<64x192xf32>
    %187 = arith.addf %180, %186 : vector<64x192xf32>
    %c18_97 = arith.constant 18 : index
    %c0_98 = arith.constant 0 : index
    %188 = vector.load %arg16[%c18_97, %c0_98] : memref<82x192xf32, #tpu.memory_space<vmem>>, vector<64x192xf32>
    %189 = vector.broadcast %37 : vector<64x1xf32> to vector<64x192xf32>
    %190 = arith.mulf %188, %189 : vector<64x192xf32>
    %c8_99 = arith.constant 8 : index
    %c0_100 = arith.constant 0 : index
    %191 = vector.load %arg4[%c8_99, %c0_100] : memref<9x192xf32, #tpu.memory_space<vmem>>, vector<1x192xf32>
    %192 = vector.broadcast %191 : vector<1x192xf32> to vector<64x192xf32>
    %193 = arith.mulf %190, %192 : vector<64x192xf32>
    %194 = arith.addf %187, %193 : vector<64x192xf32>
    %195 = vector.extract_strided_slice %194 {offsets = [0, 0], sizes = [64, 64], strides = [1, 1]} : vector<64x192xf32> to vector<64x64xf32>
    %196 = vector.extract_strided_slice %194 {offsets = [0, 64], sizes = [64, 64], strides = [1, 1]} : vector<64x192xf32> to vector<64x64xf32>
    %197 = vector.extract_strided_slice %194 {offsets = [0, 128], sizes = [64, 64], strides = [1, 1]} : vector<64x192xf32> to vector<64x64xf32>
    %c0_101 = arith.constant 0 : index
    %c0_102 = arith.constant 0 : index
    %198 = vector.load %arg7[%c0_101, %c0_102] : memref<2x64xf32, #tpu.memory_space<vmem>>, vector<1x64xf32>
    %199 = vector.broadcast %198 : vector<1x64xf32> to vector<64x64xf32>
    %200 = arith.addf %197, %199 : vector<64x64xf32>
    %cst_103 = arith.constant dense<0xFF800000> : vector<64xf32>
    %201 = vector.multi_reduction <maximumf>, %200, %cst_103 [0] : vector<64x64xf32> to vector<64xf32>
    %202 = vector.shape_cast %201 : vector<64xf32> to vector<1x64xf32>
    %203 = vector.broadcast %202 : vector<1x64xf32> to vector<64x64xf32>
    %204 = arith.subf %200, %203 : vector<64x64xf32>
    %205 = math.exp %204 : vector<64x64xf32>
    %cst_104 = arith.constant dense<0.000000e+00> : vector<64xf32>
    %206 = vector.multi_reduction <add>, %205, %cst_104 [0] : vector<64x64xf32> to vector<64xf32>
    %207 = vector.shape_cast %206 : vector<64xf32> to vector<1x64xf32>
    %208 = vector.broadcast %207 : vector<1x64xf32> to vector<64x64xf32>
    %209 = arith.divf %205, %208 : vector<64x64xf32>
    %210 = arith.mulf %209, %195 : vector<64x64xf32>
    %211 = arith.truncf %210 : vector<64x64xf32> to vector<64x64xbf16>
    %cst_105 = arith.constant dense<0.000000e+00> : vector<64x128xf32>
    %212 = tpu.matmul %211, %129, %cst_105 {dimension_numbers = #tpu.dot_dimension_numbers<[0], [0], [1], [1], [0, 1, 1, 1], [], []>} : vector<64x64xbf16>, vector<64x128xbf16>, vector<64x128xf32> -> vector<64x128xf32>
    %213 = arith.truncf %212 : vector<64x128xf32> to vector<64x128xbf16>
    %c0_106 = arith.constant 0 : index
    %c0_107 = arith.constant 0 : index
    %214 = vector.load %arg8[%c0_106, %c0_107] : memref<128x256xbf16, #tpu.memory_space<vmem>>, vector<128x256xbf16>
    %cst_108 = arith.constant dense<0.000000e+00> : vector<64x256xf32>
    %215 = tpu.matmul %213, %214, %cst_108 {dimension_numbers = #tpu.dot_dimension_numbers<[1], [0], [0], [1], [0, 0, 1, 1], [], []>} : vector<64x128xbf16>, vector<128x256xbf16>, vector<64x256xf32> -> vector<64x256xf32>
    %216 = vector.extract_strided_slice %215 {offsets = [0, 0], sizes = [64, 128], strides = [1, 1]} : vector<64x256xf32> to vector<64x128xf32>
    %217 = vector.extract_strided_slice %215 {offsets = [0, 128], sizes = [64, 128], strides = [1, 1]} : vector<64x256xf32> to vector<64x128xf32>
    %c1_109 = arith.constant 1 : index
    %c0_110 = arith.constant 0 : index
    %218 = vector.load %arg7[%c1_109, %c0_110] : memref<2x64xf32, #tpu.memory_space<vmem>>, vector<1x1xf32>
    %219 = arith.negf %217 : vector<64x128xf32>
    %220 = math.exp %219 : vector<64x128xf32>
    %cst_111 = arith.constant 1.000000e+00 : f32
    %221 = vector.broadcast %cst_111 : f32 to vector<64x128xf32>
    %222 = arith.addf %221, %220 : vector<64x128xf32>
    %223 = arith.divf %221, %222 : vector<64x128xf32>
    %224 = arith.mulf %217, %223 : vector<64x128xf32>
    %225 = vector.broadcast %218 : vector<1x1xf32> to vector<64x128xf32>
    %226 = arith.addf %224, %225 : vector<64x128xf32>
    %227 = arith.mulf %216, %226 : vector<64x128xf32>
    %228 = arith.truncf %227 : vector<64x128xf32> to vector<64x128xbf16>
    %c0_112 = arith.constant 0 : index
    %c0_113 = arith.constant 0 : index
    %229 = vector.load %arg9[%c0_112, %c0_113] : memref<128x128xbf16, #tpu.memory_space<vmem>>, vector<128x128xbf16>
    %cst_114 = arith.constant dense<0.000000e+00> : vector<64x128xf32>
    %230 = tpu.matmul %228, %229, %cst_114 {dimension_numbers = #tpu.dot_dimension_numbers<[1], [0], [0], [1], [0, 0, 1, 1], [], []>} : vector<64x128xbf16>, vector<128x128xbf16>, vector<64x128xf32> -> vector<64x128xf32>
    %c0_115 = arith.constant 0 : index
    %c0_116 = arith.constant 0 : index
    %c0_117 = arith.constant 0 : index
    %231 = vector.load %arg14[%c0_115, %c0_116, %c0_117] : memref<1x64x128xf32, #tpu.memory_space<vmem>>, vector<1x64x128xf32>
    %232 = vector.shape_cast %231 : vector<1x64x128xf32> to vector<64x128xf32>
    %233 = vector.shape_cast %230 : vector<64x128xf32> to vector<1x64x128xf32>
    tpu.vector_store %arg14[%c0_115, %c0_116, %c0_117], %233 {strides = array<i32>} : memref<1x64x128xf32, #tpu.memory_space<vmem>>, vector<1x64x128xf32>,
    %234 = arith.truncf %196 : vector<64x64xf32> to vector<64x64xbf16>
    %235 = arith.truncf %230 : vector<64x128xf32> to vector<64x128xbf16>
    %cst_118 = arith.constant dense<0.000000e+00> : vector<64x128xf32>
    %236 = tpu.matmul %234, %235, %cst_118 {dimension_numbers = #tpu.dot_dimension_numbers<[1], [0], [0], [1], [0, 0, 1, 1], [], []>} : vector<64x64xbf16>, vector<64x128xbf16>, vector<64x128xf32> -> vector<64x128xf32>
    %237 = arith.subf %236, %108 : vector<64x128xf32>
    %238 = vector.broadcast %5 : vector<1x128xf32> to vector<64x128xf32>
    %239 = arith.mulf %238, %237 : vector<64x128xf32>
    %240 = arith.addf %108, %239 : vector<64x128xf32>
    %c9_119 = arith.constant 9 : index
    %c0_120 = arith.constant 0 : index
    %241 = vector.load %arg15[%c9_119, %c0_120] : memref<82x128xf32, #tpu.memory_space<vmem>>, vector<64x128xf32>
    tpu.vector_store %arg15[%c9_119, %c0_120], %240 {strides = array<i32>} : memref<82x128xf32, #tpu.memory_space<vmem>>, vector<64x128xf32>,
    %cst_121 = arith.constant 0.000000e+00 : f32
    %242 = vector.broadcast %cst_121 : f32 to vector<64x128xf32>
    %c0_122 = arith.constant 0 : index
    %c0_123 = arith.constant 0 : index
    %243 = vector.load %arg15[%c0_122, %c0_123] : memref<82x128xf32, #tpu.memory_space<vmem>>, vector<64x128xf32>
    %244 = vector.broadcast %34 : vector<64x1xf32> to vector<64x128xf32>
    %245 = arith.mulf %243, %244 : vector<64x128xf32>
    %c0_124 = arith.constant 0 : index
    %c0_125 = arith.constant 0 : index
    %246 = vector.load %arg3[%c0_124, %c0_125] : memref<9x128xf32, #tpu.memory_space<vmem>>, vector<1x128xf32>
    %247 = vector.broadcast %246 : vector<1x128xf32> to vector<64x128xf32>
    %248 = arith.mulf %245, %247 : vector<64x128xf32>
    %249 = arith.addf %242, %248 : vector<64x128xf32>
    %c1_126 = arith.constant 1 : index
    %c0_127 = arith.constant 0 : index
    %250 = vector.load %arg15[%c1_126, %c0_127] : memref<82x128xf32, #tpu.memory_space<vmem>>, vector<64x128xf32>
    %251 = vector.broadcast %21 : vector<64x1xf32> to vector<64x128xf32>
    %252 = arith.mulf %250, %251 : vector<64x128xf32>
    %c1_128 = arith.constant 1 : index
    %c0_129 = arith.constant 0 : index
    %253 = vector.load %arg3[%c1_128, %c0_129] : memref<9x128xf32, #tpu.memory_space<vmem>>, vector<1x128xf32>
    %254 = vector.broadcast %253 : vector<1x128xf32> to vector<64x128xf32>
    %255 = arith.mulf %252, %254 : vector<64x128xf32>
    %256 = arith.addf %249, %255 : vector<64x128xf32>
    %c2_130 = arith.constant 2 : index
    %c0_131 = arith.constant 0 : index
    %257 = vector.load %arg15[%c2_130, %c0_131] : memref<82x128xf32, #tpu.memory_space<vmem>>, vector<64x128xf32>
    %258 = vector.broadcast %35 : vector<64x1xf32> to vector<64x128xf32>
    %259 = arith.mulf %257, %258 : vector<64x128xf32>
    %c2_132 = arith.constant 2 : index
    %c0_133 = arith.constant 0 : index
    %260 = vector.load %arg3[%c2_132, %c0_133] : memref<9x128xf32, #tpu.memory_space<vmem>>, vector<1x128xf32>
    %261 = vector.broadcast %260 : vector<1x128xf32> to vector<64x128xf32>
    %262 = arith.mulf %259, %261 : vector<64x128xf32>
    %263 = arith.addf %256, %262 : vector<64x128xf32>
    %c8_134 = arith.constant 8 : index
    %c0_135 = arith.constant 0 : index
    %264 = vector.load %arg15[%c8_134, %c0_135] : memref<82x128xf32, #tpu.memory_space<vmem>>, vector<64x128xf32>
    %265 = vector.broadcast %29 : vector<64x1xf32> to vector<64x128xf32>
    %266 = arith.mulf %264, %265 : vector<64x128xf32>
    %c3_136 = arith.constant 3 : index
    %c0_137 = arith.constant 0 : index
    %267 = vector.load %arg3[%c3_136, %c0_137] : memref<9x128xf32, #tpu.memory_space<vmem>>, vector<1x128xf32>
    %268 = vector.broadcast %267 : vector<1x128xf32> to vector<64x128xf32>
    %269 = arith.mulf %266, %268 : vector<64x128xf32>
    %270 = arith.addf %263, %269 : vector<64x128xf32>
    %c9_138 = arith.constant 9 : index
    %c0_139 = arith.constant 0 : index
    %271 = vector.load %arg15[%c9_138, %c0_139] : memref<82x128xf32, #tpu.memory_space<vmem>>, vector<64x128xf32>
    %c4_140 = arith.constant 4 : index
    %c0_141 = arith.constant 0 : index
    %272 = vector.load %arg3[%c4_140, %c0_141] : memref<9x128xf32, #tpu.memory_space<vmem>>, vector<1x128xf32>
    %273 = vector.broadcast %272 : vector<1x128xf32> to vector<64x128xf32>
    %274 = arith.mulf %271, %273 : vector<64x128xf32>
    %275 = arith.addf %270, %274 : vector<64x128xf32>
    %c10_142 = arith.constant 10 : index
    %c0_143 = arith.constant 0 : index
    %276 = vector.load %arg15[%c10_142, %c0_143] : memref<82x128xf32, #tpu.memory_space<vmem>>, vector<64x128xf32>
    %277 = vector.broadcast %33 : vector<64x1xf32> to vector<64x128xf32>
    %278 = arith.mulf %276, %277 : vector<64x128xf32>
    %c5_144 = arith.constant 5 : index
    %c0_145 = arith.constant 0 : index
    %279 = vector.load %arg3[%c5_144, %c0_145] : memref<9x128xf32, #tpu.memory_space<vmem>>, vector<1x128xf32>
    %280 = vector.broadcast %279 : vector<1x128xf32> to vector<64x128xf32>
    %281 = arith.mulf %278, %280 : vector<64x128xf32>
    %282 = arith.addf %275, %281 : vector<64x128xf32>
    %c16_146 = arith.constant 16 : index
    %c0_147 = arith.constant 0 : index
    %283 = vector.load %arg15[%c16_146, %c0_147] : memref<82x128xf32, #tpu.memory_space<vmem>>, vector<64x128xf32>
    %284 = vector.broadcast %36 : vector<64x1xf32> to vector<64x128xf32>
    %285 = arith.mulf %283, %284 : vector<64x128xf32>
    %c6_148 = arith.constant 6 : index
    %c0_149 = arith.constant 0 : index
    %286 = vector.load %arg3[%c6_148, %c0_149] : memref<9x128xf32, #tpu.memory_space<vmem>>, vector<1x128xf32>
    %287 = vector.broadcast %286 : vector<1x128xf32> to vector<64x128xf32>
    %288 = arith.mulf %285, %287 : vector<64x128xf32>
    %289 = arith.addf %282, %288 : vector<64x128xf32>
    %c17_150 = arith.constant 17 : index
    %c0_151 = arith.constant 0 : index
    %290 = vector.load %arg15[%c17_150, %c0_151] : memref<82x128xf32, #tpu.memory_space<vmem>>, vector<64x128xf32>
    %291 = vector.broadcast %25 : vector<64x1xf32> to vector<64x128xf32>
    %292 = arith.mulf %290, %291 : vector<64x128xf32>
    %c7_152 = arith.constant 7 : index
    %c0_153 = arith.constant 0 : index
    %293 = vector.load %arg3[%c7_152, %c0_153] : memref<9x128xf32, #tpu.memory_space<vmem>>, vector<1x128xf32>
    %294 = vector.broadcast %293 : vector<1x128xf32> to vector<64x128xf32>
    %295 = arith.mulf %292, %294 : vector<64x128xf32>
    %296 = arith.addf %289, %295 : vector<64x128xf32>
    %c18_154 = arith.constant 18 : index
    %c0_155 = arith.constant 0 : index
    %297 = vector.load %arg15[%c18_154, %c0_155] : memref<82x128xf32, #tpu.memory_space<vmem>>, vector<64x128xf32>
    %298 = vector.broadcast %37 : vector<64x1xf32> to vector<64x128xf32>
    %299 = arith.mulf %297, %298 : vector<64x128xf32>
    %c8_156 = arith.constant 8 : index
    %c0_157 = arith.constant 0 : index
    %300 = vector.load %arg3[%c8_156, %c0_157] : memref<9x128xf32, #tpu.memory_space<vmem>>, vector<1x128xf32>
    %301 = vector.broadcast %300 : vector<1x128xf32> to vector<64x128xf32>
    %302 = arith.mulf %299, %301 : vector<64x128xf32>
    %303 = arith.addf %296, %302 : vector<64x128xf32>
    %304 = vector.broadcast %3 : vector<1x128xf32> to vector<64x128xf32>
    %305 = arith.addf %303, %304 : vector<64x128xf32>
    %306 = arith.subf %305, %240 : vector<64x128xf32>
    %307 = vector.broadcast %6 : vector<1x128xf32> to vector<64x128xf32>
    %308 = arith.mulf %307, %306 : vector<64x128xf32>
    %309 = arith.addf %240, %308 : vector<64x128xf32>
    %310 = arith.truncf %309 : vector<64x128xf32> to vector<64x128xbf16>
    %c0_158 = arith.constant 0 : index
    %c0_159 = arith.constant 0 : index
    %311 = vector.load %arg10[%c0_158, %c0_159] : memref<128x512xbf16, #tpu.memory_space<vmem>>, vector<128x512xbf16>
    %cst_160 = arith.constant dense<0.000000e+00> : vector<64x512xf32>
    %312 = tpu.matmul %310, %311, %cst_160 {dimension_numbers = #tpu.dot_dimension_numbers<[1], [0], [0], [1], [0, 0, 1, 1], [], []>} : vector<64x128xbf16>, vector<128x512xbf16>, vector<64x512xf32> -> vector<64x512xf32>
    %c0_161 = arith.constant 0 : index
    %c0_162 = arith.constant 0 : index
    %313 = vector.load %arg11[%c0_161, %c0_162] : memref<1x512xf32, #tpu.memory_space<vmem>>, vector<1x512xf32>
    %314 = vector.broadcast %313 : vector<1x512xf32> to vector<64x512xf32>
    %315 = arith.addf %312, %314 : vector<64x512xf32>
    %cst_163 = arith.constant 0.000000e+00 : f32
    %316 = vector.broadcast %cst_163 : f32 to vector<64x512xf32>
    %317 = arith.maximumf %315, %316 : vector<64x512xf32>
    %318 = arith.truncf %317 : vector<64x512xf32> to vector<64x512xbf16>
    %c0_164 = arith.constant 0 : index
    %c0_165 = arith.constant 0 : index
    %319 = vector.load %arg12[%c0_164, %c0_165] : memref<512x128xbf16, #tpu.memory_space<vmem>>, vector<512x128xbf16>
    %cst_166 = arith.constant dense<0.000000e+00> : vector<64x128xf32>
    %320 = tpu.matmul %318, %319, %cst_166 {dimension_numbers = #tpu.dot_dimension_numbers<[1], [0], [0], [1], [0, 0, 1, 1], [], []>} : vector<64x512xbf16>, vector<512x128xbf16>, vector<64x128xf32> -> vector<64x128xf32>
    %321 = vector.broadcast %8 : vector<1x128xf32> to vector<64x128xf32>
    %322 = arith.addf %320, %321 : vector<64x128xf32>
    %323 = arith.subf %322, %309 : vector<64x128xf32>
    %324 = vector.broadcast %7 : vector<1x128xf32> to vector<64x128xf32>
    %325 = arith.mulf %324, %323 : vector<64x128xf32>
    %326 = arith.addf %309, %325 : vector<64x128xf32>
    %c0_167 = arith.constant 0 : index
    %c0_168 = arith.constant 0 : index
    %c0_169 = arith.constant 0 : index
    %327 = vector.load %arg13[%c0_167, %c0_168, %c0_169] : memref<1x64x128xf32, #tpu.memory_space<vmem>>, vector<1x64x128xf32>
    %328 = vector.shape_cast %327 : vector<1x64x128xf32> to vector<64x128xf32>
    %329 = vector.shape_cast %326 : vector<64x128xf32> to vector<1x64x128xf32>
    tpu.vector_store %arg13[%c0_167, %c0_168, %c0_169], %329 {strides = array<i32>} : memref<1x64x128xf32, #tpu.memory_space<vmem>>, vector<1x64x128xf32>,
    return
  }
  func.func @transform_0(%arg0: i32) -> (i32, i32, i32) {
    %c0_i32 = arith.constant 0 : i32
    %c0_i32_0 = arith.constant 0 : i32
    %c0_i32_1 = arith.constant 0 : i32
    return %arg0, %c0_i32, %c0_i32_0 : i32, i32, i32
  }
  func.func @transform_1(%arg0: i32) -> (i32, i32) {
    %c0_i32 = arith.constant 0 : i32
    %c0_i32_0 = arith.constant 0 : i32
    %c0_i32_1 = arith.constant 0 : i32
    return %c0_i32, %c0_i32_0 : i32, i32
  }
  func.func @transform_2(%arg0: i32) -> (i32, i32) {
    %c0_i32 = arith.constant 0 : i32
    %c0_i32_0 = arith.constant 0 : i32
    %c0_i32_1 = arith.constant 0 : i32
    return %c0_i32, %c0_i32_0 : i32, i32
  }
  func.func @transform_3(%arg0: i32) -> (i32, i32) {
    %c0_i32 = arith.constant 0 : i32
    %c0_i32_0 = arith.constant 0 : i32
    %c0_i32_1 = arith.constant 0 : i32
    return %c0_i32, %c0_i32_0 : i32, i32
  }
  func.func @transform_4(%arg0: i32) -> (i32, i32) {
    %c0_i32 = arith.constant 0 : i32
    %c0_i32_0 = arith.constant 0 : i32
    %c0_i32_1 = arith.constant 0 : i32
    return %c0_i32, %c0_i32_0 : i32, i32
  }
  func.func @transform_5(%arg0: i32) -> (i32, i32) {
    %c0_i32 = arith.constant 0 : i32
    %c0_i32_0 = arith.constant 0 : i32
    %c0_i32_1 = arith.constant 0 : i32
    return %c0_i32, %c0_i32_0 : i32, i32
  }
  func.func @transform_6(%arg0: i32) -> (i32, i32) {
    %c0_i32 = arith.constant 0 : i32
    %c0_i32_0 = arith.constant 0 : i32
    %c0_i32_1 = arith.constant 0 : i32
    return %c0_i32, %c0_i32_0 : i32, i32
  }
  func.func @transform_7(%arg0: i32) -> (i32, i32) {
    %c0_i32 = arith.constant 0 : i32
    %c0_i32_0 = arith.constant 0 : i32
    %c0_i32_1 = arith.constant 0 : i32
    return %c0_i32, %c0_i32_0 : i32, i32
  }
  func.func @transform_8(%arg0: i32) -> (i32, i32) {
    %c0_i32 = arith.constant 0 : i32
    %c0_i32_0 = arith.constant 0 : i32
    %c0_i32_1 = arith.constant 0 : i32
    return %c0_i32, %c0_i32_0 : i32, i32
  }
  func.func @transform_9(%arg0: i32) -> (i32, i32) {
    %c0_i32 = arith.constant 0 : i32
    %c0_i32_0 = arith.constant 0 : i32
    %c0_i32_1 = arith.constant 0 : i32
    return %c0_i32, %c0_i32_0 : i32, i32
  }
  func.func @transform_10(%arg0: i32) -> (i32, i32) {
    %c0_i32 = arith.constant 0 : i32
    %c0_i32_0 = arith.constant 0 : i32
    %c0_i32_1 = arith.constant 0 : i32
    return %c0_i32, %c0_i32_0 : i32, i32
  }
  func.func @transform_11(%arg0: i32) -> (i32, i32) {
    %c0_i32 = arith.constant 0 : i32
    %c0_i32_0 = arith.constant 0 : i32
    %c0_i32_1 = arith.constant 0 : i32
    return %c0_i32, %c0_i32_0 : i32, i32
  }
  func.func @transform_12(%arg0: i32) -> (i32, i32, i32) {
    %c0_i32 = arith.constant 0 : i32
    %c0_i32_0 = arith.constant 0 : i32
    %c0_i32_1 = arith.constant 0 : i32
    return %arg0, %c0_i32, %c0_i32_0 : i32, i32, i32
  }
  func.func @transform_13(%arg0: i32) -> (i32, i32, i32) {
    %c0_i32 = arith.constant 0 : i32
    %c0_i32_0 = arith.constant 0 : i32
    %c0_i32_1 = arith.constant 0 : i32
    return %arg0, %c0_i32, %c0_i32_0 : i32, i32, i32
  }
}

</mosaic_0001>

<bundles_post_ra>
// kernel: efficientvim_stage.2
= control target key start
LH: loop header
LB: loop body
LE: loop exit
PB: predicated region body
PF: predicated region fallthrough
CT: control target
= control target key end

     0   :  { %s8457_s0 = inlined_call_operand.hbm [shape: f32[2,64,128], index: 0, kind: input, shape index: {}]   ;;  %s8458_s1 = inlined_call_operand.hbm [shape: f32[9,128], index: 1, kind: input, shape index: {}]   ;;  %s8459_s2 = inlined_call_operand.hbm [shape: f32[9,128], index: 2, kind: input, shape index: {}]   ;;  %s8460_s3 = inlined_call_operand.vmem [shape: f32[9,192], index: 3, kind: input, shape index: {}]   ;;  %s8461_s4 = inlined_call_operand.hbm [shape: f32[9,128], index: 4, kind: input, shape index: {}]   ;;  %s8462_s5 = inlined_call_operand.vmem [shape: bf16[128,192], index: 5, kind: input, shape index: {}]   ;;  %s8463_s6 = inlined_call_operand.hbm [shape: f32[2,64], index: 6, kind: input, shape index: {}]   ;;  %s8464_s7 = inlined_call_operand.hbm [shape: bf16[128,256], index: 7, kind: input, shape index: {}]   ;;  %s8465_s8 = inlined_call_operand.vmem [shape: bf16[128,128], index: 8, kind: input, shape index: {}]   ;;  %s8466_s9 = inlined_call_operand.vmem [shape: bf16[128,512], index: 9, kind: input, shape index: {}]   ;;  %s8467_s10 = inlined_call_operand.vmem [shape: f32[1,512], index: 10, kind: input, shape index: {}]   ;;  %s8468_s11 = inlined_call_operand.hbm [shape: bf16[512,128], index: 11, kind: input, shape index: {}]   ;;  %s8469_s12 = inlined_call_operand.vmem [shape: f32[2,64,128], index: 12, kind: output, shape index: {0}]   ;;  %s8470_s13 = inlined_call_operand.hbm [shape: f32[2,64,128], index: 13, kind: output, shape index: {1}]  }
   0x1   :  { %8623 = sst [smem:[#allocation88_spill]] %s8458_s1 }
   0x2   :  { %8624 = sst [smem:[#allocation89_spill]] %s8459_s2 }
   0x3   :  { %8625 = sst [smem:[#allocation90_spill]] %s8461_s4 }
   0x4   :  { %8626 = sst [smem:[#allocation91_spill]] %s8463_s6 }
   0x5   :  { %8627 = sst [smem:[#allocation92_spill]] %s8464_s7 }
   0x6   :  { %8628 = sst [smem:[#allocation93_spill]] %s8468_s11 }
   0x7   :  { %8629 = sst [smem:[#allocation94_spill]] %s8469_s12 }
   0x8   :  { %19 = vsyncpa [#allocation5], 0 }
   0x9   :  { %21 = vsyncpa [#allocation5 + $0x1], 0 }
   0xa   :  { %22 = vsyncpa [#allocation8], 0 }
   0xb   :  { %23 = vsyncpa [#allocation11], 0 }
   0xc   :  { %24 = vsyncpa [#allocation14], 0 }
   0xd   :  { %25 = vsyncpa [#allocation6], 0 }
   0xe   :  { %27 = vsyncpa [#allocation6 + $0x1], 0  ;;  %s5755_s25 = smov 0   ;;  %s5757_s26 = smov 0  }
   0xf   :  { %s5759_s27 = smov 0   ;;  %s5761_s28 = smov 0  }
  0x10 LB: > { %s8630_s1 = sld [smem:[#allocation88_spill]]  ;;  %s5779_s15 = sadd.s32 4294967295, %s5667_s28   ;;  %s5667_s28 = sphi %s5761_s28, %s8891_s28   ;;  %s5663_s27 = sphi %s5759_s27, %s8890_s27   ;;  %s5659_s26 = sphi %s5757_s26, %s8889_s26   ;;  %s5655_s25 = sphi %s5755_s25, %s8888_s25  }
  0x11   : > { %p4554_p0 = scmp.ge.s32.totalorder %s5667_s28, 1  ;;  %p54_p1 = scmp.eq.s32.totalorder %s5779_s15, 0 }
  0x12   : > { %p347_p2 = scmp.lt.s32.totalorder %s5667_s28, 3  ;;  %s5669_s17 = smov [#allocation7]  }
  0x13   : > { %s360_s18 = sshll.u32 %s5669_s17, 4  ;;  %s8632_s4 = sld [smem:[#allocation90_spill]]  ;;  %s361_s18 = int_to_ptr.vmem [resolvable:$true] %s360_s18 }
  0x14   : > { %p5784_p3 = pnand %p4554_p0, %p347_p2  ;;  %s8634_s7 = sld [smem:[#allocation92_spill]] }
  0x15   : > { %s5670_s30 = smov [#allocation10]   ;;  %s8472_s12 = smov 8  }
  0x16   : > { %s358_s14 = sshll.u32 %s8630_s1, 4  ;;  %p5190_p4 = pneg %p5784_p3  ;;  %s359_s14 = int_to_ptr.hbm [resolvable:$true] %s358_s14 }
  0x17   : > { %s391_s17 = sshll.u32 %s5670_s30, 4  ;;  %s8471_s1 = smov 128   ;;  %s392_s17 = int_to_ptr.vmem [resolvable:$true] %s391_s17 }
  0x18   : > { %p5796_p6 = pnand %p5190_p4, %p54_p1  ;;  %s8635_s2 = sld [smem:[#allocation89_spill]] }
  0x19   : > { %s389_s21 = sshll.u32 %s8632_s4, 4  ;;  %s5673_s24 = smov [#allocation13]   ;;  %s390_s21 = int_to_ptr.hbm [resolvable:$true] %s389_s21 }
  0x1a   : > { %s418_s29 = sshll.u32 %s8634_s7, 4  ;;  %s420_s30 = sshll.u32 %s5673_s24, 4  ;;  %s419_s29 = int_to_ptr.hbm [resolvable:$true] %s418_s29  ;;  %s421_s30 = int_to_ptr.vmem [resolvable:$true] %s420_s30 }
  0x1b   : > { %5193 = dma.hbm_to_vmem [thread:$0]  (!%p5796_p6), %s359_s14, 256, %s361_s18, [#allocation8], %s8471_s1, %s8471_s1, %s8472_s12  }
  0x1c   : > { %5199 = dma.hbm_to_vmem [thread:$0]  (!%p5796_p6), %s390_s21, 256, %s392_s17, [#allocation11], %s8471_s1, %s8471_s1, %s8472_s12  }
  0x1d   : > { %5205 = dma.hbm_to_vmem [thread:$0]  (!%p5796_p6), %s419_s29, 2048, %s421_s30, [#allocation14], %s8471_s1, %s8471_s1, %s8472_s12  }
  0x1e   : > { %s372_s23 = sshll.u32 %s8635_s2, 4  ;;  %s5674_s14 = smov [#allocation9]   ;;  %s373_s23 = int_to_ptr.hbm [resolvable:$true] %s372_s23 }
  0x1f   : > { %s374_s18 = sshll.u32 %s5674_s14, 4  ;;  %s8636_s6 = sld [smem:[#allocation91_spill]]  ;;  %s375_s18 = int_to_ptr.vmem [resolvable:$true] %s374_s18 }
  0x20   : > { %5196 = dma.hbm_to_vmem [thread:$0]  (!%p5796_p6), %s373_s23, 256, %s375_s18, [#allocation8], %s8471_s1, %s8471_s1, %s8472_s12  }
  0x21   : > { %s8637_s11 = sld [smem:[#allocation93_spill]]  ;;  %s5675_s20 = smov [#allocation12]  }
  0x22   : > { %s409_s4 = sshll.u32 %s5675_s20, 4  ;;  %s5676_s7 = smov [#allocation15]   ;;  %s410_s4 = int_to_ptr.vmem [resolvable:$true] %s409_s4 }
  0x23   : > { %s443_s23 = sshll.u32 %s5676_s7, 4  ;;  %s5677_s24 = smov 64   ;;  %s444_s23 = int_to_ptr.vmem [resolvable:$true] %s443_s23 }
  0x24   : > { %s5678_s30 = smov 4   ;;  %s4553_s14 = sadd.s32 4294967294, %s5667_s28  }
  0x25   : > { %s407_s21 = sshll.u32 %s8636_s6, 4  ;;  %s5838_s18 = sadd.s32 1, %s5667_s28   ;;  %s408_s21 = int_to_ptr.hbm [resolvable:$true] %s407_s21 }
  0x26   : > { %5202 = dma.hbm_to_vmem [thread:$0]  (!%p5796_p6), %s408_s21, 32, %s410_s4, [#allocation11]  }
  0x27   : > { %s441_s29 = sshll.u32 %s8637_s11, 4  ;;  %s37_s17 = ssub.s32 %s5667_s28, %s5838_s18  ;;  %s442_s29 = int_to_ptr.hbm [resolvable:$true] %s441_s29 }
  0x28   : > { %5208 = dma.hbm_to_vmem [thread:$0]  (!%p5796_p6), %s442_s29, 4096, %s444_s23, [#allocation14], %s5677_s24, %s5677_s24, %s5678_s30  }
  0x29   : > { %s40_s19 = sadd.s32 1, %s5663_s27  ;;  %p38_p7 = scmp.eq.s32.totalorder %s37_s17, 0 }
  0x2a   : > { %p47_p8 = scmp.ne.s32.totalorder %s5663_s27, %s5659_s26  ;;  %p48_p9 = scmp.eq.s32.totalorder %s5667_s28, 0 }
  0x2b   : > { %p53_p10 = scmp.ne.s32.totalorder %s5659_s26, %s5655_s25  ;;  %p334_p13 = scmp.eq.s32.totalorder %s5779_s15, 1 }
  0x2c   : > { %s5849_s21 = scalar_select %p38_p7, %s5663_s27, %s40_s19  }
  0x2d   : > { %p5851_p11 = por %p48_p9, %p47_p8  ;;  %p5857_p12 = por %p54_p1, %p53_p10 }
  0x2e   : > { %8638 = sst [smem:[#allocation22_spill]] %s5849_s21  ;;  %p340_p0 = scmp.eq.s32.totalorder %s4553_s14, 1 }
  0x2f   : > { %p5223_p2 = scmp.lt.s32.totalorder %s5667_s28, 2  ;;  %s457_s29 = sand.u32 1, %s5663_s27  }
  0x30   : > { %p5864_p4 = por %p334_p13, %p47_p8  ;;  %p5868_p6 = por %p340_p0, %p53_p10 }
  0x31   : > { %s4562_s23 = sshll.u32 %s457_s29, 6  ;;  %s5037_s24 = sshll.u32 %s5667_s28, 6 }
  0x32   : > { %s466_s19 = scalar_lea.hbm %s8457_s0, %s5037_s24  ;;  %s461_s1 = scalar_lea.vmem [#allocation4], %s4562_s23 }
  0x33   : > { %s469_s12 = sshll.u32 %s461_s1, 4  ;;  %s467_s2 = sshll.u32 %s466_s19, 4  ;;  %s470_s12 = int_to_ptr.vmem [resolvable:$true] %s469_s12  ;;  %s468_s2 = int_to_ptr.hbm [resolvable:$true] %s467_s2 }
  0x34   : > { %p5878_p7 = pnand %p5223_p2, %p5851_p11  ;;  %s458_s6 = scalar_lea.sflag [#allocation5], %s457_s29 }
  0x35   : > { %s5559_s11 = sshra.s32 %s468_s2, 4  ;;  %s5566_s24 = scalar_lea.hbm %s8457_s0, 128  ;;  %s5560_s11 = int_to_ptr.hbm [resolvable:$true] %s5559_s11 }
  0x36   : > { %s5561_s21 = scalar_lea.hbm %s5560_s11, 64  ;;  %p5563_p9 = pneg %p5878_p7 }
  0x37   : > { %p5562_p8 = scmp.ne.s32.totalorder %s5560_s11, %s5561_s21  ;;  %p5567_p11 = scmp.lt.s32.totalorder %s5560_s11, %s8457_s0 }
  0x38   : > { %p5568_p0 = scmp.lt.s32.totalorder %s5566_s24, %s5561_s21 }
  0x39   : > { %p5564_p10 = pnand %p5563_p9, %p5562_p8 }
  0x3a   : > { %p5569_p2 = por %p5568_p0, %p5567_p11 }
  0x3b   : > { %p5565_p13 = pneg %p5564_p10 }
  0x3d   : > { %p5570_p5 = pnand %p5569_p2, %p5565_p13 }
  0x3f   : > { %5573 = shalt.err (!%p5570_p5)
}
  0x40   : > { %s8644_s29 = smov 8   ;;  %s8645_s17 = smov 128  }
  0x41   : > { %5212 = dma.hbm_to_vmem [thread:$0]  (!%p5878_p7), %s468_s2, 1024, %s470_s12, %s458_s6, %s8645_s17, %s8645_s17, %s8644_s29  }
  0x42   : > { %481 = sbr.rel (%p5784_p3) target bundleno = 2051 (0x803), region = 68 }
  0x47   : > { %s5898_s19 = sand.u32 1, %s5659_s26  }
  0x48   : > { %s4566_s11 = sshll.u32 %s5898_s19, 6  ;;  %s484_s21 = scalar_lea.sflag [#allocation5], %s5898_s19 }
  0x49   : > { %s5904_s23 = scalar_lea.vmem [#allocation4], %s4566_s11 }
  0x4a   : > { %5634 = dma.done.wait (%p5857_p12), %s484_s21, 1024  }
  0x4b   : > { %5636 = vsyncadd (%p5857_p12), %s484_s21, 4294966272 }
  0x4c   : > { %5638 = dma.done.wait (%p54_p1), [#allocation8], 512  }
  0x4d   : > { %5640 = vsyncadd (%p54_p1), [#allocation8], 4294966784 }
  0x4e   : > { %5642 = dma.done.wait (%p54_p1), [#allocation11], 288  }
  0x4f   : > { %5644 = vsyncadd (%p54_p1), [#allocation11], 4294967008 }
  0x50   : > { %5646 = dma.done.wait (%p54_p1), [#allocation14], 6144  }
  0x51   : > { %5648 = vsyncadd (%p54_p1), [#allocation14], 4294961152  ;;  %v597_v0 = vlaneseq  ;;  %v8473_v1 = vmov 0.0   ;;  %v5945_v10 = vld [vmem:[%s5904_s23] sm:$0xff]  ;;  %v5948_v11 = vld [vmem:[%s5904_s23 + $0x8] sm:$0xff]  ;;  %s5682_s21 = smov 64  }
  0x52   : > { %581 = vst [vmem:[#allocation2] sm:$0xff] %v8473_v1  ;;  %v5951_v12 = vld [vmem:[%s5904_s23 + $0x10] sm:$0xff]  ;;  %v5958_v14 = vld [vmem:[#allocation7] ss:$0 sm:$0xff]  ;;  %v5962_v18 = vld [vmem:[#allocation7 + $0x1] ss:$0 sm:$0xff] }
  0x53   : > { %582 = vst [vmem:[#allocation2 + $0x8] sm:$0x1] %v8473_v1  ;;  %v5924_v2 = vshrl.u32 %v597_v0, 7  ;;  %v5980_v26 = vld [vmem:[#allocation7 + $0x2] ss:$0 sm:$0xff]  ;;  %v5999_v33 = vmul.f32 %v5962_v18, %v5945_v10  ;;  %v6003_v34 = vmul.f32 %v5962_v18, %v5948_v11  ;;  %v6027_v47 = vld [vmem:[%s5904_s23 + $0x18] sm:$0xff] }
  0x54   : > { %583 = vst [vmem:[#allocation2 + $0x49] sm:$0xff] %v8473_v1  ;;  %v5982_v27 = vld [vmem:[#allocation7 + $0x4] ss:$0 sm:$0xff]  ;;  %v5989_v29 = vld [vmem:[#allocation7 + $0x3] ss:$0 sm:$0xff]  ;;  %v6044_v54 = vld [vmem:[%s5904_s23 + $0x28] sm:$0xff] }
  0x55   : > { %8646 = vst [vmem:[#allocation23_spill] sm:$0xff] %v5924_v2  ;;  %v606_v3 = vand.u32 7, %v5924_v2  ;;  %v602_v4 = vadd.s32 32, %v5924_v2  ;;  %v5936_v7 = vadd.s32 16, %v5924_v2  ;;  %v5966_v19 = vadd.s32 8, %v5924_v2  ;;  %v6030_v48 = vld [vmem:[%s5904_s23 + $0x20] sm:$0xff] }
  0x56   : > { %584 = vst [vmem:[#allocation2 + $0x51] sm:$0x1] %v8473_v1  ;;  %v5969_v20 = vadd.s32 40, %v5924_v2  ;;  %v5973_v22 = vadd.s32 24, %v5924_v2  ;;  %v5991_v30 = vld [vmem:[#allocation7 + $0x5] ss:$0 sm:$0xff]  ;;  %v890_v42 = vmul.f32 %v5982_v27, %v5945_v10  ;;  %v6058_v59 = vmul.f32 %v5982_v27, %v5951_v12 }
  0x57   : > { %585 = vst [vmem:[#allocation3] sm:$0xff] %v8473_v1  ;;  %vm662_vm0 = vcmp.ge.s32.totalorder %v606_v3, 1  ;;  %vm686_vm1 = vcmp.le.s32.totalorder %v606_v3, 6  ;;  %v610_v5 = vand.u32 7, %v602_v4  ;;  %v608_v21 = vand.u32 7, %v5936_v7  ;;  %v6047_v55 = vld [vmem:[%s5904_s23 + $0x30] sm:$0xff] }
  0x58   : > { %588 = vst [vmem:[#allocation3 + $0x10] sm:$0x1] %v8473_v1  ;;  %v5933_v6 = vsel %vm662_vm0, 1.0, %v8473_v1  ;;  %v5939_v8 = vsel %vm686_vm1, 1.0, %v8473_v1  ;;  %v5993_v31 = vld [vmem:[#allocation7 + $0x6] ss:$0 sm:$0xff]  ;;  %v6062_v60 = vmul.f32 %v5982_v27, %v5948_v11  ;;  %v814_v3 = vmul.f32 %v5962_v18, %v6027_v47 }
  0x59   : > { %8647 = vst [vmem:[#allocation24_spill] sm:$0xff] %v5933_v6  ;;  %v5942_v9 = vmul.f32 0.0, %v5933_v6  ;;  %vm5953_vm2 = vcmp.ge.s32.totalorder %v610_v5, 1  ;;  %v5976_v23 = vmul.f32 0.0, %v5939_v8  ;;  %v6005_v36 = vld [vmem:[#allocation7 + $0x7] ss:$0 sm:$0xff]  ;;  %v6075_v4 = vmul.f32 %v5982_v27, %v6030_v48 }
  0x5a   : > { %8648 = vst [vmem:[#allocation25_spill] sm:$0xff] %v5939_v8  ;;  %v792_v15 = vld [vmem:[#allocation2 + $0x1] sm:$0xff]  ;;  %v5987_v28 = vsel %vm5953_vm2, 1.0, %v8473_v1  ;;  %v6017_v43 = vld [vmem:[#allocation7 + $0x8] ss:$0 sm:$0xff]  ;;  %vm690_vm3 = vcmp.le.s32.totalorder %v610_v5, 6  ;;  %v971_v58 = vmul.f32 %v6005_v36, %v5948_v11 }
  0x5b   : > { %8649 = vst [vmem:[#allocation26_spill] sm:$0xff] %v5942_v9  ;;  %v766_v16 = vmul.f32 0.0, %v5942_v9  ;;  %v800_v17 = vmul.f32 0.0, %v792_v15  ;;  %vm6032_vm4 = vcmp.ge.s32.totalorder %v608_v21, 1  ;;  %v6041_v53 = vsel %vm690_vm3, 1.0, %v8473_v1  ;;  %v6065_v61 = vld [vmem:[%s5904_s23 + $0x38] sm:$0xff] }
  0x5c   : > { %750 = vst [vmem:[#allocation2 + $0x9] sm:$0xff] %v5945_v10  ;;  %v6080_v5 = vsel %vm6032_vm4, 1.0, %v8473_v1  ;;  %vm688_vm5 = vcmp.le.s32.totalorder %v608_v21, 6  ;;  %v607_v7 = vand.u32 7, %v5966_v19  ;;  %s7790_s12 = scalar_lea.vmem [#allocation16], %s4566_s11  ;;  %s5143_s24 = sshll.u32 %s5779_s15, 6 }
  0x5d   : > { %751 = vst [vmem:[#allocation2 + $0x11] sm:$0xff] %v5948_v11  ;;  %v776_v24 = vmul.f32 %v5958_v14, %v766_v16  ;;  %v810_v25 = vmul.f32 %v5962_v18, %v800_v17  ;;  %v6084_v15 = vsel %vm688_vm5, 1.0, %v8473_v1  ;;  %s4395_s1 = sshll.u32 %s7790_s12, 4  ;;  %s4394_s29 = scalar_lea.hbm %s8470_s13, %s5143_s24  ;;  %s4396_s1 = int_to_ptr.vmem [resolvable:$true] %s4395_s1 }
  0x5e   : > { %752 = vst [vmem:[#allocation2 + $0x19] sm:$0xff] %v5951_v12  ;;  %vm663_vm6 = vcmp.ge.s32.totalorder %v607_v7, 1  ;;  %vm687_vm7 = vcmp.le.s32.totalorder %v607_v7, 6 }
  0x5f   : > { %8652 = vst [vmem:[#allocation27_spill] sm:$0xff] %v5976_v23  ;;  %v818_v38 = vadd.f32 %v810_v25, %v776_v24  ;;  %v6093_v24 = vmul.f32 %v6005_v36, %v6044_v54  ;;  %v6112_v49 = vsel %vm687_vm7, 1.0, %v8473_v1 }
  0x60   : > { %8653 = vst [vmem:[#allocation28_spill] sm:$0xff] %v5987_v28 }
  0x61   : > { %591 = vst [vmem:[#allocation3 + $0x90] sm:$0xfe] %v8473_v1 }
  0x62   : > { %594 = vst [vmem:[#allocation3 + $0xa0] sm:$0x3] %v8473_v1 }
  0x63   : > { %v5995_v32 = vld [vmem:[#allocation2 + $0x8] sm:$0xff]  ;;  %8654 = vst [vmem:[#allocation29_spill] sm:$0xff] %v6027_v47 }
  0x64   : > { %v826_v35 = vld [vmem:[#allocation2 + $0x2] sm:$0xff]  ;;  %v6008_v37 = vld [vmem:[#allocation2 + $0x10] sm:$0xff]  ;;  %v861_v41 = vmul.f32 %v5933_v6, %v5995_v32  ;;  %8657 = vst [vmem:[#allocation30_spill] sm:$0xff] %v6041_v53 }
  0x65   : > { %v6010_v39 = vld [vmem:[#allocation2 + $0xa] sm:$0xff]  ;;  %v834_v40 = vmul.f32 %v826_v35, %v5976_v23  ;;  %v934_v45 = vmul.f32 %v5933_v6, %v6008_v37  ;;  %v6024_v46 = vld [vmem:[#allocation2 + $0x12] sm:$0xff]  ;;  %753 = vst [vmem:[#allocation2 + $0x21] sm:$0xff] %v6027_v47  ;;  %v768_v16 = vmul.f32 %v6080_v5, %v6008_v37  ;;  %v6100_v35 = vmul.f32 %v6005_v36, %v6027_v47 }
  0x66   : > { %v907_v44 = vmul.f32 %v5939_v8, %v6010_v39  ;;  %v871_v51 = vmul.f32 %v5989_v29, %v861_v41  ;;  %v995_v52 = vmul.f32 %v5939_v8, %v6024_v46  ;;  %v6050_v56 = vld [vmem:[#allocation2 + $0x18] sm:$0xff]  ;;  %754 = vst [vmem:[#allocation2 + $0x29] sm:$0xff] %v6030_v48  ;;  %v836_v21 = vmul.f32 %v6084_v15, %v6024_v46 }
  0x67   : > { %v844_v50 = vmul.f32 %v5980_v26, %v834_v40  ;;  %8658 = vst [vmem:[#allocation31_spill] sm:$0xff] %v6065_v61  ;;  %v944_v63 = vmul.f32 %v5993_v31, %v934_v45  ;;  %v863_v17 = vmul.f32 %v6080_v5, %v6050_v56  ;;  %v778_v25 = vmul.f32 %v5958_v14, %v768_v16 }
  0x68   : > { %v917_v57 = vmul.f32 %v5991_v30, %v907_v44  ;;  %v1005_v0 = vmul.f32 %v6017_v43, %v995_v52  ;;  %755 = vst [vmem:[#allocation2 + $0x31] sm:$0xff] %v6044_v54  ;;  %v846_v44 = vmul.f32 %v5980_v26, %v836_v21 }
  0x69   : > { %v852_v62 = vadd.f32 %v844_v50, %v818_v38  ;;  %756 = vst [vmem:[#allocation2 + $0x39] sm:$0xff] %v6047_v55  ;;  %v6103_v38 = vsel %vm663_vm6, 1.0, %v8473_v1  ;;  %v873_v45 = vmul.f32 %v5989_v29, %v863_v17  ;;  %v820_v7 = vadd.f32 %v6003_v34, %v778_v25 }
  0x6a   : > { %8659 = vst [vmem:[#allocation32_spill] sm:$0xff] %v6080_v5 }
  0x6b   : > { %v879_v13 = vadd.f32 %v871_v51, %v852_v62  ;;  %8660 = vst [vmem:[#allocation33_spill] sm:$0xff] %v6084_v15  ;;  %v854_v23 = vadd.f32 %v846_v44, %v820_v7 }
  0x6c   : > { %757 = vst [vmem:[#allocation2 + $0x41] sm:$0xff] %v6065_v61  ;;  %v6105_v40 = vld [vmem:[#allocation2 + $0x20] sm:$0xff] }
  0x6d   : > { %v898_v19 = vadd.f32 %v890_v42, %v879_v13  ;;  %8661 = vst [vmem:[#allocation34_spill] sm:$0xff] %v6103_v38  ;;  %v6107_v41 = vld [vmem:[#allocation2 + $0x1a] sm:$0xff]  ;;  %v611_v42 = vand.u32 7, %v5969_v20  ;;  %v6115_v51 = vld [vmem:[#allocation2 + $0x28] sm:$0xff]  ;;  %v770_v52 = vmul.f32 %v5987_v28, %v6105_v40  ;;  %v767_v13 = vmul.f32 %v6103_v38, %v5995_v32 }
  0x6e   : > { %8662 = vst [vmem:[#allocation35_spill] sm:$0xff] %v6112_v49  ;;  %v6119_v62 = vld [vmem:[#allocation2 + $0x22] sm:$0xff]  ;;  %v909_v21 = vmul.f32 %v6084_v15, %v6107_v41  ;;  %v881_v2 = vadd.f32 %v873_v45, %v854_v23  ;;  %v6165_v23 = vld [vmem:[#allocation10 + $0x4] ss:$0 sm:$0xff] }
  0x6f   : > { %v925_v50 = vadd.f32 %v917_v57, %v898_v19  ;;  %v6124_v16 = vld [vmem:[#allocation2 + $0x30] sm:$0xff]  ;;  %v838_v20 = vmul.f32 %v6041_v53, %v6119_v62  ;;  %v865_v57 = vmul.f32 %v5987_v28, %v6115_v51  ;;  %v862_v19 = vmul.f32 %v6103_v38, %v6008_v37 }
  0x70   : > { %v6126_v17 = vld [vmem:[#allocation2 + $0x2a] sm:$0xff]  ;;  %v780_v25 = vmul.f32 %v5958_v14, %v770_v52  ;;  %v938_v1 = vmul.f32 %v5987_v28, %v6124_v16  ;;  %v6141_v6 = vld [vmem:[#allocation2 + $0x32] sm:$0xff]  ;;  %v936_v37 = vmul.f32 %v6080_v5, %v6105_v40  ;;  %v997_v28 = vmul.f32 %v6084_v15, %v6119_v62 }
  0x71   : > { %v952_v34 = vadd.f32 %v944_v63, %v925_v50  ;;  %v911_v32 = vmul.f32 %v6041_v53, %v6126_v17  ;;  %v848_v9 = vmul.f32 %v5980_v26, %v838_v20  ;;  %v999_v8 = vmul.f32 %v6041_v53, %v6141_v6  ;;  %v6148_v50 = vld [vmem:[#allocation10 + $0x2] ss:$0 sm:$0xff] }
  0x72   : > { %v822_v52 = vadd.f32 %v814_v3, %v780_v25  ;;  %v875_v61 = vmul.f32 %v5989_v29, %v865_v57  ;;  %v948_v20 = vmul.f32 %v5993_v31, %v938_v1  ;;  %v919_v53 = vmul.f32 %v5991_v30, %v909_v21 }
  0x73   : > { %v979_v63 = vadd.f32 %v971_v58, %v952_v34  ;;  %v921_v47 = vmul.f32 %v5991_v30, %v911_v32  ;;  %v1009_v5 = vmul.f32 %v6017_v43, %v999_v8  ;;  %v777_v58 = vmul.f32 %v5958_v14, %v767_v13 }
  0x74   : > { %v856_v7 = vadd.f32 %v848_v9, %v822_v52  ;;  %v900_v3 = vadd.f32 %v6058_v59, %v881_v2  ;;  %v946_v57 = vmul.f32 %v5993_v31, %v936_v37  ;;  %v835_v34 = vmul.f32 %v6112_v49, %v6010_v39 }
  0x75   : > { %v1013_v44 = vadd.f32 %v1005_v0, %v979_v63  ;;  %v908_v25 = vmul.f32 %v6112_v49, %v6024_v46  ;;  %v1007_v9 = vmul.f32 %v6017_v43, %v997_v28  ;;  %v819_v8 = vadd.f32 %v5999_v33, %v777_v58 }
  0x76   : > { %v883_v0 = vadd.f32 %v875_v61, %v856_v7  ;;  %v927_v45 = vadd.f32 %v919_v53, %v900_v3  ;;  %v845_v2 = vmul.f32 %v5980_v26, %v835_v34  ;;  %v872_v59 = vmul.f32 %v5989_v29, %v862_v19 }
  0x77   : > { %v1022_v1 = vadd.f32 %v6148_v50, %v1013_v44  ;;  %v935_v39 = vmul.f32 %v6103_v38, %v6050_v56  ;;  %v918_v21 = vmul.f32 %v5991_v30, %v908_v25  ;;  %vm667_vm8 = vcmp.ge.s32.totalorder %v611_v42, 1  ;;  %v6196_v25 = vld [vmem:[#allocation2 + $0x38] sm:$0xff] }
  0x78   : > { %v902_v46 = vadd.f32 %v6075_v4, %v883_v0  ;;  %v954_v61 = vadd.f32 %v946_v57, %v927_v45  ;;  %v853_v32 = vadd.f32 %v845_v2, %v819_v8  ;;  %v996_v28 = vmul.f32 %v6112_v49, %v6107_v41 }
  0x79   : > { %v1030_v13 = vsub.f32 %v1022_v1, %v5945_v10  ;;  %v8663_v33 = vmov 0.0   ;;  %vm691_vm9 = vcmp.le.s32.totalorder %v611_v42, 6  ;;  %v815_v7 = vmul.f32 %v5962_v18, %v6030_v48 }
  0x7a   : > { %v6179_v53 = vsel %vm667_vm8, 1.0, %v8663_v33  ;;  %v929_v37 = vadd.f32 %v921_v47, %v902_v46  ;;  %v981_v4 = vadd.f32 %v6100_v35, %v954_v61  ;;  %v880_v52 = vadd.f32 %v872_v59, %v853_v32  ;;  %v6211_v59 = vld [vmem:[#allocation2 + $0x3a] sm:$0xff] }
  0x7b   : > { %v1039_v19 = vmul.f32 %v6165_v23, %v1030_v13  ;;  %v771_v63 = vmul.f32 %v6179_v53, %v6115_v51  ;;  %v6186_v44 = vsel %vm691_vm9, 1.0, %v8663_v33  ;;  %v945_v57 = vmul.f32 %v5993_v31, %v935_v39 }
  0x7c   : > { %8664 = vst [vmem:[#allocation36_spill] sm:$0xff] %v6186_v44  ;;  %v956_v3 = vadd.f32 %v948_v20, %v929_v37  ;;  %v1015_v42 = vadd.f32 %v1007_v9, %v981_v4  ;;  %v899_v34 = vadd.f32 %v6062_v60, %v880_v52  ;;  %v839_v35 = vmul.f32 %v6186_v44, %v6126_v17 }
  0x7d   : > { %v6191_v58 = vadd.f32 %v1039_v19, %v5945_v10  ;;  %v781_v47 = vmul.f32 %v5958_v14, %v771_v63  ;;  %v866_v1 = vmul.f32 %v6179_v53, %v6124_v16  ;;  %v972_v20 = vmul.f32 %v6005_v36, %v5951_v12 }
  0x7e   : > { %v983_v10 = vadd.f32 %v6093_v24, %v956_v3  ;;  %v912_v9 = vmul.f32 %v6186_v44, %v6141_v6  ;;  %v1024_v60 = vadd.f32 %v6148_v50, %v1015_v42  ;;  %v926_v8 = vadd.f32 %v918_v21, %v899_v34 }
  0x7f   : > { %8665 = vst [vmem:[#allocation37_spill] sm:$0xff] %v6191_v58  ;;  %1055 = vadd.xlane.f32.xlu0 %v6191_v58  ;;  %v823_v0 = vadd.f32 %v815_v7, %v781_v47  ;;  %v849_v45 = vmul.f32 %v5980_v26, %v839_v35  ;;  %v876_v2 = vmul.f32 %v5989_v29, %v866_v1 }
  0x80   : > { %v1017_v39 = vadd.f32 %v1009_v5, %v983_v10  ;;  %v1006_v13 = vmul.f32 %v6017_v43, %v996_v28  ;;  %v939_v24 = vmul.f32 %v6179_v53, %v6196_v25  ;;  %v1032_v46 = vsub.f32 %v1024_v60, %v5951_v12 }
  0x81   : > { %v953_v61 = vadd.f32 %v945_v57, %v926_v8  ;;  %v857_v32 = vadd.f32 %v849_v45, %v823_v0  ;;  %v895_v19 = vmul.f32 %v5982_v27, %v6044_v54  ;;  %v922_v37 = vmul.f32 %v5991_v30, %v912_v9 }
  0x82   : > { %v1026_v21 = vadd.f32 %v6148_v50, %v1017_v39  ;;  %v1000_v63 = vmul.f32 %v6186_v44, %v6211_v59  ;;  %v609_v5 = vand.u32 7, %v5973_v22  ;;  %v1041_v28 = vmul.f32 %v6165_v23, %v1032_v46 }
  0x83   : > { %v980_v4 = vadd.f32 %v972_v20, %v953_v61  ;;  %v884_v52 = vadd.f32 %v876_v2, %v857_v32  ;;  %v949_v7 = vmul.f32 %v5993_v31, %v939_v24  ;;  %v813_v57 = vmul.f32 %v5962_v18, %v5951_v12 }
  0x84   : > { %v1034_v3 = vsub.f32 %v1026_v21, %v6030_v48  ;;  %vm665_vm10 = vcmp.ge.s32.totalorder %v609_v5, 1  ;;  %vm689_vm11 = vcmp.le.s32.totalorder %v609_v5, 6  ;;  %v6230_v47 = vadd.f32 %v1041_v28, %v5951_v12 }
  0x85   : > { %v1014_v42 = vadd.f32 %v1006_v13, %v980_v4  ;;  %v903_v34 = vadd.f32 %v895_v19, %v884_v52  ;;  %v6233_v22 = vsel %vm665_vm10, 1.0, %v8663_v33  ;;  %v6237_v1 = vsel %vm689_vm11, 1.0, %v8663_v33  ;;  %v8670_v19 = vld [vmem:[#allocation23_spill] sm:$0xff] }
  0x86   : > { %8666 = vst [vmem:[#allocation38_spill] sm:$0xff] %v6230_v47  ;;  %v1043_v35 = vmul.f32 %v6165_v23, %v1034_v3  ;;  %v769_v10 = vmul.f32 %v6233_v22, %v6050_v56  ;;  %v864_v20 = vmul.f32 %v6233_v22, %v6105_v40  ;;  %1059 = vadd.xlane.f32.xlu1 %v6230_v47  ;;  %v604_v21 = vadd.s32 48, %v8670_v19 }
  0x87   : > { %8667 = vst [vmem:[#allocation39_spill] sm:$0xff] %v6233_v22  ;;  %v1023_v12 = vadd.f32 %v6148_v50, %v1014_v42  ;;  %v930_v0 = vadd.f32 %v922_v37, %v903_v34  ;;  %v976_v9 = vmul.f32 %v6005_v36, %v6047_v55  ;;  %v837_v60 = vmul.f32 %v6237_v1, %v6107_v41 }
  0x88   : > { %8668 = vst [vmem:[#allocation40_spill] sm:$0xff] %v6237_v1  ;;  %v6250_v8 = vadd.f32 %v1043_v35, %v6030_v48  ;;  %v779_v45 = vmul.f32 %v5958_v14, %v769_v10  ;;  %v1010_v40 = vmul.f32 %v6017_v43, %v1000_v63  ;;  %v874_v24 = vmul.f32 %v5989_v29, %v864_v20  ;;  %v8671_v63 = vld [vmem:[#allocation29_spill] sm:$0xff] }
  0x89   : > { %v1031_v56 = vsub.f32 %v1023_v12, %v5948_v11  ;;  %v957_v2 = vadd.f32 %v949_v7, %v930_v0  ;;  %v847_v39 = vmul.f32 %v5980_v26, %v837_v60  ;;  %v910_v41 = vmul.f32 %v6237_v1, %v6119_v62 }
  0x8a   : > { %8669 = vst [vmem:[#allocation41_spill] sm:$0xff] %v6250_v8  ;;  %1063 = vadd.xlane.f32.xlu2 %v6250_v8  ;;  %v821_v13 = vadd.f32 %v813_v57, %v779_v45  ;;  %v937_v32 = vmul.f32 %v6233_v22, %v6115_v51  ;;  %v893_v5 = vmul.f32 %v5982_v27, %v8671_v63  ;;  %v612_v52 = vand.u32 7, %v604_v21  ;;  %v993_v21 = vld [vmem:[#allocation2 + $0x42] sm:$0xff] }
  0x8b   : > { %v1040_v46 = vmul.f32 %v6165_v23, %v1031_v56  ;;  %v984_v61 = vadd.f32 %v976_v9, %v957_v2  ;;  %v816_v62 = vmul.f32 %v5962_v18, %v6044_v54  ;;  %v920_v3 = vmul.f32 %v5991_v30, %v910_v41 }
  0x8c   : > { %v855_v37 = vadd.f32 %v847_v39, %v821_v13  ;;  %v947_v57 = vmul.f32 %v5993_v31, %v937_v32  ;;  %vm668_vm12 = vcmp.ge.s32.totalorder %v612_v52, 1  ;;  %vm692_vm13 = vcmp.le.s32.totalorder %v612_v52, 6 }
  0x8d   : > { %v6267_v28 = vadd.f32 %v1040_v46, %v5948_v11  ;;  %v1018_v4 = vadd.f32 %v1010_v40, %v984_v61  ;;  %v998_v11 = vmul.f32 %v6237_v1, %v6126_v17  ;;  %v6278_v34 = vsel %vm668_vm12, 1.0, %v8663_v33 }
  0x8e   : > { %v882_v7 = vadd.f32 %v874_v24, %v855_v37  ;;  %8673 = vst [vmem:[#allocation29_spill] sm:$0xff] %v6278_v34  ;;  %v6281_v35 = vsel %vm692_vm13, 1.0, %v8663_v33  ;;  %v772_v20 = vmul.f32 %v6278_v34, %v6124_v16  ;;  %v867_v0 = vmul.f32 %v6278_v34, %v6196_v25  ;;  %v860_v16 = vld [vmem:[#allocation2 + $0x40] sm:$0xff] }
  0x8f   : > { %8672 = vst [vmem:[#allocation23_spill] sm:$0xff] %v6267_v28  ;;  %1057 = vadd.xlane.f32.xlu0 %v6267_v28  ;;  %v1027_v51 = vadd.f32 %v6148_v50, %v1018_v4  ;;  %v840_v12 = vmul.f32 %v6281_v35, %v6141_v6  ;;  %v974_v17 = vmul.f32 %v6005_v36, %v6030_v48 }
  0x90   : > { %v901_v42 = vadd.f32 %v893_v5, %v882_v7  ;;  %8674 = vst [vmem:[#allocation42_spill] sm:$0xff] %v6281_v35  ;;  %v782_v45 = vmul.f32 %v5958_v14, %v772_v20  ;;  %v1008_v40 = vmul.f32 %v6017_v43, %v998_v11  ;;  %v877_v13 = vmul.f32 %v5989_v29, %v867_v0 }
  0x91   : > { %v1035_v10 = vsub.f32 %v1027_v51, %v6044_v54  ;;  %v850_v56 = vmul.f32 %v5980_v26, %v840_v12  ;;  %v913_v24 = vmul.f32 %v6281_v35, %v6211_v59  ;;  %v896_v46 = vmul.f32 %v5982_v27, %v6047_v55  ;;  %v8676_v51 = vld [vmem:[#allocation31_spill] sm:$0xff] }
  0x92   : > { %v928_v9 = vadd.f32 %v920_v3, %v901_v42  ;;  %v824_v6 = vadd.f32 %v816_v62, %v782_v45  ;;  %v940_v61 = vmul.f32 %v6278_v34, %v860_v16  ;;  %v1001_v62 = vmul.f32 %v6281_v35, %v993_v21 }
  0x93   : > { %v1044_v60 = vmul.f32 %v6165_v23, %v1035_v10 }
  0x94   : > { %v955_v2 = vadd.f32 %v947_v57, %v928_v9  ;;  %v858_v41 = vadd.f32 %v850_v56, %v824_v6  ;;  %v950_v52 = vmul.f32 %v5993_v31, %v940_v61  ;;  %v977_v57 = vmul.f32 %v6005_v36, %v8676_v51 }
  0x95   : > { %v6297_v39 = vadd.f32 %v1044_v60, %v6044_v54  ;;  %v923_v54 = vmul.f32 %v5991_v30, %v913_v24  ;;  %v1011_v10 = vmul.f32 %v6017_v43, %v1001_v62  ;;  %v5680_v56 = vmov 128.0  }
  0x96   : > { %v982_v48 = vadd.f32 %v974_v17, %v955_v2  ;;  %v885_v37 = vadd.f32 %v877_v13, %v858_v41  ;;  %5308 = vrcp.f32 %v5680_v56  ;;  %v817_v24 = vmul.f32 %v5962_v18, %v6047_v55 }
  0x97   : > { %8675 = vst [vmem:[#allocation43_spill] sm:$0xff] %v6297_v39  ;;  %1065 = vadd.xlane.f32.xlu2 %v6297_v39  ;;  %v897_v18 = vmul.f32 %v5982_v27, %v8676_v51 }
  0x98   : > { %v1016_v32 = vadd.f32 %v1008_v40, %v982_v48  ;;  %v904_v4 = vadd.f32 %v896_v46, %v885_v37 }
  0x9a   : > { %v1025_v5 = vadd.f32 %v6148_v50, %v1016_v32  ;;  %v931_v3 = vadd.f32 %v923_v54, %v904_v4 }
  0x9c   : > { %v1033_v7 = vsub.f32 %v1025_v5, %v8671_v63  ;;  %v958_v11 = vadd.f32 %v950_v52, %v931_v3  ;;  %v5309_v2 = vpop.eup %5308  ;;  %v933_v52 = vld [vmem:[#allocation2 + $0x48] sm:$0xff] }
  0x9d   : > { %v1072_v6 = vmul.f32 128.0, %v5309_v2  ;;  %vm1076_vm0 = vweird.f32 %v5309_v2  ;;  %v994_v3 = vld [vmem:[#allocation2 + $0x4a] sm:$0xff] }
  0x9e   : > { %v1042_v42 = vmul.f32 %v6165_v23, %v1033_v7  ;;  %v985_v12 = vadd.f32 %v977_v57, %v958_v11 }
  0x9f   : > { %v1073_v46 = vsub.f32 1.0, %v1072_v6 }
  0xa0   : > { %v6316_v20 = vadd.f32 %v1042_v42, %v8671_v63  ;;  %v1019_v0 = vadd.f32 %v1011_v10, %v985_v12  ;;  %v605_v63 = vadd.s32 56, %v8670_v19 }
  0xa2   : > { %8677 = vst [vmem:[#allocation31_spill] sm:$0xff] %v6316_v20  ;;  %1061 = vadd.xlane.f32.xlu1 %v6316_v20  ;;  %v1028_v9 = vadd.f32 %v6148_v50, %v1019_v0  ;;  %v613_v40 = vand.u32 7, %v605_v63 }
  0xa4   : > { %v1036_v17 = vsub.f32 %v1028_v9, %v6047_v55  ;;  %vm669_vm14 = vcmp.ge.s32.totalorder %v613_v40, 1  ;;  %vm693_vm15 = vcmp.le.s32.totalorder %v613_v40, 6 }
  0xa5   : > { %v6328_v13 = vsel %vm669_vm14, 1.0, %v8663_v33  ;;  %v6335_v41 = vsel %vm693_vm15, 1.0, %v8663_v33 }
  0xa6   : > { %v1045_v60 = vmul.f32 %v6165_v23, %v1036_v17  ;;  %8679 = vst [vmem:[#allocation45_spill] sm:$0xff] %v6328_v13  ;;  %v773_v48 = vmul.f32 %v6328_v13, %v6196_v25  ;;  %v841_v61 = vmul.f32 %v6335_v41, %v6211_v59  ;;  %v868_v54 = vmul.f32 %v6328_v13, %v860_v16 }
  0xa7   : > { %8680 = vst [vmem:[#allocation46_spill] sm:$0xff] %v6335_v41  ;;  %v6346_v33 = vmul.f32 0.0, %v6328_v13  ;;  %v6352_v27 = vmul.f32 0.0, %v6335_v41 }
  0xa8   : > { %v6323_v45 = vadd.f32 %v1045_v60, %v6047_v55  ;;  %v783_v19 = vmul.f32 %v5958_v14, %v773_v48  ;;  %v851_v37 = vmul.f32 %v5980_v26, %v841_v61  ;;  %v1074_v55 = vmul.f32 %v5309_v2, %v1073_v46 }
  0xa9   : > { %v878_v25 = vmul.f32 %v5989_v29, %v868_v54  ;;  %8681 = vst [vmem:[#allocation47_spill] sm:$0xff] %v6346_v33  ;;  %v914_v14 = vmul.f32 %v6335_v41, %v993_v21  ;;  %v941_v16 = vmul.f32 %v933_v52, %v6346_v33  ;;  %v978_v21 = vmul.f32 0.0, %v6005_v36 }
  0xaa   : > { %8678 = vst [vmem:[#allocation44_spill] sm:$0xff] %v6323_v45  ;;  %1067 = vadd.xlane.f32.xlu2 %v6323_v45  ;;  %v825_v32 = vadd.f32 %v817_v24, %v783_v19  ;;  %v1075_v59 = vadd.f32 %v5309_v2, %v1074_v55  ;;  %v1002_v11 = vmul.f32 %v994_v3, %v6352_v27  ;;  %v4652_v3 = vld [vmem:[%s8462_s5 + $0x78] sm:$0xf0] }
  0xab   : > { %v924_v26 = vmul.f32 %v5991_v30, %v914_v14  ;;  %8682 = vst [vmem:[#allocation48_spill] sm:$0xff] %v6352_v27  ;;  %v951_v29 = vmul.f32 %v5993_v31, %v941_v16  ;;  %v5054_v16 = vld [vmem:[%s8462_s5 + $0x74] sm:$0xf0] }
  0xac   : > { %v859_v5 = vadd.f32 %v851_v37, %v825_v32  ;;  %v6355_v57 = vsel %vm1076_vm0, %v5309_v2, %v1075_v59  ;;  %v1012_v30 = vmul.f32 %v6017_v43, %v1002_v11 }
  0xae   : > { %v886_v4 = vadd.f32 %v878_v25, %v859_v5 }
  0xb0   : > { %v905_v62 = vadd.f32 %v897_v18, %v886_v4 }
  0xb2   : > { %v932_v7 = vadd.f32 %v924_v26, %v905_v62  ;;  %v4650_v26 = vld [vmem:[%s8462_s5 + $0x70] sm:$0xf] }
  0xb4   : > { %v959_v42 = vadd.f32 %v951_v29, %v932_v7  ;;  %v5053_v7 = vld [vmem:[%s8462_s5 + $0x74] sm:$0xf]  ;;  %v4651_v29 = vor.u32 %v5054_v16, %v4650_v26 }
  0xb6   : > { %v986_v12 = vadd.f32 %v978_v21, %v959_v42  ;;  %v4655_v42 = vor.u32 %v5053_v7, %v4652_v3  ;;  %1340 = vmatpush.bf16.msra.mxu0 %v4651_v29  ;;  %5144 = vmatpush.bf16.msra.mxu3 %v4651_v29  ;;  %v4618_v29 = vld [vmem:[%s8462_s5 + $0x30] sm:$0xf]  ;;  %v5046_v3 = vld [vmem:[%s8462_s5 + $0x34] sm:$0xf0] }
  0xb8   : > { %v1020_v9 = vadd.f32 %v1012_v30, %v986_v12  ;;  %1369 = vmatpush.bf16.msra.mxu1 %v4655_v42  ;;  %v4642_v12 = vld [vmem:[%s8462_s5 + $0x60] sm:$0xf]  ;;  %v5052_v30 = vld [vmem:[%s8462_s5 + $0x64] sm:$0xf0] }
  0xba   : > { %v1029_v31 = vadd.f32 %v6148_v50, %v1020_v9  ;;  %v4643_v9 = vor.u32 %v5052_v30, %v4642_v12  ;;  %v4620_v12 = vld [vmem:[%s8462_s5 + $0x38] sm:$0xf0] }
  0xbc   : > { %v1037_v56 = vsub.f32 %v1029_v31, %v8676_v51  ;;  %v4644_v31 = vld [vmem:[%s8462_s5 + $0x68] sm:$0xf0]  ;;  %1341 = vmatpush.bf16.msra.mxu0 %v4643_v9  ;;  %5145 = vmatpush.bf16.msra.mxu3 %v4643_v9 }
  0xbe   : > { %v1046_v36 = vmul.f32 %v6165_v23, %v1037_v56 }
  0xc0   : > { %v6370_v63 = vadd.f32 %v1046_v36, %v8676_v51 }
  0xc2   : > { %8683 = vst [vmem:[#allocation49_spill] sm:$0xff] %v6370_v63 }
  0xf2   : > { %v1056_v10 = vpop.xlane.xlu0 %1055 }
  0xf3   : > { %v1078_v0 = vmul.f32 %v6355_v57, %v1056_v10 }
  0xf5   : > { %v6362_v17 = vsub.f32 %v6191_v58, %v1078_v0  ;;  %v5051_v0 = vld [vmem:[%s8462_s5 + $0x64] sm:$0xf] }
  0xf6   : > { %v4647_v56 = vor.u32 %v5051_v0, %v4644_v31  ;;  %v4610_v31 = vld [vmem:[%s8462_s5 + $0x20] sm:$0xf] }
  0xf7   : > { %v1094_v60 = vmul.f32 %v6362_v17, %v6362_v17 }
  0xf8   : > { %1370 = vmatpush.bf16.msra.mxu1 %v4647_v56  ;;  %v5043_v56 = vld [vmem:[%s8462_s5 + $0x24] sm:$0xf] }
  0xf9   : > { %1102 = vadd.xlane.f32.xlu0 %v1094_v60  ;;  %v1060_v24 = vpop.xlane.xlu1 %1059 }
  0xfa   : > { %v1080_v23 = vmul.f32 %v6355_v57, %v1060_v24 }
  0xfc   : > { %v6387_v19 = vsub.f32 %v6230_v47, %v1080_v23  ;;  %v4636_v23 = vld [vmem:[%s8462_s5 + $0x58] sm:$0xf0] }
  0xfd   : > { %v1064_v43 = vpop.xlane.xlu2 %1063 }
  0xfe   : > { %v1082_v2 = vmul.f32 %v6355_v57, %v1064_v43  ;;  %v1096_v37 = vmul.f32 %v6387_v19, %v6387_v19  ;;  %v4634_v43 = vld [vmem:[%s8462_s5 + $0x50] sm:$0xf] }
 0x100   : > { %v6374_v40 = vsub.f32 %v6250_v8, %v1082_v2  ;;  %v5050_v2 = vld [vmem:[%s8462_s5 + $0x54] sm:$0xf0] }
 0x101   : > { %1069 = vadd.xlane.f32.xlu0 %v6370_v63 }
 0x102   : > { %v1058_v50 = vpop.xlane.xlu0 %1057  ;;  %v1098_v48 = vmul.f32 %v6374_v40, %v6374_v40 }
 0x103   : > { %v1079_v6 = vmul.f32 %v6355_v57, %v1058_v50  ;;  %v5049_v50 = vld [vmem:[%s8462_s5 + $0x54] sm:$0xf] }
 0x105   : > { %v6382_v51 = vsub.f32 %v6267_v28, %v1079_v6 }
 0x107   : > { %v1095_v46 = vmul.f32 %v6382_v51, %v6382_v51 }
 0x109   : > { %1110 = vadd.xlane.f32.xlu0 %v1098_v48  ;;  %1104 = vadd.xlane.f32.xlu1 %v1095_v46  ;;  %v4635_v48 = vor.u32 %v5050_v2, %v4634_v43  ;;  %v4612_v43 = vld [vmem:[%s8462_s5 + $0x28] sm:$0xf0] }
 0x10a   : > { %v1066_v61 = vpop.xlane.xlu2 %1065 }
 0x10b   : > { %v1083_v32 = vmul.f32 %v6355_v57, %v1066_v61  ;;  %v4639_v61 = vor.u32 %v5049_v50, %v4636_v23  ;;  %1342 = vmatpush.bf16.msra.mxu0 %v4635_v48  ;;  %5146 = vmatpush.bf16.msra.mxu3 %v4635_v48  ;;  %v4615_v50 = vor.u32 %v5043_v56, %v4612_v43 }
 0x10d   : > { %v6393_v54 = vsub.f32 %v6297_v39, %v1083_v32  ;;  %1371 = vmatpush.bf16.msra.mxu1 %v4639_v61  ;;  %v5042_v61 = vld [vmem:[%s8462_s5 + $0x14] sm:$0xf0] }
 0x10f   : > { %v1099_v55 = vmul.f32 %v6393_v54, %v6393_v54 }
 0x111   : > { %1106 = vadd.xlane.f32.xlu1 %v1096_v37  ;;  %v4626_v37 = vld [vmem:[%s8462_s5 + $0x40] sm:$0xf] }
 0x115   : > { %v1062_v18 = vpop.xlane.xlu1 %1061 }
 0x116   : > { %v1081_v5 = vmul.f32 %v6355_v57, %v1062_v18  ;;  %v5048_v18 = vld [vmem:[%s8462_s5 + $0x44] sm:$0xf0] }
 0x118   : > { %v6399_v25 = vsub.f32 %v6316_v20, %v1081_v5  ;;  %v4627_v5 = vor.u32 %v5048_v18, %v4626_v37 }
 0x119   : > { %1112 = vadd.xlane.f32.xlu1 %v1099_v55  ;;  %v5047_v55 = vld [vmem:[%s8462_s5 + $0x44] sm:$0xf] }
 0x11a   : > { %v1097_v4 = vmul.f32 %v6399_v25, %v6399_v25  ;;  %1343 = vmatpush.bf16.msra.mxu0 %v4627_v5  ;;  %5147 = vmatpush.bf16.msra.mxu3 %v4627_v5 }
 0x11c   : > { %1108 = vadd.xlane.f32.xlu2 %v1097_v4  ;;  %v4628_v4 = vld [vmem:[%s8462_s5 + $0x48] sm:$0xf0] }
 0x11d   : > { %v1068_v14 = vpop.xlane.xlu2 %1067 }
 0x11e   : > { %v1084_v52 = vmul.f32 %v6355_v57, %v1068_v14 }
 0x120   : > { %v6405_v59 = vsub.f32 %v6323_v45, %v1084_v52 }
 0x122   : > { %v1100_v62 = vmul.f32 %v6405_v59, %v6405_v59 }
 0x124   : > { %1114 = vadd.xlane.f32.xlu2 %v1100_v62  ;;  %v4631_v62 = vor.u32 %v5047_v55, %v4628_v4  ;;  %v4604_v55 = vld [vmem:[%s8462_s5 + $0x18] sm:$0xf0] }
 0x126   : > { %1372 = vmatpush.bf16.msra.mxu1 %v4631_v62 }
 0x16c   : > { %v1103_v21 = vpop.xlane.xlu0 %1102 }
 0x16d   : > { %v1118_v11 = vmul.f32 %v1103_v21, %v6355_v57  ;;  %v4619_v21 = vor.u32 %v5046_v3, %v4618_v29 }
 0x16f   : > { %v6422_v10 = vadd.f32 1e-06, %v1118_v11  ;;  %v5045_v11 = vld [vmem:[%s8462_s5 + $0x34] sm:$0xf]  ;;  %1344 = vmatpush.bf16.msra.mxu0 %v4619_v21  ;;  %5148 = vmatpush.bf16.msra.mxu3 %v4619_v21 }
 0x170   : > { %v4623_v9 = vor.u32 %v5045_v11, %v4620_v12  ;;  %v4596_v11 = vld [vmem:[%s8462_s5 + $0x8] sm:$0xf0] }
 0x171   : > { %5310 = vrsqrt.f32 %v6422_v10  ;;  %vm1140_vm2 = vweird.f32 %v6422_v10 }
 0x172   : > { %1373 = vmatpush.bf16.msra.mxu1 %v4623_v9 }
 0x174   : > { %v1070_v60 = vpop.xlane.xlu0 %1069 }
 0x175   : > { %v1085_v36 = vmul.f32 %v6355_v57, %v1070_v60  ;;  %v5044_v60 = vld [vmem:[%s8462_s5 + $0x24] sm:$0xf0] }
 0x176   : > { %1374 = vmatpush.bf16.msra.mxu1 %v4615_v50 }
 0x177   : > { %v6447_v6 = vpop.eup %5310  ;;  %v6450_v24 = vsub.f32 %v6370_v63, %v1085_v36  ;;  %v4611_v36 = vor.u32 %v5044_v60, %v4610_v31 }
 0x178   : > { %v1135_v46 = vmul.f32 %v6447_v6, %v6422_v10  ;;  %vm1141_vm1 = vweird.f32 %v6447_v6  ;;  %v5039_v10 = vld [vmem:[%s8462_s5 + $0x4] sm:$0xf] }
 0x179   : > { %v1101_v32 = vmul.f32 %v6450_v24, %v6450_v24  ;;  %1345 = vmatpush.bf16.msra.mxu0 %v4611_v36  ;;  %5149 = vmatpush.bf16.msra.mxu3 %v4611_v36  ;;  %vm6530_vm3 = vmor %vm1140_vm2, %vm1141_vm1 }
 0x17a   : > { %v1136_v14 = vmul.f32 %v6447_v6, %v1135_v46  ;;  %v4602_v46 = vld [vmem:[%s8462_s5 + $0x10] sm:$0xf] }
 0x17b   : > { %1116 = vadd.xlane.f32.xlu0 %v1101_v32  ;;  %v5041_v32 = vld [vmem:[%s8462_s5 + $0x14] sm:$0xf]  ;;  %v4603_v18 = vor.u32 %v5042_v61, %v4602_v46 }
 0x17c   : > { %v1111_v52 = vpop.xlane.xlu0 %1110  ;;  %v1105_v26 = vpop.xlane.xlu1 %1104  ;;  %v1137_v30 = vmul.f32 0.5, %v1136_v14 }
 0x17d   : > { %v1122_v16 = vmul.f32 %v1111_v52, %v6355_v57  ;;  %v1119_v7 = vmul.f32 %v1105_v26, %v6355_v57  ;;  %v4607_v52 = vor.u32 %v5041_v32, %v4604_v55  ;;  %1346 = vmatpush.bf16.msra.mxu0 %v4603_v18  ;;  %5150 = vmatpush.bf16.msra.mxu3 %v4603_v18 }
 0x17e   : > { %v1138_v2 = vsub.f32 1.5, %v1137_v30  ;;  %v4599_v30 = vor.u32 %v5039_v10, %v4596_v11 }
 0x17f   : > { %v6480_v42 = vadd.f32 1e-06, %v1122_v16  ;;  %v1127_v0 = vadd.f32 1e-06, %v1119_v7  ;;  %1375 = vmatpush.bf16.msra.mxu1 %v4607_v52  ;;  %v4594_v16 = vld [vmem:[%s8462_s5] sm:$0xf] }
 0x180   : > { %v1139_v4 = vmul.f32 %v6447_v6, %v1138_v2  ;;  %v5040_v7 = vld [vmem:[%s8462_s5 + $0x4] sm:$0xf0] }
 0x181   : > { %5312 = vrsqrt.f32 %v6480_v42  ;;  %v4595_v21 = vor.u32 %v5040_v7, %v4594_v16  ;;  %vm1150_vm4 = vweird.f32 %v1127_v0  ;;  %vm1180_vm7 = vweird.f32 %v6480_v42 }
 0x182   : > { %5314 = vrsqrt.f32 %v1127_v0  ;;  %v1143_v12 = vsel %vm6530_vm3, %v6447_v6, %v1139_v4  ;;  %v6546_v6 = vld [vmem:[#allocation10] ss:$0 sm:$0xff] }
 0x183   : > { %1347 = vmatpush.bf16.msra.mxu0 %v4595_v21  ;;  %5151 = vmatpush.bf16.msra.mxu3 %v4595_v21  ;;  %v1214_v2 = vmul.f32 %v1143_v12, %v6362_v17  ;;  %v6552_v17 = vld [vmem:[#allocation10 + $0x1] ss:$0 sm:$0xff] }
 0x184   : > { %v1107_v48 = vpop.xlane.xlu1 %1106  ;;  %1376 = vmatpush.bf16.msra.mxu1 %v4599_v30 }
 0x185   : > { %v1120_v23 = vmul.f32 %v1107_v48, %v6355_v57  ;;  %v1223_v52 = vmul.f32 %v6546_v6, %v1214_v2 }
 0x187   : > { %v6511_v37 = vpop.eup %5312  ;;  %v6518_v14 = vadd.f32 1e-06, %v1120_v23 }
 0x188   : > { %v5315_v5 = vpop.eup %5314  ;;  %v1175_v26 = vmul.f32 %v6511_v37, %v6480_v42  ;;  %vm1181_vm8 = vweird.f32 %v6511_v37 }
 0x189   : > { %v1145_v62 = vmul.f32 %v5315_v5, %v1127_v0  ;;  %5316 = vrsqrt.f32 %v6518_v14  ;;  %vm1151_vm5 = vweird.f32 %v5315_v5  ;;  %vm1160_vm9 = vweird.f32 %v6518_v14  ;;  %vm6561_vm11 = vmor %vm1180_vm7, %vm1181_vm8 }
 0x18a   : > { %v1176_v31 = vmul.f32 %v6511_v37, %v1175_v26  ;;  %vm1152_vm6 = vmor %vm1150_vm4, %vm1151_vm5 }
 0x18b   : > { %v1146_v3 = vmul.f32 %v5315_v5, %v1145_v62 }
 0x18c   : > { %v1113_v60 = vpop.xlane.xlu1 %1112  ;;  %v1177_v61 = vmul.f32 0.5, %v1176_v31 }
 0x18d   : > { %v1147_v9 = vmul.f32 0.5, %v1146_v3  ;;  %v1123_v56 = vmul.f32 %v1113_v60, %v6355_v57 }
 0x18e   : > { %v1178_v26 = vsub.f32 1.5, %v1177_v61 }
 0x18f   : > { %v1148_v36 = vsub.f32 1.5, %v1147_v9  ;;  %v5317_v43 = vpop.eup %5316  ;;  %v1109_v50 = vpop.xlane.xlu2 %1108  ;;  %v1131_v48 = vadd.f32 1e-06, %v1123_v56 }
 0x190   : > { %v1121_v0 = vmul.f32 %v1109_v50, %v6355_v57  ;;  %v1155_v46 = vmul.f32 %v5317_v43, %v6518_v14  ;;  %vm1161_vm10 = vweird.f32 %v5317_v43  ;;  %v1179_v3 = vmul.f32 %v6511_v37, %v1178_v26 }
 0x191   : > { %v1149_v23 = vmul.f32 %v5315_v5, %v1148_v36  ;;  %5318 = vrsqrt.f32 %v1131_v48  ;;  %vm6567_vm12 = vmor %vm1160_vm9, %vm1161_vm10  ;;  %vm1190_vm13 = vweird.f32 %v1131_v48  ;;  %vm586_vm10 = vcmask 523264  }
 0x192   : > { %v1129_v18 = vadd.f32 1e-06, %v1121_v0  ;;  %v1156_v55 = vmul.f32 %v5317_v43, %v1155_v46  ;;  %v1183_v31 = vsel %vm6561_vm11, %v6511_v37, %v1179_v3  ;;  %vm1414_vm11 = vcmask 1040384  }
 0x193   : > { %v1153_v32 = vsel %vm1152_vm6, %v5315_v5, %v1149_v23  ;;  %v1218_v23 = vmul.f32 %v1183_v31, %v6374_v40  ;;  %vm592_vm6 = vcmask 523265  }
 0x194   : > { %v1215_v4 = vmul.f32 %v1153_v32, %v6382_v51  ;;  %5320 = vrsqrt.f32 %v1129_v18  ;;  %v1157_v62 = vmul.f32 0.5, %v1156_v55  ;;  %v1232_v51 = vadd.f32 %v6552_v17, %v1223_v52 }
 0x195   : > { %vm1170_vm15 = vweird.f32 %v1129_v18  ;;  %v1227_v55 = vmul.f32 %v6546_v6, %v1218_v23 }
 0x196   : > { %v1224_v16 = vmul.f32 %v6546_v6, %v1215_v4  ;;  %v1158_v7 = vsub.f32 1.5, %v1157_v62 }
 0x197   : > { %v5319_v29 = vpop.eup %5318  ;;  %v1236_v40 = vadd.f32 %v6552_v17, %v1227_v55 }
 0x198   : > { %v1233_v5 = vadd.f32 %v6552_v17, %v1224_v16  ;;  %v1185_v21 = vmul.f32 %v5319_v29, %v1131_v48  ;;  %v1159_v10 = vmul.f32 %v5317_v43, %v1158_v7  ;;  %vm1191_vm14 = vweird.f32 %v5319_v29 }
 0x199   : > { %vm1192_vm1 = vmor %vm1190_vm13, %vm1191_vm14  ;;  %vm1648_vm13 = vcmask 1046528   ;;  %vm1813_vm14 = vcmask 1045504  }
 0x19a   : > { %v6565_v12 = vpack.c.bf16 %v1233_v5, %v1232_v51  ;;  %v5321_v42 = vpop.eup %5320  ;;  %v1186_v14 = vmul.f32 %v5319_v29, %v1185_v21  ;;  %v1163_v36 = vsel %vm6567_vm12, %v5317_v43, %v1159_v10  ;;  %vm1727_vm12 = vcmask 1041408  }
 0x19b   : > { %v1165_v9 = vmul.f32 %v5321_v42, %v1129_v18  ;;  %vm1171_vm0 = vweird.f32 %v5321_v42  ;;  %v1216_v0 = vmul.f32 %v1163_v36, %v6387_v19  ;;  %v6592_v36 = vld [vmem:[#allocation2] sm:$0xff] }
 0x19c   : > { %1348 = vmatmul.bf16.vlgmr.msra.gmra.mxu0 %v6565_v12  ;;  %1377 = vmatmul.bf16.vlgmr.msra.gmra.mxu1 %v6565_v12  ;;  %v1187_v60 = vmul.f32 0.5, %v1186_v14  ;;  %vm1172_vm2 = vmor %vm1170_vm15, %vm1171_vm0  ;;  %593 = vst.msk [vmem:[#allocation3 + $0x98] sm:$0xfe] %vm592_vm6, %v6592_v36  ;;  %vm589_vm15 = vcmask 516096   ;;  %vm595_vm0 = vcmask 517120  }
 0x19d   : > { %v1166_v56 = vmul.f32 %v5321_v42, %v1165_v9  ;;  %v1225_v43 = vmul.f32 %v6546_v6, %v1216_v0  ;;  %587 = vst.msk [vmem:[#allocation3 + $0x8] sm:$0xff] %vm586_vm10, %v6592_v36 }
 0x19e   : > { %v1188_v2 = vsub.f32 1.5, %v1187_v60  ;;  %590 = vst.msk [vmem:[#allocation3 + $0x18] sm:$0x1] %vm589_vm15, %v6592_v36 }
 0x19f   : > { %v1167_v50 = vmul.f32 0.5, %v1166_v56  ;;  %v1234_v26 = vadd.f32 %v6552_v17, %v1225_v43 }
 0x1a0   : > { %v1189_v46 = vmul.f32 %v5319_v29, %v1188_v2 }
 0x1a1   : > { %v1168_v61 = vsub.f32 1.5, %v1167_v50 }
 0x1a2   : > { %v1193_v37 = vsel %vm1192_vm1, %v5319_v29, %v1189_v46  ;;  %v1115_v29 = vpop.xlane.xlu2 %1114 }
 0x1a3   : > { %v1169_v32 = vmul.f32 %v5321_v42, %v1168_v61  ;;  %v1219_v48 = vmul.f32 %v1193_v37, %v6393_v54  ;;  %v1124_v51 = vmul.f32 %v1115_v29, %v6355_v57  ;;  %v1715_v29 = vld [vmem:[#allocation3] sm:$0xfc] }
 0x1a5   : > { %v1173_v4 = vsel %vm1172_vm2, %v5321_v42, %v1169_v32  ;;  %v1228_v18 = vmul.f32 %v6546_v6, %v1219_v48 }
 0x1a6   : > { %v1217_v52 = vmul.f32 %v1173_v4, %v6399_v25  ;;  %v1132_v25 = vadd.f32 1e-06, %v1124_v51 }
 0x1a7   : > { %v1237_v19 = vadd.f32 %v6552_v17, %v1228_v18  ;;  %v1551_v18 = vld [vmem:[#allocation3] sm:$0xfe] }
 0x1a8   : > { %v1226_v62 = vmul.f32 %v6546_v6, %v1217_v52  ;;  %5322 = vrsqrt.f32 %v1132_v25  ;;  %vm1200_vm3 = vweird.f32 %v1132_v25  ;;  %v5681_v52 = vmov 1.0  }
 0x1a9   : > { %v1242_v16 = vpack.c.bf16 %v1237_v19, %v1236_v40  ;;  %v6608_v40 = vrot.slane %v5681_v52, 7 }
 0x1aa   : > { %v1235_v54 = vadd.f32 %v6552_v17, %v1226_v62  ;;  %v4659_v62 = vld [vmem:[%s8460_s3 + $0x4] ss:$8 sm:$0x3] }
 0x1ab   : > { %1358 = vmatmul.bf16.vlgmr.msra.gmra.mxu3 %v1242_v16 }
 0x1ac   : > { %v1241_v7 = vpack.c.bf16 %v1235_v54, %v1234_v26  ;;  %v1513_v54 = vld [vmem:[%s8460_s3] ss:$8 sm:$0x3] }
 0x1ae   : > { %1353 = vmatmul.bf16.gmra.mxu0 %v1241_v7  ;;  %1382 = vmatmul.bf16.gmra.mxu1 %v1241_v7  ;;  %v5323_v5 = vpop.eup %5322 }
 0x1af   : > { %v1195_v3 = vmul.f32 %v5323_v5, %v1132_v25  ;;  %vm1201_vm4 = vweird.f32 %v5323_v5 }
 0x1b0   : > { %vm1202_vm5 = vmor %vm1200_vm3, %vm1201_vm4 }
 0x1b1   : > { %v1196_v21 = vmul.f32 %v5323_v5, %v1195_v3 }
 0x1b3   : > { %v1197_v30 = vmul.f32 0.5, %v1196_v21  ;;  %v4657_v21 = vld [vmem:[%s8460_s3 + $0x2] ss:$8 sm:$0x3] }
 0x1b5   : > { %v1198_v14 = vsub.f32 1.5, %v1197_v30 }
 0x1b7   : > { %v1199_v31 = vmul.f32 %v5323_v5, %v1198_v14  ;;  %v6640_v14 = vperm.slane %v1513_v54, 0 }
 0x1b9   : > { %v1203_v2 = vsel %vm1202_vm5, %v5323_v5, %v1199_v31  ;;  %v8495_v5 = vrot.slane %v6084_v15, 6 }
 0x1ba   : > { %v1220_v23 = vmul.f32 %v1203_v2, %v6405_v59  ;;  %v6605_v59 = vrot.slane %v6592_v36, 7 }
 0x1bc   : > { %v1229_v37 = vmul.f32 %v6546_v6, %v1220_v23  ;;  %8690 = vst [vmem:[#allocation50_spill] sm:$0xff] %v6605_v59  ;;  %v1587_v19 = vmul.f32 %v6605_v59, %v1551_v18  ;;  %v6679_v18 = vperm.slane %v4659_v62, 1 }
 0x1be   : > { %1387 = vmatmul.bf16.gmra.mxu1 %v1242_v16  ;;  %v1238_v48 = vadd.f32 %v6552_v17, %v1229_v37  ;;  %v6669_v37 = vperm.slane %v4657_v21, 1  ;;  %8704 = vst [vmem:[#allocation61_spill] sm:$0xff] %v6679_v18 }
 0x1c0   : > { %8701 = vst [vmem:[#allocation58_spill] sm:$0xff] %v6669_v37 }
 0x1ee   : > { %v1117_v10 = vpop.xlane.xlu0 %1116 }
 0x1ef   : > { %v1125_v11 = vmul.f32 %v1117_v10, %v6355_v57  ;;  %v6628_v10 = vperm.slane %v4657_v21, 0 }
 0x1f1   : > { %v1133_v42 = vadd.f32 1e-06, %v1125_v11  ;;  %8693 = vst [vmem:[#allocation52_spill] sm:$0xff] %v6628_v10 }
 0x1f3   : > { %5324 = vrsqrt.f32 %v1133_v42  ;;  %vm1210_vm8 = vweird.f32 %v1133_v42 }
 0x1f9   : > { %v5325_v9 = vpop.eup %5324 }
 0x1fa   : > { %v1205_v60 = vmul.f32 %v5325_v9, %v1133_v42  ;;  %vm1211_vm7 = vweird.f32 %v5325_v9  ;;  %v4658_v42 = vld [vmem:[%s8460_s3 + $0x3] ss:$8 sm:$0x3] }
 0x1fb   : > { %vm1212_vm9 = vmor %vm1210_vm8, %vm1211_vm7 }
 0x1fc   : > { %v1206_v56 = vmul.f32 %v5325_v9, %v1205_v60  ;;  %v6647_v60 = vperm.slane %v4659_v62, 0 }
 0x1fe   : > { %v1207_v50 = vmul.f32 0.5, %v1206_v56  ;;  %v6652_v56 = vsel %vm1414_vm11, %v6605_v59, %v6608_v40 }
 0x1ff   : > { %8696 = vst [vmem:[#allocation54_spill] sm:$0xff] %v6652_v56 }
 0x200   : > { %v1208_v57 = vsub.f32 1.5, %v1207_v50  ;;  %v1716_v50 = vld [vmem:[#allocation3 + $0x8] sm:$0xfc] }
 0x202   : > { %v1209_v0 = vmul.f32 %v5325_v9, %v1208_v57 }
 0x204   : > { %v1213_v46 = vsel %vm1212_vm9, %v5325_v9, %v1209_v0  ;;  %v6642_v9 = vperm.slane %v1513_v54, 1  ;;  %v4660_v0 = vld [vmem:[%s8460_s3 + $0x5] ss:$8 sm:$0x3] }
 0x205   : > { %v1221_v61 = vmul.f32 %v1213_v46, %v6450_v24  ;;  %v8691_v24 = vld [vmem:[#allocation27_spill] sm:$0xff]  ;;  %v8700_v46 = vld [vmem:[#allocation26_spill] sm:$0xff]  ;;  %v6693_v54 = vperm.slane %v4660_v0, 0 }
 0x206   : > { %v1728_v4 = vrot.slane %v8691_v24, 6 }
 0x207   : > { %v1230_v32 = vmul.f32 %v6546_v6, %v1221_v61  ;;  %v1729_v6 = vrot.slane %v6112_v49, 6  ;;  %v1497_v61 = vmul.f32 %v6592_v36, %v8700_v46  ;;  %8705 = vst [vmem:[#allocation62_spill] sm:$0xff] %v6693_v54 }
 0x208   : > { %v1752_v3 = vmul.f32 %v1728_v4, %v1715_v29  ;;  %v6695_v29 = vperm.slane %v4660_v0, 1 }
 0x209   : > { %v1239_v55 = vadd.f32 %v6552_v17, %v1230_v32  ;;  %v4656_v17 = vld [vmem:[%s8460_s3 + $0x1] ss:$8 sm:$0x3]  ;;  %v6657_v57 = vsel %vm1727_vm12, %v1728_v4, %v1729_v6  ;;  %v6662_v23 = vsel %vm1727_vm12, %v1729_v6, %v8495_v5  ;;  %v6671_v32 = vperm.slane %v4658_v42, 0 }
 0x20a   : > { %v6645_v31 = vmul.f32 %v6628_v10, %v1752_v3  ;;  %v6654_v2 = vperm.slane %v4656_v17, 1  ;;  %8698 = vst [vmem:[#allocation56_spill] sm:$0xff] %v6657_v57  ;;  %v6699_v3 = vmul.f32 %v1728_v4, %v1716_v50  ;;  %v1519_v5 = vmul.f32 %v6640_v14, %v1497_v61 }
 0x20b   : > { %v1243_v43 = vpack.c.bf16 %v1239_v55, %v1238_v48  ;;  %8699 = vst [vmem:[#allocation57_spill] sm:$0xff] %v6662_v23  ;;  %v4661_v48 = vld [vmem:[%s8460_s3 + $0x6] ss:$8 sm:$0x3] }
 0x20c   : > { %8697 = vst [vmem:[#allocation55_spill] sm:$0xff] %v6654_v2  ;;  %v6701_v21 = vperm.slane %v4661_v48, 0  ;;  %v6707_v63 = vperm.slane %v4661_v48, 1 }
 0x20d   : > { %1363 = vmatmul.bf16.gmra.mxu3 %v1243_v43  ;;  %1392 = vmatmul.bf16.gmra.mxu1 %v1243_v43  ;;  %8702 = vst [vmem:[#allocation59_spill] sm:$0xff] %v6671_v32 }
 0x20e   : > { %2738 = vmatpush.bf16.msra.mxu2 %v1243_v43  ;;  %v6677_v43 = vperm.slane %v4658_v42, 1  ;;  %8706 = vst [vmem:[#allocation63_spill] sm:$0xff] %v6699_v3 }
 0x20f   : > { %8707 = vst [vmem:[#allocation64_spill] sm:$0xff] %v6701_v21 }
 0x210   : > { %8703 = vst [vmem:[#allocation60_spill] sm:$0xff] %v6677_v43 }
 0x211   : > { %8708 = vst [vmem:[#allocation65_spill] sm:$0xff] %v6707_v63 }
 0x212   : > { %2739 = vmatpush.bf16.msra.mxu2 %v1242_v16 }
 0x216   : > { %2740 = vmatpush.bf16.msra.mxu2 %v1241_v7  ;;  %v6621_v7 = vperm.slane %v4656_v17, 0 }
 0x218   : > { %8692 = vst [vmem:[#allocation51_spill] sm:$0xff] %v6621_v7  ;;  %v6631_v11 = vmul.f32 %v6621_v7, %v1587_v19  ;;  %v4662_v19 = vld [vmem:[%s8460_s3 + $0x7] ss:$8 sm:$0x3] }
 0x219   : > { %v1349_v26 = vpop.f32.mrf.mxu0  ;;  %v1378_v16 = vpop.f32.mrf.mxu1  ;;  %v6709_v0 = vperm.slane %v4662_v19, 0 }
 0x21a   : > { %v1415_v51 = vrot.slane %v1349_v26, 7  ;;  %v1416_v25 = vrot.slane %v1378_v16, 7  ;;  %2741 = vmatpush.bf16.msra.mxu2 %v6565_v12  ;;  %v8694_v12 = vld [vmem:[#allocation25_spill] sm:$0xff]  ;;  %v1649_v55 = vrot.slane %v6631_v11, 1  ;;  %v1814_v16 = vrot.slane %v6645_v31, 2 }
 0x21b   : > { %v6637_v30 = vrot.slane %v8694_v12, 6  ;;  %v4663_v11 = vld [vmem:[%s8460_s3 + $0x10] ss:$8 sm:$0x3]  ;;  %8709 = vst [vmem:[#allocation66_spill] sm:$0xff] %v6709_v0 }
 0x21c   : > { %1463 = vst [vmem:[#allocation3 + $0x10] sm:$0xfe] %v1415_v51  ;;  %v6735_v24 = vperm.slane %v4663_v11, 0 }
 0x21d   : > { %8695 = vst [vmem:[#allocation53_spill] sm:$0xff] %v6637_v30  ;;  %v6683_v52 = vsel %vm1727_vm12, %v6637_v30, %v1729_v6 }
 0x21e   : > { %1464 = vst.msk [vmem:[#allocation3 + $0x18] sm:$0xfe] %vm592_vm6, %v1416_v25 }
 0x21f   : > { %8712 = vst [vmem:[#allocation68_spill] sm:$0xff] %v6735_v24 }
 0x221   : > { %v6688_v17 = vpop.f32.mrf.mxu0  ;;  %v6690_v26 = vpop.f32.mrf.mxu1 }
 0x222   : > { %v8502_v62 = vrot.slane %v6688_v17, 7  ;;  %v8503_v6 = vrot.slane %v6690_v26, 7 }
 0x223   : > { %v1483_v42 = vld [vmem:[#allocation3 + $0x10] sm:$0xff] }
 0x224   : > { %v1937_v31 = vld [vmem:[#allocation3 + $0x10] sm:$0xfe]  ;;  %v6714_v4 = vsel %vm1414_vm11, %v1415_v51, %v8502_v62  ;;  %v1420_v50 = vsel %vm1414_vm11, %v1416_v25, %v8503_v6  ;;  %v1499_v45 = vmul.f32 %v6103_v38, %v1483_v42  ;;  %v1589_v39 = vmul.f32 %v6652_v56, %v1483_v42 }
 0x225   : > { %1465 = vst [vmem:[#allocation3 + $0x20] sm:$0xff] %v6714_v4  ;;  %v1591_v61 = vmul.f32 %v6608_v40, %v6714_v4  ;;  %v1754_v48 = vmul.f32 %v6657_v57, %v1483_v42  ;;  %v1756_v51 = vmul.f32 %v6662_v23, %v6714_v4  ;;  %v6729_v62 = vperm.slane %v4662_v19, 1  ;;  %v8711_v6 = vld [vmem:[#allocation24_spill] sm:$0xff]  ;;  %v2050_v49 = vld [vmem:[#allocation3 + $0x10] sm:$0xfc] }
 0x226   : > { %1466 = vst.msk [vmem:[#allocation3 + $0x28] sm:$0xff] %vm586_vm10, %v1420_v50  ;;  %v1614_v25 = vmul.f32 %v6621_v7, %v1589_v39  ;;  %v1882_v12 = vmul.f32 %v8711_v6, %v1483_v42  ;;  %v1948_v36 = vmul.f32 %v6647_v60, %v1937_v31  ;;  %v6744_v19 = vperm.slane %v4663_v11, 1 }
 0x227   : > { %8710 = vst [vmem:[#allocation67_spill] sm:$0xff] %v6729_v62  ;;  %v6738_v8 = vmul.f32 %v6621_v7, %v1591_v61  ;;  %v1779_v20 = vmul.f32 %v6628_v10, %v1754_v48  ;;  %v6742_v47 = vmul.f32 %v6628_v10, %v1756_v51  ;;  %v1521_v50 = vmul.f32 %v6640_v14, %v1499_v45 }
 0x228   : > { %8713 = vst [vmem:[#allocation69_spill] sm:$0xff] %v6744_v19  ;;  %v1650_v39 = vrot.slane %v1614_v25, 1  ;;  %v1884_v42 = vmul.f32 %v6103_v38, %v6714_v4  ;;  %v1950_v31 = vmul.f32 %v6647_v60, %v6714_v4  ;;  %v2086_v48 = vmul.f32 %v6637_v30, %v2050_v49 }
 0x229   : > { %v8528_v28 = vrot.slane %v6738_v8, 1  ;;  %v1815_v61 = vrot.slane %v1779_v20, 2  ;;  %v1905_v11 = vmul.f32 %v6671_v32, %v1882_v12  ;;  %v1984_v27 = vrot.slane %v1948_v36, 1 }
 0x22a   : > { %v1651_v51 = vsel %vm1648_vm13, %v1649_v55, %v1650_v39  ;;  %v2088_v45 = vmul.f32 %v6683_v52, %v6714_v4  ;;  %v1985_v13 = vrot.slane %v1950_v31, 1  ;;  %v2215_v20 = vmul.f32 %v8711_v6, %v6714_v4 }
 0x22b   : > { %v1656_v25 = vsel %vm1648_vm13, %v1650_v39, %v8528_v28  ;;  %v1699_v33 = vadd.f32 %v1651_v51, %v1519_v5  ;;  %v1354_v58 = vpop.f32.mrf.mxu0  ;;  %v1383_v41 = vpop.f32.mrf.mxu1  ;;  %v1816_v55 = vsel %vm1813_vm14, %v1814_v16, %v1815_v61  ;;  %v2111_v12 = vmul.f32 %v6693_v54, %v2086_v48 }
 0x22c   : > { %v1701_v49 = vadd.f32 %v1656_v25, %v1521_v50  ;;  %v2113_v36 = vmul.f32 %v6693_v54, %v2088_v45  ;;  %v1421_v34 = vrot.slane %v1354_v58, 7  ;;  %v1423_v19 = vrot.slane %v1383_v41, 7  ;;  %v2433_v6 = vld [vmem:[#allocation3 + $0x20] sm:$0xfc] }
 0x22d   : > { %v6766_v62 = vld [vmem:[#allocation3 + $0x28] sm:$0xff]  ;;  %v8714_v39 = vrot.slane %v6742_v47, 2  ;;  %v1864_v31 = vadd.f32 %v1816_v55, %v1699_v33  ;;  %v2147_v50 = vrot.slane %v2111_v12, 2  ;;  %v8715_v48 = vrot.slane %v6688_v17, 7 }
 0x22e   : > { %v1757_v51 = vmul.f32 %v6662_v23, %v6766_v62  ;;  %v2089_v16 = vmul.f32 %v6683_v52, %v6766_v62  ;;  %v8716_v41 = vrot.slane %v6690_v26, 7  ;;  %v1359_v25 = vpop.f32.mrf.mxu3  ;;  %v2148_v33 = vrot.slane %v2113_v36, 2 }
 0x22f   : > { %v1821_v5 = vsel %vm1813_vm14, %v1815_v61, %v8714_v39  ;;  %v6778_v58 = vsel %vm1414_vm11, %v8715_v48, %v1421_v34  ;;  %v1921_v61 = vadd.f32 %v1905_v11, %v1864_v31  ;;  %v1986_v39 = vsel %vm1648_vm13, %v1984_v27, %v1985_v13 }
 0x230   : > { %v1866_v28 = vadd.f32 %v1821_v5, %v1701_v49  ;;  %v1424_v45 = vsel %vm1414_vm11, %v8716_v41, %v1423_v19  ;;  %v1593_v55 = vmul.f32 %v6608_v40, %v6778_v58  ;;  %v1907_v49 = vmul.f32 %v6671_v32, %v1884_v42  ;;  %v2270_v5 = vld [vmem:[#allocation3 + $0x20] sm:$0xfe] }
 0x231   : > { %1468 = vst.msk [vmem:[#allocation3 + $0x38] sm:$0xff] %vm586_vm10, %v1424_v45  ;;  %v6791_v17 = vmul.f32 %v6647_v60, %v6778_v58  ;;  %v2034_v26 = vadd.f32 %v1986_v39, %v1921_v61  ;;  %v2090_v11 = vmul.f32 %v6662_v23, %v6778_v58  ;;  %v6796_v36 = vmul.f32 %v6695_v29, %v2089_v16 }
 0x232   : > { %v1429_v31 = vrot.slane %v1359_v25, 7  ;;  %v1923_v42 = vadd.f32 %v1907_v49, %v1866_v28  ;;  %v2149_v27 = vsel %vm1813_vm14, %v2147_v50, %v2148_v33  ;;  %v2238_v48 = vmul.f32 %v6701_v21, %v2215_v20 }
 0x233   : > { %8717 = vst [vmem:[#allocation70_spill] sm:$0xff] %v6796_v36  ;;  %v6801_v41 = vmul.f32 %v6669_v37, %v1757_v51  ;;  %v8535_v45 = vrot.slane %v6791_v17, 1  ;;  %v6805_v61 = vmul.f32 %v6693_v54, %v2090_v11  ;;  %v2197_v39 = vadd.f32 %v2149_v27, %v2034_v26  ;;  %v1356_v12 = vpop.f32.mrf.mxu0  ;;  %v1385_v63 = vpop.f32.mrf.mxu1 }
 0x234   : > { %v1618_v16 = vmul.f32 %v6621_v7, %v1593_v55  ;;  %v2217_v28 = vmul.f32 %v6103_v38, %v6778_v58  ;;  %v2306_v50 = vmul.f32 %v2270_v5, %v6608_v40  ;;  %v2333_v20 = vmul.f32 %v6709_v0, %v1593_v55 }
 0x235   : > { %8718 = vst [vmem:[#allocation71_spill] sm:$0xff] %v6801_v41  ;;  %v1425_v25 = vrot.slane %v1356_v12, 7  ;;  %v1427_v51 = vrot.slane %v1385_v63, 7  ;;  %v1991_v49 = vsel %vm1648_vm13, %v1985_v13, %v8535_v45  ;;  %v8533_v11 = vrot.slane %v6805_v61, 2 }
 0x236   : > { %v2036_v26 = vadd.f32 %v1991_v49, %v1923_v42  ;;  %v2254_v27 = vadd.f32 %v2238_v48, %v2197_v39  ;;  %v2331_v18 = vmul.f32 %v6709_v0, %v2306_v50  ;;  %v2368_v43 = vrot.slane %v2333_v20, 1  ;;  %v6824_v55 = vpop.f32.mrf.mxu3 }
 0x237   : > { %v6818_v3 = vsel %vm1414_vm11, %v1421_v34, %v1425_v25  ;;  %v6821_v5 = vsel %vm1414_vm11, %v1425_v25, %v1429_v31  ;;  %v1428_v63 = vsel %vm1414_vm11, %v1423_v19, %v1427_v51  ;;  %8719 = vst [vmem:[#allocation72_spill] sm:$0xff] %v6824_v55  ;;  %v2154_v13 = vsel %vm1813_vm14, %v2148_v33, %v8533_v11 }
 0x238   : > { %v8534_v12 = vrot.slane %v6824_v55, 7  ;;  %v1595_v42 = vmul.f32 %v6608_v40, %v6818_v3  ;;  %v2199_v48 = vadd.f32 %v2154_v13, %v2036_v26  ;;  %v2367_v39 = vrot.slane %v2331_v18, 1  ;;  %1470 = vst.msk [vmem:[#allocation3 + $0x48] sm:$0xff] %vm586_vm10, %v1428_v63 }
 0x239   : > { %v2469_v50 = vmul.f32 %v2433_v6, %v6637_v30  ;;  %v2471_v19 = vmul.f32 %v6683_v52, %v6778_v58  ;;  %v2473_v20 = vmul.f32 %v6662_v23, %v6818_v3  ;;  %v1659_v25 = vrot.slane %v1618_v16, 1 }
 0x23a   : > { %v6842_v33 = vsel %vm1414_vm11, %v1429_v31, %v8534_v12  ;;  %v2240_v18 = vmul.f32 %v6701_v21, %v2217_v28  ;;  %v6846_v49 = vmul.f32 %v6709_v0, %v1595_v42  ;;  %v2369_v6 = vsel %vm1648_vm13, %v2367_v39, %v2368_v43 }
 0x23b   : > { %v2494_v26 = vmul.f32 %v6735_v24, %v2469_v50  ;;  %v2496_v13 = vmul.f32 %v6735_v24, %v2471_v19  ;;  %v6852_v34 = vmul.f32 %v6735_v24, %v2473_v20  ;;  %v1388_v63 = vpop.f32.mrf.mxu1  ;;  %v2417_v12 = vadd.f32 %v2369_v6, %v2254_v27  ;;  %v8720_v20 = vld [vmem:[#allocation32_spill] sm:$0xff] }
 0x23c   : > { %v2256_v11 = vadd.f32 %v2240_v18, %v2199_v48  ;;  %v8539_v31 = vrot.slane %v6846_v49, 1  ;;  %v6856_v16 = vmul.f32 %v6621_v7, %v1595_v42  ;;  %v1431_v28 = vrot.slane %v1388_v63, 7 }
 0x23d   : > { %v2530_v45 = vrot.slane %v2494_v26, 2  ;;  %v2531_v55 = vrot.slane %v2496_v13, 2  ;;  %v8537_v39 = vrot.slane %v6852_v34, 2  ;;  %v1501_v48 = vmul.f32 %v8720_v20, %v6714_v4  ;;  %v6871_v13 = vld [vmem:[#allocation3 + $0x38] sm:$0xff] }
 0x23e   : > { %v2374_v50 = vsel %vm1648_vm13, %v2368_v43, %v8539_v31  ;;  %v8538_v19 = vrot.slane %v6856_v16, 1  ;;  %v1503_v27 = vmul.f32 %v6233_v22, %v6778_v58  ;;  %v1432_v42 = vsel %vm1414_vm11, %v1427_v51, %v1431_v28 }
 0x23f   : > { %v2419_v6 = vadd.f32 %v2374_v50, %v2256_v11  ;;  %v2532_v26 = vsel %vm1813_vm14, %v2530_v45, %v2531_v55  ;;  %1472 = vst.msk [vmem:[#allocation3 + $0x58] sm:$0xff] %vm586_vm10, %v1432_v42  ;;  %v2537_v43 = vsel %vm1813_vm14, %v2531_v55, %v8537_v39  ;;  %v6880_v4 = vmul.f32 %v6608_v40, %v6821_v5  ;;  %v6901_v18 = vld [vmem:[#allocation3 + $0x48] sm:$0xff] }
 0x240   : > { %v6876_v63 = vadd.f32 %v2532_v26, %v2417_v12  ;;  %v6884_v51 = vmul.f32 %v6608_v40, %v6842_v33  ;;  %v8723_v45 = vrot.slane %v6738_v8, 1  ;;  %v1664_v55 = vsel %vm1648_vm13, %v1659_v25, %v8538_v19 }
 0x241   : > { %v6886_v11 = vadd.f32 %v2537_v43, %v2419_v6  ;;  %v8724_v12 = vrot.slane %v6237_v1, 6  ;;  %v8725_v42 = vrot.slane %v6084_v15, 6  ;;  %v1523_v6 = vmul.f32 %v6640_v14, %v1501_v48 }
 0x242   : > { %8721 = vst [vmem:[#allocation73_spill] sm:$0xff] %v6876_v63  ;;  %v1660_v50 = vsel %vm1648_vm13, %v8723_v45, %v1659_v25  ;;  %v1525_v43 = vmul.f32 %v6640_v14, %v1503_v27  ;;  %v6907_v8 = vmul.f32 %v6621_v7, %v6880_v4  ;;  %v8726_v45 = vld [vmem:[#allocation30_spill] sm:$0xff]  ;;  %v6914_v19 = vmul.f32 %v6621_v7, %v6884_v51 }
 0x243   : > { %8722 = vst [vmem:[#allocation74_spill] sm:$0xff] %v6886_v11  ;;  %v6899_v26 = vsel %vm1727_vm12, %v8725_v42, %v8724_v12  ;;  %v3207_v25 = vpack.c.bf16 %v6886_v11, %v6876_v63  ;;  %v6920_v27 = vpop.f32.mrf.mxu1  ;;  %v6924_v42 = vmul.f32 %v6683_v52, %v6871_v13  ;;  %v1703_v31 = vadd.f32 %v1660_v50, %v1523_v6 }
 0x244   : > { %8727 = vst [vmem:[#allocation75_spill] sm:$0xff] %v6914_v19  ;;  %v1758_v12 = vmul.f32 %v6899_v26, %v6778_v58  ;;  %v1759_v48 = vmul.f32 %v6899_v26, %v6871_v13  ;;  %v1705_v39 = vadd.f32 %v1664_v55, %v1525_v43  ;;  %v8730_v15 = vrot.slane %v8726_v45, 6 }
 0x245   : > { %8728 = vst [vmem:[#allocation76_spill] sm:$0xff] %v6920_v27  ;;  %v8731_v11 = vrot.slane %v6237_v1, 6  ;;  %v8551_v7 = vrot.slane %v6920_v27, 7  ;;  %3219 = vrot.lane.b32.xlu2 %v3207_v25, %s5682_s21  ;;  %v2092_v27 = vmul.f32 %v6899_v26, %v6818_v3 }
 0x246   : > { %8729 = vst [vmem:[#allocation77_spill] sm:$0xff] %v6924_v42  ;;  %v1783_v50 = vmul.f32 %v6628_v10, %v1758_v12  ;;  %v6942_v6 = vmul.f32 %v6669_v37, %v1759_v48  ;;  %v1888_v48 = vmul.f32 %v6233_v22, %v6818_v3 }
 0x247   : > { %v6931_v63 = vsel %vm1727_vm12, %v8731_v11, %v8730_v15  ;;  %v1886_v15 = vmul.f32 %v8720_v20, %v6778_v58  ;;  %v1954_v11 = vmul.f32 %v6647_v60, %v6818_v3  ;;  %v1436_v43 = vsel %vm1414_vm11, %v1431_v28, %v8551_v7 }
 0x248   : > { %v1760_v36 = vmul.f32 %v6931_v63, %v6818_v3  ;;  %v1761_v52 = vmul.f32 %v6931_v63, %v6901_v18  ;;  %v1824_v12 = vrot.slane %v1783_v50, 2  ;;  %1474 = vst.msk [vmem:[#allocation3 + $0x68] sm:$0xff] %vm586_vm10, %v1436_v43  ;;  %v6960_v58 = vmul.f32 %v6647_v60, %v6821_v5 }
 0x249   : > { %v1994_v55 = vrot.slane %v1954_v11, 1  ;;  %v2093_v7 = vmul.f32 %v6899_v26, %v6901_v18  ;;  %v1909_v42 = vmul.f32 %v6671_v32, %v1886_v15  ;;  %v8733_v11 = vrot.slane %v6791_v17, 1 }
 0x24a   : > { %v6953_v1 = vmul.f32 %v6628_v10, %v1760_v36  ;;  %v6965_v28 = vmul.f32 %v6669_v37, %v1761_v52  ;;  %v8732_v36 = vrot.slane %v6742_v47, 2  ;;  %v2094_v52 = vmul.f32 %v6931_v63, %v6821_v5 }
 0x24b   : > { %v1995_v23 = vsel %vm1648_vm13, %v8733_v11, %v1994_v55  ;;  %v2117_v30 = vmul.f32 %v6693_v54, %v2092_v27  ;;  %v6985_v41 = vmul.f32 %v6695_v29, %v2093_v7  ;;  %v1911_v17 = vmul.f32 %v6671_v32, %v1888_v48 }
 0x24c   : > { %v1825_v50 = vsel %vm1813_vm14, %v8732_v36, %v1824_v12  ;;  %v8559_v43 = vrot.slane %v6953_v1, 2  ;;  %v6991_v11 = vmul.f32 %v6693_v54, %v2094_v52  ;;  %v2219_v27 = vmul.f32 %v8720_v20, %v6818_v3 }
 0x24d   : > { %v1868_v25 = vadd.f32 %v1825_v50, %v1703_v31  ;;  %v6987_v31 = vld [vmem:[#allocation3 + $0x58] sm:$0xff]  ;;  %v8735_v52 = vrot.slane %v6805_v61, 2 }
 0x24e   : > { %v1829_v47 = vsel %vm1813_vm14, %v1824_v12, %v8559_v43  ;;  %v2157_v43 = vrot.slane %v2117_v30, 2  ;;  %v8563_v56 = vrot.slane %v6991_v11, 2  ;;  %v2095_v48 = vmul.f32 %v6931_v63, %v6987_v31 }
 0x24f   : > { %v1870_v15 = vadd.f32 %v1829_v47, %v1705_v39  ;;  %v1925_v50 = vadd.f32 %v1909_v42, %v1868_v25  ;;  %v2221_v39 = vmul.f32 %v6233_v22, %v6821_v5  ;;  %v8734_v42 = vrot.slane %v6960_v58, 1 }
 0x250   : > { %v2158_v30 = vsel %vm1813_vm14, %v8735_v52, %v2157_v43  ;;  %v2337_v47 = vmul.f32 %v6709_v0, %v6880_v4  ;;  %v2475_v52 = vmul.f32 %v6899_v26, %v6821_v5 }
 0x251   : > { %v1927_v36 = vadd.f32 %v1911_v17, %v1870_v15  ;;  %v2038_v7 = vadd.f32 %v1995_v23, %v1925_v50  ;;  %v1999_v25 = vsel %vm1648_vm13, %v1994_v55, %v8734_v42  ;;  %v2162_v15 = vsel %vm1813_vm14, %v2157_v43, %v8563_v56  ;;  %v8737_v43 = vld [vmem:[#allocation28_spill] sm:$0xff] }
 0x252   : > { %v2242_v50 = vmul.f32 %v6701_v21, %v2219_v27  ;;  %v2244_v55 = vmul.f32 %v6701_v21, %v2221_v39  ;;  %v7017_v42 = vmul.f32 %v6709_v0, %v6884_v51  ;;  %v2377_v61 = vrot.slane %v2337_v47, 1 }
 0x253   : > { %v2040_v23 = vadd.f32 %v1999_v25, %v1927_v36  ;;  %v2201_v17 = vadd.f32 %v2158_v30, %v2038_v7  ;;  %v2477_v36 = vmul.f32 %v6931_v63, %v6842_v33  ;;  %v1505_v7 = vmul.f32 %v8737_v43, %v6818_v3 }
 0x254   : > { %8736 = vst [vmem:[#allocation78_spill] sm:$0xff] %v7017_v42  ;;  %v8738_v27 = vrot.slane %v6846_v49, 1  ;;  %v8561_v25 = vrot.slane %v7017_v42, 1  ;;  %v2500_v51 = vmul.f32 %v6735_v24, %v2475_v52  ;;  %v1507_v30 = vmul.f32 %v6179_v53, %v6821_v5 }
 0x255   : > { %v2203_v12 = vadd.f32 %v2162_v15, %v2040_v23  ;;  %v2258_v4 = vadd.f32 %v2242_v50, %v2201_v17  ;;  %v7033_v15 = vmul.f32 %v6735_v24, %v2477_v36  ;;  %v1527_v17 = vmul.f32 %v6640_v14, %v1505_v7 }
 0x256   : > { %v2378_v39 = vsel %vm1648_vm13, %v8738_v27, %v2377_v61  ;;  %v2382_v3 = vsel %vm1648_vm13, %v2377_v61, %v8561_v25  ;;  %v2540_v49 = vrot.slane %v2500_v51, 2  ;;  %v1529_v50 = vmul.f32 %v6640_v14, %v1507_v30  ;;  %v7051_v61 = vld [vmem:[#allocation3 + $0x68] sm:$0xff] }
 0x257   : > { %v2260_v47 = vadd.f32 %v2244_v55, %v2203_v12  ;;  %v2421_v23 = vadd.f32 %v2378_v39, %v2258_v4  ;;  %8739 = vst [vmem:[#allocation79_spill] sm:$0xff] %v7033_v15  ;;  %v8740_v27 = vrot.slane %v6907_v8, 1  ;;  %v8741_v52 = vrot.slane %v6856_v16, 1 }
 0x258   : > { %v8562_v55 = vrot.slane %v7033_v15, 2  ;;  %v8742_v4 = vrot.slane %v6914_v19, 1  ;;  %v8744_v51 = vrot.slane %v6852_v34, 2  ;;  %v1737_v16 = vrot.slane %v6186_v44, 6  ;;  %v1482_v44 = vld [vmem:[#allocation3 + $0x8] sm:$0xff] }
 0x259   : > { %v1668_v57 = vsel %vm1648_vm13, %v8741_v52, %v8740_v27  ;;  %v2423_v12 = vadd.f32 %v2382_v3, %v2260_v47  ;;  %v8743_v36 = vmov %v8740_v27  ;;  %v7058_v47 = vrot.slane %v6281_v35, 6 }
 0x25a   : > { %v1672_v7 = vsel %vm1648_vm13, %v8743_v36, %v8742_v4  ;;  %v1707_v39 = vadd.f32 %v1668_v57, %v1527_v17  ;;  %v2541_v30 = vsel %vm1813_vm14, %v8744_v51, %v2540_v49  ;;  %v7061_v3 = vmul.f32 %v6695_v29, %v2095_v48 }
 0x25b   : > { %v1709_v25 = vadd.f32 %v1672_v7, %v1529_v50  ;;  %v2545_v57 = vsel %vm1813_vm14, %v2540_v49, %v8562_v55  ;;  %v7067_v17 = vadd.f32 %v2541_v30, %v2421_v23  ;;  %v8747_v50 = vrot.slane %v8726_v45, 6 }
 0x25c   : > { %v7069_v34 = vadd.f32 %v2545_v57, %v2423_v12  ;;  %v7078_v52 = vsel %vm1727_vm12, %v1737_v16, %v7058_v47  ;;  %v7082_v48 = vmul.f32 %v6647_v60, %v6842_v33  ;;  %v1890_v7 = vmul.f32 %v8737_v43, %v6821_v5 }
 0x25d   : > { %8745 = vst [vmem:[#allocation80_spill] sm:$0xff] %v7067_v17  ;;  %v7074_v27 = vsel %vm1727_vm12, %v8747_v50, %v1737_v16  ;;  %v1764_v12 = vmul.f32 %v7078_v52, %v6842_v33  ;;  %v1765_v4 = vmul.f32 %v7078_v52, %v7051_v61  ;;  %v1892_v51 = vmul.f32 %v6179_v53, %v6842_v33 }
 0x25e   : > { %8746 = vst [vmem:[#allocation81_spill] sm:$0xff] %v7069_v34  ;;  %v1762_v49 = vmul.f32 %v7074_v27, %v6821_v5  ;;  %v1763_v23 = vmul.f32 %v7074_v27, %v6987_v31  ;;  %v3208_v36 = vpack.c.bf16 %v7069_v34, %v7067_v17  ;;  %v8564_v30 = vrot.slane %v7082_v48, 1 }
 0x25f   : > { %8748 = vst [vmem:[#allocation82_spill] sm:$0xff] %v7074_v27  ;;  %v7105_v55 = vmul.f32 %v6628_v10, %v1764_v12  ;;  %v7109_v8 = vmul.f32 %v6669_v37, %v1765_v4  ;;  %v8751_v5 = vrot.slane %v6960_v58, 1  ;;  %v7122_v12 = vmul.f32 %v6899_v26, %v6987_v31 }
 0x260   : > { %8749 = vst [vmem:[#allocation83_spill] sm:$0xff] %v7082_v48  ;;  %v1787_v57 = vmul.f32 %v6628_v10, %v1762_v49  ;;  %v7102_v50 = vmul.f32 %v6669_v37, %v1763_v23  ;;  %3221 = vrot.lane.b32.xlu0 %v3208_v36, %s5682_s21  ;;  %v2096_v49 = vmul.f32 %v7074_v27, %v6842_v33  ;;  %v8753_v26 = vrot.slane %v6953_v1, 2  ;;  %v8763_v48 = vld [vmem:[#allocation71_spill] sm:$0xff] }
 0x261   : > { %8750 = vst [vmem:[#allocation84_spill] sm:$0xff] %v7105_v55  ;;  %v2003_v56 = vsel %vm1648_vm13, %v8751_v5, %v8564_v30  ;;  %v2097_v23 = vmul.f32 %v7074_v27, %v7051_v61  ;;  %v2223_v16 = vmul.f32 %v8737_v43, %v6842_v33  ;;  %v1913_v58 = vmul.f32 %v6671_v32, %v1890_v7 }
 0x262   : > { %v1832_v36 = vrot.slane %v1787_v57, 2  ;;  %v1915_v5 = vmul.f32 %v6671_v32, %v1892_v51  ;;  %v7130_v30 = vmul.f32 %v6693_v54, %v2096_v49  ;;  %v8754_v45 = vrot.slane %v7105_v55, 2  ;;  %v7146_v51 = vld [vmem:[#allocation3 + $0x18] sm:$0xff] }
 0x263   : > { %v7133_v35 = vmul.f32 %v6695_v29, %v2097_v23  ;;  %v7144_v7 = vmul.f32 %v6608_v40, %v7051_v61  ;;  %v2246_v4 = vmul.f32 %v6701_v21, %v2223_v16  ;;  %v8764_v24 = vrot.slane %v8763_v48, 2 }
 0x264   : > { %8752 = vst [vmem:[#allocation85_spill] sm:$0xff] %v7130_v30  ;;  %v1833_v57 = vsel %vm1813_vm14, %v8753_v26, %v1832_v36  ;;  %v1837_v34 = vsel %vm1813_vm14, %v1832_v36, %v8754_v45  ;;  %v8575_v1 = vrot.slane %v7130_v30, 2  ;;  %v1498_v45 = vmul.f32 %v1482_v44, %v8700_v46 }
 0x265   : > { %v1872_v23 = vadd.f32 %v1833_v57, %v1707_v39  ;;  %v1874_v17 = vadd.f32 %v1837_v34, %v1709_v25  ;;  %v7154_v32 = vmul.f32 %v6654_v2, %v7144_v7  ;;  %v8757_v39 = vrot.slane %v6991_v11, 2  ;;  %v1552_v57 = vld [vmem:[#allocation3 + $0x8] sm:$0xfe] }
 0x266   : > { %v1500_v34 = vmul.f32 %v6103_v38, %v7146_v51  ;;  %v1502_v26 = vmul.f32 %v8720_v20, %v6766_v62  ;;  %v1504_v44 = vmul.f32 %v6233_v22, %v6871_v13  ;;  %v1508_v11 = vmul.f32 %v6179_v53, %v6987_v31 }
 0x267   : > { %8755 = vst [vmem:[#allocation86_spill] sm:$0xff] %v7154_v32  ;;  %v1929_v36 = vadd.f32 %v1913_v58, %v1872_v23  ;;  %v7157_v55 = vadd.f32 %v1915_v5, %v1874_v17  ;;  %v2166_v25 = vsel %vm1813_vm14, %v8757_v39, %v8575_v1  ;;  %v1506_v17 = vmul.f32 %v8737_v43, %v6901_v18 }
 0x268   : > { %v1520_v5 = vmul.f32 %v6642_v9, %v1498_v45  ;;  %v1522_v23 = vmul.f32 %v6642_v9, %v1500_v34  ;;  %v1524_v39 = vmul.f32 %v6642_v9, %v1502_v26  ;;  %v1526_v1 = vmul.f32 %v6642_v9, %v1504_v44 }
 0x269   : > { %8756 = vst [vmem:[#allocation87_spill] sm:$0xff] %v7157_v55  ;;  %v2042_v58 = vadd.f32 %v2003_v56, %v1929_v36  ;;  %v1528_v49 = vmul.f32 %v6642_v9, %v1506_v17  ;;  %v1588_v16 = vmul.f32 %v6605_v59, %v1552_v57  ;;  %v7182_v10 = vmul.f32 %v6642_v9, %v1508_v11  ;;  %v8758_v56 = vld [vmem:[#allocation54_spill] sm:$0xff]  ;;  %v8760_v11 = vld [vmem:[#allocation56_spill] sm:$0xff] }
 0x26a   : > { %v1590_v36 = vmul.f32 %v8758_v56, %v7146_v51  ;;  %v1592_v45 = vmul.f32 %v6608_v40, %v6766_v62  ;;  %v7190_v34 = vmul.f32 %v6608_v40, %v6871_v13  ;;  %v7194_v26 = vmul.f32 %v6608_v40, %v6901_v18 }
 0x26b   : > { %v2205_v46 = vadd.f32 %v2166_v25, %v2042_v58  ;;  %v7198_v25 = vmul.f32 %v6608_v40, %v6987_v31  ;;  %v1613_v57 = vmul.f32 %v6654_v2, %v1588_v16  ;;  %v1755_v56 = vmul.f32 %v8760_v11, %v7146_v51 }
 0x26c   : > { %v1615_v17 = vmul.f32 %v6654_v2, %v1590_v36  ;;  %v1617_v58 = vmul.f32 %v6654_v2, %v1592_v45  ;;  %v1619_v59 = vmul.f32 %v6654_v2, %v7190_v34  ;;  %v1621_v19 = vmul.f32 %v6654_v2, %v7194_v26 }
 0x26d   : > { %v7201_v44 = vadd.f32 %v2246_v4, %v2205_v46  ;;  %v1623_v15 = vmul.f32 %v6654_v2, %v7198_v25  ;;  %v1652_v42 = vrot.slane %v1613_v57, 1  ;;  %v8761_v4 = vld [vmem:[#allocation63_spill] sm:$0xff]  ;;  %v1780_v45 = vmul.f32 %v6669_v37, %v1755_v56 }
 0x26e   : > { %v1653_v16 = vrot.slane %v1615_v17, 1  ;;  %v1657_v46 = vrot.slane %v1617_v58, 1  ;;  %v1778_v36 = vmul.f32 %v6669_v37, %v8761_v4  ;;  %v1665_v30 = vrot.slane %v1621_v19, 1 }
 0x26f   : > { %8759 = vst [vmem:[#allocation54_spill] sm:$0xff] %v7201_v44  ;;  %v1661_v44 = vrot.slane %v1619_v59, 1  ;;  %v1669_v11 = vrot.slane %v1623_v15, 1  ;;  %v8762_v55 = vrot.slane %v6942_v6, 2  ;;  %v1818_v58 = vrot.slane %v1780_v45, 2 }
 0x270   : > { %v1654_v21 = vsel %vm1648_vm13, %v1652_v42, %v1653_v16  ;;  %v1658_v57 = vsel %vm1648_vm13, %v1653_v16, %v1657_v46  ;;  %v1817_v17 = vrot.slane %v1778_v36, 2  ;;  %v8766_v16 = vrot.slane %v6942_v6, 2 }
 0x271   : > { %v1827_v0 = vsel %vm1813_vm14, %v8764_v24, %v8762_v55  ;;  %v1662_v2 = vsel %vm1648_vm13, %v1657_v46, %v1661_v44  ;;  %v1666_v4 = vsel %vm1648_vm13, %v1661_v44, %v1665_v30  ;;  %v1670_v59 = vsel %vm1648_vm13, %v1665_v30, %v1669_v11  ;;  %v8767_v44 = vld [vmem:[#allocation24_spill] sm:$0xff] }
 0x272   : > { %v1700_v19 = vadd.f32 %v1654_v21, %v1520_v5  ;;  %v1702_v15 = vadd.f32 %v1658_v57, %v1522_v23  ;;  %v1704_v56 = vadd.f32 %v1662_v2, %v1524_v39  ;;  %v1706_v37 = vadd.f32 %v1666_v4, %v1526_v1  ;;  %v1938_v21 = vld [vmem:[#allocation3 + $0x18] sm:$0xfe]  ;;  %v8770_v57 = vld [vmem:[#allocation60_spill] sm:$0xff] }
 0x273   : > { %v1708_v54 = vadd.f32 %v1670_v59, %v1528_v49  ;;  %v1819_v27 = vsel %vm1813_vm14, %v1817_v17, %v1818_v58  ;;  %v1823_v42 = vsel %vm1813_vm14, %v1818_v58, %v8764_v24  ;;  %v8765_v55 = vrot.slane %v6965_v28, 2  ;;  %v8771_v17 = vld [vmem:[#allocation61_spill] sm:$0xff] }
 0x274   : > { %v1883_v30 = vmul.f32 %v8767_v44, %v7146_v51  ;;  %v8768_v2 = vrot.slane %v7102_v50, 2  ;;  %v1865_v5 = vadd.f32 %v1819_v27, %v1700_v19  ;;  %v1867_v48 = vadd.f32 %v1823_v42, %v1702_v15  ;;  %v2051_v42 = vld [vmem:[#allocation3 + $0x18] sm:$0xfc] }
 0x275   : > { %v1831_v46 = vsel %vm1813_vm14, %v8766_v16, %v8765_v55  ;;  %v8769_v49 = vmov %v8765_v55  ;;  %v1869_v23 = vadd.f32 %v1827_v0, %v1704_v56  ;;  %v1885_v36 = vmul.f32 %v6103_v38, %v6766_v62 }
 0x276   : > { %v1835_v1 = vsel %vm1813_vm14, %v8769_v49, %v8768_v2  ;;  %v1871_v39 = vadd.f32 %v1831_v46, %v1706_v37  ;;  %v1887_v6 = vmul.f32 %v8720_v20, %v6871_v13  ;;  %v1889_v51 = vmul.f32 %v6233_v22, %v6901_v18 }
 0x277   : > { %v1891_v45 = vmul.f32 %v8737_v43, %v6987_v31  ;;  %v1906_v28 = vmul.f32 %v8770_v57, %v1883_v30  ;;  %v1949_v58 = vmul.f32 %v8771_v17, %v1938_v21  ;;  %v1951_v0 = vmul.f32 %v8771_v17, %v6766_v62 }
 0x278   : > { %v1873_v37 = vadd.f32 %v1835_v1, %v1708_v54  ;;  %v1908_v27 = vmul.f32 %v8770_v57, %v1885_v36  ;;  %v1910_v4 = vmul.f32 %v8770_v57, %v1887_v6  ;;  %v1912_v59 = vmul.f32 %v8770_v57, %v1889_v51  ;;  %v8773_v6 = vld [vmem:[#allocation53_spill] sm:$0xff] }
 0x279   : > { %v1914_v19 = vmul.f32 %v8770_v57, %v1891_v45  ;;  %v1922_v15 = vadd.f32 %v1906_v28, %v1865_v5  ;;  %v1953_v56 = vmul.f32 %v8771_v17, %v6871_v13  ;;  %v1955_v24 = vmul.f32 %v8771_v17, %v6901_v18  ;;  %v8774_v45 = vld [vmem:[#allocation57_spill] sm:$0xff] }
 0x27a   : > { %v8772_v55 = vrot.slane %v7154_v32, 1  ;;  %v1924_v16 = vadd.f32 %v1908_v27, %v1867_v48  ;;  %v1926_v46 = vadd.f32 %v1910_v4, %v1869_v23  ;;  %v1928_v30 = vadd.f32 %v1912_v59, %v1871_v39 }
 0x27b   : > { %v1957_v2 = vmul.f32 %v8771_v17, %v6987_v31  ;;  %v1987_v49 = vrot.slane %v1949_v58, 1  ;;  %v1988_v1 = vrot.slane %v1951_v0, 1  ;;  %v1992_v5 = vrot.slane %v1953_v56, 1 }
 0x27c   : > { %v1674_v54 = vsel %vm1648_vm13, %v1669_v11, %v8772_v55  ;;  %v1996_v36 = vrot.slane %v1955_v24, 1  ;;  %v2087_v51 = vmul.f32 %v8773_v6, %v2051_v42  ;;  %v2091_v28 = vmul.f32 %v8774_v45, %v6871_v13 }
 0x27d   : > { %v1710_v21 = vadd.f32 %v1674_v54, %v7182_v10  ;;  %v8775_v32 = vrot.slane %v7109_v8, 2  ;;  %v8776_v11 = vrot.slane %v7102_v50, 2  ;;  %v1893_v10 = vmul.f32 %v6179_v53, %v7051_v61 }
 0x27e   : > { %v1989_v23 = vsel %vm1648_vm13, %v1987_v49, %v1988_v1  ;;  %v2000_v39 = vrot.slane %v1957_v2, 1  ;;  %v1993_v58 = vsel %vm1648_vm13, %v1988_v1, %v1992_v5  ;;  %v1997_v0 = vsel %vm1648_vm13, %v1992_v5, %v1996_v36 }
 0x27f   : > { %v1839_v48 = vsel %vm1813_vm14, %v8776_v11, %v8775_v32  ;;  %v2035_v27 = vadd.f32 %v1989_v23, %v1922_v15  ;;  %v2112_v4 = vmul.f32 %v6695_v29, %v2087_v51  ;;  %v2037_v56 = vadd.f32 %v1993_v58, %v1924_v16  ;;  %v2271_v32 = vld [vmem:[#allocation3 + $0x28] sm:$0xfe]  ;;  %v8777_v51 = vld [vmem:[#allocation70_spill] sm:$0xff]  ;;  %v8781_v11 = vld [vmem:[#allocation65_spill] sm:$0xff] }
 0x280   : > { %v2001_v59 = vsel %vm1648_vm13, %v1996_v36, %v2000_v39  ;;  %v2039_v24 = vadd.f32 %v1997_v0, %v1926_v46  ;;  %v2116_v50 = vmul.f32 %v6695_v29, %v2091_v28  ;;  %v1875_v42 = vadd.f32 %v1839_v48, %v1710_v21 }
 0x281   : > { %v1916_v55 = vmul.f32 %v8770_v57, %v1893_v10  ;;  %v7287_v54 = vmul.f32 %v8771_v17, %v7051_v61  ;;  %v2041_v2 = vadd.f32 %v2001_v59, %v1928_v30  ;;  %v1930_v49 = vadd.f32 %v1914_v19, %v1873_v37 }
 0x282   : > { %v2150_v1 = vrot.slane %v2112_v4, 2  ;;  %v2155_v15 = vrot.slane %v2116_v50, 2  ;;  %v2216_v5 = vmul.f32 %v8767_v44, %v6766_v62  ;;  %v2218_v16 = vmul.f32 %v6103_v38, %v6871_v13  ;;  %v8813_v38 = vld [vmem:[#allocation85_spill] sm:$0xff] }
 0x283   : > { %v2220_v46 = vmul.f32 %v8720_v20, %v6901_v18  ;;  %v2222_v21 = vmul.f32 %v6233_v22, %v6987_v31  ;;  %v2307_v36 = vmul.f32 %v2271_v32, %v6608_v40  ;;  %v8778_v28 = vrot.slane %v8777_v51, 2  ;;  %v8812_v22 = vld [vmem:[#allocation87_spill] sm:$0xff] }
 0x284   : > { %v8780_v62 = vrot.slane %v6985_v41, 2  ;;  %v2239_v48 = vmul.f32 %v8781_v11, %v2216_v5  ;;  %v8603_v10 = vrot.slane %v7287_v54, 1  ;;  %v8782_v31 = vrot.slane %v7061_v3, 2 }
 0x285   : > { %v2152_v37 = vsel %vm1813_vm14, %v2150_v1, %v8778_v28  ;;  %v8779_v19 = vmov %v8778_v28  ;;  %v2241_v32 = vmul.f32 %v8781_v11, %v2218_v16  ;;  %v2243_v1 = vmul.f32 %v8781_v11, %v2220_v46 }
 0x286   : > { %v2156_v30 = vsel %vm1813_vm14, %v8779_v19, %v2155_v15  ;;  %v2160_v13 = vsel %vm1813_vm14, %v2155_v15, %v8780_v62  ;;  %v8783_v23 = vmov %v8780_v62  ;;  %v2198_v0 = vadd.f32 %v2152_v37, %v2035_v27 }
 0x287   : > { %v2164_v58 = vsel %vm1813_vm14, %v8783_v23, %v8782_v31  ;;  %v2200_v4 = vadd.f32 %v2156_v30, %v2037_v56  ;;  %v2202_v59 = vadd.f32 %v2160_v13, %v2039_v24  ;;  %v2005_v15 = vsel %vm1648_vm13, %v2000_v39, %v8603_v10  ;;  %v8784_v56 = vld [vmem:[#allocation67_spill] sm:$0xff] }
 0x288   : > { %v2204_v50 = vadd.f32 %v2164_v58, %v2041_v2  ;;  %v2224_v5 = vmul.f32 %v8737_v43, %v7051_v61  ;;  %v2245_v51 = vmul.f32 %v8781_v11, %v2222_v21  ;;  %v2255_v41 = vadd.f32 %v2239_v48, %v2198_v0  ;;  %v2434_v2 = vld [vmem:[#allocation3 + $0x28] sm:$0xfc]  ;;  %v8810_v10 = vld [vmem:[#allocation83_spill] sm:$0xff] }
 0x289   : > { %v2043_v28 = vadd.f32 %v2005_v15, %v1930_v49  ;;  %v2257_v19 = vadd.f32 %v2241_v32, %v2200_v4  ;;  %v2259_v27 = vadd.f32 %v2243_v1, %v2202_v59  ;;  %v2332_v24 = vmul.f32 %v8784_v56, %v2307_v36  ;;  %v5377_v32 = vld [vmem:[#allocation2] sm:$0xff] }
 0x28a   : > { %v2247_v16 = vmul.f32 %v8781_v11, %v2224_v5  ;;  %v2261_v37 = vadd.f32 %v2245_v51, %v2204_v50  ;;  %v2334_v46 = vmul.f32 %v8784_v56, %v7190_v34  ;;  %v2336_v39 = vmul.f32 %v8784_v56, %v7194_v26  ;;  %v1393_v50 = vpop.f32.mrf.mxu1  ;;  %596 = vst.msk [vmem:[#allocation3 + $0xa8] sm:$0x3] %vm595_vm0, %v5377_v32 }
 0x28b   : > { %v7328_v30 = vadd.f32 %v1916_v55, %v1875_v42  ;;  %v2338_v21 = vmul.f32 %v8784_v56, %v7198_v25  ;;  %v7334_v49 = vmul.f32 %v8784_v56, %v7144_v7  ;;  %v2370_v36 = vrot.slane %v2332_v24, 1  ;;  %v8786_v55 = vld [vmem:[#allocation77_spill] sm:$0xff] }
 0x28c   : > { %v2371_v62 = vrot.slane %v2334_v46, 1  ;;  %v2375_v13 = vrot.slane %v2336_v39, 1  ;;  %v2470_v48 = vmul.f32 %v2434_v2, %v8773_v6  ;;  %v2474_v34 = vmul.f32 %v8774_v45, %v6901_v18  ;;  %v8787_v25 = vld [vmem:[#allocation69_spill] sm:$0xff] }
 0x28d   : > { %8785 = vst [vmem:[#allocation56_spill] sm:$0xff] %v7334_v49  ;;  %v2379_v31 = vrot.slane %v2338_v21, 1  ;;  %v8602_v26 = vrot.slane %v7334_v49, 1  ;;  %v2478_v42 = vmul.f32 %v6931_v63, %v7051_v61  ;;  %v2497_v23 = vmul.f32 %v8787_v25, %v8786_v55 }
 0x28e   : > { %v8788_v7 = vrot.slane %v7133_v35, 2  ;;  %v8789_v58 = vrot.slane %v7061_v3, 2  ;;  %v2372_v6 = vsel %vm1648_vm13, %v2370_v36, %v2371_v62  ;;  %v2376_v4 = vsel %vm1648_vm13, %v2371_v62, %v2375_v13  ;;  %v8792_v36 = vld [vmem:[#allocation76_spill] sm:$0xff] }
 0x28f   : > { %v2495_v18 = vmul.f32 %v8787_v25, %v2470_v48  ;;  %v2380_v59 = vsel %vm1648_vm13, %v2375_v13, %v2379_v31  ;;  %v2384_v63 = vsel %vm1648_vm13, %v2379_v31, %v8602_v26  ;;  %v2418_v3 = vadd.f32 %v2372_v6, %v2255_v41  ;;  %v7386_v6 = vld [vmem:[#allocation12] ss:$0 sm:$0xff] }
 0x290   : > { %v2168_v0 = vsel %vm1813_vm14, %v8789_v58, %v8788_v7  ;;  %v2420_v1 = vadd.f32 %v2376_v4, %v2257_v19  ;;  %v2422_v15 = vadd.f32 %v2380_v59, %v2259_v27  ;;  %v2424_v5 = vadd.f32 %v2384_v63, %v2261_v37  ;;  %v8794_v19 = vld [vmem:[#allocation29_spill] sm:$0xff]  ;;  %8798 = vst [vmem:[#allocation53_spill] sm:$0xff] %v7386_v6  ;;  %v8800_v63 = vld [vmem:[#allocation72_spill] sm:$0xff] }
 0x291   : > { %v2206_v45 = vadd.f32 %v2168_v0, %v2043_v28  ;;  %v1439_v51 = vrot.slane %v1393_v50, 7  ;;  %v2499_v2 = vmul.f32 %v8787_v25, %v2474_v34  ;;  %v2501_v28 = vmul.f32 %v8787_v25, %v7122_v12 }
 0x292   : > { %v7362_v46 = vmul.f32 %v8787_v25, %v2478_v42  ;;  %v2533_v39 = vrot.slane %v2495_v18, 2  ;;  %v2534_v21 = vrot.slane %v2497_v23, 2  ;;  %v8793_v62 = vrot.slane %v8792_v36, 7  ;;  %v1364_v23 = vpop.f32.mrf.mxu3 }
 0x293   : > { %v7356_v24 = vadd.f32 %v2247_v16, %v2206_v45  ;;  %v1509_v27 = vmul.f32 %v8794_v19, %v6842_v33  ;;  %v2538_v37 = vrot.slane %v2499_v2, 2  ;;  %v8795_v16 = vld [vmem:[#allocation46_spill] sm:$0xff]  ;;  %v2542_v48 = vrot.slane %v2501_v28, 2 }
 0x294   : > { %8791 = vst [vmem:[#allocation71_spill] sm:$0xff] %v7362_v46  ;;  %v1440_v41 = vsel %vm1414_vm11, %v8793_v62, %v1439_v51  ;;  %v7371_v13 = vrot.slane %v8795_v16, 6  ;;  %v2535_v12 = vsel %vm1813_vm14, %v2533_v39, %v2534_v21  ;;  %v8601_v34 = vrot.slane %v7362_v46, 2  ;;  %v8803_v62 = vld [vmem:[#allocation82_spill] sm:$0xff] }
 0x295   : > { %8790 = vst [vmem:[#allocation63_spill] sm:$0xff] %v7356_v24  ;;  %v1510_v31 = vmul.f32 %v8794_v19, %v7051_v61  ;;  %v2539_v42 = vsel %vm1813_vm14, %v2534_v21, %v2538_v37  ;;  %v7378_v55 = vadd.f32 %v2535_v12, %v2418_v3  ;;  %v2543_v33 = vsel %vm1813_vm14, %v2538_v37, %v2542_v48  ;;  %v1395_v61 = vpop.f32.mrf.mxu1 }
 0x296   : > { %1476 = vst.msk [vmem:[#allocation3 + $0x78] sm:$0xff] %vm586_vm10, %v1440_v41  ;;  %v2547_v7 = vsel %vm1813_vm14, %v2542_v48, %v8601_v34  ;;  %v7384_v58 = vadd.f32 %v2539_v42, %v2420_v1  ;;  %v1437_v0 = vrot.slane %v1364_v23, 7  ;;  %v2585_v4 = vadd.f32 %v2543_v33, %v2422_v15  ;;  %v8805_v48 = vld [vmem:[#allocation51_spill] sm:$0xff]  ;;  %v8806_v23 = vld [vmem:[#allocation62_spill] sm:$0xff] }
 0x297   : > { %8796 = vst [vmem:[#allocation60_spill] sm:$0xff] %v7378_v55  ;;  %v7388_v18 = vadd.f32 %v2547_v7, %v2424_v5  ;;  %v1531_v45 = vmul.f32 %v6640_v14, %v1509_v27  ;;  %v7394_v59 = vsel %vm1727_vm12, %v7058_v47, %v7371_v13  ;;  %v8801_v50 = vrot.slane %v8800_v63, 7  ;;  %v8804_v27 = vld [vmem:[#allocation45_spill] sm:$0xff]  ;;  %v8807_v7 = vld [vmem:[#allocation64_spill] sm:$0xff] }
 0x298   : > { %8797 = vst [vmem:[#allocation61_spill] sm:$0xff] %v7384_v58  ;;  %v1443_v3 = vrot.slane %v1395_v61, 7  ;;  %v7402_v1 = vmul.f32 %v6642_v9, %v1510_v31  ;;  %v7405_v15 = vadd.f32 %v7386_v6, %v2585_v4  ;;  %v8808_v61 = vld [vmem:[#allocation66_spill] sm:$0xff]  ;;  %v8811_v16 = vrot.slane %v8810_v10, 1 }
 0x299   : > { %8799 = vst [vmem:[#allocation57_spill] sm:$0xff] %v7388_v18  ;;  %v7399_v32 = vsel %vm1414_vm11, %v8801_v50, %v1437_v0  ;;  %v8809_v50 = vld [vmem:[#allocation68_spill] sm:$0xff]  ;;  %v8814_v26 = vrot.slane %v8813_v38, 2 }
 0x29a   : > { %8802 = vst [vmem:[#allocation70_spill] sm:$0xff] %v7405_v15  ;;  %v1601_v5 = vmul.f32 %v6608_v40, %v7399_v32  ;;  %v7411_v2 = vmul.f32 %v6647_v60, %v7399_v32  ;;  %v2098_v28 = vmul.f32 %v7078_v52, %v7399_v32  ;;  %v2225_v39 = vmul.f32 %v6179_v53, %v7399_v32  ;;  %v1366_v34 = vpop.f32.mrf.mxu3 }
 0x29b   : > { %v1444_v36 = vsel %vm1414_vm11, %v1439_v51, %v1443_v3  ;;  %1480 = vst.msk [vmem:[#allocation3 + $0x98] sm:$0x1] %vm589_vm15, %v1443_v3  ;;  %v2479_v41 = vmul.f32 %v8803_v62, %v7399_v32  ;;  %v1511_v37 = vmul.f32 %v8804_v27, %v7399_v32  ;;  %v1766_v12 = vmul.f32 %v7394_v59, %v7399_v32 }
 0x29c   : > { %1478 = vst.msk [vmem:[#allocation3 + $0x88] sm:$0xff] %vm586_vm10, %v1444_v36  ;;  %v7429_v31 = vmul.f32 %v8805_v48, %v1601_v5  ;;  %v8611_v42 = vrot.slane %v7411_v2, 1  ;;  %v7435_v33 = vmul.f32 %v8806_v23, %v2098_v28  ;;  %v2248_v4 = vmul.f32 %v8807_v7, %v2225_v39 }
 0x29d   : > { %v7417_v21 = vld [vmem:[#allocation3 + $0x78] sm:$0xff]  ;;  %v2341_v63 = vmul.f32 %v8808_v61, %v1601_v5  ;;  %v2504_v3 = vmul.f32 %v8809_v50, %v2479_v41  ;;  %v1441_v5 = vrot.slane %v1366_v34, 7 }
 0x29e   : > { %v2099_v51 = vmul.f32 %v7078_v52, %v7417_v21  ;;  %v1512_v36 = vmul.f32 %v8804_v27, %v7417_v21  ;;  %v2007_v43 = vsel %vm1648_vm13, %v8811_v16, %v8611_v42  ;;  %v8612_v39 = vrot.slane %v7435_v33, 2 }
 0x29f   : > { %v2044_v41 = vadd.f32 %v2007_v43, %v8812_v22  ;;  %v2385_v20 = vrot.slane %v2341_v63, 1  ;;  %v2548_v44 = vrot.slane %v2504_v3, 2  ;;  %v7460_v16 = vmul.f32 %v6640_v14, %v1511_v37  ;;  %1479 = vst [vmem:[#allocation3 + $0x90] sm:$0x1] %v1441_v5  ;;  %v8815_v43 = vld [vmem:[#allocation78_spill] sm:$0xff]  ;;  %v8817_v3 = vld [vmem:[#allocation79_spill] sm:$0xff] }
 0x2a0   : > { %v7449_v28 = vmul.f32 %v6695_v29, %v2099_v51  ;;  %v2170_v58 = vsel %vm1813_vm14, %v8814_v26, %v8612_v39  ;;  %v1534_v51 = vmul.f32 %v6642_v9, %v1512_v36  ;;  %v7464_v42 = vsel %vm1414_vm11, %v1437_v0, %v1441_v5  ;;  %v8819_v37 = vld [vmem:[#allocation54_spill] sm:$0xff] }
 0x2a1   : > { %v2207_v22 = vadd.f32 %v2170_v58, %v2044_v41  ;;  %v8816_v34 = vrot.slane %v8815_v43, 1  ;;  %v8818_v38 = vrot.slane %v8817_v3, 2  ;;  %1477 = vst [vmem:[#allocation3 + $0x80] sm:$0xff] %v7464_v42  ;;  %v2318_v14 = vmul.f32 %v6608_v40, %v7464_v42 }
 0x2a2   : > { %v2481_v0 = vmul.f32 %v7078_v52, %v7464_v42  ;;  %v7480_v58 = vmul.f32 %v6608_v40, %v7417_v21  ;;  %v8820_v43 = vrot.slane %v7429_v31, 1  ;;  %v1767_v10 = vmul.f32 %v7394_v59, %v7417_v21 }
 0x2a3   : > { %v2386_v63 = vsel %vm1648_vm13, %v8816_v34, %v2385_v20  ;;  %v2549_v26 = vsel %vm1813_vm14, %v8818_v38, %v2548_v44  ;;  %v1554_v36 = vld [vmem:[#allocation3 + $0x88] sm:$0x1]  ;;  %v2264_v41 = vadd.f32 %v2248_v4, %v2207_v22  ;;  %v7492_v55 = vmul.f32 %v8808_v61, %v2318_v14 }
 0x2a4   : > { %v2425_v9 = vadd.f32 %v2386_v63, %v8819_v37  ;;  %v1718_v5 = vld [vmem:[#allocation3 + $0x88] sm:$0x3]  ;;  %v8823_v63 = vld [vmem:[#allocation52_spill] sm:$0xff]  ;;  %v1604_v39 = vmul.f32 %v6608_v40, %v1554_v36  ;;  %v7495_v46 = vmul.f32 %v8809_v50, %v2481_v0 }
 0x2a5   : > { %v8821_v34 = vld [vmem:[#allocation75_spill] sm:$0xff]  ;;  %v1791_v37 = vmul.f32 %v8823_v63, %v1766_v12  ;;  %v8618_v12 = vrot.slane %v7492_v55, 1 }
 0x2a6   : > { %v8822_v3 = vrot.slane %v8821_v34, 1  ;;  %v7497_v4 = vadd.f32 %v2549_v26, %v2425_v9  ;;  %v8824_v22 = vld [vmem:[#allocation55_spill] sm:$0xff]  ;;  %v2552_v36 = vrot.slane %v7495_v46, 2  ;;  %v1894_v9 = vmul.f32 %v8794_v19, %v7399_v32 }
 0x2a7   : > { %v1627_v34 = vmul.f32 %v8824_v22, %v7480_v58  ;;  %v1629_v14 = vmul.f32 %v8824_v22, %v1604_v39  ;;  %v1840_v49 = vrot.slane %v1791_v37, 2 }
 0x2a8   : > { %v1676_v38 = vsel %vm1648_vm13, %v8822_v3, %v8820_v43  ;;  %v1769_v43 = vmul.f32 %v7371_v13, %v1718_v5  ;;  %v8825_v3 = vld [vmem:[#allocation58_spill] sm:$0xff] }
 0x2a9   : > { %v1711_v15 = vadd.f32 %v1676_v38, %v1531_v45  ;;  %v1792_v24 = vmul.f32 %v8825_v3, %v1767_v10  ;;  %v1677_v6 = vrot.slane %v1627_v34, 1  ;;  %v2390_v45 = vsel %vm1648_vm13, %v2385_v20, %v8618_v12  ;;  %v8826_v38 = vld [vmem:[#allocation84_spill] sm:$0xff]  ;;  %v1553_v22 = vld [vmem:[#allocation3 + $0x80] sm:$0x1] }
 0x2aa   : > { %v1794_v0 = vmul.f32 %v8825_v3, %v1769_v43  ;;  %v2553_v10 = vsel %vm1813_vm14, %v2548_v44, %v2552_v36  ;;  %v1681_v5 = vrot.slane %v1629_v14, 1  ;;  %v8827_v18 = vrot.slane %v8826_v38, 2  ;;  %v8828_v34 = vld [vmem:[#allocation86_spill] sm:$0xff] }
 0x2ab   : > { %v1842_v26 = vrot.slane %v1792_v24, 2  ;;  %v2427_v37 = vadd.f32 %v2390_v45, %v2264_v41  ;;  %v8829_v24 = vrot.slane %v8828_v34, 1  ;;  %v1717_v32 = vld [vmem:[#allocation3 + $0x80] sm:$0x3]  ;;  %v8830_v3 = vrot.slane %v7109_v8, 2  ;;  %v7528_v41 = vld [vmem:[#allocation3 + $0x88] sm:$0xff] }
 0x2ac   : > { %v1841_v39 = vsel %vm1813_vm14, %v8827_v18, %v1840_v49  ;;  %v1846_v12 = vrot.slane %v1794_v0, 2  ;;  %v1603_v62 = vmul.f32 %v6608_v40, %v1553_v22  ;;  %v1682_v44 = vsel %vm1648_vm13, %v1677_v6, %v1681_v5  ;;  %v1940_v22 = vld [vmem:[#allocation3 + $0x98] sm:$0x1] }
 0x2ad   : > { %v1678_v43 = vsel %vm1648_vm13, %v8829_v24, %v1677_v6  ;;  %v1843_v20 = vsel %vm1813_vm14, %v8830_v3, %v1842_v26  ;;  %v1768_v18 = vmul.f32 %v7371_v13, %v1717_v32  ;;  %v7530_v45 = vadd.f32 %v2553_v10, %v2427_v37 }
 0x2ae   : > { %v1712_v14 = vadd.f32 %v1678_v43, %v7402_v1  ;;  %v1714_v38 = vadd.f32 %v1682_v44, %v1534_v51  ;;  %v1847_v34 = vsel %vm1813_vm14, %v1842_v26, %v1846_v12  ;;  %v1876_v24 = vadd.f32 %v1841_v39, %v1711_v15  ;;  %v8831_v26 = vld [vmem:[#allocation59_spill] sm:$0xff] }
 0x2af   : > { %v1628_v8 = vmul.f32 %v8805_v48, %v1603_v62  ;;  %v1793_v0 = vmul.f32 %v8823_v63, %v1768_v18  ;;  %v1895_v6 = vmul.f32 %v8794_v19, %v7417_v21  ;;  %v3209_v1 = vpack.c.bf16 %v7530_v45, %v7497_v4  ;;  %v1939_v63 = vld [vmem:[#allocation3 + $0x90] sm:$0x1] }
 0x2b0   : > { %v1877_v3 = vadd.f32 %v1843_v20, %v1712_v14  ;;  %v1879_v5 = vadd.f32 %v1847_v34, %v1714_v38  ;;  %v1896_v10 = vmul.f32 %v8804_v27, %v7464_v42  ;;  %v1897_v51 = vmul.f32 %v8804_v27, %v7528_v41 }
 0x2b1   : > { %v1679_v12 = vrot.slane %v1628_v8, 1  ;;  %v1844_v15 = vrot.slane %v1793_v0, 2  ;;  %v1917_v62 = vmul.f32 %v8831_v26, %v1894_v9  ;;  %v1918_v48 = vmul.f32 %v8770_v57, %v1895_v6  ;;  %3223 = vrot.lane.b32.xlu2 %v3209_v1, %s5682_s21  ;;  %v2052_v0 = vld [vmem:[#allocation3 + $0x90] sm:$0x3]  ;;  %v2053_v6 = vld [vmem:[#allocation3 + $0x98] sm:$0x3] }
 0x2b2   : > { %v1919_v39 = vmul.f32 %v8831_v26, %v1896_v10  ;;  %v1920_v37 = vmul.f32 %v8770_v57, %v1897_v51  ;;  %v7550_v43 = vmul.f32 %v8771_v17, %v7417_v21  ;;  %v1962_v32 = vmul.f32 %v6647_v60, %v7464_v42 }
 0x2b3   : > { %v8832_v20 = vrot.slane %v7429_v31, 1  ;;  %v1845_v44 = vsel %vm1813_vm14, %v1840_v49, %v1844_v15  ;;  %v1933_v14 = vadd.f32 %v1917_v62, %v1876_v24  ;;  %v1934_v18 = vadd.f32 %v1918_v48, %v1877_v3 }
 0x2b4   : > { %v1936_v34 = vadd.f32 %v1920_v37, %v1879_v5  ;;  %v1963_v57 = vmul.f32 %v8771_v17, %v7528_v41  ;;  %v1964_v8 = vmul.f32 %v6647_v60, %v1939_v63  ;;  %v1965_v1 = vmul.f32 %v8771_v17, %v1940_v22 }
 0x2b5   : > { %v1680_v9 = vsel %vm1648_vm13, %v8832_v20, %v1679_v12  ;;  %v2008_v31 = vrot.slane %v7550_v43, 1  ;;  %v2010_v10 = vrot.slane %v1962_v32, 1  ;;  %v2100_v49 = vmul.f32 %v7394_v59, %v7464_v42  ;;  %v2213_v32 = vld [vmem:[#allocation3 + $0x90] sm:$0xff]  ;;  %v2214_v20 = vld [vmem:[#allocation3 + $0x98] sm:$0xff] }
 0x2b6   : > { %v1713_v38 = vadd.f32 %v1680_v9, %v7460_v16  ;;  %v2012_v3 = vrot.slane %v1963_v57, 1  ;;  %v2014_v51 = vrot.slane %v1964_v8, 1  ;;  %v2101_v16 = vmul.f32 %v7528_v41, %v7394_v59 }
 0x2b7   : > { %v8833_v5 = vrot.slane %v7411_v2, 1  ;;  %v2016_v12 = vrot.slane %v1965_v1, 1  ;;  %v2102_v15 = vmul.f32 %v2052_v0, %v7371_v13  ;;  %v2103_v17 = vmul.f32 %v2053_v6, %v7371_v13  ;;  %v8834_v6 = vld [vmem:[#allocation47_spill] sm:$0xff] }
 0x2b8   : > { %v1878_v24 = vadd.f32 %v1845_v44, %v1713_v38  ;;  %v2013_v62 = vsel %vm1648_vm13, %v2008_v31, %v2012_v3  ;;  %v2015_v48 = vsel %vm1648_vm13, %v2010_v10, %v2014_v51  ;;  %v2125_v2 = vmul.f32 %v8806_v23, %v2100_v49 }
 0x2b9   : > { %v2011_v60 = vsel %vm1648_vm13, %v8833_v5, %v2010_v10  ;;  %v2017_v37 = vsel %vm1648_vm13, %v2012_v3, %v2016_v12  ;;  %v2047_v59 = vadd.f32 %v2013_v62, %v1934_v18  ;;  %v2126_v22 = vmul.f32 %v6695_v29, %v2101_v16 }
 0x2ba   : > { %v1935_v26 = vadd.f32 %v1919_v39, %v1878_v24  ;;  %v2046_v63 = vadd.f32 %v2011_v60, %v1933_v14  ;;  %v2049_v44 = vadd.f32 %v2017_v37, %v1936_v34  ;;  %v2127_v13 = vmul.f32 %v8806_v23, %v2102_v15  ;;  %v8837_v37 = vld [vmem:[#allocation50_spill] sm:$0xff] }
 0x2bb   : > { %v2128_v39 = vmul.f32 %v6695_v29, %v2103_v17  ;;  %v2173_v38 = vrot.slane %v2125_v2, 2  ;;  %v2175_v57 = vrot.slane %v2126_v22, 2  ;;  %v2227_v14 = vmul.f32 %v8794_v19, %v7464_v42  ;;  %v2272_v17 = vld [vmem:[#allocation3 + $0xa0] sm:$0x1] }
 0x2bc   : > { %v2048_v9 = vadd.f32 %v2015_v48, %v1935_v26  ;;  %v2228_v18 = vmul.f32 %v8794_v19, %v7528_v41  ;;  %v2177_v8 = vrot.slane %v2127_v13, 2  ;;  %v2229_v1 = vmul.f32 %v2213_v32, %v8834_v6  ;;  %v2273_v26 = vld [vmem:[#allocation3 + $0xa8] sm:$0x1] }
 0x2bd   : > { %v2179_v0 = vrot.slane %v2128_v39, 2  ;;  %v2230_v10 = vmul.f32 %v2214_v20, %v8834_v6  ;;  %v8835_v34 = vrot.slane %v7435_v33, 2  ;;  %v8836_v29 = vrot.slane %v7449_v28, 2 }
 0x2be   : > { %v2250_v24 = vmul.f32 %v8807_v7, %v2227_v14  ;;  %v2251_v42 = vmul.f32 %v8781_v11, %v2228_v18  ;;  %v2178_v3 = vsel %vm1813_vm14, %v2173_v38, %v2177_v8  ;;  %v2252_v33 = vmul.f32 %v8807_v7, %v2229_v1  ;;  %v2435_v8 = vld [vmem:[#allocation3 + $0xa0] sm:$0x3] }
 0x2bf   : > { %v2174_v23 = vsel %vm1813_vm14, %v8835_v34, %v2173_v38  ;;  %v2176_v49 = vsel %vm1813_vm14, %v8836_v29, %v2175_v57  ;;  %v2180_v51 = vsel %vm1813_vm14, %v2175_v57, %v2179_v0  ;;  %v2211_v60 = vadd.f32 %v2178_v3, %v2048_v9  ;;  %v8838_v38 = vld [vmem:[#allocation48_spill] sm:$0xff]  ;;  %v2436_v0 = vld [vmem:[#allocation3 + $0xa8] sm:$0x3] }
 0x2c0   : > { %v2209_v16 = vadd.f32 %v2174_v23, %v2046_v63  ;;  %v2210_v5 = vadd.f32 %v2176_v49, %v2047_v59  ;;  %v2212_v12 = vadd.f32 %v2180_v51, %v2049_v44  ;;  %v2253_v15 = vmul.f32 %v8781_v11, %v2230_v10 }
 0x2c1   : > { %v2296_v2 = vsel %vm1414_vm11, %v6608_v40, %v8837_v37  ;;  %v2319_v22 = vmul.f32 %v7528_v41, %v6608_v40  ;;  %v2268_v13 = vadd.f32 %v2252_v33, %v2211_v60  ;;  %v2322_v44 = vmul.f32 %v2272_v17, %v8837_v37 }
 0x2c2   : > { %v2266_v62 = vadd.f32 %v2250_v24, %v2209_v16  ;;  %v2267_v48 = vadd.f32 %v2251_v42, %v2210_v5  ;;  %v2269_v63 = vadd.f32 %v2253_v15, %v2212_v12  ;;  %v2320_v59 = vmul.f32 %v2296_v2, %v2213_v32 }
 0x2c3   : > { %v2321_v9 = vmul.f32 %v2296_v2, %v2214_v20  ;;  %v2323_v7 = vmul.f32 %v2273_v26, %v8837_v37  ;;  %v2344_v39 = vmul.f32 %v8784_v56, %v2319_v22  ;;  %v2458_v57 = vrot.slane %v8838_v38, 6 }
 0x2c4   : > { %v2345_v14 = vmul.f32 %v8808_v61, %v2320_v59  ;;  %v2482_v40 = vmul.f32 %v7528_v41, %v7078_v52  ;;  %v8839_v1 = vrot.slane %v7287_v54, 1  ;;  %v2347_v34 = vmul.f32 %v8808_v61, %v2322_v44 }
 0x2c5   : > { %v2346_v18 = vmul.f32 %v8784_v56, %v2321_v9  ;;  %v2348_v23 = vmul.f32 %v8784_v56, %v2323_v7  ;;  %v2391_v29 = vrot.slane %v2344_v39, 1  ;;  %v2459_v49 = vsel %vm1727_vm12, %v7058_v47, %v2458_v57 }
 0x2c6   : > { %v2009_v10 = vsel %vm1648_vm13, %v8839_v1, %v2008_v31  ;;  %v2393_v24 = vrot.slane %v2345_v14, 1  ;;  %v2483_v3 = vmul.f32 %v2459_v49, %v2213_v32  ;;  %v2484_v51 = vmul.f32 %v2459_v49, %v2214_v20 }
 0x2c7   : > { %v2395_v42 = vrot.slane %v2346_v18, 1  ;;  %v2397_v16 = vrot.slane %v2347_v34, 1  ;;  %v2399_v52 = vrot.slane %v2348_v23, 1  ;;  %v2485_v41 = vmul.f32 %v2458_v57, %v2435_v8 }
 0x2c8   : > { %v2486_v43 = vmul.f32 %v2458_v57, %v2436_v0  ;;  %v8840_v54 = vrot.slane %v7492_v55, 1  ;;  %v2507_v5 = vmul.f32 %v8787_v25, %v2482_v40  ;;  %v2508_v60 = vmul.f32 %v8809_v50, %v2483_v3  ;;  %v8843_v40 = vld [vmem:[#allocation82_spill] sm:$0xff] }
 0x2c9   : > { %v2396_v61 = vsel %vm1648_vm13, %v2391_v29, %v2395_v42  ;;  %v2398_v47 = vsel %vm1648_vm13, %v2393_v24, %v2397_v16  ;;  %v2400_v12 = vsel %vm1648_vm13, %v2395_v42, %v2399_v52  ;;  %v2509_v17 = vmul.f32 %v8787_v25, %v2484_v51  ;;  %v8848_v51 = vld [vmem:[#allocation63_spill] sm:$0xff] }
 0x2ca   : > { %v2394_v31 = vsel %vm1648_vm13, %v8840_v54, %v2393_v24  ;;  %v2430_v20 = vadd.f32 %v2396_v61, %v2267_v48  ;;  %v2431_v33 = vadd.f32 %v2398_v47, %v2268_v13  ;;  %v2432_v15 = vadd.f32 %v2400_v12, %v2269_v63  ;;  %v8850_v47 = vld [vmem:[#allocation71_spill] sm:$0xff] }
 0x2cb   : > { %v2429_v32 = vadd.f32 %v2394_v31, %v2266_v62  ;;  %v2510_v55 = vmul.f32 %v8809_v50, %v2485_v41  ;;  %v2511_v26 = vmul.f32 %v8787_v25, %v2486_v43  ;;  %v2554_v37 = vrot.slane %v2507_v5, 2  ;;  %v8849_v41 = vld [vmem:[#allocation70_spill] sm:$0xff] }
 0x2cc   : > { %v2556_v2 = vrot.slane %v2508_v60, 2  ;;  %v2045_v22 = vadd.f32 %v2009_v10, %v7328_v30  ;;  %v2558_v59 = vrot.slane %v2509_v17, 2  ;;  %v8841_v44 = vrot.slane %v7449_v28, 2 }
 0x2cd   : > { %v2560_v9 = vrot.slane %v2510_v55, 2  ;;  %v8842_v7 = vrot.slane %v7133_v35, 2  ;;  %v2226_v48 = vmul.f32 %v6179_v53, %v7417_v21  ;;  %v2562_v13 = vrot.slane %v2511_v26, 2  ;;  %v8853_v55 = vld [vmem:[#allocation61_spill] sm:$0xff] }
 0x2ce   : > { %v2557_v50 = vsel %vm1813_vm14, %v2552_v36, %v2556_v2  ;;  %v2342_v30 = vmul.f32 %v8784_v56, %v7480_v58  ;;  %v2559_v39 = vsel %vm1813_vm14, %v2554_v37, %v2558_v59  ;;  %v2480_v1 = vmul.f32 %v8843_v40, %v7417_v21  ;;  %v8844_v56 = vld [vmem:[#allocation57_spill] sm:$0xff] }
 0x2cf   : > { %v2172_v62 = vsel %vm1813_vm14, %v8842_v7, %v8841_v44  ;;  %v2561_v28 = vsel %vm1813_vm14, %v2556_v2, %v2560_v9  ;;  %v7648_v57 = vadd.f32 %v2557_v50, %v2429_v32  ;;  %v2249_v35 = vmul.f32 %v8781_v11, %v2226_v48  ;;  %v8845_v58 = vld [vmem:[#allocation53_spill] sm:$0xff]  ;;  %v8846_v11 = vld [vmem:[#allocation56_spill] sm:$0xff] }
 0x2d0   : > { %v2208_v63 = vadd.f32 %v2172_v62, %v2045_v22  ;;  %v2563_v14 = vsel %vm1813_vm14, %v2558_v59, %v2562_v13  ;;  %v2593_v18 = vadd.f32 %v2559_v39, %v2430_v20  ;;  %v7652_v8 = vadd.f32 %v2561_v28, %v2431_v33  ;;  %v8852_v20 = vld [vmem:[#allocation60_spill] sm:$0xff] }
 0x2d1   : > { %v2387_v46 = vrot.slane %v2342_v30, 1  ;;  %v2595_v36 = vadd.f32 %v2563_v14, %v2432_v15  ;;  %v2601_v10 = vadd.f32 %v8845_v58, %v8844_v56  ;;  %v8847_v49 = vrot.slane %v8846_v11, 1 }
 0x2d2   : > { %v2265_v0 = vadd.f32 %v2249_v35, %v2208_v63  ;;  %v2604_v34 = vadd.f32 %v8845_v58, %v2593_v18  ;;  %v3210_v23 = vpack.c.bf16 %v7652_v8, %v7648_v57  ;;  %v2505_v21 = vmul.f32 %v8787_v25, %v2480_v1 }
 0x2d3   : > { %v2388_v24 = vsel %vm1648_vm13, %v8847_v49, %v2387_v46  ;;  %v2392_v42 = vsel %vm1648_vm13, %v2387_v46, %v2391_v29  ;;  %v2605_v3 = vadd.f32 %v8845_v58, %v2595_v36  ;;  %v2608_v43 = vsel %vm586_vm10, %v8849_v41, -inf }
 0x2d4   : > { %v2426_v16 = vadd.f32 %v2388_v24, %v8848_v51  ;;  %v2428_v52 = vadd.f32 %v2392_v42, %v2265_v0  ;;  %3225 = vrot.lane.b32.xlu0 %v3210_v23, %s5682_s21  ;;  %v2614_v54 = vsel %vm586_vm10, %v2604_v34, -inf  ;;  %v2550_v31 = vrot.slane %v2505_v21, 2  ;;  %s4380_s21 = scalar_lea.sflag [#allocation6], %s5898_s19 }
 0x2d5   : > { %v2609_v61 = vsel %vm586_vm10, %v2601_v10, -inf  ;;  %v2615_v5 = vmax.f32 %v2608_v43, %v2614_v54  ;;  %v2616_v29 = vsel %vm586_vm10, %v2605_v3, -inf  ;;  %v8851_v12 = vrot.slane %v8850_v47, 2 }
 0x2d6   : > { %v2617_v60 = vmax.f32 %v2609_v61, %v2616_v29  ;;  %v2555_v25 = vsel %vm1813_vm14, %v2550_v31, %v2554_v37  ;;  %v2598_v33 = vadd.f32 %v8845_v58, %v8852_v20  ;;  %v2599_v26 = vadd.f32 %v8845_v58, %v8853_v55 }
 0x2d7   : > { %v2551_v32 = vsel %vm1813_vm14, %v8851_v12, %v2550_v31  ;;  %v2591_v17 = vadd.f32 %v2555_v25, %v2428_v52 }
 0x2d8   : > { %v2589_v15 = vadd.f32 %v2551_v32, %v2426_v16  ;;  %v2619_v2 = vmax.f32 %v2615_v5, %v2617_v60  ;;  %v2606_v9 = vsel %vm586_vm10, %v2598_v33, -inf  ;;  %v2607_v44 = vsel %vm586_vm10, %v2599_v26, -inf }
 0x2d9   : > { %v2603_v59 = vadd.f32 %v8845_v58, %v2591_v17 }
 0x2da   : > { %v2602_v22 = vadd.f32 %v8845_v58, %v2589_v15 }
 0x2db   : > { %v2612_v37 = vsel %vm586_vm10, %v2603_v59, -inf }
 0x2dc   : > { %v2610_v7 = vsel %vm586_vm10, %v2602_v22, -inf  ;;  %v2613_v48 = vmax.f32 %v2607_v44, %v2612_v37 }
 0x2dd   : > { %v2611_v62 = vmax.f32 %v2606_v9, %v2610_v7 }
 0x2df   : > { %v2618_v50 = vmax.f32 %v2611_v62, %v2613_v48 }
 0x2e1   : > { %v2620_v13 = vmax.f32 %v2618_v50, %v2619_v2 }
 0x2e3   : > { %v2621_v63 = vrot.slane %v2620_v13, 4 }
 0x2e5   : > { %v2622_v30 = vmax.f32 %v2620_v13, %v2621_v63 }
 0x2e7   : > { %v2623_v39 = vrot.slane %v2622_v30, 2 }
 0x2e9   : > { %v2624_v28 = vmax.f32 %v2622_v30, %v2623_v39 }
 0x2eb   : > { %v2625_v35 = vrot.slane %v2624_v28, 1 }
 0x2ed   : > { %v2626_v14 = vmax.f32 %v2624_v28, %v2625_v35 }
 0x2ef   : > { %v2627_v18 = vsub.f32 %v2598_v33, %v2626_v14  ;;  %v2628_v46 = vsub.f32 %v2599_v26, %v2626_v14  ;;  %v2629_v36 = vsub.f32 %v8849_v41, %v2626_v14  ;;  %v2630_v0 = vsub.f32 %v2601_v10, %v2626_v14 }
 0x2f0   : > { %v2631_v40 = vsub.f32 %v2602_v22, %v2626_v14  ;;  %v2632_v1 = vsub.f32 %v2603_v59, %v2626_v14  ;;  %v2633_v56 = vsub.f32 %v2604_v34, %v2626_v14  ;;  %v2634_v58 = vsub.f32 %v2605_v3, %v2626_v14 }
 0x2f1   : > { %v2635_v23 = vmul.f32 1.442695, %v2627_v18  ;;  %v2637_v11 = vmul.f32 1.442695, %v2628_v46  ;;  %v2639_v49 = vmul.f32 1.442695, %v2629_v36 }
 0x2f2   : > { %v2641_v24 = vmul.f32 1.442695, %v2630_v0  ;;  %v2643_v42 = vmul.f32 1.442695, %v2631_v40  ;;  %v2645_v51 = vmul.f32 1.442695, %v2632_v1 }
 0x2f3   : > { %5326 = vpow2.f32 %v2635_v23  ;;  %v2647_v16 = vmul.f32 1.442695, %v2633_v56  ;;  %v2649_v10 = vmul.f32 1.442695, %v2634_v58  ;;  %v8854_v56 = vld [vmem:[#allocation73_spill] sm:$0xff]  ;;  %v8855_v23 = vld [vmem:[#allocation74_spill] sm:$0xff] }
 0x2f4   : > { %5328 = vpow2.f32 %v2637_v11 }
 0x2f5   : > { %5330 = vpow2.f32 %v2639_v49  ;;  %v8856_v49 = vld [vmem:[#allocation80_spill] sm:$0xff] }
 0x2f6   : > { %5332 = vpow2.f32 %v2641_v24 }
 0x2f7   : > { %5334 = vpow2.f32 %v2643_v42  ;;  %v8857_v42 = vld [vmem:[#allocation81_spill] sm:$0xff] }
 0x2f8   : > { %5336 = vpow2.f32 %v2645_v51 }
 0x2f9   : > { %v5327_v52 = vpop.eup %5326  ;;  %5338 = vpow2.f32 %v2647_v16 }
 0x2fa   : > { %v5329_v21 = vpop.eup %5328  ;;  %v2651_v41 = vsel %vm586_vm10, %v5327_v52, 0.0  ;;  %5340 = vpow2.f32 %v2649_v10 }
 0x2fb   : > { %v5331_v34 = vpop.eup %5330  ;;  %v2652_v3 = vsel %vm586_vm10, %v5329_v21, 0.0 }
 0x2fc   : > { %v5333_v43 = vpop.eup %5332  ;;  %v2653_v54 = vadd.f32 %v2652_v3, %v2651_v41  ;;  %v2654_v31 = vsel %vm586_vm10, %v5331_v34, 0.0 }
 0x2fd   : > { %v5335_v61 = vpop.eup %5334  ;;  %v2656_v29 = vsel %vm586_vm10, %v5333_v43, 0.0 }
 0x2fe   : > { %v2655_v5 = vadd.f32 %v2654_v31, %v2653_v54  ;;  %v5337_v60 = vpop.eup %5336  ;;  %v2658_v12 = vsel %vm586_vm10, %v5335_v61, 0.0 }
 0x2ff   : > { %v5339_v32 = vpop.eup %5338  ;;  %v2660_v20 = vsel %vm586_vm10, %v5337_v60, 0.0 }
 0x300   : > { %v2657_v47 = vadd.f32 %v2656_v29, %v2655_v5  ;;  %v5341_v33 = vpop.eup %5340  ;;  %v2662_v17 = vsel %vm586_vm10, %v5339_v32, 0.0  ;;  %v5070_v5 = vld [vmem:[#allocation13 + $0x74] sm:$0xf0]  ;;  %v5069_v29 = vld [vmem:[#allocation13 + $0x74] sm:$0xf] }
 0x301   : > { %v2664_v26 = vsel %vm586_vm10, %v5341_v33, 0.0 }
 0x302   : > { %v2659_v25 = vadd.f32 %v2658_v12, %v2657_v47  ;;  %v4728_v47 = vld [vmem:[#allocation13 + $0x78] sm:$0xf0]  ;;  %v4718_v12 = vld [vmem:[#allocation13 + $0x60] sm:$0xf] }
 0x304   : > { %v2661_v15 = vadd.f32 %v2660_v20, %v2659_v25  ;;  %v5067_v25 = vld [vmem:[#allocation13 + $0x64] sm:$0xf] }
 0x306   : > { %v2663_v55 = vadd.f32 %v2662_v17, %v2661_v15  ;;  %v4710_v15 = vld [vmem:[#allocation13 + $0x50] sm:$0xf]  ;;  %v5066_v17 = vld [vmem:[#allocation13 + $0x54] sm:$0xf0] }
 0x308   : > { %v2665_v2 = vadd.f32 %v2664_v26, %v2663_v55  ;;  %v5065_v55 = vld [vmem:[#allocation13 + $0x54] sm:$0xf]  ;;  %v4712_v26 = vld [vmem:[#allocation13 + $0x58] sm:$0xf0] }
 0x30a   : > { %v2666_v22 = vrot.slane %v2665_v2, 4 }
 0x30c   : > { %v2667_v59 = vadd.f32 %v2666_v22, %v2665_v2  ;;  %v4711_v2 = vor.u32 %v5066_v17, %v4710_v15  ;;  %v4715_v22 = vor.u32 %v5065_v55, %v4712_v26  ;;  %v5076_v15 = vld [vmem:[%s8465_s8 + $0x28] sm:$0xff] }
 0x30e   : > { %v2668_v9 = vrot.slane %v2667_v59, 2 }
 0x310   : > { %v2669_v44 = vadd.f32 %v2668_v9, %v2667_v59  ;;  %v4702_v59 = vld [vmem:[#allocation13 + $0x40] sm:$0xf]  ;;  %v5064_v9 = vld [vmem:[#allocation13 + $0x44] sm:$0xf0] }
 0x312   : > { %v2670_v7 = vrot.slane %v2669_v44, 1 }
 0x314   : > { %v2671_v37 = vadd.f32 %v2670_v7, %v2669_v44  ;;  %v5063_v44 = vld [vmem:[#allocation13 + $0x44] sm:$0xf]  ;;  %v4704_v7 = vld [vmem:[#allocation13 + $0x48] sm:$0xf0] }
 0x316   : > { %5342 = vrcp.f32 %v2671_v37  ;;  %v2683_v13 = vand.u32 2147483648, %v2671_v37  ;;  %v2681_v30 = vand.u32 2147483647, %v2671_v37  ;;  %vm2677_vm2 = vweird.f32 %v2671_v37 }
 0x318   : > { %v2684_v28 = vor.u32 1.1754944e-38, %v2683_v13  ;;  %vm2682_vm4 = vcmp.eq.f32.partialorder %v2681_v30, 8.507059e+37  ;;  %v5061_v13 = vld [vmem:[#allocation13 + $0x34] sm:$0xf] }
 0x31c   : > { %v5343_v62 = vpop.eup %5342 }
 0x31d   : > { %v2673_v48 = vmul.f32 %v5343_v62, %v2671_v37  ;;  %vm2678_vm1 = vweird.f32 %v5343_v62  ;;  %v4703_v37 = vor.u32 %v5064_v9, %v4702_v59 }
 0x31e   : > { %vm2679_vm3 = vmor %vm2677_vm2, %vm2678_vm1 }
 0x31f   : > { %v2674_v50 = vsub.f32 1.0, %v2673_v48  ;;  %v5062_v48 = vld [vmem:[#allocation13 + $0x34] sm:$0xf0] }
 0x321   : > { %v2675_v63 = vmul.f32 %v5343_v62, %v2674_v50  ;;  %v4707_v50 = vor.u32 %v5063_v44, %v4704_v7  ;;  %v5075_v7 = vld [vmem:[%s8465_s8 + $0x20] sm:$0xff] }
 0x323   : > { %v2676_v39 = vadd.f32 %v5343_v62, %v2675_v63  ;;  %v4696_v63 = vld [vmem:[#allocation13 + $0x38] sm:$0xf0] }
 0x325   : > { %v2680_v35 = vsel %vm2679_vm3, %v5343_v62, %v2676_v39  ;;  %v4694_v62 = vld [vmem:[#allocation13 + $0x30] sm:$0xf] }
 0x326   : > { %v2685_v14 = vsel %vm2682_vm4, %v2684_v28, %v2680_v35  ;;  %v4695_v39 = vor.u32 %v5062_v48, %v4694_v62  ;;  %v4699_v28 = vor.u32 %v5061_v13, %v4696_v63  ;;  %v5074_v62 = vld [vmem:[%s8465_s8 + $0x18] sm:$0xff] }
 0x327   : > { %v2686_v18 = vmul.f32 %v5327_v52, %v2685_v14  ;;  %v2687_v46 = vmul.f32 %v5329_v21, %v2685_v14  ;;  %v2688_v36 = vmul.f32 %v5331_v34, %v2685_v14  ;;  %v2689_v0 = vmul.f32 %v5333_v43, %v2685_v14 }
 0x328   : > { %v2690_v40 = vmul.f32 %v5335_v61, %v2685_v14  ;;  %v2691_v1 = vmul.f32 %v5337_v60, %v2685_v14  ;;  %v2692_v21 = vmul.f32 %v5339_v32, %v2685_v14  ;;  %v2693_v34 = vmul.f32 %v5341_v33, %v2685_v14  ;;  %v5068_v32 = vld [vmem:[#allocation13 + $0x64] sm:$0xf0]  ;;  %v4686_v14 = vld [vmem:[#allocation13 + $0x20] sm:$0xf] }
 0x329   : > { %v2694_v58 = vmul.f32 %v2686_v18, %v8854_v56  ;;  %v2695_v11 = vmul.f32 %v2687_v46, %v8855_v23  ;;  %v2696_v24 = vmul.f32 %v2688_v36, %v8856_v49  ;;  %v2697_v51 = vmul.f32 %v2689_v0, %v8857_v42  ;;  %v5060_v18 = vld [vmem:[#allocation13 + $0x24] sm:$0xf0]  ;;  %v5059_v46 = vld [vmem:[#allocation13 + $0x24] sm:$0xf]  ;;  %v4688_v0 = vld [vmem:[#allocation13 + $0x28] sm:$0xf0] }
 0x32a   : > { %v2698_v16 = vmul.f32 %v2690_v40, %v7497_v4  ;;  %v2699_v10 = vmul.f32 %v2691_v1, %v7530_v45  ;;  %v2700_v43 = vmul.f32 %v2692_v21, %v7648_v57  ;;  %v2701_v54 = vmul.f32 %v2693_v34, %v7652_v8  ;;  %v4726_v45 = vld [vmem:[#allocation13 + $0x70] sm:$0xf]  ;;  %v4720_v8 = vld [vmem:[#allocation13 + $0x68] sm:$0xf0]  ;;  %v5058_v1 = vld [vmem:[#allocation13 + $0x14] sm:$0xf0] }
 0x32b   : > { %v2702_v41 = vpack.c.bf16 %v2695_v11, %v2694_v58  ;;  %v2703_v3 = vpack.c.bf16 %v2697_v51, %v2696_v24  ;;  %v4727_v60 = vor.u32 %v5070_v5, %v4726_v45  ;;  %v4731_v57 = vor.u32 %v5069_v29, %v4728_v47  ;;  %v4678_v40 = vld [vmem:[#allocation13 + $0x10] sm:$0xf]  ;;  %v5057_v58 = vld [vmem:[#allocation13 + $0x14] sm:$0xf]  ;;  %v4680_v23 = vld [vmem:[#allocation13 + $0x18] sm:$0xf0] }
 0x32c   : > { %v2704_v52 = vpack.c.bf16 %v2699_v10, %v2698_v16  ;;  %v2705_v31 = vpack.c.bf16 %v2701_v54, %v2700_v43  ;;  %v4719_v20 = vor.u32 %v5068_v32, %v4718_v12  ;;  %v4723_v33 = vor.u32 %v5067_v25, %v4720_v8  ;;  %v4670_v24 = vld [vmem:[#allocation13] sm:$0xf]  ;;  %v5056_v42 = vld [vmem:[#allocation13 + $0x4] sm:$0xf0]  ;;  %v5055_v51 = vld [vmem:[#allocation13 + $0x4] sm:$0xf] }
 0x32d   : > { %2706 = vxpose.xlu1.c.b16.start [1/4] (short) (narrow) %v2702_v41, 64  ;;  %2863 = vmatpush.bf16.msrb.mxu3 %v4727_v60  ;;  %v4687_v36 = vor.u32 %v5060_v18, %v4686_v14  ;;  %v4691_v56 = vor.u32 %v5059_v46, %v4688_v0  ;;  %v4679_v11 = vor.u32 %v5058_v1, %v4678_v40  ;;  %v4672_v10 = vld [vmem:[#allocation13 + $0x8] sm:$0xf0]  ;;  %v5078_v32 = vld [vmem:[%s8465_s8 + $0x38] sm:$0xff] }
 0x32e   : > { %2892 = vmatpush.bf16.msrb.mxu2 %v4731_v57  ;;  %v4683_v49 = vor.u32 %v5057_v58, %v4680_v23  ;;  %v4671_v16 = vor.u32 %v5056_v42, %v4670_v24  ;;  %v4675_v41 = vor.u32 %v5055_v51, %v4672_v10  ;;  %3170 = vmatpush.bf16.msrb.mxu0 %v5078_v32  ;;  %v5073_v58 = vld [vmem:[%s8465_s8 + $0x10] sm:$0xff]  ;;  %v5072_v51 = vld [vmem:[%s8465_s8 + $0x8] sm:$0xff] }
 0x331   : > { %2864 = vmatpush.bf16.msrb.mxu3 %v4719_v20 }
 0x332   : > { %2893 = vmatpush.bf16.msrb.mxu2 %v4723_v33  ;;  %v5077_v33 = vld [vmem:[%s8465_s8 + $0x30] sm:$0xff] }
 0x333   : > { %3171 = vmatpush.bf16.msrb.mxu0 %v5077_v33 }
 0x335   : > { %2865 = vmatpush.bf16.msrb.mxu3 %v4711_v2 }
 0x336   : > { %2894 = vmatpush.bf16.msrb.mxu2 %v4715_v22 }
 0x337   : > { %3172 = vmatpush.bf16.msrb.mxu0 %v5076_v15 }
 0x339   : > { %2866 = vmatpush.bf16.msrb.mxu3 %v4703_v37 }
 0x33a   : > { %2895 = vmatpush.bf16.msrb.mxu2 %v4707_v50 }
 0x33b   : > { %3173 = vmatpush.bf16.msrb.mxu0 %v5075_v7 }
 0x33d   : > { %2707 = vxpose.xlu1.c.b16.cont [2/4] (short) (narrow) %v2703_v3, 64  ;;  %2867 = vmatpush.bf16.msrb.mxu3 %v4695_v39 }
 0x33e   : > { %2896 = vmatpush.bf16.msrb.mxu2 %v4699_v28 }
 0x33f   : > { %3174 = vmatpush.bf16.msrb.mxu0 %v5074_v62 }
 0x341   : > { %2868 = vmatpush.bf16.msrb.mxu3 %v4687_v36 }
 0x342   : > { %2897 = vmatpush.bf16.msrb.mxu2 %v4691_v56 }
 0x343   : > { %3175 = vmatpush.bf16.msrb.mxu0 %v5073_v58 }
 0x345   : > { %2869 = vmatpush.bf16.msrb.mxu3 %v4679_v11 }
 0x346   : > { %2898 = vmatpush.bf16.msrb.mxu2 %v4683_v49 }
 0x347   : > { %3176 = vmatpush.bf16.msrb.mxu0 %v5072_v51 }
 0x349   : > { %2870 = vmatpush.bf16.msrb.mxu3 %v4671_v16 }
 0x34a   : > { %2899 = vmatpush.bf16.msrb.mxu2 %v4675_v41 }
 0x34d   : > { %2708 = vxpose.xlu1.c.b16.cont [3/4] (short) (narrow) %v2704_v52, 64 }
 0x35d   : > { %2709 = vxpose.xlu1.c.b16.end [4/4] (short) (narrow) %v2705_v31, 64  ;;  %v2921_v31 = vld [vmem:[#allocation12 + $0x1] sm:$0x1] }
 0x35e   : > { %5160 = vpush %v2921_v31 }
 0x38f   : > { %s5161_s17 = spop %5160 }
 0x3d9   : > { %v2714_v61 = vpop.trf.xlu1 }
 0x3da   : > { %4664 = vmatmul.msk.bf16.vlgmr.msra.gmra.mxu2 %vm586_vm10, %v2714_v61 }
 0x3e9   : > { %v2715_v4 = vpop.trf.xlu1 }
 0x3ea   : > { %4665 = vmatmul.msk.bf16.gmra.mxu2 %vm586_vm10, %v2715_v4 }
 0x3f9   : > { %v2716_v30 = vpop.trf.xlu1 }
 0x3fa   : > { %4666 = vmatmul.msk.bf16.gmra.mxu2 %vm586_vm10, %v2716_v30 }
 0x409   : > { %v2717_v35 = vpop.trf.xlu1 }
 0x40a   : > { %4667 = vmatmul.msk.bf16.gmra.mxu2 %vm586_vm10, %v2717_v35 }
 0x45d   : > { %v2743_v3 = vpop.f32.mrf.mxu2 }
 0x465   : > { %v2745_v52 = vpop.f32.mrf.mxu2 }
 0x466   : > { %v2763_v21 = vpack.c.bf16 %v2745_v52, %v2743_v3 }
 0x468   : > { %2871 = vmatmul.bf16.vlgmr.msrb.gmra.mxu3 %v2763_v21  ;;  %2900 = vmatmul.bf16.vlgmr.msrb.gmra.mxu2 %v2763_v21 }
 0x46d   : > { %v2748_v34 = vpop.f32.mrf.mxu2 }
 0x475   : > { %v2750_v43 = vpop.f32.mrf.mxu2 }
 0x476   : > { %v2764_v54 = vpack.c.bf16 %v2750_v43, %v2748_v34  ;;  %v7752_v43 = vstv %s5161_s17  ;;  %s4397_s17 = sshll.u32 %s4394_s29, 4  ;;  %s4398_s17 = int_to_ptr.hbm [resolvable:$true] %s4397_s17 }
 0x477   : > { %s5603_s23 = sshra.s32 %s4398_s17, 4  ;;  %s5604_s23 = int_to_ptr.hbm [resolvable:$true] %s5603_s23 }
 0x478   : > { %2876 = vmatmul.bf16.gmra.mxu3 %v2764_v54  ;;  %2905 = vmatmul.bf16.gmra.mxu2 %v2764_v54  ;;  %s5605_s2 = scalar_lea.hbm %s5604_s23, 64  ;;  %p5610_p12 = scmp.lt.s32.totalorder %s5604_s23, %s8470_s13 }
 0x479   : > { %p5606_p1 = scmp.ne.s32.totalorder %s5604_s23, %s5605_s2 }
 0x47b   : > { %p5607_p3 = pnand %p5606_p1, %p5864_p4 }
 0x47d   : > { %v2753_v61 = vpop.f32.mrf.mxu2  ;;  %p5608_p5 = pneg %p5607_p3 }
 0x485   : > { %v2755_v4 = vpop.f32.mrf.mxu2 }
 0x486   : > { %v2765_v45 = vpack.c.bf16 %v2755_v4, %v2753_v61 }
 0x488   : > { %2881 = vmatmul.bf16.gmra.mxu3 %v2765_v45  ;;  %2910 = vmatmul.bf16.gmra.mxu2 %v2765_v45  ;;  %v5071_v45 = vld [vmem:[%s8465_s8] sm:$0xff] }
 0x489   : > { %3177 = vmatpush.bf16.msrb.mxu0 %v5071_v45 }
 0x48d   : > { %v2758_v5 = vpop.f32.mrf.mxu2 }
 0x495   : > { %v2760_v29 = vpop.f32.mrf.mxu2 }
 0x496   : > { %v2766_v60 = vpack.c.bf16 %v2760_v29, %v2758_v5 }
 0x498   : > { %2886 = vmatmul.bf16.gmra.mxu3 %v2766_v60  ;;  %2915 = vmatmul.bf16.gmra.mxu2 %v2766_v60 }
 0x4eb   : > { %v7709_v47 = vpop.f32.mrf.mxu2  ;;  %v7727_v22 = vpop.f32.mrf.mxu3 }
 0x4ec   : > { %v4732_v12 = vmul.f32 -1.442695, %v7709_v47 }
 0x4ee   : > { %5344 = vpow2.f32 %v4732_v12 }
 0x4f3   : > { %v7715_v57 = vpop.f32.mrf.mxu2  ;;  %v2874_v18 = vpop.f32.mrf.mxu3 }
 0x4f4   : > { %v5345_v25 = vpop.eup %5344  ;;  %v4733_v8 = vmul.f32 -1.442695, %v7715_v57 }
 0x4f5   : > { %v2946_v20 = vadd.f32 1.0, %v5345_v25 }
 0x4f6   : > { %5346 = vpow2.f32 %v4733_v8 }
 0x4f7   : > { %5348 = vrcp.f32 %v2946_v20  ;;  %v2965_v39 = vand.u32 2147483648, %v2946_v20  ;;  %vm2959_vm6 = vweird.f32 %v2946_v20  ;;  %v2963_v35 = vand.u32 2147483647, %v2946_v20 }
 0x4f9   : > { %v2966_v0 = vor.u32 1.1754944e-38, %v2965_v39  ;;  %vm2964_vm8 = vcmp.eq.f32.partialorder %v2963_v35, 8.507059e+37 }
 0x4fb   : > { %v7724_v17 = vpop.f32.mrf.mxu2  ;;  %v7755_v61 = vpop.f32.mrf.mxu3 }
 0x4fc   : > { %v5347_v55 = vpop.eup %5346  ;;  %v4734_v26 = vmul.f32 -1.442695, %v7724_v17 }
 0x4fd   : > { %v5349_v2 = vpop.eup %5348  ;;  %v2947_v59 = vadd.f32 1.0, %v5347_v55 }
 0x4fe   : > { %v2955_v9 = vmul.f32 %v5349_v2, %v2946_v20  ;;  %5350 = vpow2.f32 %v4734_v26  ;;  %vm2960_vm5 = vweird.f32 %v5349_v2 }
 0x4ff   : > { %5352 = vrcp.f32 %v2947_v59  ;;  %vm2961_vm7 = vmor %vm2959_vm6, %vm2960_vm5  ;;  %v2978_v40 = vand.u32 2147483647, %v2947_v59  ;;  %v2980_v1 = vand.u32 2147483648, %v2947_v59  ;;  %vm2974_vm11 = vweird.f32 %v2947_v59 }
 0x500   : > { %v2956_v44 = vsub.f32 1.0, %v2955_v9 }
 0x501   : > { %vm2979_vm13 = vcmp.eq.f32.partialorder %v2978_v40, 8.507059e+37  ;;  %v2981_v10 = vor.u32 1.1754944e-38, %v2980_v1 }
 0x502   : > { %v2957_v37 = vmul.f32 %v5349_v2, %v2956_v44 }
 0x503   : > { %v7735_v48 = vpop.f32.mrf.mxu2 }
 0x504   : > { %v5351_v50 = vpop.eup %5350  ;;  %v2958_v13 = vadd.f32 %v5349_v2, %v2957_v37  ;;  %v4735_v63 = vmul.f32 -1.442695, %v7735_v48 }
 0x505   : > { %v5353_v30 = vpop.eup %5352  ;;  %v7738_v28 = vadd.f32 1.0, %v5351_v50  ;;  %v2879_v50 = vpop.f32.mrf.mxu3 }
 0x506   : > { %v2970_v14 = vmul.f32 %v5353_v30, %v2947_v59  ;;  %5354 = vpow2.f32 %v4735_v63  ;;  %v2962_v46 = vsel %vm2961_vm7, %v5349_v2, %v2958_v13  ;;  %vm2975_vm9 = vweird.f32 %v5353_v30 }
 0x507   : > { %5356 = vrcp.f32 %v7738_v28  ;;  %v2967_v23 = vsel %vm2964_vm8, %v2966_v0, %v2962_v46  ;;  %vm2976_vm12 = vmor %vm2974_vm11, %vm2975_vm9  ;;  %vm2989_vm15 = vweird.f32 %v7738_v28  ;;  %v2995_v8 = vand.u32 2147483648, %v7738_v28 }
 0x508   : > { %v2971_v36 = vsub.f32 1.0, %v2970_v14  ;;  %v3074_v3 = vmul.f32 %v2967_v23, %v7709_v47  ;;  %v2993_v33 = vand.u32 2147483647, %v7738_v28 }
 0x509   : > { %v2996_v9 = vor.u32 1.1754944e-38, %v2995_v8 }
 0x50a   : > { %v2972_v56 = vmul.f32 %v5353_v30, %v2971_v36  ;;  %v3086_v5 = vadd.f32 %v7752_v43, %v3074_v3  ;;  %vm2994_vm1 = vcmp.eq.f32.partialorder %v2993_v33, 8.507059e+37 }
 0x50b   : > { %v7744_v11 = vpop.f32.mrf.mxu2 }
 0x50c   : > { %v5355_v49 = vpop.eup %5354  ;;  %v2973_v24 = vadd.f32 %v5353_v30, %v2972_v56  ;;  %v4736_v42 = vmul.f32 -1.442695, %v7744_v11  ;;  %v3094_v55 = vmul.f32 %v3086_v5, %v7727_v22 }
 0x50d   : > { %v5357_v16 = vpop.eup %5356  ;;  %v2949_v41 = vadd.f32 1.0, %v5355_v49 }
 0x50e   : > { %v2977_v52 = vsel %vm2976_vm12, %v5353_v30, %v2973_v24  ;;  %v2985_v21 = vmul.f32 %v5357_v16, %v7738_v28  ;;  %5358 = vpow2.f32 %v4736_v42  ;;  %vm2990_vm14 = vweird.f32 %v5357_v16 }
 0x50f   : > { %v2982_v34 = vsel %vm2979_vm13, %v2981_v10, %v2977_v52  ;;  %5360 = vrcp.f32 %v2949_v41  ;;  %vm2991_vm0 = vmor %vm2989_vm15, %vm2990_vm14  ;;  %v3008_v44 = vand.u32 2147483647, %v2949_v41  ;;  %v3010_v7 = vand.u32 2147483648, %v2949_v41 }
 0x510   : > { %v3075_v54 = vmul.f32 %v2982_v34, %v7715_v57  ;;  %v2986_v31 = vsub.f32 1.0, %v2985_v21  ;;  %vm3004_vm3 = vweird.f32 %v2949_v41 }
 0x511   : > { %vm3009_vm5 = vcmp.eq.f32.partialorder %v3008_v44, 8.507059e+37  ;;  %v3011_v28 = vor.u32 1.1754944e-38, %v3010_v7 }
 0x512   : > { %v2987_v4 = vmul.f32 %v5357_v16, %v2986_v31  ;;  %v3087_v29 = vadd.f32 %v7752_v43, %v3075_v54 }
 0x513   : > { %v7762_v60 = vpop.f32.mrf.mxu2 }
 0x514   : > { %v5359_v47 = vpop.eup %5358  ;;  %v2988_v12 = vadd.f32 %v5357_v16, %v2987_v4  ;;  %v4737_v32 = vmul.f32 -1.442695, %v7762_v60  ;;  %v3095_v57 = vmul.f32 %v3087_v29, %v2874_v18 }
 0x515   : > { %v5361_v25 = vpop.eup %5360  ;;  %v2950_v20 = vadd.f32 1.0, %v5359_v47 }
 0x516   : > { %v3000_v15 = vmul.f32 %v5361_v25, %v2949_v41  ;;  %5362 = vpow2.f32 %v4737_v32  ;;  %v2992_v26 = vsel %vm2991_vm0, %v5357_v16, %v2988_v12  ;;  %v3102_v59 = vpack.c.bf16 %v3095_v57, %v3094_v55  ;;  %v2882_v41 = vpop.f32.mrf.mxu3 }
 0x517   : > { %5364 = vrcp.f32 %v2950_v20  ;;  %vm3005_vm2 = vweird.f32 %v5361_v25  ;;  %v2997_v62 = vsel %vm2994_vm1, %v2996_v9, %v2992_v26  ;;  %vm3019_vm7 = vweird.f32 %v2950_v20 }
 0x518   : > { %v3001_v2 = vsub.f32 1.0, %v3000_v15  ;;  %3178 = vmatmul.bf16.vlgmr.msrb.gmra.mxu0 %v3102_v59  ;;  %vm3006_vm4 = vmor %vm3004_vm3, %vm3005_vm2  ;;  %v3076_v14 = vmul.f32 %v2997_v62, %v7724_v17  ;;  %v3025_v23 = vand.u32 2147483648, %v2950_v20  ;;  %v3023_v42 = vand.u32 2147483647, %v2950_v20 }
 0x51a   : > { %v3002_v37 = vmul.f32 %v5361_v25, %v3001_v2  ;;  %v3088_v56 = vadd.f32 %v7752_v43, %v3076_v14  ;;  %v3026_v34 = vor.u32 1.1754944e-38, %v3025_v23  ;;  %vm3024_vm9 = vcmp.eq.f32.partialorder %v3023_v42, 8.507059e+37 }
 0x51b   : > { %v7769_v13 = vpop.f32.mrf.mxu2 }
 0x51c   : > { %v5363_v63 = vpop.eup %5362  ;;  %v3003_v30 = vadd.f32 %v5361_v25, %v3002_v37  ;;  %v4738_v22 = vmul.f32 -1.442695, %v7769_v13  ;;  %v3096_v21 = vmul.f32 %v3088_v56, %v7755_v61 }
 0x51d   : > { %v5365_v39 = vpop.eup %5364  ;;  %v2951_v35 = vadd.f32 1.0, %v5363_v63 }
 0x51e   : > { %v3007_v18 = vsel %vm3006_vm4, %v5361_v25, %v3003_v30  ;;  %v3015_v46 = vmul.f32 %v5365_v39, %v2950_v20  ;;  %5366 = vpow2.f32 %v4738_v22  ;;  %vm3020_vm6 = vweird.f32 %v5365_v39  ;;  %v2884_v33 = vpop.f32.mrf.mxu3 }
 0x51f   : > { %v3012_v36 = vsel %vm3009_vm5, %v3011_v28, %v3007_v18  ;;  %5368 = vrcp.f32 %v2951_v35  ;;  %vm3021_vm8 = vmor %vm3019_vm7, %vm3020_vm6  ;;  %v3040_v45 = vand.u32 2147483648, %v2951_v35  ;;  %v3038_v29 = vand.u32 2147483647, %v2951_v35 }
 0x520   : > { %v3077_v0 = vmul.f32 %v3012_v36, %v7735_v48  ;;  %v3016_v40 = vsub.f32 1.0, %v3015_v46  ;;  %vm3034_vm12 = vweird.f32 %v2951_v35 }
 0x521   : > { %v3041_v25 = vor.u32 1.1754944e-38, %v3040_v45  ;;  %vm3039_vm14 = vcmp.eq.f32.partialorder %v3038_v29, 8.507059e+37  ;;  %v3222_v45 = vpop.permute.xlu0 %3221 }
 0x522   : > { %v3017_v1 = vmul.f32 %v5365_v39, %v3016_v40  ;;  %v3089_v58 = vadd.f32 %v7752_v43, %v3077_v0 }
 0x523   : > { %v7776_v49 = vpop.f32.mrf.mxu2 }
 0x524   : > { %v5367_v24 = vpop.eup %5366  ;;  %v3018_v17 = vadd.f32 %v5365_v39, %v3017_v1  ;;  %v4739_v51 = vmul.f32 -1.442695, %v7776_v49  ;;  %v3097_v16 = vmul.f32 %v3089_v58, %v2879_v50 }
 0x525   : > { %v5369_v10 = vpop.eup %5368  ;;  %v2952_v48 = vadd.f32 1.0, %v5367_v24 }
 0x526   : > { %v3022_v3 = vsel %vm3021_vm8, %v5365_v39, %v3018_v17  ;;  %v3030_v52 = vmul.f32 %v5369_v10, %v2951_v35  ;;  %5370 = vpow2.f32 %v4739_v51  ;;  %v3103_v31 = vpack.c.bf16 %v3097_v16, %v3096_v21 }
 0x527   : > { %5372 = vrcp.f32 %v2952_v48  ;;  %v3027_v4 = vsel %vm3024_vm9, %v3026_v34, %v3022_v3  ;;  %vm3035_vm11 = vweird.f32 %v5369_v10  ;;  %vm3049_vm0 = vweird.f32 %v2952_v48 }
 0x528   : > { %v3031_v54 = vsub.f32 1.0, %v3030_v52  ;;  %3183 = vmatmul.bf16.gmra.mxu0 %v3103_v31  ;;  %v3078_v12 = vmul.f32 %v3027_v4, %v7744_v11  ;;  %vm3036_vm13 = vmor %vm3034_vm12, %vm3035_vm11  ;;  %v3055_v9 = vand.u32 2147483648, %v2952_v48  ;;  %v3053_v7 = vand.u32 2147483647, %v2952_v48  ;;  %v3220_v4 = vpop.permute.xlu2 %3219 }
 0x529   : > { %v3226_v29 = vpop.permute.xlu0 %3225 }
 0x52a   : > { %v3032_v5 = vmul.f32 %v5369_v10, %v3031_v54  ;;  %v3090_v55 = vadd.f32 %v7752_v43, %v3078_v12  ;;  %v3056_v39 = vor.u32 1.1754944e-38, %v3055_v9  ;;  %vm3054_vm2 = vcmp.eq.f32.partialorder %v3053_v7, 8.507059e+37  ;;  %v4890_v12 = vld [vmem:[%s8466_s9 + $0xe0] sm:$0xf]  ;;  %v5105_v7 = vld [vmem:[%s8466_s9 + $0xcc] sm:$0xf0] }
 0x52b   : > { %v4874_v9 = vld [vmem:[%s8466_s9 + $0xc0] sm:$0xf] }
 0x52c   : > { %v5371_v47 = vpop.eup %5370  ;;  %v3033_v32 = vadd.f32 %v5369_v10, %v3032_v5  ;;  %v3098_v37 = vmul.f32 %v3090_v55, %v2882_v41 }
 0x52d   : > { %v5373_v57 = vpop.eup %5372  ;;  %v2953_v61 = vadd.f32 1.0, %v5371_v47  ;;  %v7804_v47 = vld [vmem:[#allocation10 + $0x5] ss:$0 sm:$0xff] }
 0x52e   : > { %v3037_v8 = vsel %vm3036_vm13, %v5369_v10, %v3033_v32  ;;  %v3045_v20 = vmul.f32 %v5373_v57, %v2952_v48  ;;  %vm3050_vm15 = vweird.f32 %v5373_v57  ;;  %v5109_v32 = vld [vmem:[%s8466_s9 + $0xec] sm:$0xf0] }
 0x52f   : > { %v3042_v15 = vsel %vm3039_vm14, %v3041_v25, %v3037_v8  ;;  %5374 = vrcp.f32 %v2953_v61  ;;  %vm3051_vm1 = vmor %vm3049_vm0, %vm3050_vm15  ;;  %v3070_v14 = vand.u32 2147483648, %v2953_v61  ;;  %v3068_v46 = vand.u32 2147483647, %v2953_v61  ;;  %v4892_v8 = vld [vmem:[%s8466_s9 + $0xf0] sm:$0xf0] }
 0x530   : > { %v3079_v26 = vmul.f32 %v3042_v15, %v7762_v60  ;;  %v3046_v2 = vsub.f32 1.0, %v3045_v20  ;;  %v2887_v60 = vpop.f32.mrf.mxu3  ;;  %vm3064_vm4 = vweird.f32 %v2953_v61  ;;  %v3224_v5 = vpop.permute.xlu2 %3223  ;;  %v4898_v20 = vld [vmem:[%s8466_s9 + $0xe8] sm:$0xf] }
 0x531   : > { %v3071_v40 = vor.u32 1.1754944e-38, %v3070_v14  ;;  %vm3069_vm6 = vcmp.eq.f32.partialorder %v3068_v46, 8.507059e+37  ;;  %v8858_v15 = vld [vmem:[#allocation37_spill] sm:$0xff]  ;;  %v4858_v46 = vld [vmem:[%s8466_s9 + $0xa0] sm:$0xf] }
 0x532   : > { %v3091_v59 = vadd.f32 %v7752_v43, %v3079_v26  ;;  %v3047_v11 = vmul.f32 %v5373_v57, %v3046_v2 }
 0x534   : > { %v3048_v44 = vadd.f32 %v5373_v57, %v3047_v11  ;;  %v3099_v62 = vmul.f32 %v3091_v59, %v2884_v33  ;;  %v5110_v33 = vld [vmem:[%s8466_s9 + $0xf4] sm:$0xf0]  ;;  %v5108_v59 = vld [vmem:[%s8466_s9 + $0xec] sm:$0xf]  ;;  %v4900_v11 = vld [vmem:[%s8466_s9 + $0xf8] sm:$0xf0] }
 0x535   : > { %v5375_v50 = vpop.eup %5374  ;;  %v4899_v2 = vor.u32 %v5110_v33, %v4898_v20  ;;  %v4834_v20 = vld [vmem:[%s8466_s9 + $0x68] sm:$0xf]  ;;  %v8860_v33 = vld [vmem:[#allocation38_spill] sm:$0xff] }
 0x536   : > { %v3052_v63 = vsel %vm3051_vm1, %v5373_v57, %v3048_v44  ;;  %v3060_v30 = vmul.f32 %v5375_v50, %v2953_v61  ;;  %v3104_v22 = vpack.c.bf16 %v3099_v62, %v3098_v37  ;;  %vm3065_vm3 = vweird.f32 %v5375_v50  ;;  %v5107_v57 = vld [vmem:[%s8466_s9 + $0xe4] sm:$0xf]  ;;  %v4876_v62 = vld [vmem:[%s8466_s9 + $0xd0] sm:$0xf0] }
 0x537   : > { %v3057_v35 = vsel %vm3054_vm2, %v3056_v39, %v3052_v63  ;;  %vm3066_vm5 = vmor %vm3064_vm4, %vm3065_vm3  ;;  %v4891_v61 = vor.u32 %v5109_v32, %v4890_v12  ;;  %v4895_v26 = vor.u32 %v5107_v57, %v4892_v8  ;;  %v4903_v44 = vor.u32 %v5108_v59, %v4900_v11  ;;  %v5103_v37 = vld [vmem:[%s8466_s9 + $0xc4] sm:$0xf]  ;;  %3862 = vmatpush.bf16.msra.mxu0 %v4899_v2  ;;  %v5106_v39 = vld [vmem:[%s8466_s9 + $0xd4] sm:$0xf0] }
 0x538   : > { %v3061_v28 = vsub.f32 1.0, %v3060_v30  ;;  %3188 = vmatmul.bf16.gmra.mxu0 %v3104_v22  ;;  %v3080_v36 = vmul.f32 %v3057_v35, %v7769_v13  ;;  %v2889_v17 = vpop.f32.mrf.mxu3  ;;  %v4875_v63 = vor.u32 %v5105_v7, %v4874_v9  ;;  %v4879_v30 = vor.u32 %v5103_v37, %v4876_v62  ;;  %v4882_v22 = vld [vmem:[%s8466_s9 + $0xc8] sm:$0xf]  ;;  %v4884_v35 = vld [vmem:[%s8466_s9 + $0xd8] sm:$0xf0] }
 0x539   : > { %3804 = vmatpush.bf16.msra.mxu3 %v4891_v61  ;;  %3833 = vmatpush.bf16.msra.mxu2 %v4895_v26  ;;  %v4826_v12 = vld [vmem:[%s8466_s9 + $0x60] sm:$0xf]  ;;  %v5093_v32 = vld [vmem:[%s8466_s9 + $0x6c] sm:$0xf0]  ;;  %v5091_v61 = vld [vmem:[%s8466_s9 + $0x64] sm:$0xf] }
 0x53a   : > { %v3062_v18 = vmul.f32 %v5375_v50, %v3061_v28  ;;  %v3092_v58 = vadd.f32 %v7752_v43, %v3080_v36  ;;  %v5104_v28 = vld [vmem:[%s8466_s9 + $0xcc] sm:$0xf]  ;;  %v5101_v36 = vld [vmem:[%s8466_s9 + $0xac] sm:$0xf0]  ;;  %v4828_v8 = vld [vmem:[%s8466_s9 + $0x70] sm:$0xf0] }
 0x53b   : > { %v5094_v26 = vld [vmem:[%s8466_s9 + $0x74] sm:$0xf0]  ;;  %v5092_v2 = vld [vmem:[%s8466_s9 + $0x6c] sm:$0xf]  ;;  %v4836_v59 = vld [vmem:[%s8466_s9 + $0x78] sm:$0xf0] }
 0x53c   : > { %v3063_v0 = vadd.f32 %v5375_v50, %v3062_v18  ;;  %v3100_v42 = vmul.f32 %v3092_v58, %v2887_v60  ;;  %v4883_v60 = vor.u32 %v5106_v39, %v4882_v22  ;;  %v4887_v18 = vor.u32 %v5104_v28, %v4884_v35  ;;  %v4866_v58 = vld [vmem:[%s8466_s9 + $0xa8] sm:$0xf]  ;;  %v5089_v7 = vld [vmem:[%s8466_s9 + $0x4c] sm:$0xf0]  ;;  %v5087_v37 = vld [vmem:[%s8466_s9 + $0x44] sm:$0xf] }
 0x53d   : > { %3805 = vmatpush.bf16.msra.mxu3 %v4875_v63  ;;  %3834 = vmatpush.bf16.msra.mxu2 %v4879_v30  ;;  %v4835_v11 = vor.u32 %v5094_v26, %v4834_v20  ;;  %v4839_v9 = vor.u32 %v5092_v2, %v4836_v59  ;;  %v4812_v63 = vld [vmem:[%s8466_s9 + $0x50] sm:$0xf0]  ;;  %v4818_v30 = vld [vmem:[%s8466_s9 + $0x48] sm:$0xf]  ;;  %v5090_v22 = vld [vmem:[%s8466_s9 + $0x54] sm:$0xf0] }
 0x53e   : > { %v3067_v1 = vsel %vm3066_vm5, %v5375_v50, %v3063_v0  ;;  %3863 = vmatpush.bf16.msra.mxu0 %v4883_v60  ;;  %v4815_v39 = vor.u32 %v5087_v37, %v4812_v63  ;;  %v4819_v28 = vor.u32 %v5090_v22, %v4818_v30  ;;  %v5088_v60 = vld [vmem:[%s8466_s9 + $0x4c] sm:$0xf]  ;;  %v4820_v35 = vld [vmem:[%s8466_s9 + $0x58] sm:$0xf0]  ;;  %v8030_v59 = vld [vmem:[#allocation9 + $0x1] ss:$0 sm:$0xff] }
 0x53f   : > { %v3072_v56 = vsel %vm3069_vm6, %v3071_v40, %v3067_v1  ;;  %v4859_v40 = vor.u32 %v5101_v36, %v4858_v46  ;;  %v5099_v1 = vld [vmem:[%s8466_s9 + $0xa4] sm:$0xf]  ;;  %v4823_v46 = vor.u32 %v5088_v60, %v4820_v35  ;;  %v4794_v36 = vld [vmem:[%s8466_s9 + $0x20] sm:$0xf]  ;;  %v8864_v63 = vld [vmem:[#allocation41_spill] sm:$0xff] }
 0x540   : > { %v3081_v23 = vmul.f32 %v3072_v56, %v7776_v49  ;;  %v4860_v56 = vld [vmem:[%s8466_s9 + $0xb0] sm:$0xf0]  ;;  %v8865_v22 = vld [vmem:[#allocation24_spill] sm:$0xff]  ;;  %v8042_v60 = vld [vmem:[#allocation9 + $0x3] ss:$0 sm:$0xff] }
 0x541   : > { %3806 = vmatpush.bf16.msra.mxu3 %v4859_v40 }
 0x542   : > { %v3093_v24 = vadd.f32 %v7752_v43, %v3081_v23  ;;  %v8859_v23 = vld [vmem:[#allocation23_spill] sm:$0xff] }
 0x544   : > { %v3101_v51 = vmul.f32 %v3093_v24, %v2889_v17  ;;  %v4863_v17 = vor.u32 %v5099_v1, %v4860_v56 }
 0x546   : > { %v3105_v16 = vpack.c.bf16 %v3101_v51, %v3100_v42  ;;  %v5102_v42 = vld [vmem:[%s8466_s9 + $0xb4] sm:$0xf0]  ;;  %v5100_v51 = vld [vmem:[%s8466_s9 + $0xac] sm:$0xf]  ;;  %3835 = vmatpush.bf16.msra.mxu2 %v4863_v17 }
 0x547   : > { %v8861_v17 = vld [vmem:[#allocation31_spill] sm:$0xff] }
 0x548   : > { %3193 = vmatmul.bf16.gmra.mxu0 %v3105_v16  ;;  %v4868_v16 = vld [vmem:[%s8466_s9 + $0xb8] sm:$0xf0] }
 0x595   : > { %v3179_v13 = vpop.f32.mrf.mxu0 }
 0x596   : > { %3199 = vst [vmem:[%s7790_s12] sm:$0xff] %v3179_v13 }
 0x59d   : > { %v3181_v49 = vpop.f32.mrf.mxu0 }
 0x59e   : > { %3200 = vst [vmem:[%s7790_s12 + $0x8] sm:$0xff] %v3181_v49  ;;  %v3211_v31 = vpack.c.bf16 %v3181_v49, %v3179_v13  ;;  %v4867_v13 = vor.u32 %v5102_v42, %v4866_v58  ;;  %v4871_v49 = vor.u32 %v5100_v51, %v4868_v16  ;;  %v5083_v58 = vld [vmem:[%s8466_s9 + $0x24] sm:$0xf]  ;;  %v5086_v16 = vld [vmem:[%s8466_s9 + $0x34] sm:$0xf0] }
 0x5a0   : > { %3864 = vmatpush.bf16.msra.mxu0 %v4867_v13  ;;  %v5084_v13 = vld [vmem:[%s8466_s9 + $0x2c] sm:$0xf] }
 0x5a5   : > { %v3184_v43 = vpop.f32.mrf.mxu0 }
 0x5a6   : > { %3201 = vst [vmem:[%s7790_s12 + $0x10] sm:$0xff] %v3184_v43 }
 0x5ad   : > { %v3186_v10 = vpop.f32.mrf.mxu0 }
 0x5ae   : > { %3202 = vst [vmem:[%s7790_s12 + $0x18] sm:$0xff] %v3186_v10  ;;  %v3212_v54 = vpack.c.bf16 %v3186_v10, %v3184_v43  ;;  %v4842_v43 = vld [vmem:[%s8466_s9 + $0x80] sm:$0xf]  ;;  %v5097_v10 = vld [vmem:[%s8466_s9 + $0x8c] sm:$0xf0] }
 0x5b5   : > { %v3189_v41 = vpop.f32.mrf.mxu0 }
 0x5b6   : > { %3203 = vst [vmem:[%s7790_s12 + $0x20] sm:$0xff] %v3189_v41 }
 0x5bd   : > { %v3191_v48 = vpop.f32.mrf.mxu0 }
 0x5be   : > { %3204 = vst [vmem:[%s7790_s12 + $0x28] sm:$0xff] %v3191_v48  ;;  %v3213_v34 = vpack.c.bf16 %v3191_v48, %v3189_v41  ;;  %v5095_v41 = vld [vmem:[%s8466_s9 + $0x84] sm:$0xf] }
 0x5c5   : > { %v3194_v3 = vpop.f32.mrf.mxu0 }
 0x5c6   : > { %3205 = vst [vmem:[%s7790_s12 + $0x30] sm:$0xff] %v3194_v3 }
 0x5cd   : > { %v3196_v52 = vpop.f32.mrf.mxu0 }
 0x5ce   : > { %3206 = vst [vmem:[%s7790_s12 + $0x38] sm:$0xff] %v3196_v52  ;;  %v3214_v21 = vpack.c.bf16 %v3196_v52, %v3194_v3  ;;  %v4843_v3 = vor.u32 %v5097_v10, %v4842_v43  ;;  %v4844_v52 = vld [vmem:[%s8466_s9 + $0x90] sm:$0xf0]  ;;  %s5609_s12 = scalar_lea.hbm %s8470_s13, 128 }
 0x5cf   : > { %p5611_p7 = scmp.lt.s32.totalorder %s5609_s12, %s5605_s2 }
 0x5d0   : > { %3243 = vmatpush.bf16.msrb.mxu1 %v3214_v21  ;;  %v4850_v21 = vld [vmem:[%s8466_s9 + $0x88] sm:$0xf]  ;;  %3807 = vmatpush.bf16.msra.mxu3 %v4843_v3  ;;  %v5079_v3 = vld [vmem:[%s8466_s9 + $0x4] sm:$0xf] }
 0x5d1   : > { %p5612_p8 = por %p5611_p7, %p5610_p12 }
 0x5d3   : > { %p5613_p9 = pnand %p5612_p8, %p5608_p5 }
 0x5d4   : > { %3244 = vmatpush.bf16.msrb.mxu1 %v3213_v34  ;;  %v5098_v34 = vld [vmem:[%s8466_s9 + $0x94] sm:$0xf0] }
 0x5d8   : > { %3245 = vmatpush.bf16.msrb.mxu1 %v3212_v54  ;;  %v4847_v54 = vor.u32 %v5095_v41, %v4844_v52  ;;  %v4778_v41 = vld [vmem:[%s8466_s9] sm:$0xf] }
 0x5da   : > { %3836 = vmatpush.bf16.msra.mxu2 %v4847_v54  ;;  %v4786_v54 = vld [vmem:[%s8466_s9 + $0x8] sm:$0xf] }
 0x5dc   : > { %3246 = vmatpush.bf16.msrb.mxu1 %v3211_v31  ;;  %v4851_v31 = vor.u32 %v5098_v34, %v4850_v21  ;;  %v4780_v34 = vld [vmem:[%s8466_s9 + $0x10] sm:$0xf0] }
 0x5de   : > { %3865 = vmatpush.bf16.msra.mxu0 %v4851_v31  ;;  %v5082_v31 = vld [vmem:[%s8466_s9 + $0x14] sm:$0xf0] }
 0x5df   : > { %4772 = vmatmul.msk.bf16.vlgmr.msrb.gmra.mxu1 %vm586_vm10, %v3220_v4  ;;  %v5096_v4 = vld [vmem:[%s8466_s9 + $0x8c] sm:$0xf] }
 0x5e0   : > { %3891 = vmatpush.bf16.msra.mxu1 %v4903_v44  ;;  %v4810_v44 = vld [vmem:[%s8466_s9 + $0x40] sm:$0xf] }
 0x5e2   : > { %3866 = vmatpush.bf16.msra.mxu0 %v4835_v11 }
 0x5e4   : > { %3892 = vmatpush.bf16.msra.mxu1 %v4887_v18 }
 0x5e6   : > { %3867 = vmatpush.bf16.msra.mxu0 %v4819_v28 }
 0x5e8   : > { %3893 = vmatpush.bf16.msra.mxu1 %v4871_v49  ;;  %v4804_v49 = vld [vmem:[%s8466_s9 + $0x38] sm:$0xf0] }
 0x5e9   : > { %v4807_v10 = vor.u32 %v5084_v13, %v4804_v49 }
 0x5ef   : > { %4773 = vmatmul.msk.bf16.gmra.mxu1 %vm586_vm10, %v3222_v45  ;;  %v4852_v45 = vld [vmem:[%s8466_s9 + $0x98] sm:$0xf0] }
 0x5ff   : > { %4774 = vmatmul.msk.bf16.gmra.mxu1 %vm586_vm10, %v3224_v5 }
 0x60f   : > { %4775 = vmatmul.msk.bf16.gmra.mxu1 %vm586_vm10, %v3226_v29  ;;  %v4855_v29 = vor.u32 %v5096_v4, %v4852_v45  ;;  %v8012_v4 = vld [vmem:[#allocation2] sm:$0xff]  ;;  %v8862_v45 = vld [vmem:[#allocation26_spill] sm:$0xff] }
 0x611   : > { %3894 = vmatpush.bf16.msra.mxu1 %v4855_v29  ;;  %v3309_v29 = vmul.f32 %v8012_v4, %v8862_v45 }
 0x615   : > { %3895 = vmatpush.bf16.msra.mxu1 %v4839_v9 }
 0x619   : > { %3896 = vmatpush.bf16.msra.mxu1 %v4823_v46 }
 0x61d   : > { %3897 = vmatpush.bf16.msra.mxu1 %v4807_v10 }
 0x65c   : > { %v3248_v25 = vpop.f32.mrf.mxu1 }
 0x65d   : > { %v3268_v55 = vsub.f32 %v3248_v25, %v8858_v15  ;;  %v4827_v25 = vor.u32 %v5093_v32, %v4826_v12  ;;  %v4783_v12 = vor.u32 %v5079_v3, %v4780_v34  ;;  %v4787_v32 = vor.u32 %v5082_v31, %v4786_v54 }
 0x65f   : > { %v3277_v50 = vmul.f32 %v7804_v47, %v3268_v55  ;;  %v4831_v55 = vor.u32 %v5091_v61, %v4828_v8  ;;  %3808 = vmatpush.bf16.msra.mxu3 %v4827_v25  ;;  %v4788_v25 = vld [vmem:[%s8466_s9 + $0x18] sm:$0xf0]  ;;  %v8863_v61 = vld [vmem:[#allocation34_spill] sm:$0xff] }
 0x661   : > { %v7857_v14 = vadd.f32 %v3277_v50, %v8858_v15  ;;  %3837 = vmatpush.bf16.msra.mxu2 %v4831_v55  ;;  %v4811_v50 = vor.u32 %v5089_v7, %v4810_v44  ;;  %v3335_v55 = vld [vmem:[#allocation2 + $0x1] sm:$0xff] }
 0x662   : > { %v3343_v2 = vmul.f32 0.0, %v3335_v55 }
 0x663   : > { %3293 = vst [vmem:[#allocation2 + $0x9] sm:$0xff] %v7857_v14  ;;  %3809 = vmatpush.bf16.msra.mxu3 %v4811_v50  ;;  %v8036_v50 = vld [vmem:[#allocation9 + $0x2] ss:$0 sm:$0xff]  ;;  %v3354_v35 = vmul.f32 %v8030_v59, %v7857_v14 }
 0x664   : > { %v3250_v0 = vpop.f32.mrf.mxu1 }
 0x665   : > { %v3269_v24 = vsub.f32 %v3250_v0, %v8859_v23  ;;  %3838 = vmatpush.bf16.msra.mxu2 %v4815_v39  ;;  %v5085_v0 = vld [vmem:[%s8466_s9 + $0x2c] sm:$0xf0] }
 0x666   : > { %v4795_v56 = vor.u32 %v5085_v0, %v4794_v36  ;;  %v8866_v36 = vld [vmem:[#allocation27_spill] sm:$0xff] }
 0x667   : > { %v3278_v48 = vmul.f32 %v7804_v47, %v3269_v24  ;;  %v4802_v24 = vld [vmem:[%s8466_s9 + $0x28] sm:$0xf] }
 0x668   : > { %3810 = vmatpush.bf16.msra.mxu3 %v4795_v56  ;;  %v4803_v43 = vor.u32 %v5086_v16, %v4802_v24 }
 0x669   : > { %v7911_v5 = vadd.f32 %v3278_v48, %v8859_v23  ;;  %v4796_v23 = vld [vmem:[%s8466_s9 + $0x30] sm:$0xf0]  ;;  %v5081_v48 = vld [vmem:[%s8466_s9 + $0xc] sm:$0xf0] }
 0x66a   : > { %v3302_v40 = vld [vmem:[#allocation2 + $0x8] sm:$0xff]  ;;  %v4799_v51 = vor.u32 %v5083_v58, %v4796_v23  ;;  %v4779_v21 = vor.u32 %v5081_v48, %v4778_v41  ;;  %3868 = vmatpush.bf16.msra.mxu0 %v4803_v43  ;;  %v8049_v23 = vld [vmem:[#allocation9 + $0x4] ss:$0 sm:$0xff] }
 0x66b   : > { %3294 = vst [vmem:[#allocation2 + $0x11] sm:$0xff] %v7911_v5  ;;  %v3310_v8 = vmul.f32 %v8863_v61, %v3302_v40  ;;  %v3369_v9 = vld [vmem:[#allocation2 + $0x2] sm:$0xff]  ;;  %v3404_v39 = vmul.f32 %v8865_v22, %v3302_v40  ;;  %v8868_v48 = vld [vmem:[#allocation25_spill] sm:$0xff] }
 0x66c   : > { %v3253_v57 = vpop.f32.mrf.mxu1  ;;  %3839 = vmatpush.bf16.msra.mxu2 %v4799_v51  ;;  %3811 = vmatpush.bf16.msra.mxu3 %v4779_v21  ;;  %v3377_v0 = vmul.f32 %v3369_v9, %v8866_v36  ;;  %v8055_v51 = vld [vmem:[#allocation9 + $0x5] ss:$0 sm:$0xff]  ;;  %v3434_v21 = vmul.f32 %v8049_v23, %v7911_v5 }
 0x66d   : > { %v3270_v15 = vsub.f32 %v3253_v57, %v8860_v33  ;;  %v5080_v57 = vld [vmem:[%s8466_s9 + $0xc] sm:$0xf]  ;;  %v3414_v49 = vmul.f32 %v8042_v60, %v3404_v39 }
 0x66e   : > { %3869 = vmatpush.bf16.msra.mxu0 %v4787_v32  ;;  %v3387_v40 = vmul.f32 %v8036_v50, %v3377_v0 }
 0x66f   : > { %v3279_v62 = vmul.f32 %v7804_v47, %v3270_v15  ;;  %v8026_v15 = vld [vmem:[#allocation9] ss:$0 sm:$0xff] }
 0x670   : > { %3840 = vmatpush.bf16.msra.mxu2 %v4783_v12  ;;  %v3319_v11 = vmul.f32 %v8026_v15, %v3309_v29  ;;  %v3320_v37 = vmul.f32 %v8026_v15, %v3310_v8  ;;  %v8869_v8 = vld [vmem:[#allocation43_spill] sm:$0xff] }
 0x671   : > { %v7965_v18 = vadd.f32 %v3279_v62, %v8860_v33  ;;  %v4791_v33 = vor.u32 %v5080_v57, %v4788_v25  ;;  %v3353_v62 = vmul.f32 %v8030_v59, %v3343_v2  ;;  %v8079_v25 = vld [vmem:[#allocation9 + $0x6] ss:$0 sm:$0xff]  ;;  %v8083_v2 = vld [vmem:[#allocation9 + $0x7] ss:$0 sm:$0xff] }
 0x672   : > { %v8028_v26 = vld [vmem:[#allocation2 + $0x10] sm:$0xff]  ;;  %v3362_v24 = vadd.f32 %v3354_v35, %v3320_v37  ;;  %v8089_v37 = vld [vmem:[#allocation9 + $0x8] ss:$0 sm:$0xff] }
 0x673   : > { %3295 = vst [vmem:[#allocation2 + $0x19] sm:$0xff] %v7965_v18  ;;  %v3370_v44 = vld [vmem:[#allocation2 + $0xa] sm:$0xff]  ;;  %3898 = vmatpush.bf16.msra.mxu1 %v4791_v33  ;;  %v3405_v28 = vmul.f32 %v8863_v61, %v8028_v26  ;;  %v3361_v46 = vadd.f32 %v3353_v62, %v3319_v11  ;;  %v3477_v54 = vmul.f32 %v8865_v22, %v8028_v26 }
 0x674   : > { %v3255_v1 = vpop.f32.mrf.mxu1  ;;  %v3450_v3 = vmul.f32 %v8868_v48, %v3370_v44  ;;  %v3515_v35 = vmul.f32 %v8083_v2, %v7965_v18 }
 0x675   : > { %v3271_v42 = vsub.f32 %v3255_v1, %v8861_v17  ;;  %v8867_v1 = vld [vmem:[#allocation35_spill] sm:$0xff]  ;;  %v3395_v43 = vadd.f32 %v3387_v40, %v3361_v46  ;;  %v3415_v41 = vmul.f32 %v8042_v60, %v3405_v28  ;;  %v3514_v28 = vmul.f32 %v8083_v2, %v7911_v5  ;;  %v8104_v40 = vld [vmem:[#allocation10 + $0x3] ss:$0 sm:$0xff] }
 0x676   : > { %v3378_v56 = vmul.f32 %v8867_v1, %v3370_v44  ;;  %v3460_v32 = vmul.f32 %v8055_v51, %v3450_v3 }
 0x677   : > { %v3280_v52 = vmul.f32 %v7804_v47, %v3271_v42  ;;  %v3422_v29 = vadd.f32 %v3414_v49, %v3395_v43 }
 0x678   : > { %v3388_v42 = vmul.f32 %v8036_v50, %v3378_v56 }
 0x679   : > { %v8024_v20 = vadd.f32 %v3280_v52, %v8861_v17  ;;  %v3433_v52 = vmul.f32 %v8049_v23, %v7857_v14 }
 0x67a   : > { %v8051_v17 = vld [vmem:[#allocation2 + $0x12] sm:$0xff]  ;;  %v3396_v10 = vadd.f32 %v3388_v42, %v3362_v24  ;;  %v8870_v42 = vld [vmem:[#allocation44_spill] sm:$0xff] }
 0x67b   : > { %3296 = vst [vmem:[#allocation2 + $0x21] sm:$0xff] %v8024_v20  ;;  %v8060_v13 = vld [vmem:[#allocation2 + $0x18] sm:$0xff]  ;;  %v3451_v34 = vmul.f32 %v8867_v1, %v8051_v17  ;;  %v3441_v11 = vadd.f32 %v3433_v52, %v3422_v29  ;;  %v3538_v44 = vmul.f32 %v8868_v48, %v8051_v17  ;;  %v8110_v52 = vld [vmem:[#allocation10 + $0x6] ss:$0 sm:$0xff] }
 0x67c   : > { %v3258_v7 = vpop.f32.mrf.mxu1  ;;  %v3423_v12 = vadd.f32 %v3415_v41, %v3396_v10  ;;  %v3478_v57 = vmul.f32 %v8863_v61, %v8060_v13 }
 0x67d   : > { %v3272_v30 = vsub.f32 %v3258_v7, %v8864_v63  ;;  %v3461_v55 = vmul.f32 %v8055_v51, %v3451_v34  ;;  %v3468_v62 = vadd.f32 %v3460_v32, %v3441_v11  ;;  %v3548_v0 = vmul.f32 %v8089_v37, %v3538_v44  ;;  %v8871_v34 = vld [vmem:[#allocation32_spill] sm:$0xff] }
 0x67e   : > { %v3442_v9 = vadd.f32 %v3434_v21, %v3423_v12  ;;  %v3488_v22 = vmul.f32 %v8079_v25, %v3478_v57 }
 0x67f   : > { %v3281_v58 = vmul.f32 %v7804_v47, %v3272_v30  ;;  %v3487_v30 = vmul.f32 %v8079_v25, %v3477_v54  ;;  %v3311_v54 = vmul.f32 %v8871_v34, %v8028_v26 }
 0x681   : > { %v8058_v16 = vadd.f32 %v3281_v58, %v8864_v63  ;;  %v3469_v63 = vadd.f32 %v3461_v55, %v3442_v9  ;;  %v3495_v46 = vadd.f32 %v3487_v30, %v3468_v62  ;;  %v8873_v55 = vld [vmem:[#allocation49_spill] sm:$0xff]  ;;  %v3321_v9 = vmul.f32 %v8026_v15, %v3311_v54 }
 0x682   : > { %v8074_v31 = vld [vmem:[#allocation2 + $0x1a] sm:$0xff]  ;;  %v3355_v62 = vmul.f32 %v8030_v59, %v7911_v5 }
 0x683   : > { %3297 = vst [vmem:[#allocation2 + $0x29] sm:$0xff] %v8058_v16  ;;  %v3539_v7 = vmul.f32 %v8867_v1, %v8074_v31  ;;  %v3496_v36 = vadd.f32 %v3488_v22, %v3469_v63  ;;  %v3522_v58 = vadd.f32 %v3514_v28, %v3495_v46  ;;  %v3356_v63 = vmul.f32 %v8030_v59, %v7965_v18  ;;  %v8876_v28 = vld [vmem:[#allocation33_spill] sm:$0xff] }
 0x684   : > { %v3260_v45 = vpop.f32.mrf.mxu1  ;;  %v3511_v22 = vmul.f32 0.0, %v8012_v4  ;;  %v3363_v46 = vadd.f32 %v3355_v62, %v3321_v9  ;;  %v8879_v9 = vld [vmem:[#allocation30_spill] sm:$0xff] }
 0x685   : > { %v3273_v33 = vsub.f32 %v3260_v45, %v8869_v8  ;;  %v3549_v1 = vmul.f32 %v8089_v37, %v3539_v7  ;;  %v3523_v24 = vadd.f32 %v3515_v35, %v3496_v36  ;;  %v3556_v43 = vadd.f32 %v3548_v0, %v3522_v58  ;;  %v8872_v45 = vld [vmem:[#allocation39_spill] sm:$0xff] }
 0x686   : > { %v3312_v29 = vmul.f32 %v8872_v45, %v8060_v13  ;;  %v3406_v0 = vmul.f32 %v8871_v34, %v8060_v13  ;;  %v8156_v58 = vmul.f32 %v8083_v2, %v3511_v22  ;;  %v8878_v13 = vld [vmem:[#allocation40_spill] sm:$0xff]  ;;  %v3452_v22 = vmul.f32 %v8876_v28, %v8074_v31 }
 0x687   : > { %v3282_v61 = vmul.f32 %v7804_v47, %v3273_v33  ;;  %v3557_v10 = vadd.f32 %v3549_v1, %v3523_v24  ;;  %v3565_v48 = vadd.f32 %v8104_v40, %v3556_v43  ;;  %v3435_v1 = vmul.f32 %v8049_v23, %v7965_v18  ;;  %v8877_v24 = vld [vmem:[#allocation28_spill] sm:$0xff] }
 0x688   : > { %v3322_v26 = vmul.f32 %v8026_v15, %v3312_v29  ;;  %v3380_v43 = vmul.f32 %v8878_v13, %v8074_v31 }
 0x689   : > { %v8095_v39 = vadd.f32 %v3282_v61, %v8869_v8  ;;  %v3566_v3 = vadd.f32 %v8104_v40, %v3557_v10  ;;  %v3573_v12 = vsub.f32 %v3565_v48, %v7857_v14 }
 0x68a   : > { %v3364_v36 = vadd.f32 %v3356_v63, %v3322_v26  ;;  %v3373_v48 = vld [vmem:[#allocation2 + $0x22] sm:$0xff] }
 0x68b   : > { %3298 = vst [vmem:[#allocation2 + $0x31] sm:$0xff] %v8095_v39  ;;  %v3574_v32 = vsub.f32 %v3566_v3, %v7911_v5  ;;  %v3582_v57 = vmul.f32 %v8110_v52, %v3573_v12  ;;  %v3357_v12 = vmul.f32 %v8030_v59, %v8024_v20  ;;  %v3381_v26 = vmul.f32 %v8879_v9, %v3373_v48 }
 0x68c   : > { %v3263_v56 = vpop.f32.mrf.mxu1 }
 0x68d   : > { %v3274_v49 = vsub.f32 %v3263_v56, %v8870_v42  ;;  %v3583_v8 = vmul.f32 %v8110_v52, %v3574_v32  ;;  %v8128_v44 = vadd.f32 %v3582_v57, %v7857_v14  ;;  %v3379_v14 = vmul.f32 %v8876_v28, %v8051_v17  ;;  %v3305_v17 = vld [vmem:[#allocation2 + $0x20] sm:$0xff]  ;;  %v3306_v56 = vld [vmem:[#allocation2 + $0x28] sm:$0xff] }
 0x68e   : > { %v3407_v54 = vmul.f32 %v8872_v45, %v3305_v17  ;;  %v3358_v32 = vmul.f32 %v8030_v59, %v8058_v16  ;;  %v3390_v57 = vmul.f32 %v8036_v50, %v3380_v43  ;;  %v3408_v63 = vmul.f32 %v8877_v24, %v3306_v56 }
 0x68f   : > { %v3283_v41 = vmul.f32 %v7804_v47, %v3274_v49  ;;  %8874 = vst [vmem:[#allocation65_spill] sm:$0xff] %v8128_v44  ;;  %v8131_v7 = vadd.f32 %v3583_v8, %v7911_v5  ;;  %v3537_v5 = vld [vmem:[#allocation2 + $0x4a] sm:$0xff]  ;;  %v3314_v49 = vmul.f32 %v6179_v53, %v3306_v56  ;;  %v3389_v3 = vmul.f32 %v8036_v50, %v3379_v14 }
 0x690   : > { %v3417_v62 = vmul.f32 %v8042_v60, %v3407_v54  ;;  %v3453_v14 = vmul.f32 %v8878_v13, %v3373_v48 }
 0x691   : > { %v8113_v21 = vadd.f32 %v3283_v41, %v8870_v42  ;;  %8875 = vst [vmem:[#allocation67_spill] sm:$0xff] %v8131_v7  ;;  %v3598_v30 = vpack.c.bf16 %v8131_v7, %v8128_v44  ;;  %v3313_v42 = vmul.f32 %v8877_v24, %v3305_v17  ;;  %v8165_v41 = vmul.f32 %v3537_v5, %v8838_v38 }
 0x692   : > { %v3462_v7 = vmul.f32 %v8055_v51, %v3452_v22  ;;  %v3540_v22 = vmul.f32 %v8876_v28, %v3373_v48 }
 0x693   : > { %3299 = vst [vmem:[#allocation2 + $0x39] sm:$0xff] %v8113_v21  ;;  %3812 = vmatmul.bf16.vlgmr.msra.gmra.mxu3 %v3598_v30  ;;  %3841 = vmatmul.bf16.vlgmr.msra.gmra.mxu2 %v3598_v30  ;;  %v3360_v10 = vmul.f32 %v8030_v59, %v8113_v21  ;;  %v3323_v8 = vmul.f32 %v8026_v15, %v3313_v42 }
 0x694   : > { %v3265_v33 = vpop.f32.mrf.mxu1  ;;  %3870 = vmatmul.bf16.vlgmr.msra.gmra.mxu0 %v3598_v30  ;;  %3899 = vmatmul.bf16.vlgmr.msra.gmra.mxu1 %v3598_v30  ;;  %v3479_v42 = vmul.f32 %v8871_v34, %v3305_v17  ;;  %v3516_v17 = vmul.f32 %v8083_v2, %v8024_v20 }
 0x695   : > { %v3275_v11 = vsub.f32 %v3265_v33, %v8873_v55  ;;  %v3397_v33 = vadd.f32 %v3389_v3, %v3363_v46  ;;  %v8880_v3 = vld [vmem:[#allocation46_spill] sm:$0xff] }
 0x697   : > { %v3284_v61 = vmul.f32 %v7804_v47, %v3275_v11  ;;  %v3324_v11 = vmul.f32 %v8026_v15, %v3314_v49  ;;  %v3480_v49 = vmul.f32 %v8872_v45, %v3306_v56  ;;  %v3307_v56 = vld [vmem:[#allocation2 + $0x30] sm:$0xff] }
 0x699   : > { %v8144_v35 = vadd.f32 %v3284_v61, %v8873_v55  ;;  %v3416_v55 = vmul.f32 %v8042_v60, %v3406_v0  ;;  %v3398_v61 = vadd.f32 %v3390_v57, %v3364_v36  ;;  %v3436_v36 = vmul.f32 %v8049_v23, %v8024_v20 }
 0x69a   : > { %v8146_v47 = vld [vmem:[#allocation2 + $0x38] sm:$0xff]  ;;  %v3365_v57 = vadd.f32 %v3357_v12, %v3323_v8  ;;  %v3366_v45 = vadd.f32 %v3358_v32, %v3324_v11  ;;  %v3490_v12 = vmul.f32 %v8079_v25, %v3480_v49  ;;  %v3517_v11 = vmul.f32 %v8083_v2, %v8058_v16  ;;  %v8881_v49 = vld [vmem:[#allocation36_spill] sm:$0xff] }
 0x69b   : > { %3300 = vst [vmem:[#allocation2 + $0x41] sm:$0xff] %v8144_v35  ;;  %v3316_v4 = vmul.f32 %v8804_v27, %v8146_v47  ;;  %v8171_v29 = vmul.f32 %v8049_v23, %v8144_v35  ;;  %v3424_v30 = vadd.f32 %v3416_v55, %v3397_v33 }
 0x69d   : > { %v3326_v38 = vmul.f32 %v8026_v15, %v3316_v4  ;;  %v3425_v4 = vadd.f32 %v3417_v62, %v3398_v61  ;;  %v3443_v33 = vadd.f32 %v3435_v1, %v3424_v30  ;;  %v3463_v61 = vmul.f32 %v8055_v51, %v3453_v14  ;;  %v3533_v62 = vld [vmem:[#allocation2 + $0x2a] sm:$0xff] }
 0x69e   : > { %v3489_v1 = vmul.f32 %v8079_v25, %v3479_v42  ;;  %v3541_v14 = vmul.f32 %v8878_v13, %v3533_v62  ;;  %v3550_v42 = vmul.f32 %v8089_v37, %v3540_v22  ;;  %v3454_v22 = vmul.f32 %v8879_v9, %v3533_v62 }
 0x69f   : > { %v3368_v43 = vadd.f32 %v3360_v10, %v3326_v38  ;;  %v3444_v55 = vadd.f32 %v3436_v36, %v3425_v4  ;;  %v3470_v10 = vadd.f32 %v3462_v7, %v3443_v33  ;;  %v3315_v7 = vmul.f32 %v8794_v19, %v3307_v56 }
 0x6a0   : > { %v3437_v36 = vmul.f32 %v8049_v23, %v8058_v16 }
 0x6a1   : > { %v3497_v4 = vadd.f32 %v3489_v1, %v3470_v10  ;;  %v3359_v1 = vmul.f32 %v8030_v59, %v8095_v39  ;;  %v3438_v59 = vmul.f32 %v8049_v23, %v8095_v39 }
 0x6a2   : > { %v8188_v5 = vld [vmem:[#allocation2 + $0x3a] sm:$0xff]  ;;  %v8192_v0 = vld [vmem:[#allocation2 + $0x42] sm:$0xff] }
 0x6a3   : > { %v8190_v46 = vld [vmem:[#allocation2 + $0x40] sm:$0xff]  ;;  %v3384_v31 = vmul.f32 %v8880_v3, %v8188_v5  ;;  %v3457_v34 = vmul.f32 %v8880_v3, %v8192_v0  ;;  %v3476_v30 = vld [vmem:[#allocation2 + $0x48] sm:$0xff]  ;;  %v3524_v13 = vadd.f32 %v3516_v17, %v3497_v4  ;;  %v3418_v17 = vmul.f32 %v8042_v60, %v3408_v63 }
 0x6a4   : > { %v3411_v54 = vmul.f32 %v8804_v27, %v8190_v46  ;;  %v3471_v27 = vadd.f32 %v3463_v61, %v3444_v55  ;;  %v3484_v28 = vmul.f32 %v3476_v30, %v8834_v6  ;;  %v3409_v55 = vmul.f32 %v6179_v53, %v3307_v56 }
 0x6a5   : > { %v3394_v44 = vmul.f32 %v8036_v50, %v3384_v31  ;;  %v3467_v31 = vmul.f32 %v8055_v51, %v3457_v34  ;;  %v3558_v61 = vadd.f32 %v3550_v42, %v3524_v13  ;;  %v3464_v4 = vmul.f32 %v8055_v51, %v3454_v22 }
 0x6a6   : > { %v3421_v8 = vmul.f32 %v8042_v60, %v3411_v54  ;;  %v3498_v32 = vadd.f32 %v3490_v12, %v3471_v27  ;;  %v3391_v54 = vmul.f32 %v8036_v50, %v3381_v26  ;;  %v3325_v27 = vmul.f32 %v8026_v15, %v3315_v7  ;;  %v3375_v12 = vld [vmem:[#allocation2 + $0x32] sm:$0xff] }
 0x6a7   : > { %v3402_v38 = vadd.f32 %v3394_v44, %v3368_v43  ;;  %v3551_v44 = vmul.f32 %v8089_v37, %v3541_v14  ;;  %v3382_v43 = vmul.f32 %v8881_v49, %v3533_v62  ;;  %v3419_v34 = vmul.f32 %v8042_v60, %v3409_v55 }
 0x6a8   : > { %v3525_v48 = vadd.f32 %v3517_v11, %v3498_v32  ;;  %v8882_v32 = vld [vmem:[#allocation42_spill] sm:$0xff]  ;;  %v3482_v13 = vmul.f32 %v6179_v53, %v8146_v47  ;;  %v3519_v53 = vmul.f32 %v8083_v2, %v8113_v21 }
 0x6a9   : > { %v3429_v3 = vadd.f32 %v3421_v8, %v3402_v38  ;;  %v3392_v33 = vmul.f32 %v8036_v50, %v3382_v43  ;;  %v3399_v38 = vadd.f32 %v3391_v54, %v3365_v57  ;;  %v3567_v8 = vadd.f32 %v8104_v40, %v3558_v61 }
 0x6aa   : > { %v3559_v10 = vadd.f32 %v3551_v44, %v3525_v48  ;;  %v3455_v57 = vmul.f32 %v8881_v49, %v3375_v12  ;;  %v3383_v11 = vmul.f32 %v8882_v32, %v3375_v12  ;;  %v3518_v61 = vmul.f32 %v8083_v2, %v8095_v39 }
 0x6ab   : > { %v3400_v6 = vadd.f32 %v3392_v33, %v3366_v45  ;;  %v3448_v26 = vadd.f32 %v8171_v29, %v3429_v3  ;;  %v3426_v14 = vadd.f32 %v3418_v17, %v3399_v38  ;;  %v3575_v45 = vsub.f32 %v3567_v8, %v7965_v18 }
 0x6ac   : > { %v3568_v30 = vadd.f32 %v8104_v40, %v3559_v10  ;;  %v3481_v29 = vmul.f32 %v8877_v24, %v3307_v56  ;;  %v3465_v62 = vmul.f32 %v8055_v51, %v3455_v57  ;;  %v3367_v3 = vadd.f32 %v3359_v1, %v3325_v27  ;;  %v5126_v57 = vld [vmem:[#allocation15 + $0x78] sm:$0xff] }
 0x6ad   : > { %v3427_v15 = vadd.f32 %v3419_v34, %v3400_v6  ;;  %v3445_v7 = vadd.f32 %v3437_v36, %v3426_v14  ;;  %v3584_v44 = vmul.f32 %v8110_v52, %v3575_v45  ;;  %v3475_v48 = vadd.f32 %v3467_v31, %v3448_v26  ;;  %v5133_v45 = vld [vmem:[#allocation15 + $0xb0] sm:$0xff]  ;;  %4254 = vmatpush.bf16.msrb.mxu2 %v5126_v57 }
 0x6ae   : > { %v3576_v63 = vsub.f32 %v3568_v30, %v8024_v20  ;;  %v3491_v55 = vmul.f32 %v8079_v25, %v3481_v29  ;;  %v3492_v36 = vmul.f32 %v8079_v25, %v3482_v13  ;;  %v3542_v31 = vmul.f32 %v8879_v9, %v3375_v12  ;;  %v5134_v30 = vld [vmem:[#allocation15 + $0xb8] sm:$0xff]  ;;  %v5117_v29 = vld [vmem:[#allocation15 + $0x30] sm:$0xff]  ;;  %v5116_v13 = vld [vmem:[#allocation15 + $0x28] sm:$0xff] }
 0x6af   : > { %v3446_v42 = vadd.f32 %v3438_v59, %v3427_v15  ;;  %v3472_v54 = vadd.f32 %v3464_v4, %v3445_v7  ;;  %v8251_v24 = vadd.f32 %v3584_v44, %v7965_v18  ;;  %v3543_v27 = vmul.f32 %v8881_v49, %v8188_v5  ;;  %4283 = vmatpush.bf16.msrb.mxu0 %v5134_v30 }
 0x6b0   : > { %v3585_v43 = vmul.f32 %v8110_v52, %v3576_v63  ;;  %v3410_v38 = vmul.f32 %v8794_v19, %v8146_v47  ;;  %v3494_v6 = vmul.f32 %v8079_v25, %v3484_v28  ;;  %v3552_v34 = vmul.f32 %v8089_v37, %v3542_v31  ;;  %v5118_v28 = vld [vmem:[#allocation15 + $0x38] sm:$0xff] }
 0x6b1   : > { %v3473_v33 = vadd.f32 %v3465_v62, %v3446_v42  ;;  %v3499_v10 = vadd.f32 %v3491_v55, %v3472_v54  ;;  %v3553_v26 = vmul.f32 %v8089_v37, %v3543_v27  ;;  %v3439_v47 = vmul.f32 %v8049_v23, %v8113_v21  ;;  %4225 = vmatpush.bf16.msrb.mxu3 %v5118_v28  ;;  %v5124_v54 = vld [vmem:[#allocation15 + $0x68] sm:$0xff]  ;;  %v5131_v55 = vld [vmem:[#allocation15 + $0xa0] sm:$0xff] }
 0x6b2   : > { %v8254_v56 = vadd.f32 %v3585_v43, %v8024_v20  ;;  %v3393_v20 = vmul.f32 %v8036_v50, %v3383_v11  ;;  %v3420_v12 = vmul.f32 %v8042_v60, %v3410_v38  ;;  %v3502_v8 = vadd.f32 %v3494_v6, %v3475_v48  ;;  %v5132_v43 = vld [vmem:[#allocation15 + $0xa8] sm:$0xff]  ;;  %v5123_v38 = vld [vmem:[#allocation15 + $0x60] sm:$0xff]  ;;  %v5141_v6 = vld [vmem:[#allocation15 + $0xf0] sm:$0xff] }
 0x6b3   : > { %v3500_v1 = vadd.f32 %v3492_v36, %v3473_v33  ;;  %v3526_v17 = vadd.f32 %v3518_v61, %v3499_v10  ;;  %v3456_v15 = vmul.f32 %v8882_v32, %v8188_v5  ;;  %v3483_v59 = vmul.f32 %v8794_v19, %v8190_v46  ;;  %v5125_v19 = vld [vmem:[#allocation15 + $0x70] sm:$0xff]  ;;  %4284 = vmatpush.bf16.msrb.mxu0 %v5133_v45 }
 0x6b4   : > { %v3599_v18 = vpack.c.bf16 %v8254_v56, %v8251_v24  ;;  %v3401_v49 = vadd.f32 %v3393_v20, %v3367_v3  ;;  %v3529_v11 = vadd.f32 %v8156_v58, %v3502_v8  ;;  %v3555_v5 = vmul.f32 %v8089_v37, %v8165_v41  ;;  %4255 = vmatpush.bf16.msrb.mxu2 %v5125_v19  ;;  %v5115_v20 = vld [vmem:[#allocation15 + $0x20] sm:$0xff]  ;;  %v5112_v8 = vld [vmem:[#allocation15 + $0x8] sm:$0xff] }
 0x6b5   : > { %v3527_v9 = vadd.f32 %v3519_v53, %v3500_v1  ;;  %v3560_v50 = vadd.f32 %v3552_v34, %v3526_v17  ;;  %v3466_v23 = vmul.f32 %v8055_v51, %v3456_v15  ;;  %v3493_v62 = vmul.f32 %v8079_v25, %v3483_v59  ;;  %4226 = vmatpush.bf16.msrb.mxu3 %v5117_v29  ;;  %v5142_v1 = vld [vmem:[#allocation15 + $0xf8] sm:$0xff]  ;;  %v5128_v17 = vld [vmem:[#allocation15 + $0x88] sm:$0xff]  ;;  %v5119_v15 = vld [vmem:[#allocation15 + $0x40] sm:$0xff] }
 0x6b6   : > { %3817 = vmatmul.bf16.gmra.mxu3 %v3599_v18  ;;  %3846 = vmatmul.bf16.gmra.mxu2 %v3599_v18  ;;  %v3428_v14 = vadd.f32 %v3420_v12, %v3401_v49  ;;  %v3544_v44 = vmul.f32 %v8882_v32, %v8192_v0  ;;  %v3520_v41 = vmul.f32 %v8083_v2, %v8144_v35  ;;  %v5140_v34 = vld [vmem:[#allocation15 + $0xe8] sm:$0xff]  ;;  %v5127_v49 = vld [vmem:[#allocation15 + $0x80] sm:$0xff] }
 0x6b7   : > { %3875 = vmatmul.bf16.gmra.mxu0 %v3599_v18  ;;  %3904 = vmatmul.bf16.gmra.mxu1 %v3599_v18  ;;  %v3561_v22 = vadd.f32 %v3553_v26, %v3527_v9  ;;  %v3569_v60 = vadd.f32 %v8104_v40, %v3560_v50  ;;  %v3563_v48 = vadd.f32 %v3555_v5, %v3529_v11  ;;  %v5113_v26 = vld [vmem:[#allocation15 + $0x10] sm:$0xff]  ;;  %v5139_v12 = vld [vmem:[#allocation15 + $0xe0] sm:$0xff]  ;;  %v5120_v50 = vld [vmem:[#allocation15 + $0x48] sm:$0xff] }
 0x6b8   : > { %v3447_v4 = vadd.f32 %v3439_v47, %v3428_v14  ;;  %v3554_v33 = vmul.f32 %v8089_v37, %v3544_v44  ;;  %4285 = vmatpush.bf16.msrb.mxu0 %v5132_v43  ;;  %4256 = vmatpush.bf16.msrb.mxu2 %v5124_v54  ;;  %v5121_v9 = vld [vmem:[#allocation15 + $0x50] sm:$0xff]  ;;  %v3634_v47 = vld [vmem:[%s8467_s10] sm:$0xf] }
 0x6b9   : > { %v3570_v63 = vadd.f32 %v8104_v40, %v3561_v22  ;;  %v3577_v7 = vsub.f32 %v3569_v60, %v8058_v16  ;;  %4227 = vmatpush.bf16.msrb.mxu3 %v5116_v13  ;;  %v3572_v61 = vadd.f32 %v8104_v40, %v3563_v48  ;;  %5152 = vmatpush.bf16.msrb.mxu1 %v5142_v1  ;;  %v5138_v22 = vld [vmem:[#allocation15 + $0xd8] sm:$0xff]  ;;  %v5111_v14 = vld [vmem:[#allocation15] sm:$0xff]  ;;  %v8320_v59 = vperm.slane %v3634_v47, 2  ;;  %v5137_v60 = vld [vmem:[#allocation15 + $0xd0] sm:$0xff] }
 0x6ba   : > { %v3474_v42 = vadd.f32 %v3466_v23, %v3447_v4  ;;  %v8322_v57 = vperm.slane %v3634_v47, 3  ;;  %v8326_v29 = vperm.slane %v3634_v47, 0  ;;  %v8328_v11 = vperm.slane %v3634_v47, 1  ;;  %v5136_v43 = vld [vmem:[#allocation15 + $0xc8] sm:$0xff] }
 0x6bb   : > { %v3578_v46 = vsub.f32 %v3570_v63, %v8095_v39  ;;  %v3586_v51 = vmul.f32 %v8110_v52, %v3577_v7 }
 0x6bc   : > { %v3501_v3 = vadd.f32 %v3493_v62, %v3474_v42  ;;  %4286 = vmatpush.bf16.msrb.mxu0 %v5131_v55  ;;  %4257 = vmatpush.bf16.msrb.mxu2 %v5123_v38 }
 0x6bd   : > { %v3587_v58 = vmul.f32 %v8110_v52, %v3578_v46  ;;  %v8295_v25 = vadd.f32 %v3586_v51, %v8058_v16  ;;  %4228 = vmatpush.bf16.msrb.mxu3 %v5115_v20  ;;  %5153 = vmatpush.bf16.msrb.mxu1 %v5141_v6 }
 0x6be   : > { %v3528_v32 = vadd.f32 %v3520_v41, %v3501_v3 }
 0x6bf   : > { %v8298_v0 = vadd.f32 %v3587_v58, %v8095_v39  ;;  %v3580_v39 = vsub.f32 %v3572_v61, %v8144_v35 }
 0x6c0   : > { %v3562_v2 = vadd.f32 %v3554_v33, %v3528_v32  ;;  %v5135_v32 = vld [vmem:[#allocation15 + $0xc0] sm:$0xff] }
 0x6c1   : > { %v3600_v36 = vpack.c.bf16 %v8298_v0, %v8295_v25  ;;  %v3589_v10 = vmul.f32 %v8110_v52, %v3580_v39  ;;  %5154 = vmatpush.bf16.msrb.mxu1 %v5140_v34 }
 0x6c2   : > { %v3571_v16 = vadd.f32 %v8104_v40, %v3562_v2  ;;  %v5130_v40 = vld [vmem:[#allocation15 + $0x98] sm:$0xff] }
 0x6c3   : > { %v8310_v31 = vadd.f32 %v3589_v10, %v8144_v35  ;;  %4287 = vmatpush.bf16.msrb.mxu0 %v5130_v40  ;;  %v5114_v35 = vld [vmem:[#allocation15 + $0x18] sm:$0xff] }
 0x6c4   : > { %v3579_v37 = vsub.f32 %v3571_v16, %v8113_v21  ;;  %4229 = vmatpush.bf16.msrb.mxu3 %v5114_v35 }
 0x6c5   : > { %5155 = vmatpush.bf16.msrb.mxu1 %v5139_v12 }
 0x6c6   : > { %3822 = vmatmul.bf16.gmra.mxu3 %v3600_v36  ;;  %3851 = vmatmul.bf16.gmra.mxu2 %v3600_v36  ;;  %v3588_v53 = vmul.f32 %v8110_v52, %v3579_v37  ;;  %v5129_v52 = vld [vmem:[#allocation15 + $0x90] sm:$0xff] }
 0x6c7   : > { %3880 = vmatmul.bf16.gmra.mxu0 %v3600_v36  ;;  %3909 = vmatmul.bf16.gmra.mxu1 %v3600_v36 }
 0x6c8   : > { %v8313_v27 = vadd.f32 %v3588_v53, %v8113_v21  ;;  %v5122_v21 = vld [vmem:[#allocation15 + $0x58] sm:$0xff]  ;;  %4288 = vmatpush.bf16.msrb.mxu0 %v5129_v52  ;;  %4230 = vmatpush.bf16.msrb.mxu3 %v5113_v26 }
 0x6c9   : > { %4258 = vmatpush.bf16.msrb.mxu2 %v5122_v21  ;;  %5156 = vmatpush.bf16.msrb.mxu1 %v5138_v22 }
 0x6ca   : > { %v3601_v18 = vpack.c.bf16 %v8310_v31, %v8313_v27 }
 0x6cc   : > { %4289 = vmatpush.bf16.msrb.mxu0 %v5128_v17  ;;  %4231 = vmatpush.bf16.msrb.mxu3 %v5112_v8 }
 0x6cd   : > { %4259 = vmatpush.bf16.msrb.mxu2 %v5121_v9  ;;  %5157 = vmatpush.bf16.msrb.mxu1 %v5137_v60 }
 0x6d0   : > { %4290 = vmatpush.bf16.msrb.mxu0 %v5127_v49  ;;  %4232 = vmatpush.bf16.msrb.mxu3 %v5111_v14 }
 0x6d1   : > { %4260 = vmatpush.bf16.msrb.mxu2 %v5120_v50  ;;  %5158 = vmatpush.bf16.msrb.mxu1 %v5136_v43 }
 0x6d4   : > { %4312 = vmatpush.bf16.msra.mxu0 %v5142_v1 }
 0x6d5   : > { %4261 = vmatpush.bf16.msrb.mxu2 %v5119_v15  ;;  %5159 = vmatpush.bf16.msrb.mxu1 %v5135_v32 }
 0x6d6   : > { %3827 = vmatmul.bf16.gmra.mxu3 %v3601_v18  ;;  %3856 = vmatmul.bf16.gmra.mxu2 %v3601_v18 }
 0x6d7   : > { %3885 = vmatmul.bf16.gmra.mxu0 %v3601_v18  ;;  %3914 = vmatmul.bf16.gmra.mxu1 %v3601_v18 }
 0x6d8   : > { %4313 = vmatpush.bf16.msra.mxu0 %v5141_v6 }
 0x6dc   : > { %4314 = vmatpush.bf16.msra.mxu0 %v5140_v34 }
 0x6e0   : > { %4315 = vmatpush.bf16.msra.mxu0 %v5139_v12 }
 0x6e4   : > { %4316 = vmatpush.bf16.msra.mxu0 %v5138_v22 }
 0x6e8   : > { %4317 = vmatpush.bf16.msra.mxu0 %v5137_v60 }
 0x6ec   : > { %4318 = vmatpush.bf16.msra.mxu0 %v5136_v43 }
 0x6f0   : > { %4319 = vmatpush.bf16.msra.mxu0 %v5135_v32 }
 0x711   : > { %v3871_v30 = vpop.f32.mrf.mxu0  ;;  %v3900_v28 = vpop.f32.mrf.mxu1 }
 0x712   : > { %v3872_v4 = vadd.f32 %v3871_v30, %v8320_v59  ;;  %v3901_v23 = vadd.f32 %v3900_v28, %v8322_v57 }
 0x714   : > { %v3922_v42 = vmax.f32 %v3872_v4, 0.0  ;;  %v3923_v62 = vmax.f32 %v3901_v23, 0.0 }
 0x716   : > { %v3813_v45 = vpop.f32.mrf.mxu3  ;;  %v3842_v63 = vpop.f32.mrf.mxu2 }
 0x717   : > { %v3814_v58 = vadd.f32 %v3813_v45, %v8326_v29  ;;  %v3843_v3 = vadd.f32 %v3842_v63, %v8328_v11 }
 0x719   : > { %v3873_v5 = vpop.f32.mrf.mxu0  ;;  %v3902_v7 = vpop.f32.mrf.mxu1  ;;  %v3920_v36 = vmax.f32 %v3814_v58, 0.0  ;;  %v3921_v2 = vmax.f32 %v3843_v3, 0.0 }
 0x71a   : > { %v3874_v19 = vadd.f32 %v3873_v5, %v8320_v59  ;;  %v3903_v46 = vadd.f32 %v3902_v7, %v8322_v57 }
 0x71c   : > { %v3926_v44 = vmax.f32 %v3874_v19, 0.0  ;;  %v3927_v51 = vmax.f32 %v3903_v46, 0.0 }
 0x71e   : > { %v3954_v41 = vpack.c.bf16 %v3926_v44, %v3922_v42  ;;  %v8334_v13 = vpack.c.bf16 %v3927_v51, %v3923_v62  ;;  %v3815_v48 = vpop.f32.mrf.mxu3  ;;  %v3844_v54 = vpop.f32.mrf.mxu2 }
 0x71f   : > { %v3816_v33 = vadd.f32 %v3815_v48, %v8326_v29  ;;  %v3845_v55 = vadd.f32 %v3844_v54, %v8328_v11 }
 0x720   : > { %4291 = vmatmul.bf16.vlgmr.msrb.gmra.mxu0 %v3954_v41 }
 0x721   : > { %v3924_v61 = vmax.f32 %v3816_v33, 0.0  ;;  %v3925_v16 = vmax.f32 %v3845_v55, 0.0 }
 0x723   : > { %v3952_v39 = vpack.c.bf16 %v3924_v61, %v3920_v36  ;;  %v3953_v37 = vpack.c.bf16 %v3925_v16, %v3921_v2 }
 0x725   : > { %4233 = vmatmul.bf16.vlgmr.msrb.gmra.mxu3 %v3952_v39  ;;  %4262 = vmatmul.bf16.vlgmr.msrb.gmra.mxu2 %v3953_v37 }
 0x734   : > { %v3876_v10 = vpop.f32.mrf.mxu0  ;;  %v3905_v53 = vpop.f32.mrf.mxu1 }
 0x735   : > { %v3877_v1 = vadd.f32 %v3876_v10, %v8320_v59  ;;  %v3906_v20 = vadd.f32 %v3905_v53, %v8322_v57 }
 0x737   : > { %v3930_v21 = vmax.f32 %v3877_v1, 0.0  ;;  %v3931_v17 = vmax.f32 %v3906_v20, 0.0 }
 0x739   : > { %v3818_v18 = vpop.f32.mrf.mxu3  ;;  %v3847_v40 = vpop.f32.mrf.mxu2 }
 0x73a   : > { %v3819_v9 = vadd.f32 %v3818_v18, %v8326_v29  ;;  %v3848_v49 = vadd.f32 %v3847_v40, %v8328_v11 }
 0x73c   : > { %v3878_v38 = vpop.f32.mrf.mxu0  ;;  %v3907_v52 = vpop.f32.mrf.mxu1  ;;  %v3928_v22 = vmax.f32 %v3819_v9, 0.0  ;;  %v3929_v14 = vmax.f32 %v3848_v49, 0.0 }
 0x73d   : > { %v3879_v6 = vadd.f32 %v3878_v38, %v8320_v59  ;;  %v3908_v35 = vadd.f32 %v3907_v52, %v8322_v57 }
 0x73f   : > { %v3934_v34 = vmax.f32 %v3879_v6, 0.0  ;;  %v3935_v26 = vmax.f32 %v3908_v35, 0.0 }
 0x741   : > { %v3959_v12 = vpack.c.bf16 %v3935_v26, %v3931_v17  ;;  %v3820_v8 = vpop.f32.mrf.mxu3  ;;  %v3849_v50 = vpop.f32.mrf.mxu2  ;;  %v3958_v47 = vpack.c.bf16 %v3934_v34, %v3930_v21 }
 0x742   : > { %v3821_v30 = vadd.f32 %v3820_v8, %v8326_v29  ;;  %v3850_v28 = vadd.f32 %v3849_v50, %v8328_v11 }
 0x743   : > { %4296 = vmatmul.bf16.gmra.mxu0 %v3958_v47  ;;  %4325 = vmatmul.bf16.vlgmr.msrb.gmra.mxu1 %v3959_v12 }
 0x744   : > { %v3932_v15 = vmax.f32 %v3821_v30, 0.0  ;;  %v3933_v60 = vmax.f32 %v3850_v28, 0.0  ;;  %v3881_v45 = vpop.f32.mrf.mxu0  ;;  %v3910_v63 = vpop.f32.mrf.mxu1 }
 0x745   : > { %v3882_v19 = vadd.f32 %v3881_v45, %v8320_v59  ;;  %v3911_v46 = vadd.f32 %v3910_v63, %v8322_v57 }
 0x746   : > { %v3957_v4 = vpack.c.bf16 %v3933_v60, %v3929_v14  ;;  %v3956_v23 = vpack.c.bf16 %v3932_v15, %v3928_v22 }
 0x747   : > { %v3938_v43 = vmax.f32 %v3882_v19, 0.0  ;;  %v3939_v58 = vmax.f32 %v3911_v46, 0.0 }
 0x748   : > { %4238 = vmatmul.bf16.gmra.mxu3 %v3956_v23  ;;  %4267 = vmatmul.bf16.gmra.mxu2 %v3957_v4 }
 0x749   : > { %v3823_v5 = vpop.f32.mrf.mxu3  ;;  %v3852_v7 = vpop.f32.mrf.mxu2 }
 0x74a   : > { %v3824_v48 = vadd.f32 %v3823_v5, %v8326_v29  ;;  %v3853_v54 = vadd.f32 %v3852_v7, %v8328_v11 }
 0x74c   : > { %v3883_v42 = vpop.f32.mrf.mxu0  ;;  %v3912_v62 = vpop.f32.mrf.mxu1  ;;  %v3936_v16 = vmax.f32 %v3824_v48, 0.0  ;;  %v3937_v39 = vmax.f32 %v3853_v54, 0.0 }
 0x74d   : > { %v3884_v44 = vadd.f32 %v3883_v42, %v8320_v59  ;;  %v3913_v51 = vadd.f32 %v3912_v62, %v8322_v57 }
 0x74f   : > { %v3942_v3 = vmax.f32 %v3884_v44, 0.0  ;;  %v3943_v41 = vmax.f32 %v3913_v51, 0.0 }
 0x751   : > { %v3962_v32 = vpack.c.bf16 %v3942_v3, %v3938_v43  ;;  %v3963_v33 = vpack.c.bf16 %v3943_v41, %v3939_v58  ;;  %v3825_v55 = vpop.f32.mrf.mxu3  ;;  %v3854_v36 = vpop.f32.mrf.mxu2 }
 0x752   : > { %v3826_v2 = vadd.f32 %v3825_v55, %v8326_v29  ;;  %v3855_v61 = vadd.f32 %v3854_v36, %v8328_v11 }
 0x753   : > { %4301 = vmatmul.bf16.gmra.mxu0 %v3962_v32  ;;  %4330 = vmatmul.bf16.gmra.mxu1 %v3963_v33 }
 0x754   : > { %v3940_v37 = vmax.f32 %v3826_v2, 0.0  ;;  %v3941_v10 = vmax.f32 %v3855_v61, 0.0  ;;  %v3886_v53 = vpop.f32.mrf.mxu0  ;;  %v3915_v18 = vpop.f32.mrf.mxu1 }
 0x755   : > { %v3887_v52 = vadd.f32 %v3886_v53, %v8320_v59  ;;  %v3916_v6 = vadd.f32 %v3915_v18, %v8322_v57 }
 0x756   : > { %v3960_v40 = vpack.c.bf16 %v3940_v37, %v3936_v16  ;;  %v3961_v1 = vpack.c.bf16 %v3941_v10, %v3937_v39 }
 0x757   : > { %v3946_v26 = vmax.f32 %v3887_v52, 0.0  ;;  %v3947_v9 = vmax.f32 %v3916_v6, 0.0 }
 0x758   : > { %4243 = vmatmul.bf16.gmra.mxu3 %v3960_v40  ;;  %4272 = vmatmul.bf16.gmra.mxu2 %v3961_v1 }
 0x759   : > { %v3828_v20 = vpop.f32.mrf.mxu3  ;;  %v3857_v38 = vpop.f32.mrf.mxu2 }
 0x75a   : > { %v3829_v8 = vadd.f32 %v3828_v20, %v8326_v29  ;;  %v3858_v50 = vadd.f32 %v3857_v38, %v8328_v11 }
 0x75c   : > { %v3888_v35 = vpop.f32.mrf.mxu0  ;;  %v3917_v21 = vpop.f32.mrf.mxu1  ;;  %v3945_v15 = vmax.f32 %v3858_v50, 0.0 }
 0x75d   : > { %v3889_v17 = vadd.f32 %v3888_v35, %v8320_v59  ;;  %v3918_v34 = vadd.f32 %v3917_v21, %v8322_v57  ;;  %v3944_v57 = vmax.f32 %v3829_v8, 0.0 }
 0x75f   : > { %v3950_v49 = vmax.f32 %v3889_v17, 0.0  ;;  %v3951_v12 = vmax.f32 %v3918_v34, 0.0 }
 0x761   : > { %v3966_v47 = vpack.c.bf16 %v3950_v49, %v3946_v26  ;;  %v3967_v30 = vpack.c.bf16 %v3951_v12, %v3947_v9  ;;  %v3830_v28 = vpop.f32.mrf.mxu3  ;;  %v3859_v22 = vpop.f32.mrf.mxu2 }
 0x762   : > { %v3831_v14 = vadd.f32 %v3830_v28, %v8326_v29  ;;  %v3860_v59 = vadd.f32 %v3859_v22, %v8328_v11 }
 0x763   : > { %4306 = vmatmul.bf16.gmra.mxu0 %v3966_v47  ;;  %4335 = vmatmul.bf16.gmra.mxu1 %v3967_v30 }
 0x764   : > { %v3948_v60 = vmax.f32 %v3831_v14, 0.0  ;;  %v3949_v45 = vmax.f32 %v3860_v59, 0.0 }
 0x766   : > { %v3964_v63 = vpack.c.bf16 %v3948_v60, %v3944_v57  ;;  %v3965_v4 = vpack.c.bf16 %v3949_v45, %v3945_v15 }
 0x768   : > { %4248 = vmatmul.bf16.gmra.mxu3 %v3964_v63  ;;  %4277 = vmatmul.bf16.gmra.mxu2 %v3965_v4 }
 0x773   : > { %4320 = vmatmul.bf16.vlgmr.msra.gmra.mxu0 %v8334_v13 }
 0x774   : > { %5616 = shalt.err (!%p5613_p9)
}
 0x775   : > { %s5683_s19 = smov 128   ;;  %s5684_s14 = smov 8   ;;  %v8385_v62 = vld [vmem:[#allocation10 + $0x8] ss:$0 sm:$0xff]  ;;  %v8390_v32 = vld [vmem:[#allocation10 + $0x7] ss:$0 sm:$0xff] }
 0x776   : > { %5188 = dma.vmem_to_hbm [thread:$0]  (%p5864_p4), %s4396_s1, 1024, %s4398_s17, %s4380_s21, %s5683_s19, %s5683_s19, %s5684_s14  }
 0x777   : > { %p566_p4 = scmp.lt.s32.totalorder %s5779_s15, 1  ;;  %s8883_s30 = sld [smem:[#allocation94_spill]] }
 0x779   : > { %s8893_s15 = smov (!%p566_p4, %s5779_s15), 1 }
 0x77a   : > { %s5038_s4 = sshll.u32 %s8893_s15, 6 }
 0x77d   : > { %s8398_s20 = scalar_lea.vmem %s8883_s30, %s5038_s4 }
 0x79d   : > { %v8379_v29 = vpop.f32.mrf.mxu0 }
 0x7a5   : > { %v8381_v11 = vpop.f32.mrf.mxu0 }
 0x7a8   : > { %v4234_v13 = vpop.f32.mrf.mxu3  ;;  %v4263_v23 = vpop.f32.mrf.mxu2 }
 0x7a9   : > { %v4235_v47 = vadd.f32 %v8385_v62, %v4234_v13 }
 0x7ab   : > { %v4264_v14 = vadd.f32 %v4263_v23, %v4235_v47 }
 0x7b0   : > { %v4236_v7 = vpop.f32.mrf.mxu3  ;;  %v8383_v19 = vpop.f32.mrf.mxu2 }
 0x7b1   : > { %v4237_v4 = vadd.f32 %v8385_v62, %v4236_v7 }
 0x7c0   : > { %v4297_v5 = vpop.f32.mrf.mxu0  ;;  %v4326_v46 = vpop.f32.mrf.mxu1 }
 0x7c8   : > { %v4299_v42 = vpop.f32.mrf.mxu0  ;;  %v4328_v3 = vpop.f32.mrf.mxu1 }
 0x7cb   : > { %v4239_v44 = vpop.f32.mrf.mxu3  ;;  %v4268_v51 = vpop.f32.mrf.mxu2 }
 0x7cc   : > { %v4240_v43 = vadd.f32 %v8385_v62, %v4239_v44 }
 0x7ce   : > { %v4269_v58 = vadd.f32 %v4268_v51, %v4240_v43  ;;  %v4266_v51 = vadd.f32 %v8383_v19, %v4237_v4  ;;  %v8884_v43 = vld [vmem:[#allocation65_spill] sm:$0xff] }
 0x7d0   : > { %v4298_v41 = vadd.f32 %v4297_v5, %v4269_v58  ;;  %v4302_v48 = vpop.f32.mrf.mxu0  ;;  %v4331_v53 = vpop.f32.mrf.mxu1 }
 0x7d2   : > { %v4327_v54 = vadd.f32 %v4326_v46, %v4298_v41 }
 0x7d3   : > { %v4241_v33 = vpop.f32.mrf.mxu3  ;;  %v4270_v55 = vpop.f32.mrf.mxu2 }
 0x7d4   : > { %v4343_v36 = vsub.f32 %v4327_v54, %v8251_v24  ;;  %v4242_v2 = vadd.f32 %v8385_v62, %v4241_v33 }
 0x7d6   : > { %v4352_v61 = vmul.f32 %v8390_v32, %v4343_v36  ;;  %v4271_v16 = vadd.f32 %v4270_v55, %v4242_v2  ;;  %v4295_v55 = vadd.f32 %v8381_v11, %v4266_v51 }
 0x7d8   : > { %v4360_v39 = vadd.f32 %v4352_v61, %v8251_v24  ;;  %v4300_v37 = vadd.f32 %v4299_v42, %v4271_v16  ;;  %v4304_v10 = vpop.f32.mrf.mxu0  ;;  %v4333_v12 = vpop.f32.mrf.mxu1 }
 0x7da   : > { %4368 = vst [vmem:[%s8398_s20 + $0x10] sm:$0xff] %v4360_v39  ;;  %v4329_v18 = vadd.f32 %v4328_v3, %v4300_v37  ;;  %v8885_v39 = vld [vmem:[#allocation67_spill] sm:$0xff] }
 0x7db   : > { %v4244_v40 = vpop.f32.mrf.mxu3  ;;  %v4273_v1 = vpop.f32.mrf.mxu2 }
 0x7dc   : > { %v4344_v20 = vsub.f32 %v4329_v18, %v8254_v56  ;;  %v4245_v38 = vadd.f32 %v8385_v62, %v4244_v40 }
 0x7de   : > { %v4353_v52 = vmul.f32 %v8390_v32, %v4344_v20  ;;  %v4274_v6 = vadd.f32 %v4273_v1, %v4245_v38 }
 0x7e0   : > { %v4361_v35 = vadd.f32 %v4353_v52, %v8254_v56  ;;  %v4303_v21 = vadd.f32 %v4302_v48, %v4274_v6  ;;  %v4307_v17 = vpop.f32.mrf.mxu0  ;;  %v4336_v13 = vpop.f32.mrf.mxu1 }
 0x7e2   : > { %4369 = vst [vmem:[%s8398_s20 + $0x18] sm:$0xff] %v4361_v35  ;;  %v4332_v24 = vadd.f32 %v4331_v53, %v4303_v21 }
 0x7e3   : > { %v4246_v34 = vpop.f32.mrf.mxu3  ;;  %v4275_v26 = vpop.f32.mrf.mxu2 }
 0x7e4   : > { %v4345_v9 = vsub.f32 %v4332_v24, %v8295_v25  ;;  %v4247_v49 = vadd.f32 %v8385_v62, %v4246_v34 }
 0x7e6   : > { %v4354_v8 = vmul.f32 %v8390_v32, %v4345_v9  ;;  %v4276_v50 = vadd.f32 %v4275_v26, %v4247_v49 }
 0x7e8   : > { %v4362_v30 = vadd.f32 %v4354_v8, %v8295_v25  ;;  %v4305_v56 = vadd.f32 %v4304_v10, %v4276_v50  ;;  %v4309_v28 = vpop.f32.mrf.mxu0  ;;  %v4293_v25 = vadd.f32 %v8379_v29, %v4264_v14  ;;  %v4338_v61 = vpop.f32.mrf.mxu1 }
 0x7ea   : > { %4370 = vst [vmem:[%s8398_s20 + $0x20] sm:$0xff] %v4362_v30  ;;  %v4334_v22 = vadd.f32 %v4333_v12, %v4305_v56 }
 0x7eb   : > { %v4249_v59 = vpop.f32.mrf.mxu3  ;;  %v4278_v57 = vpop.f32.mrf.mxu2 }
 0x7ec   : > { %v4346_v15 = vsub.f32 %v4334_v22, %v8298_v0  ;;  %v4250_v60 = vadd.f32 %v8385_v62, %v4249_v59 }
 0x7ee   : > { %v4355_v45 = vmul.f32 %v8390_v32, %v4346_v15  ;;  %v4279_v63 = vadd.f32 %v4278_v57, %v4250_v60 }
 0x7f0   : > { %v4363_v5 = vadd.f32 %v4355_v45, %v8298_v0  ;;  %v4308_v46 = vadd.f32 %v4307_v17, %v4279_v63  ;;  %v4321_v42 = vpop.f32.mrf.mxu0 }
 0x7f1   : > { %v4322_v44 = vadd.f32 %v4321_v42, %v4293_v25 }
 0x7f2   : > { %4371 = vst [vmem:[%s8398_s20 + $0x28] sm:$0xff] %v4363_v5  ;;  %v4337_v23 = vadd.f32 %v4336_v13, %v4308_v46 }
 0x7f3   : > { %v4341_v58 = vsub.f32 %v4322_v44, %v8884_v43  ;;  %v4251_v3 = vpop.f32.mrf.mxu3  ;;  %v4280_v48 = vpop.f32.mrf.mxu2 }
 0x7f4   : > { %v4347_v41 = vsub.f32 %v4337_v23, %v8313_v27  ;;  %v4252_v7 = vadd.f32 %v8385_v62, %v4251_v3 }
 0x7f5   : > { %v4350_v29 = vmul.f32 %v8390_v32, %v4341_v58 }
 0x7f6   : > { %v4356_v0 = vmul.f32 %v8390_v32, %v4347_v41  ;;  %v4281_v54 = vadd.f32 %v4280_v48, %v4252_v7 }
 0x7f7   : > { %v4358_v33 = vadd.f32 %v4350_v29, %v8884_v43 }
 0x7f8   : > { %v4364_v19 = vadd.f32 %v4356_v0, %v8313_v27  ;;  %v4310_v36 = vadd.f32 %v4309_v28, %v4281_v54  ;;  %v4323_v2 = vpop.f32.mrf.mxu0 }
 0x7f9   : > { %4366 = vst [vmem:[%s8398_s20] sm:$0xff] %v4358_v33  ;;  %v4324_v16 = vadd.f32 %v4323_v2, %v4295_v55 }
 0x7fa   : > { %4372 = vst [vmem:[%s8398_s20 + $0x30] sm:$0xff] %v4364_v19  ;;  %v4339_v62 = vadd.f32 %v4338_v61, %v4310_v36 }
 0x7fb   : > { %v4342_v37 = vsub.f32 %v4324_v16, %v8885_v39 }
 0x7fc   : > { %v4348_v10 = vsub.f32 %v4339_v62, %v8310_v31 }
 0x7fd   : > { %v4351_v53 = vmul.f32 %v8390_v32, %v4342_v37 }
 0x7fe   : > { %v4357_v18 = vmul.f32 %v8390_v32, %v4348_v10 }
 0x7ff   : > { %v4359_v11 = vadd.f32 %v4351_v53, %v8885_v39 }
 0x800   : > { %v4365_v40 = vadd.f32 %v4357_v18, %v8310_v31 }
 0x801   : > { %4367 = vst [vmem:[%s8398_s20 + $0x8] sm:$0xff] %v4359_v11 }
 0x802   : > { %4373 = vst [vmem:[%s8398_s20 + $0x38] sm:$0xff] %v4365_v40 }
 0x803 PF: > { %s4420_s15 = sand.u32 1, %s5655_s25   ;;  %p8886_p10 = scmp.ge.s32.totalorder %s5667_s28, 2 }
 0x804   : > { %s4421_s29 = scalar_lea.sflag [#allocation6], %s4420_s15 }
 0x805   : > { %p5214_p13 = pnand %p8886_p10, %p5868_p6 }
 0x807   : > { %p5215_p11 = pneg %p5214_p13 }
 0x809   : > { %5650 = dma.done.wait (%p5215_p11), %s4421_s29, 1024  }
 0x80a   : > { %5652 = vsyncadd (%p5215_p11), %s4421_s29, 4294966272  ;;  %s8887_s17 = sld [smem:[#allocation22_spill]]  ;;  %p30_p0 = scmp.ge.s32.totalorder %s5838_s18, 4  }
 0x80b   : > { %s8888_s25 = smov %s5659_s26  ;;  %s8889_s26 = smov %s5663_s27 }
 0x80c   : > { %s8891_s28 = smov %s5838_s18  ;;  %32 = sbr.rel (!%p30_p0) target bundleno = 16 (0x10), region = 157 }
 0x810   : > { %s8890_s27 = smov %s8887_s17 }
 0x811   :  { %4427 = vsyncpa [#allocation5], 1 }
 0x812   :  { %4429 = vsyncpa [#allocation5 + $0x1], 1 }
 0x813   :  { %4430 = vsyncpa [#allocation8], 1 }
 0x814   :  { %4431 = vsyncpa [#allocation11], 1 }
 0x815   :  { %4432 = vsyncpa [#allocation14], 1 }
 0x816   :  { %4433 = vsyncpa [#allocation6], 1 }
 0x817   :  { %4435 = vsyncpa [#allocation6 + $0x1], 1 }

// kernel: efficientvim_stage.3
= control target key start
LH: loop header
LB: loop body
LE: loop exit
PB: predicated region body
PF: predicated region fallthrough
CT: control target
= control target key end

     0   :  { %s8331_s0 = inlined_call_operand.vmem [shape: f32[2,64,128], index: 0, kind: input, shape index: {}]   ;;  %s8332_s1 = inlined_call_operand.hbm [shape: f32[9,128], index: 1, kind: input, shape index: {}]   ;;  %s8333_s2 = inlined_call_operand.hbm [shape: f32[9,128], index: 2, kind: input, shape index: {}]   ;;  %s8334_s3 = inlined_call_operand.hbm [shape: f32[9,192], index: 3, kind: input, shape index: {}]   ;;  %s8335_s4 = inlined_call_operand.hbm [shape: f32[9,128], index: 4, kind: input, shape index: {}]   ;;  %s8336_s5 = inlined_call_operand.vmem [shape: bf16[128,192], index: 5, kind: input, shape index: {}]   ;;  %s8337_s6 = inlined_call_operand.hbm [shape: f32[2,64], index: 6, kind: input, shape index: {}]   ;;  %s8338_s7 = inlined_call_operand.hbm [shape: bf16[128,256], index: 7, kind: input, shape index: {}]   ;;  %s8339_s8 = inlined_call_operand.hbm [shape: bf16[128,128], index: 8, kind: input, shape index: {}]   ;;  %s8340_s9 = inlined_call_operand.hbm [shape: bf16[128,512], index: 9, kind: input, shape index: {}]   ;;  %s8341_s10 = inlined_call_operand.vmem [shape: f32[1,512], index: 10, kind: input, shape index: {}]   ;;  %s8342_s11 = inlined_call_operand.hbm [shape: bf16[512,128], index: 11, kind: input, shape index: {}]   ;;  %s8343_s12 = inlined_call_operand.vmem [shape: f32[2,64,128], index: 12, kind: output, shape index: {0}]   ;;  %s8344_s13 = inlined_call_operand.hbm [shape: f32[2,64,128], index: 13, kind: output, shape index: {1}]  }
   0x1   :  { %8510 = sst [smem:[#allocation101_spill]] %s8332_s1 }
   0x2   :  { %8511 = sst [smem:[#allocation102_spill]] %s8333_s2 }
   0x3   :  { %8512 = sst [smem:[#allocation103_spill]] %s8335_s4 }
   0x4   :  { %8513 = sst [smem:[#allocation104_spill]] %s8338_s7 }
   0x5   :  { %8514 = sst [smem:[#allocation105_spill]] %s8340_s9 }
   0x6   :  { %19 = vsyncpa [#allocation5], 0 }
   0x7   :  { %20 = vsyncpa [#allocation8], 0 }
   0x8   :  { %21 = vsyncpa [#allocation11], 0 }
   0x9   :  { %22 = vsyncpa [#allocation14], 0 }
   0xa   :  { %23 = vsyncpa [#allocation17], 0 }
   0xb   :  { %24 = vsyncpa [#allocation6], 0 }
   0xc   :  { %26 = vsyncpa [#allocation6 + $0x1], 0  ;;  %s5893_s25 = smov 0   ;;  %s5895_s26 = smov 0  }
   0xd   :  { %s5897_s27 = smov 0   ;;  %s5899_s28 = smov 0  }
   0xe LB: > { %8515 = sst [smem:[#allocation26_spill]] %s5788_s25  ;;  %s5914_s29 = sadd.s32 4294967295, %s5800_s28   ;;  %s5800_s28 = sphi %s5899_s28, %s8785_s28   ;;  %s5796_s27 = sphi %s5897_s27, %s8787_s27   ;;  %s5792_s26 = sphi %s5895_s26, %s8789_s26   ;;  %s5788_s25 = sphi %s5893_s25, %s8788_s25  }
   0xf   : > { %8516 = sst [smem:[#allocation27_spill]] %s5796_s27  ;;  %s4601_s30 = sadd.s32 4294967294, %s5800_s28  }
  0x10   : > { %8517 = sst [smem:[#allocation28_spill]] %s5800_s28  ;;  %s5918_s14 = sadd.s32 1, %s5800_s28  }
  0x11   : > { %8518 = sst [smem:[#allocation29_spill]] %s5918_s14  ;;  %s322_s15 = sadd.s32 1, %s5796_s27 }
  0x12   : > { %s319_s16 = ssub.s32 %s5800_s28, %s5918_s14  ;;  %p332_p0 = scmp.ne.s32.totalorder %s5796_s27, %s5792_s26 }
  0x13   : > { %p320_p1 = scmp.eq.s32.totalorder %s319_s16, 0  ;;  %p333_p2 = scmp.eq.s32.totalorder %s5914_s29, 1 }
  0x14   : > { %p338_p3 = scmp.ne.s32.totalorder %s5792_s26, %s5788_s25  ;;  %p339_p4 = scmp.eq.s32.totalorder %s4601_s30, 1 }
  0x15   : > { %s5929_s17 = scalar_select %p320_p1, %s5796_s27, %s322_s15  }
  0x16   : > { %p5931_p5 = por %p333_p2, %p332_p0  ;;  %p5935_p6 = por %p339_p4, %p338_p3 }
  0x17   : > { %8519 = sst [smem:[#allocation30_spill]] %s5929_s17  ;;  %p4602_p7 = scmp.ge.s32.totalorder %s5800_s28, 1 }
  0x18   : > { %s8521_s19 = scalar_select %p5935_p6, 1, 0 }
  0x19   : > { %p346_p8 = scmp.lt.s32.totalorder %s5800_s28, 3  ;;  %p5276_p9 = scmp.eq.s32.totalorder %s5914_s29, 0 }
  0x1a   : > { %8522 = sst [smem:[#allocation31_spill]] %s8521_s19  ;;  %s5802_s17 = smov [#allocation7]  }
  0x1b   : > { %p5942_p10 = pnand %p4602_p7, %p346_p8  ;;  %s8524_s2 = sld [smem:[#allocation102_spill]] }
  0x1c   : > { %s8525_s4 = sld [smem:[#allocation103_spill]]  ;;  %s373_s27 = sshll.u32 %s5802_s17, 4  ;;  %s374_s27 = int_to_ptr.vmem [resolvable:$true] %s373_s27 }
  0x1d   : > { %p5244_p11 = pneg %p5942_p10  ;;  %s5803_s21 = smov 128  }
  0x1e   : > { %s5804_s22 = smov 8   ;;  %s5805_s24 = smov [#allocation10]  }
  0x1f   : > { %p5956_p12 = pnand %p5276_p9, %p5244_p11  ;;  %s401_s30 = sshll.u32 %s5805_s24, 4  ;;  %s402_s30 = int_to_ptr.vmem [resolvable:$true] %s401_s30 }
  0x20   : > { %s8527_s7 = sld [smem:[#allocation104_spill]]  ;;  %s5806_s17 = smov [#allocation13]  }
  0x21   : > { %s371_s23 = sshll.u32 %s8524_s2, 4  ;;  %s430_s19 = sshll.u32 %s5806_s17, 4  ;;  %s372_s23 = int_to_ptr.hbm [resolvable:$true] %s371_s23  ;;  %s431_s19 = int_to_ptr.vmem [resolvable:$true] %s430_s19 }
  0x22   : > { %s399_s15 = sshll.u32 %s8525_s4, 4  ;;  %s8528_s9 = sld [smem:[#allocation105_spill]]  ;;  %s400_s15 = int_to_ptr.hbm [resolvable:$true] %s399_s15 }
  0x23   : > { %5250 = dma.hbm_to_vmem [thread:$0]  (!%p5956_p12), %s372_s23, 256, %s374_s27, [#allocation8], %s5803_s21, %s5803_s21, %s5804_s22  }
  0x24   : > { %5256 = dma.hbm_to_vmem [thread:$0]  (!%p5956_p12), %s400_s15, 256, %s402_s30, [#allocation11], %s5803_s21, %s5803_s21, %s5804_s22  }
  0x25   : > { %s5807_s2 = smov [#allocation16]   ;;  %s8529_s1 = sld [smem:[#allocation101_spill]] }
  0x26   : > { %s428_s14 = sshll.u32 %s8527_s7, 4  ;;  %s458_s4 = sshll.u32 %s5807_s2, 4  ;;  %s429_s14 = int_to_ptr.hbm [resolvable:$true] %s428_s14  ;;  %s459_s4 = int_to_ptr.vmem [resolvable:$true] %s458_s4 }
  0x27   : > { %5262 = dma.hbm_to_vmem [thread:$0]  (!%p5956_p12), %s429_s14, 2048, %s431_s19, [#allocation14], %s5803_s21, %s5803_s21, %s5804_s22  }
  0x28   : > { %s456_s27 = sshll.u32 %s8528_s9, 4  ;;  %s5808_s30 = smov 256   ;;  %s457_s27 = int_to_ptr.hbm [resolvable:$true] %s456_s27 }
  0x29   : > { %s5809_s17 = smov 16   ;;  %s385_s7 = sshll.u32 %s8334_s3, 4  ;;  %s386_s7 = int_to_ptr.hbm [resolvable:$true] %s385_s7 }
  0x2a   : > { %5268 = dma.hbm_to_vmem [thread:$0]  (!%p5956_p12), %s457_s27, 4096, %s459_s4, [#allocation17], %s5808_s30, %s5808_s30, %s5809_s17  }
  0x2b   : > { %s357_s15 = sshll.u32 %s8529_s1, 4  ;;  %s5810_s9 = smov [#allocation4]   ;;  %s358_s15 = int_to_ptr.hbm [resolvable:$true] %s357_s15 }
  0x2c   : > { %s359_s14 = sshll.u32 %s5810_s9, 4  ;;  %s5811_s19 = smov [#allocation9]   ;;  %s360_s14 = int_to_ptr.vmem [resolvable:$true] %s359_s14 }
  0x2d   : > { %5247 = dma.hbm_to_vmem [thread:$0]  (!%p5956_p12), %s358_s15, 256, %s360_s14, [#allocation5], %s5803_s21, %s5803_s21, %s5804_s22  }
  0x2e   : > { %s387_s2 = sshll.u32 %s5811_s19, 4  ;;  %s417_s27 = sshll.u32 %s8337_s6, 4  ;;  %s388_s2 = int_to_ptr.vmem [resolvable:$true] %s387_s2  ;;  %s418_s27 = int_to_ptr.hbm [resolvable:$true] %s417_s27 }
  0x2f   : > { %5253 = dma.hbm_to_vmem [thread:$0]  (!%p5956_p12), %s386_s7, 512, %s388_s2, [#allocation8], %s5808_s30, %s5808_s30, %s5809_s17  }
  0x30   : > { %s442_s25 = sshll.u32 %s8339_s8, 4  ;;  %s5812_s28 = smov [#allocation12]   ;;  %s443_s25 = int_to_ptr.hbm [resolvable:$true] %s442_s25 }
  0x31   : > { %s419_s1 = sshll.u32 %s5812_s28, 4  ;;  %s5813_s21 = smov [#allocation15]   ;;  %s420_s1 = int_to_ptr.vmem [resolvable:$true] %s419_s1 }
  0x32   : > { %5259 = dma.hbm_to_vmem [thread:$0]  (!%p5956_p12), %s418_s27, 32, %s420_s1, [#allocation11]  }
  0x33   : > { %s444_s22 = sshll.u32 %s5813_s21, 4  ;;  %s5814_s15 = smov 64   ;;  %s445_s22 = int_to_ptr.vmem [resolvable:$true] %s444_s22 }
  0x34   : > { %s5815_s14 = smov 4   ;;  %s473_s30 = sshll.u32 %s8342_s11, 4  ;;  %s474_s30 = int_to_ptr.hbm [resolvable:$true] %s473_s30 }
  0x35   : > { %5265 = dma.hbm_to_vmem [thread:$0]  (!%p5956_p12), %s443_s25, 1024, %s445_s22, [#allocation14], %s5814_s15, %s5814_s15, %s5815_s14  }
  0x36   : > { %s5816_s17 = smov [#allocation18]   ;;  %499 = sbr.rel (%p5942_p10) target bundleno = 2041 (0x7f9), region = 68 }
  0x37   : > { %s475_s2 = sshll.u32 %s5816_s17, 4  ;;  %s476_s2 = int_to_ptr.vmem [resolvable:$true] %s475_s2 }
  0x38   : > { %5271 = dma.hbm_to_vmem [thread:$0]  (!%p5956_p12), %s474_s30, 4096, %s476_s2, [#allocation17], %s5814_s15, %s5814_s15, %s5815_s14  }
  0x3b   : > { %5763 = dma.done.wait (%p5276_p9), [#allocation5], 256  }
  0x3c   : > { %5765 = vsyncadd (%p5276_p9), [#allocation5], 4294967040 }
  0x3d   : > { %5767 = dma.done.wait (%p5276_p9), [#allocation8], 768  }
  0x3e   : > { %5769 = vsyncadd (%p5276_p9), [#allocation8], 4294966528 }
  0x3f   : > { %5771 = dma.done.wait (%p5276_p9), [#allocation11], 288  }
  0x40   : > { %5773 = vsyncadd (%p5276_p9), [#allocation11], 4294967008 }
  0x41   : > { %5775 = dma.done.wait (%p5276_p9), [#allocation14], 3072  }
  0x42   : > { %5777 = vsyncadd (%p5276_p9), [#allocation14], 4294964224 }
  0x43   : > { %5779 = dma.done.wait (%p5276_p9), [#allocation17], 8192  }
  0x44   : > { %5781 = vsyncadd (%p5276_p9), [#allocation17], 4294959104  ;;  %p589_p13 = scmp.lt.s32.totalorder %s5914_s29, 1  ;;  %v625_v0 = vlaneseq  ;;  %v8351_v1 = vmov 0.0   ;;  %v6102_v22 = vld [vmem:[#allocation4] ss:$0 sm:$0xff] }
  0x45   : > { %609 = vst [vmem:[#allocation2] sm:$0xff] %v8351_v1  ;;  %v6109_v25 = vld [vmem:[#allocation4 + $0x1] ss:$0 sm:$0xff]  ;;  %v6120_v30 = vld [vmem:[#allocation4 + $0x2] ss:$0 sm:$0xff]  ;;  %s5820_s2 = smov 64  }
  0x46   : > { %s6036_s1 = scalar_select %p589_p13, %s5914_s29, 1  ;;  %610 = vst [vmem:[#allocation2 + $0x8] sm:$0x1] %v8351_v1  ;;  %v6039_v2 = vshrl.u32 %v625_v0, 7  ;;  %v6122_v31 = vld [vmem:[#allocation4 + $0x3] ss:$0 sm:$0xff] }
  0x47   : > { %611 = vst [vmem:[#allocation2 + $0x49] sm:$0xff] %v8351_v1  ;;  %v6131_v34 = vld [vmem:[#allocation4 + $0x4] ss:$0 sm:$0xff]  ;;  %v6139_v36 = vld [vmem:[#allocation4 + $0x5] ss:$0 sm:$0xff]  ;;  %s586_s23 = sand.u32 1, %s5792_s26  }
  0x48   : > { %8530 = vst [vmem:[#allocation32_spill] sm:$0xff] %v6039_v2  ;;  %s5081_s20 = sshll.u32 %s6036_s1, 6  ;;  %v634_v3 = vand.u32 7, %v6039_v2  ;;  %v630_v4 = vadd.s32 32, %v6039_v2  ;;  %v6047_v5 = vadd.s32 16, %v6039_v2  ;;  %v6059_v7 = vadd.s32 8, %v6039_v2 }
  0x49   : > { %612 = vst [vmem:[#allocation2 + $0x51] sm:$0x1] %v8351_v1  ;;  %s6054_s24 = scalar_lea.vmem %s8331_s0, %s5081_s20  ;;  %v6065_v9 = vadd.s32 40, %v6039_v2  ;;  %v6081_v15 = vadd.s32 24, %v6039_v2  ;;  %v6160_v47 = vld [vmem:[#allocation4 + $0x6] ss:$0 sm:$0xff] }
  0x4a   : > { %613 = vst [vmem:[#allocation3] sm:$0xff] %v8351_v1  ;;  %vm690_vm0 = vcmp.ge.s32.totalorder %v634_v3, 1  ;;  %vm714_vm1 = vcmp.le.s32.totalorder %v634_v3, 6  ;;  %v638_v6 = vand.u32 7, %v630_v4  ;;  %v6071_v11 = vld [vmem:[%s6054_s24] sm:$0xff]  ;;  %v6074_v12 = vld [vmem:[%s6054_s24 + $0x8] sm:$0xff] }
  0x4b   : > { %616 = vst [vmem:[#allocation3 + $0x10] sm:$0x1] %v8351_v1  ;;  %v6062_v8 = vsel %vm690_vm0, 1.0, %v8351_v1  ;;  %v6077_v13 = vld [vmem:[%s6054_s24 + $0x10] sm:$0xff]  ;;  %v636_v14 = vand.u32 7, %v6047_v5  ;;  %v6084_v16 = vsel %vm714_vm1, 1.0, %v8351_v1  ;;  %v6148_v39 = vmul.f32 %v6109_v25, %v6071_v11 }
  0x4c   : > { %8531 = vst [vmem:[#allocation33_spill] sm:$0xff] %v6062_v8  ;;  %v6068_v10 = vmul.f32 0.0, %v6062_v8  ;;  %v6087_v17 = vld [vmem:[%s6054_s24 + $0x18] sm:$0xff]  ;;  %v6090_v18 = vld [vmem:[%s6054_s24 + $0x28] sm:$0xff]  ;;  %v6093_v19 = vld [vmem:[%s6054_s24 + $0x30] sm:$0xff]  ;;  %vm6096_vm2 = vcmp.ge.s32.totalorder %v638_v6, 1  ;;  %v840_v40 = vmul.f32 %v6109_v25, %v6074_v12  ;;  %v918_v56 = vmul.f32 %v6131_v34, %v6071_v11 }
  0x4d   : > { %8533 = vst [vmem:[#allocation35_spill] sm:$0xff] %v6074_v12  ;;  %vm6104_vm3 = vcmp.le.s32.totalorder %v638_v6, 6  ;;  %v820_v24 = vld [vmem:[#allocation2 + $0x1] sm:$0xff]  ;;  %v6112_v26 = vmul.f32 0.0, %v6084_v16  ;;  %v6115_v27 = vld [vmem:[%s6054_s24 + $0x38] sm:$0xff]  ;;  %v6127_v32 = vsel %vm6096_vm2, 1.0, %v8351_v1  ;;  %v842_v48 = vmul.f32 %v6109_v25, %v6087_v17 }
  0x4e   : > { %8532 = vst [vmem:[#allocation34_spill] sm:$0xff] %v6068_v10  ;;  %v794_v21 = vmul.f32 0.0, %v6068_v10  ;;  %v828_v28 = vmul.f32 0.0, %v820_v24  ;;  %v6136_v35 = vsel %vm6104_vm3, 1.0, %v8351_v1  ;;  %v6142_v37 = vld [vmem:[%s6054_s24 + $0x20] sm:$0xff]  ;;  %vm6174_vm4 = vcmp.ge.s32.totalorder %v636_v14, 1 }
  0x4f   : > { %8534 = vst [vmem:[#allocation36_spill] sm:$0xff] %v6084_v16  ;;  %v6169_v51 = vld [vmem:[#allocation4 + $0x7] ss:$0 sm:$0xff]  ;;  %v6180_v53 = vmul.f32 %v6109_v25, %v6142_v37  ;;  %v6190_v58 = vmul.f32 %v6131_v34, %v6142_v37  ;;  %v920_v62 = vmul.f32 %v6131_v34, %v6077_v13  ;;  %v6202_v63 = vmul.f32 %v6131_v34, %v6074_v12  ;;  %s4623_s24 = sshll.u32 %s586_s23, 6  ;;  %s5187_s28 = sshll.u32 %s5914_s29, 6 }
  0x50   : > { %8535 = vst [vmem:[#allocation37_spill] sm:$0xff] %v6090_v18  ;;  %v804_v29 = vmul.f32 %v6102_v22, %v794_v21  ;;  %v838_v33 = vmul.f32 %v6109_v25, %v828_v28  ;;  %v6206_v0 = vmul.f32 %v6131_v34, %v6090_v18  ;;  %v6216_v21 = vsel %vm6174_vm4, 1.0, %v8351_v1  ;;  %v6221_v28 = vld [vmem:[#allocation4 + $0x8] ss:$0 sm:$0xff]  ;;  %s7856_s27 = scalar_lea.vmem [#allocation19], %s4623_s24  ;;  %s4422_s15 = scalar_lea.hbm %s8344_s13, %s5187_s28 }
  0x51   : > { %778 = vst [vmem:[#allocation2 + $0x9] sm:$0xff] %v6071_v11  ;;  %v999_v24 = vmul.f32 %v6169_v51, %v6074_v12  ;;  %vm716_vm5 = vcmp.le.s32.totalorder %v636_v14, 6  ;;  %s4423_s25 = sshll.u32 %s7856_s27, 4  ;;  %s4425_s14 = sshll.u32 %s4422_s15, 4  ;;  %s4424_s25 = int_to_ptr.vmem [resolvable:$true] %s4423_s25  ;;  %s4426_s14 = int_to_ptr.hbm [resolvable:$true] %s4425_s14 }
  0x52   : > { %779 = vst [vmem:[#allocation2 + $0x11] sm:$0xff] %v6074_v12  ;;  %v846_v43 = vadd.f32 %v838_v33, %v804_v29  ;;  %s4408_s19 = scalar_lea.sflag [#allocation6], %s586_s23  ;;  %s5732_s7 = sshra.s32 %s4426_s14, 4  ;;  %s5733_s7 = int_to_ptr.hbm [resolvable:$true] %s5732_s7 }
  0x53   : > { %780 = vst [vmem:[#allocation2 + $0x19] sm:$0xff] %v6077_v13  ;;  %s5734_s30 = scalar_lea.hbm %s5733_s7, 64  ;;  %p5739_p3 = scmp.lt.s32.totalorder %s5733_s7, %s8344_s13 }
  0x54   : > { %8540 = vst [vmem:[#allocation38_spill] sm:$0xff] %v6112_v26  ;;  %p5735_p0 = scmp.ne.s32.totalorder %s5733_s7, %s5734_s30 }
  0x55   : > { %8541 = vst [vmem:[#allocation39_spill] sm:$0xff] %v6115_v27 }
  0x56   : > { %781 = vst [vmem:[#allocation2 + $0x21] sm:$0xff] %v6087_v17  ;;  %p5736_p1 = pnand %p5735_p0, %p5931_p5 }
  0x57   : > { %783 = vst [vmem:[#allocation2 + $0x31] sm:$0xff] %v6090_v18 }
  0x58   : > { %8542 = vst [vmem:[#allocation40_spill] sm:$0xff] %v6127_v32  ;;  %v6144_v38 = vld [vmem:[#allocation2 + $0x8] sm:$0xff]  ;;  %p5737_p2 = pneg %p5736_p1 }
  0x59   : > { %784 = vst [vmem:[#allocation2 + $0x39] sm:$0xff] %v6093_v19  ;;  %v854_v41 = vld [vmem:[#allocation2 + $0x2] sm:$0xff]  ;;  %v6153_v42 = vld [vmem:[#allocation2 + $0x10] sm:$0xff]  ;;  %v889_v46 = vmul.f32 %v6062_v8, %v6144_v38 }
  0x5a   : > { %8543 = vst [vmem:[#allocation41_spill] sm:$0xff] %v6131_v34  ;;  %v6155_v44 = vld [vmem:[#allocation2 + $0xa] sm:$0xff]  ;;  %v862_v45 = vmul.f32 %v854_v41, %v6112_v26  ;;  %v962_v50 = vmul.f32 %v6062_v8, %v6153_v42  ;;  %v6186_v57 = vld [vmem:[#allocation2 + $0x12] sm:$0xff]  ;;  %v796_v29 = vmul.f32 %v6216_v21, %v6153_v42 }
  0x5b   : > { %8544 = vst [vmem:[#allocation42_spill] sm:$0xff] %v6136_v35  ;;  %v935_v49 = vmul.f32 %v6084_v16, %v6155_v44  ;;  %v899_v55 = vmul.f32 %v6122_v31, %v889_v46  ;;  %v1023_v59 = vmul.f32 %v6084_v16, %v6186_v57  ;;  %v6196_v61 = vld [vmem:[#allocation2 + $0x18] sm:$0xff] }
  0x5c   : > { %785 = vst [vmem:[#allocation2 + $0x41] sm:$0xff] %v6115_v27  ;;  %v872_v54 = vmul.f32 %v6120_v30, %v862_v45  ;;  %v972_v23 = vmul.f32 %v6160_v47, %v962_v50  ;;  %v6231_v45 = vsel %vm716_vm5, 1.0, %v8351_v1  ;;  %v891_v46 = vmul.f32 %v6216_v21, %v6196_v61 }
  0x5d   : > { %619 = vst [vmem:[#allocation3 + $0x90] sm:$0xfe] %v8351_v1  ;;  %v6194_v60 = vld [vmem:[#allocation2 + $0x20] sm:$0xff]  ;;  %v945_v4 = vmul.f32 %v6139_v36, %v935_v49  ;;  %v6237_v49 = vmul.f32 %v6169_v51, %v6090_v18  ;;  %v806_v14 = vmul.f32 %v6102_v22, %v796_v29  ;;  %v864_v50 = vmul.f32 %v6231_v45, %v6186_v57 }
  0x5e   : > { %622 = vst [vmem:[#allocation3 + $0xa0] sm:$0x3] %v8351_v1  ;;  %v880_v3 = vadd.f32 %v872_v54, %v846_v43  ;;  %v798_v6 = vmul.f32 %v6127_v32, %v6194_v60  ;;  %v6227_v33 = vld [vmem:[#allocation2 + $0x1a] sm:$0xff]  ;;  %v964_v8 = vmul.f32 %v6216_v21, %v6194_v60  ;;  %v1033_v27 = vmul.f32 %v6221_v28, %v1023_v59 }
  0x5f   : > { %782 = vst [vmem:[#allocation2 + $0x29] sm:$0xff] %v6142_v37  ;;  %v937_v1 = vmul.f32 %v6231_v45, %v6227_v33  ;;  %v874_v26 = vmul.f32 %v6120_v30, %v864_v50  ;;  %v635_v59 = vand.u32 7, %v6059_v7 }
  0x60   : > { %8547 = vst [vmem:[#allocation43_spill] sm:$0xff] %v6194_v60  ;;  %v6211_v20 = vld [vmem:[#allocation2 + $0x32] sm:$0xff]  ;;  %v907_v41 = vadd.f32 %v899_v55, %v880_v3  ;;  %v808_v43 = vmul.f32 %v6102_v22, %v798_v6 }
  0x61   : > { %8548 = vst [vmem:[#allocation44_spill] sm:$0xff] %v6216_v21  ;;  %v1027_v5 = vmul.f32 %v6136_v35, %v6211_v20  ;;  %v901_v21 = vmul.f32 %v6122_v31, %v891_v46  ;;  %v1001_v46 = vmul.f32 %v6169_v51, %v6087_v17  ;;  %vm691_vm6 = vcmp.ge.s32.totalorder %v635_v59, 1 }
  0x62   : > { %8549 = vst [vmem:[#allocation45_spill] sm:$0xff] %v6231_v45  ;;  %v926_v52 = vadd.f32 %v918_v56, %v907_v41  ;;  %v850_v3 = vadd.f32 %v842_v48, %v808_v43  ;;  %v848_v48 = vadd.f32 %v840_v40, %v806_v14  ;;  %v947_v40 = vmul.f32 %v6139_v36, %v937_v1 }
  0x63   : > { %v1037_v12 = vmul.f32 %v6221_v28, %v1027_v5  ;;  %vm715_vm7 = vcmp.le.s32.totalorder %v635_v59, 6 }
  0x64   : > { %v953_v43 = vadd.f32 %v945_v4, %v926_v52  ;;  %v882_v60 = vadd.f32 %v874_v26, %v848_v48  ;;  %v974_v4 = vmul.f32 %v6160_v47, %v964_v8  ;;  %v639_v26 = vand.u32 7, %v6065_v9 }
  0x66   : > { %v6244_v54 = vld [vmem:[#allocation2 + $0x28] sm:$0xff]  ;;  %v6246_v55 = vld [vmem:[#allocation2 + $0x30] sm:$0xff]  ;;  %v980_v2 = vadd.f32 %v972_v23, %v953_v43  ;;  %v909_v5 = vadd.f32 %v901_v21, %v882_v60  ;;  %vm695_vm8 = vcmp.ge.s32.totalorder %v639_v26, 1  ;;  %vm719_vm9 = vcmp.le.s32.totalorder %v639_v26, 6 }
  0x67   : > { %v6248_v6 = vld [vmem:[#allocation2 + $0x22] sm:$0xff]  ;;  %v6254_v10 = vld [vmem:[#allocation2 + $0x2a] sm:$0xff]  ;;  %v893_v56 = vmul.f32 %v6127_v32, %v6244_v54  ;;  %v966_v41 = vmul.f32 %v6127_v32, %v6246_v55 }
  0x68   : > { %v866_v29 = vmul.f32 %v6136_v35, %v6248_v6  ;;  %v939_v16 = vmul.f32 %v6136_v35, %v6254_v10  ;;  %v1007_v50 = vadd.f32 %v999_v24, %v980_v2  ;;  %v1025_v1 = vmul.f32 %v6231_v45, %v6248_v6  ;;  %v6296_v60 = vld [vmem:[#allocation10 + $0x4] ss:$0 sm:$0xff] }
  0x69   : > { %v903_v34 = vmul.f32 %v6122_v31, %v893_v56  ;;  %v976_v52 = vmul.f32 %v6160_v47, %v966_v41 }
  0x6a   : > { %v876_v18 = vmul.f32 %v6120_v30, %v866_v29  ;;  %v6276_v29 = vld [vmem:[#allocation10 + $0x2] ss:$0 sm:$0xff]  ;;  %v949_v56 = vmul.f32 %v6139_v36, %v939_v16  ;;  %v1041_v8 = vadd.f32 %v1033_v27, %v1007_v50 }
  0x6c   : > { %v884_v14 = vadd.f32 %v876_v18, %v850_v3  ;;  %v928_v18 = vadd.f32 %v920_v62, %v909_v5  ;;  %v8550_v3 = vmov 0.0   ;;  %v1050_v27 = vadd.f32 %v6276_v29, %v1041_v8  ;;  %v6321_v8 = vld [vmem:[#allocation2 + $0x38] sm:$0xff] }
  0x6d   : > { %v6283_v41 = vsel %vm691_vm6, 1.0, %v8550_v3  ;;  %v6286_v2 = vsel %vm715_vm7, 1.0, %v8550_v3  ;;  %v6310_v50 = vsel %vm695_vm8, 1.0, %v8550_v3 }
  0x6e   : > { %v911_v23 = vadd.f32 %v903_v34, %v884_v14  ;;  %8551 = vst [vmem:[#allocation46_spill] sm:$0xff] %v6283_v41  ;;  %v795_v16 = vmul.f32 %v6283_v41, %v6144_v38  ;;  %v863_v9 = vmul.f32 %v6286_v2, %v6155_v44  ;;  %v890_v34 = vmul.f32 %v6283_v41, %v6153_v42 }
  0x6f   : > { %8552 = vst [vmem:[#allocation47_spill] sm:$0xff] %v6286_v2  ;;  %v955_v62 = vadd.f32 %v947_v40, %v928_v18  ;;  %v936_v21 = vmul.f32 %v6286_v2, %v6186_v57  ;;  %v1058_v44 = vsub.f32 %v1050_v27, %v6071_v11  ;;  %v963_v14 = vmul.f32 %v6283_v41, %v6196_v61 }
  0x70   : > { %v930_v7 = vadd.f32 %v6190_v58, %v911_v23  ;;  %v1035_v58 = vmul.f32 %v6221_v28, %v1025_v1  ;;  %v805_v38 = vmul.f32 %v6102_v22, %v795_v16  ;;  %v873_v48 = vmul.f32 %v6120_v30, %v863_v9 }
  0x71   : > { %v982_v43 = vadd.f32 %v974_v4, %v955_v62  ;;  %v900_v42 = vmul.f32 %v6122_v31, %v890_v34  ;;  %v946_v57 = vmul.f32 %v6139_v36, %v936_v21  ;;  %v799_v4 = vmul.f32 %v6310_v50, %v6244_v54 }
  0x72   : > { %v957_v24 = vadd.f32 %v949_v56, %v930_v7  ;;  %v847_v59 = vadd.f32 %v6148_v39, %v805_v38  ;;  %v1067_v56 = vmul.f32 %v6296_v60, %v1058_v44  ;;  %v6319_v39 = vsel %vm719_vm9, 1.0, %v8550_v3 }
  0x73   : > { %v1009_v5 = vadd.f32 %v1001_v46, %v982_v43  ;;  %8553 = vst [vmem:[#allocation48_spill] sm:$0xff] %v6319_v39  ;;  %v809_v46 = vmul.f32 %v6102_v22, %v799_v4  ;;  %v867_v26 = vmul.f32 %v6319_v39, %v6254_v10  ;;  %v894_v9 = vmul.f32 %v6310_v50, %v6246_v55 }
  0x74   : > { %v984_v40 = vadd.f32 %v976_v52, %v957_v24  ;;  %v881_v1 = vadd.f32 %v873_v48, %v847_v59  ;;  %v1024_v52 = vmul.f32 %v6286_v2, %v6227_v33  ;;  %v6324_v18 = vadd.f32 %v1067_v56, %v6071_v11  ;;  %v6343_v48 = vld [vmem:[#allocation2 + $0x3a] sm:$0xff] }
  0x75   : > { %v1043_v7 = vadd.f32 %v1035_v58, %v1009_v5  ;;  %v940_v34 = vmul.f32 %v6319_v39, %v6211_v20  ;;  %v851_v11 = vadd.f32 %v6180_v53, %v809_v46  ;;  %v877_v62 = vmul.f32 %v6120_v30, %v867_v26 }
  0x76   : > { %v1011_v23 = vadd.f32 %v6237_v49, %v984_v40  ;;  %8554 = vst [vmem:[#allocation49_spill] sm:$0xff] %v6324_v18  ;;  %v908_v49 = vadd.f32 %v900_v42, %v881_v1  ;;  %1083 = vadd.xlane.f32.xlu0 %v6324_v18  ;;  %v967_v21 = vmul.f32 %v6310_v50, %v6321_v8 }
  0x77   : > { %v1052_v27 = vadd.f32 %v6276_v29, %v1043_v7  ;;  %v973_v58 = vmul.f32 %v6160_v47, %v963_v14  ;;  %v904_v38 = vmul.f32 %v6122_v31, %v894_v9  ;;  %v1000_v53 = vmul.f32 %v6169_v51, %v6077_v13 }
  0x78   : > { %v1045_v16 = vadd.f32 %v1037_v12, %v1011_v23  ;;  %v927_v24 = vadd.f32 %v6202_v63, %v908_v49  ;;  %v1034_v43 = vmul.f32 %v6221_v28, %v1024_v52  ;;  %v885_v42 = vadd.f32 %v877_v62, %v851_v11 }
  0x79   : > { %v1060_v44 = vsub.f32 %v1052_v27, %v6077_v13  ;;  %v950_v56 = vmul.f32 %v6139_v36, %v940_v34  ;;  %v637_v63 = vand.u32 7, %v6081_v15  ;;  %v977_v4 = vmul.f32 %v6160_v47, %v967_v21  ;;  %v8559_v27 = vld [vmem:[#allocation43_spill] sm:$0xff] }
  0x7a   : > { %v1054_v12 = vadd.f32 %v6276_v29, %v1045_v16  ;;  %v954_v59 = vadd.f32 %v946_v57, %v927_v24  ;;  %v912_v5 = vadd.f32 %v904_v38, %v885_v42  ;;  %v1028_v23 = vmul.f32 %v6319_v39, %v6343_v48 }
  0x7b   : > { %v1069_v14 = vmul.f32 %v6296_v60, %v1060_v44  ;;  %vm693_vm10 = vcmp.ge.s32.totalorder %v637_v63, 1  ;;  %v841_v52 = vmul.f32 %v6109_v25, %v6077_v13  ;;  %vm717_vm11 = vcmp.le.s32.totalorder %v637_v63, 6 }
  0x7c   : > { %v1062_v40 = vsub.f32 %v1054_v12, %v6142_v37  ;;  %v981_v7 = vadd.f32 %v973_v58, %v954_v59  ;;  %v931_v15 = vadd.f32 %v6206_v0, %v912_v5  ;;  %v6364_v46 = vsel %vm693_vm10, 1.0, %v8550_v3  ;;  %v8561_v59 = vld [vmem:[#allocation35_spill] sm:$0xff] }
  0x7d   : > { %v6360_v57 = vadd.f32 %v1069_v14, %v6077_v13  ;;  %8556 = vst [vmem:[#allocation51_spill] sm:$0xff] %v6364_v46  ;;  %v6370_v49 = vsel %vm717_vm11, 1.0, %v8550_v3  ;;  %v797_v9 = vmul.f32 %v6364_v46, %v6196_v61  ;;  %v1004_v0 = vmul.f32 %v6169_v51, %v6093_v19  ;;  %v8562_v14 = vld [vmem:[#allocation41_spill] sm:$0xff] }
  0x7e   : > { %v1071_v1 = vmul.f32 %v6296_v60, %v1062_v40  ;;  %v1008_v16 = vadd.f32 %v1000_v53, %v981_v7  ;;  %8558 = vst [vmem:[#allocation53_spill] sm:$0xff] %v6370_v49  ;;  %v958_v13 = vadd.f32 %v950_v56, %v931_v15  ;;  %v865_v34 = vmul.f32 %v6370_v49, %v6227_v33 }
  0x7f   : > { %8555 = vst [vmem:[#allocation50_spill] sm:$0xff] %v6360_v57  ;;  %1087 = vadd.xlane.f32.xlu1 %v6360_v57  ;;  %v892_v11 = vmul.f32 %v6364_v46, %v8559_v27  ;;  %v807_v21 = vmul.f32 %v6102_v22, %v797_v9  ;;  %v1038_v61 = vmul.f32 %v6221_v28, %v1028_v23 }
  0x80   : > { %v6367_v26 = vadd.f32 %v1071_v1, %v6142_v37  ;;  %v1042_v62 = vadd.f32 %v1034_v43, %v1008_v16  ;;  %v985_v12 = vadd.f32 %v977_v4, %v958_v13  ;;  %v875_v24 = vmul.f32 %v6120_v30, %v865_v34  ;;  %v8560_v43 = vld [vmem:[#allocation32_spill] sm:$0xff]  ;;  %v8563_v4 = vld [vmem:[#allocation37_spill] sm:$0xff] }
  0x81   : > { %v938_v58 = vmul.f32 %v6370_v49, %v6248_v6  ;;  %v849_v44 = vadd.f32 %v841_v52, %v807_v21  ;;  %v902_v33 = vmul.f32 %v6122_v31, %v892_v11  ;;  %v965_v53 = vmul.f32 %v6364_v46, %v6244_v54 }
  0x82   : > { %8557 = vst [vmem:[#allocation52_spill] sm:$0xff] %v6367_v26  ;;  %1091 = vadd.xlane.f32.xlu2 %v6367_v26  ;;  %v1051_v38 = vadd.f32 %v6276_v29, %v1042_v62  ;;  %v1012_v42 = vadd.f32 %v1004_v0, %v985_v12  ;;  %v632_v40 = vadd.s32 48, %v8560_v43  ;;  %v921_v5 = vmul.f32 %v8562_v14, %v6087_v17 }
  0x83   : > { %v883_v63 = vadd.f32 %v875_v24, %v849_v44  ;;  %v844_v6 = vmul.f32 %v6109_v25, %v8563_v4  ;;  %v948_v15 = vmul.f32 %v6139_v36, %v938_v58  ;;  %v975_v54 = vmul.f32 %v6160_v47, %v965_v53 }
  0x84   : > { %v1059_v56 = vsub.f32 %v1051_v38, %v8561_v59  ;;  %v1046_v23 = vadd.f32 %v1038_v61, %v1012_v42  ;;  %v640_v1 = vand.u32 7, %v632_v40  ;;  %v1026_v9 = vmul.f32 %v6370_v49, %v6254_v10 }
  0x85   : > { %v910_v52 = vadd.f32 %v902_v33, %v883_v63  ;;  %v1002_v61 = vmul.f32 %v6169_v51, %v6142_v37  ;;  %v888_v33 = vld [vmem:[#allocation2 + $0x40] sm:$0xff] }
  0x86   : > { %v1068_v7 = vmul.f32 %v6296_v60, %v1059_v56  ;;  %v1055_v16 = vadd.f32 %v6276_v29, %v1046_v23  ;;  %vm696_vm12 = vcmp.ge.s32.totalorder %v640_v1, 1  ;;  %vm720_vm13 = vcmp.le.s32.totalorder %v640_v1, 6  ;;  %v1021_v23 = vld [vmem:[#allocation2 + $0x42] sm:$0xff] }
  0x87   : > { %v929_v0 = vadd.f32 %v921_v5, %v910_v52  ;;  %v6407_v34 = vsel %vm696_vm12, 1.0, %v8550_v3  ;;  %v6410_v27 = vsel %vm720_vm13, 1.0, %v8550_v3  ;;  %v924_v56 = vmul.f32 %v8562_v14, %v6093_v19 }
  0x88   : > { %v6404_v13 = vadd.f32 %v1068_v7, %v8561_v59  ;;  %8565 = vst [vmem:[#allocation32_spill] sm:$0xff] %v6407_v34  ;;  %v1063_v11 = vsub.f32 %v1055_v16, %v8563_v4  ;;  %v800_v62 = vmul.f32 %v6407_v34, %v6246_v55  ;;  %v868_v10 = vmul.f32 %v6410_v27, %v6211_v20 }
  0x89   : > { %8566 = vst [vmem:[#allocation35_spill] sm:$0xff] %v6410_v27  ;;  %v895_v21 = vmul.f32 %v6407_v34, %v6321_v8  ;;  %v956_v12 = vadd.f32 %v948_v15, %v929_v0  ;;  %v1036_v55 = vmul.f32 %v6221_v28, %v1026_v9  ;;  %v941_v40 = vmul.f32 %v6410_v27, %v6343_v48  ;;  %v8568_v9 = vld [vmem:[#allocation39_spill] sm:$0xff] }
  0x8a   : > { %8564 = vst [vmem:[#allocation43_spill] sm:$0xff] %v6404_v13  ;;  %1085 = vadd.xlane.f32.xlu0 %v6404_v13  ;;  %v1072_v24 = vmul.f32 %v6296_v60, %v1063_v11  ;;  %v810_v58 = vmul.f32 %v6102_v22, %v800_v62  ;;  %v878_v38 = vmul.f32 %v6120_v30, %v868_v10 }
  0x8b   : > { %v983_v44 = vadd.f32 %v975_v54, %v956_v12  ;;  %v905_v42 = vmul.f32 %v6122_v31, %v895_v21  ;;  %v968_v63 = vmul.f32 %v6407_v34, %v888_v33  ;;  %v1029_v15 = vmul.f32 %v6410_v27, %v1021_v23 }
  0x8c   : > { %v6427_v20 = vadd.f32 %v1072_v24, %v8563_v4  ;;  %v852_v53 = vadd.f32 %v844_v6, %v810_v58  ;;  %v951_v4 = vmul.f32 %v6139_v36, %v941_v40  ;;  %v1005_v0 = vmul.f32 %v6169_v51, %v8568_v9 }
  0x8d   : > { %v1010_v37 = vadd.f32 %v1002_v61, %v983_v44  ;;  %v978_v52 = vmul.f32 %v6160_v47, %v968_v63  ;;  %v1039_v10 = vmul.f32 %v6221_v28, %v1029_v15 }
  0x8e   : > { %8567 = vst [vmem:[#allocation41_spill] sm:$0xff] %v6427_v20  ;;  %1093 = vadd.xlane.f32.xlu2 %v6427_v20  ;;  %v886_v59 = vadd.f32 %v878_v38, %v852_v53 }
  0x8f   : > { %v1044_v5 = vadd.f32 %v1036_v55, %v1010_v37  ;;  %v5818_v55 = vmov 128.0  }
  0x90   : > { %v913_v1 = vadd.f32 %v905_v42, %v886_v59  ;;  %5377 = vrcp.f32 %v5818_v55  ;;  %v845_v59 = vmul.f32 %v6109_v25, %v6093_v19 }
  0x91   : > { %v1053_v6 = vadd.f32 %v6276_v29, %v1044_v5 }
  0x92   : > { %v932_v7 = vadd.f32 %v924_v56, %v913_v1 }
  0x93   : > { %v1061_v54 = vsub.f32 %v1053_v6, %v6087_v17 }
  0x94   : > { %v959_v16 = vadd.f32 %v951_v4, %v932_v7 }
  0x95   : > { %v1070_v11 = vmul.f32 %v6296_v60, %v1061_v54 }
  0x96   : > { %v986_v62 = vadd.f32 %v978_v52, %v959_v16  ;;  %v5378_v53 = vpop.eup %5377 }
  0x97   : > { %v6446_v21 = vadd.f32 %v1070_v11, %v6087_v17  ;;  %v633_v17 = vadd.s32 56, %v8560_v43  ;;  %v1100_v40 = vmul.f32 128.0, %v5378_v53  ;;  %vm1104_vm0 = vweird.f32 %v5378_v53  ;;  %v1022_v11 = vld [vmem:[#allocation2 + $0x4a] sm:$0xff] }
  0x98   : > { %v1013_v12 = vadd.f32 %v1005_v0, %v986_v62 }
  0x99   : > { %8569 = vst [vmem:[#allocation37_spill] sm:$0xff] %v6446_v21  ;;  %1089 = vadd.xlane.f32.xlu1 %v6446_v21  ;;  %v641_v42 = vand.u32 7, %v633_v17  ;;  %v1101_v1 = vsub.f32 1.0, %v1100_v40 }
  0x9a   : > { %v1047_v61 = vadd.f32 %v1039_v10, %v1013_v12  ;;  %v1006_v10 = vmul.f32 0.0, %v6169_v51 }
  0x9b   : > { %vm697_vm14 = vcmp.ge.s32.totalorder %v641_v42, 1  ;;  %vm721_vm15 = vcmp.le.s32.totalorder %v641_v42, 6  ;;  %v1102_v52 = vmul.f32 %v5378_v53, %v1101_v1 }
  0x9c   : > { %v1056_v24 = vadd.f32 %v6276_v29, %v1047_v61  ;;  %v6458_v37 = vsel %vm697_vm14, 1.0, %v8550_v3  ;;  %v6465_v63 = vsel %vm721_vm15, 1.0, %v8550_v3 }
  0x9d   : > { %8571 = vst [vmem:[#allocation54_spill] sm:$0xff] %v6458_v37  ;;  %v801_v56 = vmul.f32 %v6458_v37, %v6321_v8  ;;  %v869_v43 = vmul.f32 %v6465_v63, %v6343_v48  ;;  %v896_v7 = vmul.f32 %v6458_v37, %v888_v33  ;;  %v6476_v3 = vmul.f32 0.0, %v6458_v37  ;;  %v961_v48 = vld [vmem:[#allocation2 + $0x48] sm:$0xff] }
  0x9e   : > { %v1064_v58 = vsub.f32 %v1056_v24, %v6093_v19  ;;  %8572 = vst [vmem:[#allocation55_spill] sm:$0xff] %v6465_v63  ;;  %v942_v15 = vmul.f32 %v6465_v63, %v1021_v23  ;;  %v1103_v33 = vadd.f32 %v5378_v53, %v1102_v52 }
  0x9f   : > { %v811_v5 = vmul.f32 %v6102_v22, %v801_v56  ;;  %v879_v6 = vmul.f32 %v6120_v30, %v869_v43  ;;  %v906_v8 = vmul.f32 %v6122_v31, %v896_v7  ;;  %8573 = vst [vmem:[#allocation56_spill] sm:$0xff] %v6476_v3  ;;  %v969_v30 = vmul.f32 %v961_v48, %v6476_v3 }
  0xa0   : > { %v1073_v38 = vmul.f32 %v6296_v60, %v1064_v58  ;;  %v952_v16 = vmul.f32 %v6139_v36, %v942_v15  ;;  %v6487_v12 = vsel %vm1104_vm0, %v5378_v53, %v1103_v33 }
  0xa1   : > { %v853_v4 = vadd.f32 %v845_v59, %v811_v5  ;;  %v979_v31 = vmul.f32 %v6160_v47, %v969_v30 }
  0xa2   : > { %v6453_v44 = vadd.f32 %v1073_v38, %v6093_v19  ;;  %v925_v19 = vmul.f32 %v8562_v14, %v8568_v9  ;;  %v6482_v14 = vmul.f32 0.0, %v6465_v63 }
  0xa3   : > { %v887_v25 = vadd.f32 %v879_v6, %v853_v4 }
  0xa4   : > { %8570 = vst [vmem:[#allocation39_spill] sm:$0xff] %v6453_v44  ;;  %1095 = vadd.xlane.f32.xlu2 %v6453_v44  ;;  %v1030_v23 = vmul.f32 %v1022_v11, %v6482_v14  ;;  %v5097_v11 = vld [vmem:[%s8336_s5 + $0x74] sm:$0xf] }
  0xa5   : > { %v914_v22 = vadd.f32 %v906_v8, %v887_v25  ;;  %8574 = vst [vmem:[#allocation57_spill] sm:$0xff] %v6482_v14 }
  0xa6   : > { %v1040_v36 = vmul.f32 %v6221_v28, %v1030_v23 }
  0xa7   : > { %v933_v54 = vadd.f32 %v925_v19, %v914_v22 }
  0xa9   : > { %v960_v0 = vadd.f32 %v952_v16, %v933_v54 }
  0xab   : > { %v987_v62 = vadd.f32 %v979_v31, %v960_v0  ;;  %v4702_v0 = vld [vmem:[%s8336_s5 + $0x70] sm:$0xf]  ;;  %v5098_v31 = vld [vmem:[%s8336_s5 + $0x74] sm:$0xf0] }
  0xad   : > { %v1014_v61 = vadd.f32 %v1006_v10, %v987_v62  ;;  %v4703_v62 = vor.u32 %v5098_v31, %v4702_v0  ;;  %v4704_v10 = vld [vmem:[%s8336_s5 + $0x78] sm:$0xf0] }
  0xae   : > { %v4707_v23 = vor.u32 %v5097_v11, %v4704_v10  ;;  %v4670_v11 = vld [vmem:[%s8336_s5 + $0x30] sm:$0xf]  ;;  %v5089_v10 = vld [vmem:[%s8336_s5 + $0x34] sm:$0xf] }
  0xaf   : > { %v1048_v38 = vadd.f32 %v1040_v36, %v1014_v61  ;;  %1368 = vmatpush.bf16.msra.mxu0 %v4703_v62  ;;  %5188 = vmatpush.bf16.msra.mxu3 %v4703_v62  ;;  %v5090_v62 = vld [vmem:[%s8336_s5 + $0x34] sm:$0xf0] }
  0xb0   : > { %1397 = vmatpush.bf16.msra.mxu1 %v4707_v23 }
  0xb1   : > { %v1057_v47 = vadd.f32 %v6276_v29, %v1048_v38  ;;  %v5096_v38 = vld [vmem:[%s8336_s5 + $0x64] sm:$0xf0] }
  0xb3   : > { %v1065_v51 = vsub.f32 %v1057_v47, %v8568_v9  ;;  %v5095_v47 = vld [vmem:[%s8336_s5 + $0x64] sm:$0xf] }
  0xb5   : > { %v1074_v53 = vmul.f32 %v6296_v60, %v1065_v51  ;;  %v4696_v51 = vld [vmem:[%s8336_s5 + $0x68] sm:$0xf0] }
  0xb7   : > { %v6501_v40 = vadd.f32 %v1074_v53, %v8568_v9  ;;  %v4699_v53 = vor.u32 %v5095_v47, %v4696_v51  ;;  %v4662_v51 = vld [vmem:[%s8336_s5 + $0x20] sm:$0xf] }
  0xb9   : > { %8575 = vst [vmem:[#allocation58_spill] sm:$0xff] %v6501_v40  ;;  %1398 = vmatpush.bf16.msra.mxu1 %v4699_v53  ;;  %v5088_v53 = vld [vmem:[%s8336_s5 + $0x24] sm:$0xf0] }
  0xe9   : > { %v1084_v24 = vpop.xlane.xlu0 %1083 }
  0xea   : > { %v1106_v58 = vmul.f32 %v6487_v12, %v1084_v24 }
  0xec   : > { %v6492_v55 = vsub.f32 %v6324_v18, %v1106_v58  ;;  %v4694_v58 = vld [vmem:[%s8336_s5 + $0x60] sm:$0xf] }
  0xee   : > { %v1122_v17 = vmul.f32 %v6492_v55, %v6492_v55 }
  0xf0   : > { %1130 = vadd.xlane.f32.xlu0 %v1122_v17  ;;  %v4695_v17 = vor.u32 %v5096_v38, %v4694_v58 }
  0xf2   : > { %v1088_v43 = vpop.xlane.xlu1 %1087  ;;  %1369 = vmatpush.bf16.msra.mxu0 %v4695_v17  ;;  %5189 = vmatpush.bf16.msra.mxu3 %v4695_v17 }
  0xf3   : > { %v1108_v60 = vmul.f32 %v6487_v12, %v1088_v43 }
  0xf5   : > { %v1092_v42 = vpop.xlane.xlu2 %1091  ;;  %v6517_v4 = vsub.f32 %v6360_v57, %v1108_v60  ;;  %v4688_v60 = vld [vmem:[%s8336_s5 + $0x58] sm:$0xf0] }
  0xf6   : > { %v1110_v28 = vmul.f32 %v6487_v12, %v1092_v42 }
  0xf7   : > { %v1124_v19 = vmul.f32 %v6517_v4, %v6517_v4 }
  0xf8   : > { %v6504_v59 = vsub.f32 %v6367_v26, %v1110_v28  ;;  %1097 = vadd.xlane.f32.xlu0 %v6501_v40 }
  0xfa   : > { %v1126_v56 = vmul.f32 %v6504_v59, %v6504_v59 }
  0xfd   : > { %v1086_v29 = vpop.xlane.xlu0 %1085 }
  0xfe   : > { %v1107_v5 = vmul.f32 %v6487_v12, %v1086_v29  ;;  %v4686_v29 = vld [vmem:[%s8336_s5 + $0x50] sm:$0xf] }
 0x100   : > { %v6512_v1 = vsub.f32 %v6404_v13, %v1107_v5  ;;  %1138 = vadd.xlane.f32.xlu0 %v1126_v56  ;;  %v5094_v56 = vld [vmem:[%s8336_s5 + $0x54] sm:$0xf0]  ;;  %v5093_v5 = vld [vmem:[%s8336_s5 + $0x54] sm:$0xf] }
 0x101   : > { %v1094_v6 = vpop.xlane.xlu2 %1093  ;;  %v4687_v43 = vor.u32 %v5094_v56, %v4686_v29  ;;  %v4663_v56 = vor.u32 %v5088_v53, %v4662_v51 }
 0x102   : > { %v1123_v9 = vmul.f32 %v6512_v1, %v6512_v1  ;;  %v1111_v7 = vmul.f32 %v6487_v12, %v1094_v6 }
 0x103   : > { %1370 = vmatpush.bf16.msra.mxu0 %v4687_v43  ;;  %5190 = vmatpush.bf16.msra.mxu3 %v4687_v43 }
 0x104   : > { %1132 = vadd.xlane.f32.xlu1 %v1123_v9  ;;  %v6523_v25 = vsub.f32 %v6427_v20, %v1111_v7  ;;  %v4691_v7 = vor.u32 %v5093_v5, %v4688_v60  ;;  %v4664_v5 = vld [vmem:[%s8336_s5 + $0x28] sm:$0xf0]  ;;  %v4654_v60 = vld [vmem:[%s8336_s5 + $0x10] sm:$0xf] }
 0x106   : > { %v1127_v15 = vmul.f32 %v6523_v25, %v6523_v25  ;;  %1399 = vmatpush.bf16.msra.mxu1 %v4691_v7  ;;  %v5086_v7 = vld [vmem:[%s8336_s5 + $0x14] sm:$0xf0] }
 0x10c   : > { %1134 = vadd.xlane.f32.xlu1 %v1124_v19  ;;  %v1090_v8 = vpop.xlane.xlu1 %1089 }
 0x10d   : > { %v1109_v52 = vmul.f32 %v6487_v12, %v1090_v8  ;;  %v4678_v8 = vld [vmem:[%s8336_s5 + $0x40] sm:$0xf] }
 0x10f   : > { %v6527_v22 = vsub.f32 %v6446_v21, %v1109_v52  ;;  %v5092_v52 = vld [vmem:[%s8336_s5 + $0x44] sm:$0xf0] }
 0x111   : > { %v1125_v48 = vmul.f32 %v6527_v22, %v6527_v22 }
 0x113   : > { %1136 = vadd.xlane.f32.xlu2 %v1125_v48  ;;  %v4679_v48 = vor.u32 %v5092_v52, %v4678_v8  ;;  %v4655_v52 = vor.u32 %v5086_v7, %v4654_v60 }
 0x114   : > { %1140 = vadd.xlane.f32.xlu1 %v1127_v15 }
 0x115   : > { %1371 = vmatpush.bf16.msra.mxu0 %v4679_v48  ;;  %5191 = vmatpush.bf16.msra.mxu3 %v4679_v48 }
 0x117   : > { %v1096_v54 = vpop.xlane.xlu2 %1095 }
 0x118   : > { %v1112_v16 = vmul.f32 %v6487_v12, %v1096_v54  ;;  %v5091_v54 = vld [vmem:[%s8336_s5 + $0x44] sm:$0xf] }
 0x11a   : > { %v6535_v30 = vsub.f32 %v6453_v44, %v1112_v16  ;;  %v4680_v16 = vld [vmem:[%s8336_s5 + $0x48] sm:$0xf0] }
 0x11c   : > { %v1128_v33 = vmul.f32 %v6535_v30, %v6535_v30 }
 0x11e   : > { %1142 = vadd.xlane.f32.xlu2 %v1128_v33  ;;  %v4683_v33 = vor.u32 %v5091_v54, %v4680_v16 }
 0x120   : > { %1400 = vmatpush.bf16.msra.mxu1 %v4683_v33 }
 0x163   : > { %v1131_v61 = vpop.xlane.xlu0 %1130 }
 0x164   : > { %v1146_v36 = vmul.f32 %v1131_v61, %v6487_v12  ;;  %v4671_v61 = vor.u32 %v5090_v62, %v4670_v11 }
 0x166   : > { %v6552_v24 = vadd.f32 1e-06, %v1146_v36  ;;  %v4672_v36 = vld [vmem:[%s8336_s5 + $0x38] sm:$0xf0]  ;;  %1372 = vmatpush.bf16.msra.mxu0 %v4671_v61  ;;  %5192 = vmatpush.bf16.msra.mxu3 %v4671_v61  ;;  %v5083_v61 = vld [vmem:[%s8336_s5 + $0x4] sm:$0xf] }
 0x167   : > { %v4675_v47 = vor.u32 %v5089_v10, %v4672_v36  ;;  %v4648_v36 = vld [vmem:[%s8336_s5 + $0x8] sm:$0xf0] }
 0x168   : > { %5379 = vrsqrt.f32 %v6552_v24  ;;  %vm1168_vm2 = vweird.f32 %v6552_v24 }
 0x169   : > { %1401 = vmatpush.bf16.msra.mxu1 %v4675_v47 }
 0x16a   : > { %1373 = vmatpush.bf16.msra.mxu0 %v4663_v56  ;;  %5193 = vmatpush.bf16.msra.mxu3 %v4663_v56 }
 0x16b   : > { %v1098_v42 = vpop.xlane.xlu0 %1097 }
 0x16c   : > { %v1113_v28 = vmul.f32 %v6487_v12, %v1098_v42  ;;  %v5087_v42 = vld [vmem:[%s8336_s5 + $0x24] sm:$0xf] }
 0x16d   : > { %v4667_v43 = vor.u32 %v5087_v42, %v4664_v5 }
 0x16e   : > { %v6580_v9 = vpop.eup %5379  ;;  %v6583_v6 = vsub.f32 %v6501_v40, %v1113_v28  ;;  %1374 = vmatpush.bf16.msra.mxu0 %v4655_v52  ;;  %5194 = vmatpush.bf16.msra.mxu3 %v4655_v52 }
 0x16f   : > { %v1163_v15 = vmul.f32 %v6580_v9, %v6552_v24  ;;  %1402 = vmatpush.bf16.msra.mxu1 %v4667_v43  ;;  %vm1169_vm1 = vweird.f32 %v6580_v9 }
 0x170   : > { %v1129_v19 = vmul.f32 %v6583_v6, %v6583_v6  ;;  %vm1170_vm3 = vmor %vm1168_vm2, %vm1169_vm1 }
 0x171   : > { %v1164_v23 = vmul.f32 %v6580_v9, %v1163_v15  ;;  %v4656_v15 = vld [vmem:[%s8336_s5 + $0x18] sm:$0xf0] }
 0x172   : > { %1144 = vadd.xlane.f32.xlu0 %v1129_v19  ;;  %v5085_v19 = vld [vmem:[%s8336_s5 + $0x14] sm:$0xf] }
 0x173   : > { %v1139_v0 = vpop.xlane.xlu0 %1138  ;;  %v1165_v28 = vmul.f32 0.5, %v1164_v23  ;;  %v4659_v54 = vor.u32 %v5085_v19, %v4656_v15  ;;  %v6668_v15 = vld [vmem:[#allocation10] ss:$0 sm:$0xff] }
 0x174   : > { %v1150_v31 = vmul.f32 %v1139_v0, %v6487_v12  ;;  %v4646_v0 = vld [vmem:[%s8336_s5] sm:$0xf] }
 0x175   : > { %v1166_v8 = vsub.f32 1.5, %v1165_v28  ;;  %1403 = vmatpush.bf16.msra.mxu1 %v4659_v54 }
 0x176   : > { %v6615_v38 = vadd.f32 1e-06, %v1150_v31  ;;  %v5084_v31 = vld [vmem:[%s8336_s5 + $0x4] sm:$0xf0] }
 0x177   : > { %v1133_v58 = vpop.xlane.xlu1 %1132  ;;  %v1167_v62 = vmul.f32 %v6580_v9, %v1166_v8  ;;  %v4647_v23 = vor.u32 %v5084_v31, %v4646_v0 }
 0x178   : > { %v1147_v17 = vmul.f32 %v1133_v58, %v6487_v12  ;;  %5381 = vrsqrt.f32 %v6615_v38  ;;  %vm1208_vm9 = vweird.f32 %v6615_v38 }
 0x179   : > { %1375 = vmatpush.bf16.msra.mxu0 %v4647_v23  ;;  %5195 = vmatpush.bf16.msra.mxu3 %v4647_v23  ;;  %v1171_v53 = vsel %vm1170_vm3, %v6580_v9, %v1167_v62  ;;  %v6672_v62 = vld [vmem:[#allocation10 + $0x1] ss:$0 sm:$0xff] }
 0x17a   : > { %v1155_v29 = vadd.f32 1e-06, %v1147_v17  ;;  %v4651_v17 = vor.u32 %v5083_v61, %v4648_v36  ;;  %v1242_v19 = vmul.f32 %v1171_v53, %v6492_v55 }
 0x17c   : > { %5383 = vrsqrt.f32 %v1155_v29  ;;  %1404 = vmatpush.bf16.msra.mxu1 %v4651_v17  ;;  %vm1178_vm4 = vweird.f32 %v1155_v29  ;;  %v1251_v31 = vmul.f32 %v6668_v15, %v1242_v19 }
 0x17e   : > { %v6643_v16 = vpop.eup %5381 }
 0x17f   : > { %v1135_v48 = vpop.xlane.xlu1 %1134  ;;  %v1203_v47 = vmul.f32 %v6643_v16, %v6615_v38  ;;  %vm1209_vm10 = vweird.f32 %v6643_v16 }
 0x180   : > { %v1148_v33 = vmul.f32 %v1135_v48, %v6487_v12  ;;  %vm6684_vm12 = vmor %vm1208_vm9, %vm1209_vm10  ;;  %vm614_vm10 = vcmask 523264  }
 0x181   : > { %v1204_v56 = vmul.f32 %v6643_v16, %v1203_v47 }
 0x182   : > { %v5384_v11 = vpop.eup %5383  ;;  %v1156_v10 = vadd.f32 1e-06, %v1148_v33 }
 0x183   : > { %v1173_v58 = vmul.f32 %v5384_v11, %v1155_v29  ;;  %vm1179_vm5 = vweird.f32 %v5384_v11  ;;  %v1205_v48 = vmul.f32 0.5, %v1204_v56 }
 0x184   : > { %5385 = vrsqrt.f32 %v1156_v10  ;;  %vm1180_vm6 = vmor %vm1178_vm4, %vm1179_vm5  ;;  %vm1188_vm7 = vweird.f32 %v1156_v10 }
 0x185   : > { %v1174_v51 = vmul.f32 %v5384_v11, %v1173_v58  ;;  %v1206_v55 = vsub.f32 1.5, %v1205_v48 }
 0x186   : > { %v1137_v28 = vpop.xlane.xlu2 %1136 }
 0x187   : > { %v1175_v42 = vmul.f32 0.5, %v1174_v51  ;;  %v1141_v5 = vpop.xlane.xlu1 %1140  ;;  %v1149_v43 = vmul.f32 %v1137_v28, %v6487_v12  ;;  %v1207_v53 = vmul.f32 %v6643_v16, %v1206_v55 }
 0x188   : > { %v1151_v60 = vmul.f32 %v1141_v5, %v6487_v12 }
 0x189   : > { %v1176_v24 = vsub.f32 1.5, %v1175_v42  ;;  %v1157_v8 = vadd.f32 1e-06, %v1149_v43 }
 0x18a   : > { %v5386_v7 = vpop.eup %5385  ;;  %v1159_v52 = vadd.f32 1e-06, %v1151_v60 }
 0x18b   : > { %v1177_v9 = vmul.f32 %v5384_v11, %v1176_v24  ;;  %v1183_v29 = vmul.f32 %v5386_v7, %v1156_v10  ;;  %5387 = vrsqrt.f32 %v1157_v8  ;;  %vm1189_vm8 = vweird.f32 %v5386_v7 }
 0x18c   : > { %5389 = vrsqrt.f32 %v1159_v52  ;;  %vm6677_vm11 = vmor %vm1188_vm7, %vm1189_vm8  ;;  %vm1198_vm13 = vweird.f32 %v1157_v8  ;;  %v1211_v24 = vsel %vm6684_vm12, %v6643_v16, %v1207_v53  ;;  %vm1218_vm15 = vweird.f32 %v1159_v52 }
 0x18d   : > { %v1181_v54 = vsel %vm1180_vm6, %v5384_v11, %v1177_v9  ;;  %v1184_v33 = vmul.f32 %v5386_v7, %v1183_v29  ;;  %vm620_vm6 = vcmask 523265   ;;  %vm1755_vm12 = vcmask 1041408  }
 0x18e   : > { %v1243_v0 = vmul.f32 %v1181_v54, %v6512_v1  ;;  %v1260_v1 = vadd.f32 %v6672_v62, %v1251_v31  ;;  %v1246_v54 = vmul.f32 %v1211_v24, %v6504_v59 }
 0x18f   : > { %v1185_v23 = vmul.f32 0.5, %v1184_v33 }
 0x190   : > { %v1252_v61 = vmul.f32 %v6668_v15, %v1243_v0 }
 0x191   : > { %v1186_v36 = vsub.f32 1.5, %v1185_v23  ;;  %v5388_v11 = vpop.eup %5387 }
 0x192   : > { %v1261_v47 = vadd.f32 %v6672_v62, %v1252_v61  ;;  %v5390_v17 = vpop.eup %5389  ;;  %v1193_v10 = vmul.f32 %v5388_v11, %v1157_v8  ;;  %vm1199_vm14 = vweird.f32 %v5388_v11 }
 0x193   : > { %v1187_v51 = vmul.f32 %v5386_v7, %v1186_v36  ;;  %v1213_v38 = vmul.f32 %v5390_v17, %v1159_v52  ;;  %vm1219_vm0 = vweird.f32 %v5390_v17  ;;  %vm1200_vm1 = vmor %vm1198_vm13, %vm1199_vm14  ;;  %vm617_vm13 = vcmask 516096  }
 0x194   : > { %v6688_v28 = vpack.c.bf16 %v1261_v47, %v1260_v1  ;;  %v1194_v56 = vmul.f32 %v5388_v11, %v1193_v10  ;;  %vm1220_vm2 = vmor %vm1218_vm15, %vm1219_vm0  ;;  %vm1676_vm14 = vcmask 1046528   ;;  %vm1841_vm15 = vcmask 1045504  }
 0x195   : > { %v1191_v5 = vsel %vm6677_vm11, %v5386_v7, %v1187_v51  ;;  %v1214_v43 = vmul.f32 %v5390_v17, %v1213_v38  ;;  %vm1442_vm11 = vcmask 1040384   ;;  %vm623_vm0 = vcmask 517120  }
 0x196   : > { %1376 = vmatmul.bf16.vlgmr.msra.gmra.mxu0 %v6688_v28  ;;  %1405 = vmatmul.bf16.vlgmr.msra.gmra.mxu1 %v6688_v28  ;;  %v1195_v60 = vmul.f32 0.5, %v1194_v56  ;;  %v1244_v19 = vmul.f32 %v1191_v5, %v6517_v4  ;;  %v1255_v4 = vmul.f32 %v6668_v15, %v1246_v54 }
 0x197   : > { %v1215_v9 = vmul.f32 0.5, %v1214_v43 }
 0x198   : > { %v1196_v29 = vsub.f32 1.5, %v1195_v60  ;;  %v1253_v8 = vmul.f32 %v6668_v15, %v1244_v19  ;;  %v1264_v36 = vadd.f32 %v6672_v62, %v1255_v4 }
 0x199   : > { %v1216_v7 = vsub.f32 1.5, %v1215_v9 }
 0x19a   : > { %v1197_v48 = vmul.f32 %v5388_v11, %v1196_v29  ;;  %v1262_v55 = vadd.f32 %v6672_v62, %v1253_v8 }
 0x19b   : > { %v1217_v33 = vmul.f32 %v5390_v17, %v1216_v7  ;;  %v6711_v7 = vld [vmem:[#allocation2] sm:$0xff] }
 0x19c   : > { %v1201_v0 = vsel %vm1200_vm1, %v5388_v11, %v1197_v48  ;;  %621 = vst.msk [vmem:[#allocation3 + $0x98] sm:$0xfe] %vm620_vm6, %v6711_v7 }
 0x19d   : > { %v1245_v31 = vmul.f32 %v1201_v0, %v6527_v22  ;;  %v1221_v23 = vsel %vm1220_vm2, %v5390_v17, %v1217_v33  ;;  %615 = vst.msk [vmem:[#allocation3 + $0x8] sm:$0xff] %vm614_vm10, %v6711_v7 }
 0x19e   : > { %v1247_v16 = vmul.f32 %v1221_v23, %v6523_v25  ;;  %v1143_v25 = vpop.xlane.xlu2 %1142  ;;  %618 = vst.msk [vmem:[#allocation3 + $0x18] sm:$0x1] %vm617_vm13, %v6711_v7 }
 0x19f   : > { %v1254_v52 = vmul.f32 %v6668_v15, %v1245_v31  ;;  %v1152_v22 = vmul.f32 %v1143_v25, %v6487_v12 }
 0x1a0   : > { %v1256_v61 = vmul.f32 %v6668_v15, %v1247_v16 }
 0x1a1   : > { %v1263_v59 = vadd.f32 %v6672_v62, %v1254_v52  ;;  %v1160_v47 = vadd.f32 1e-06, %v1152_v22  ;;  %v1634_v52 = vld [vmem:[#allocation9 + $0x1] ss:$8 sm:$0x3] }
 0x1a2   : > { %v1265_v58 = vadd.f32 %v6672_v62, %v1256_v61  ;;  %v1743_v61 = vld [vmem:[#allocation3] sm:$0xfc] }
 0x1a3   : > { %v1269_v11 = vpack.c.bf16 %v1263_v59, %v1262_v55  ;;  %5391 = vrsqrt.f32 %v1160_v47  ;;  %vm1228_vm3 = vweird.f32 %v1160_v47  ;;  %v1799_v59 = vld [vmem:[#allocation9 + $0x2] ss:$8 sm:$0x3] }
 0x1a4   : > { %v1270_v1 = vpack.c.bf16 %v1265_v58, %v1264_v36  ;;  %v1970_v58 = vld [vmem:[#allocation9 + $0x4] ss:$8 sm:$0x3] }
 0x1a6   : > { %1381 = vmatmul.bf16.gmra.mxu0 %v1269_v11  ;;  %1410 = vmatmul.bf16.gmra.mxu1 %v1269_v11 }
 0x1a7   : > { %1386 = vmatmul.bf16.vlgmr.msra.gmra.mxu3 %v1270_v1 }
 0x1a9   : > { %v5392_v17 = vpop.eup %5391 }
 0x1aa   : > { %v1223_v10 = vmul.f32 %v5392_v17, %v1160_v47  ;;  %vm1229_vm4 = vweird.f32 %v5392_v17  ;;  %v6731_v47 = vperm.slane %v1799_v59, 0 }
 0x1ab   : > { %vm1230_vm5 = vmor %vm1228_vm3, %vm1229_vm4 }
 0x1ac   : > { %v1224_v51 = vmul.f32 %v5392_v17, %v1223_v10  ;;  %8583 = vst [vmem:[#allocation61_spill] sm:$0xff] %v6731_v47 }
 0x1ae   : > { %v1225_v56 = vmul.f32 0.5, %v1224_v51  ;;  %v5819_v51 = vmov 1.0  }
 0x1b0   : > { %v1226_v5 = vsub.f32 1.5, %v1225_v56  ;;  %v8584_v56 = vld [vmem:[#allocation36_spill] sm:$0xff] }
 0x1b2   : > { %v1227_v60 = vmul.f32 %v5392_v17, %v1226_v5  ;;  %v6738_v5 = vrot.slane %v8584_v56, 6 }
 0x1b4   : > { %v1231_v9 = vsel %vm1230_vm5, %v5392_v17, %v1227_v60  ;;  %8585 = vst [vmem:[#allocation62_spill] sm:$0xff] %v6738_v5 }
 0x1b5   : > { %v1248_v48 = vmul.f32 %v1231_v9, %v6535_v30  ;;  %v6724_v30 = vrot.slane %v6711_v7, 7 }
 0x1b6   : > { %1415 = vmatmul.bf16.gmra.mxu1 %v1270_v1 }
 0x1b7   : > { %v1257_v0 = vmul.f32 %v6668_v15, %v1248_v48  ;;  %8580 = vst [vmem:[#allocation59_spill] sm:$0xff] %v6724_v30  ;;  %v6758_v48 = vperm.slane %v1634_v52, 1 }
 0x1b9   : > { %v1266_v23 = vadd.f32 %v6672_v62, %v1257_v0  ;;  %8588 = vst [vmem:[#allocation65_spill] sm:$0xff] %v6758_v48  ;;  %v8591_v0 = vld [vmem:[#allocation34_spill] sm:$0xff] }
 0x1e5   : > { %v1145_v53 = vpop.xlane.xlu0 %1144 }
 0x1e6   : > { %v1153_v42 = vmul.f32 %v1145_v53, %v6487_v12  ;;  %v6733_v53 = vrot.slane %v5819_v51, 7 }
 0x1e8   : > { %v1161_v38 = vadd.f32 1e-06, %v1153_v42  ;;  %v1757_v42 = vrot.slane %v6286_v2, 6 }
 0x1ea   : > { %5393 = vrsqrt.f32 %v1161_v38  ;;  %vm1238_vm8 = vweird.f32 %v1161_v38 }
 0x1f0   : > { %v5394_v43 = vpop.eup %5393 }
 0x1f1   : > { %v1233_v24 = vmul.f32 %v5394_v43, %v1161_v38  ;;  %vm1239_vm7 = vweird.f32 %v5394_v43  ;;  %v1927_v38 = vld [vmem:[#allocation9 + $0x3] ss:$8 sm:$0x3] }
 0x1f2   : > { %vm1240_vm9 = vmor %vm1238_vm8, %vm1239_vm7 }
 0x1f3   : > { %v1234_v19 = vmul.f32 %v5394_v43, %v1233_v24  ;;  %v6745_v24 = vperm.slane %v1970_v58, 0 }
 0x1f5   : > { %v1235_v29 = vmul.f32 0.5, %v1234_v19 }
 0x1f7   : > { %v1236_v12 = vsub.f32 1.5, %v1235_v29  ;;  %v2133_v29 = vld [vmem:[#allocation9 + $0x5] ss:$8 sm:$0x3] }
 0x1f9   : > { %v1237_v54 = vmul.f32 %v5394_v43, %v1236_v12  ;;  %v6756_v12 = vsel %vm1442_vm11, %v6724_v30, %v6733_v53 }
 0x1fa   : > { %8587 = vst [vmem:[#allocation64_spill] sm:$0xff] %v6756_v12 }
 0x1fb   : > { %v1241_v33 = vsel %vm1240_vm9, %v5394_v43, %v1237_v54  ;;  %v6760_v54 = vperm.slane %v1799_v59, 1  ;;  %v6779_v59 = vperm.slane %v1970_v58, 1 }
 0x1fc   : > { %v1249_v8 = vmul.f32 %v1241_v33, %v6583_v6  ;;  %v1579_v6 = vld [vmem:[#allocation3] sm:$0xfe]  ;;  %v6762_v33 = vperm.slane %v1927_v38, 0 }
 0x1fd   : > { %v1615_v36 = vmul.f32 %v6724_v30, %v1579_v6  ;;  %8589 = vst [vmem:[#allocation66_spill] sm:$0xff] %v6760_v54  ;;  %v2353_v6 = vld [vmem:[#allocation9 + $0x7] ss:$8 sm:$0x3] }
 0x1fe   : > { %v1258_v31 = vmul.f32 %v6668_v15, %v1249_v8  ;;  %v8581_v15 = vld [vmem:[#allocation38_spill] sm:$0xff]  ;;  %8590 = vst [vmem:[#allocation67_spill] sm:$0xff] %v6762_v33  ;;  %v6790_v40 = vperm.slane %v2353_v6, 0 }
 0x1ff   : > { %v1756_v55 = vrot.slane %v8581_v15, 6  ;;  %v2260_v8 = vld [vmem:[#allocation9 + $0x6] ss:$8 sm:$0x3]  ;;  %8595 = vst [vmem:[#allocation71_spill] sm:$0xff] %v6779_v59 }
 0x200   : > { %v1267_v16 = vadd.f32 %v6672_v62, %v1258_v31  ;;  %v6729_v62 = vperm.slane %v1634_v52, 0  ;;  %v1525_v31 = vmul.f32 %v6711_v7, %v8591_v0  ;;  %v6786_v51 = vperm.slane %v2260_v8, 0  ;;  %8599 = vst [vmem:[#allocation75_spill] sm:$0xff] %v6790_v40 }
 0x202   : > { %v1271_v4 = vpack.c.bf16 %v1267_v16, %v1266_v23  ;;  %8582 = vst [vmem:[#allocation60_spill] sm:$0xff] %v6729_v62  ;;  %v6743_v60 = vmul.f32 %v6729_v62, %v1615_v36  ;;  %v6767_v23 = vsel %vm1755_vm12, %v1756_v55, %v1757_v42  ;;  %v6781_v36 = vperm.slane %v2133_v29, 0 }
 0x203   : > { %8592 = vst [vmem:[#allocation68_spill] sm:$0xff] %v6767_v23 }
 0x204   : > { %1391 = vmatmul.bf16.gmra.mxu3 %v1271_v4  ;;  %1420 = vmatmul.bf16.gmra.mxu1 %v1271_v4  ;;  %v1677_v52 = vrot.slane %v6743_v60, 1  ;;  %8596 = vst [vmem:[#allocation72_spill] sm:$0xff] %v6781_v36  ;;  %v6792_v60 = vperm.slane %v2353_v6, 1 }
 0x205   : > { %2766 = vmatpush.bf16.msra.mxu2 %v1271_v4  ;;  %v6774_v4 = vperm.slane %v1927_v38, 1  ;;  %8597 = vst [vmem:[#allocation73_spill] sm:$0xff] %v6786_v51  ;;  %v6788_v38 = vperm.slane %v2260_v8, 1 }
 0x206   : > { %8600 = vst [vmem:[#allocation76_spill] sm:$0xff] %v6792_v60 }
 0x207   : > { %8594 = vst [vmem:[#allocation70_spill] sm:$0xff] %v6774_v4 }
 0x208   : > { %8598 = vst [vmem:[#allocation74_spill] sm:$0xff] %v6788_v38 }
 0x209   : > { %2767 = vmatpush.bf16.msra.mxu2 %v1270_v1  ;;  %v1780_v1 = vmul.f32 %v1756_v55, %v1743_v61  ;;  %v1744_v61 = vld [vmem:[#allocation3 + $0x8] sm:$0xfc] }
 0x20a   : > { %v6795_v20 = vmul.f32 %v1756_v55, %v1744_v61  ;;  %v8602_v61 = vld [vmem:[#allocation33_spill] sm:$0xff] }
 0x20b   : > { %v6751_v9 = vmul.f32 %v6731_v47, %v1780_v1  ;;  %v6784_v1 = vperm.slane %v2133_v29, 1  ;;  %v2516_v29 = vld [vmem:[#allocation9 + $0x10] ss:$8 sm:$0x3] }
 0x20c   : > { %8601 = vst [vmem:[#allocation77_spill] sm:$0xff] %v6795_v20  ;;  %v6817_v15 = vperm.slane %v2516_v29, 0  ;;  %v6819_v26 = vperm.slane %v2516_v29, 1 }
 0x20d   : > { %2768 = vmatpush.bf16.msra.mxu2 %v1269_v11  ;;  %v1541_v11 = vld [vmem:[#allocation9] ss:$8 sm:$0x3] }
 0x20e   : > { %v6740_v43 = vperm.slane %v1541_v11, 0  ;;  %v6748_v19 = vperm.slane %v1541_v11, 1  ;;  %v1842_v11 = vrot.slane %v6751_v9, 2  ;;  %v6799_v9 = vsel %vm1755_vm12, %v6738_v5, %v1757_v42  ;;  %8603 = vst [vmem:[#allocation78_spill] sm:$0xff] %v6817_v15 }
 0x20f   : > { %8604 = vst [vmem:[#allocation79_spill] sm:$0xff] %v6819_v26 }
 0x210   : > { %8586 = vst [vmem:[#allocation63_spill] sm:$0xff] %v6748_v19  ;;  %v1547_v44 = vmul.f32 %v6740_v43, %v1525_v31 }
 0x211   : > { %2769 = vmatpush.bf16.msra.mxu2 %v6688_v28  ;;  %v8374_v28 = vrot.slane %v6231_v45, 6 }
 0x213   : > { %v1377_v25 = vpop.f32.mrf.mxu0  ;;  %v1406_v22 = vpop.f32.mrf.mxu1  ;;  %v6772_v16 = vsel %vm1755_vm12, %v1757_v42, %v8374_v28 }
 0x214   : > { %v1443_v17 = vrot.slane %v1377_v25, 7  ;;  %v1444_v10 = vrot.slane %v1406_v22, 7  ;;  %8593 = vst [vmem:[#allocation69_spill] sm:$0xff] %v6772_v16 }
 0x216   : > { %1491 = vst [vmem:[#allocation3 + $0x10] sm:$0xfe] %v1443_v17 }
 0x217   : > { %1492 = vst.msk [vmem:[#allocation3 + $0x18] sm:$0xfe] %vm620_vm6, %v1444_v10 }
 0x21b   : > { %v1379_v25 = vpop.f32.mrf.mxu0  ;;  %v1408_v22 = vpop.f32.mrf.mxu1 }
 0x21c   : > { %v1445_v28 = vrot.slane %v1379_v25, 7  ;;  %v1447_v7 = vrot.slane %v1408_v22, 7 }
 0x21d   : > { %v1511_v58 = vld [vmem:[#allocation3 + $0x10] sm:$0xff] }
 0x21e   : > { %v1965_v56 = vld [vmem:[#allocation3 + $0x10] sm:$0xfe]  ;;  %v6802_v8 = vsel %vm1442_vm11, %v1443_v17, %v1445_v28  ;;  %v1448_v25 = vsel %vm1442_vm11, %v1444_v10, %v1447_v7  ;;  %v1527_v22 = vmul.f32 %v6283_v41, %v1511_v58  ;;  %v1617_v6 = vmul.f32 %v6756_v12, %v1511_v58 }
 0x21f   : > { %1493 = vst [vmem:[#allocation3 + $0x20] sm:$0xff] %v6802_v8  ;;  %v1619_v55 = vmul.f32 %v6733_v53, %v6802_v8  ;;  %v1782_v31 = vmul.f32 %v6767_v23, %v1511_v58  ;;  %v1784_v42 = vmul.f32 %v6772_v16, %v6802_v8  ;;  %v1910_v2 = vmul.f32 %v8602_v61, %v1511_v58  ;;  %v2078_v58 = vld [vmem:[#allocation3 + $0x10] sm:$0xfc] }
 0x220   : > { %1494 = vst.msk [vmem:[#allocation3 + $0x28] sm:$0xff] %vm614_vm10, %v1448_v25  ;;  %v1642_v17 = vmul.f32 %v6729_v62, %v1617_v6  ;;  %v1976_v10 = vmul.f32 %v6745_v24, %v1965_v56  ;;  %v1549_v21 = vmul.f32 %v6740_v43, %v1527_v22  ;;  %v1912_v6 = vmul.f32 %v6283_v41, %v6802_v8 }
 0x221   : > { %v6823_v57 = vmul.f32 %v6729_v62, %v1619_v55  ;;  %v1807_v13 = vmul.f32 %v6731_v47, %v1782_v31  ;;  %v6827_v18 = vmul.f32 %v6731_v47, %v1784_v42  ;;  %v1933_v56 = vmul.f32 %v6762_v33, %v1910_v2 }
 0x222   : > { %v1678_v25 = vrot.slane %v1642_v17, 1  ;;  %v1978_v29 = vmul.f32 %v6745_v24, %v6802_v8  ;;  %v2012_v37 = vrot.slane %v1976_v10, 1  ;;  %v2114_v26 = vmul.f32 %v6738_v5, %v2078_v58 }
 0x223   : > { %v1382_v14 = vpop.f32.mrf.mxu0  ;;  %v1411_v22 = vpop.f32.mrf.mxu1  ;;  %v8407_v55 = vrot.slane %v6823_v57, 1  ;;  %v1843_v3 = vrot.slane %v1807_v13, 2  ;;  %v8406_v31 = vrot.slane %v6827_v18, 2 }
 0x224   : > { %v1449_v42 = vrot.slane %v1382_v14, 7  ;;  %v1451_v63 = vrot.slane %v1411_v22, 7  ;;  %v1679_v17 = vsel %vm1676_vm14, %v1677_v52, %v1678_v25  ;;  %v2013_v59 = vrot.slane %v1978_v29, 1 }
 0x225   : > { %v1684_v2 = vsel %vm1676_vm14, %v1678_v25, %v8407_v55  ;;  %v1727_v60 = vadd.f32 %v1679_v17, %v1547_v44  ;;  %v1844_v38 = vsel %vm1841_vm15, %v1842_v11, %v1843_v3  ;;  %v1849_v14 = vsel %vm1841_vm15, %v1843_v3, %v8406_v31 }
 0x226   : > { %v6843_v4 = vsel %vm1442_vm11, %v1445_v28, %v1449_v42  ;;  %v1452_v13 = vsel %vm1442_vm11, %v1447_v7, %v1451_v63  ;;  %v1729_v10 = vadd.f32 %v1684_v2, %v1549_v21  ;;  %v2116_v28 = vmul.f32 %v6799_v9, %v6802_v8  ;;  %v2298_v30 = vld [vmem:[#allocation3 + $0x20] sm:$0xfe] }
 0x227   : > { %v6849_v52 = vld [vmem:[#allocation3 + $0x28] sm:$0xff]  ;;  %v1621_v58 = vmul.f32 %v6733_v53, %v6843_v4  ;;  %v1892_v25 = vadd.f32 %v1844_v38, %v1727_v60  ;;  %v6855_v44 = vmul.f32 %v6745_v24, %v6843_v4  ;;  %1496 = vst.msk [vmem:[#allocation3 + $0x38] sm:$0xff] %vm614_vm10, %v1452_v13  ;;  %v1935_v3 = vmul.f32 %v6762_v33, %v1912_v6 }
 0x228   : > { %v1785_v21 = vmul.f32 %v6772_v16, %v6849_v52  ;;  %v1894_v11 = vadd.f32 %v1849_v14, %v1729_v10  ;;  %v2117_v7 = vmul.f32 %v6799_v9, %v6849_v52  ;;  %v2118_v60 = vmul.f32 %v6772_v16, %v6843_v4 }
 0x229   : > { %v1949_v29 = vadd.f32 %v1933_v56, %v1892_v25  ;;  %v8413_v38 = vrot.slane %v6855_v44, 1  ;;  %v2139_v22 = vmul.f32 %v6781_v36, %v2114_v26  ;;  %v2141_v13 = vmul.f32 %v6781_v36, %v2116_v28 }
 0x22a   : > { %v1387_v17 = vpop.f32.mrf.mxu3  ;;  %v1951_v2 = vadd.f32 %v1935_v3, %v1894_v11  ;;  %v6871_v31 = vmul.f32 %v6784_v1, %v2117_v7  ;;  %v6875_v56 = vmul.f32 %v6729_v62, %v1621_v58  ;;  %v6878_v25 = vmul.f32 %v6760_v54, %v1785_v21 }
 0x22b   : > { %v1384_v10 = vpop.f32.mrf.mxu0  ;;  %v1413_v14 = vpop.f32.mrf.mxu1  ;;  %v2014_v55 = vsel %vm1676_vm14, %v2012_v37, %v2013_v59  ;;  %v2019_v26 = vsel %vm1676_vm14, %v2013_v59, %v8413_v38  ;;  %v1457_v28 = vrot.slane %v1387_v17, 7  ;;  %v6885_v6 = vmul.f32 %v6781_v36, %v2118_v60  ;;  %v2461_v17 = vld [vmem:[#allocation3 + $0x20] sm:$0xfc] }
 0x22c   : > { %8605 = vst [vmem:[#allocation80_spill] sm:$0xff] %v6871_v31  ;;  %v1453_v11 = vrot.slane %v1384_v10, 7  ;;  %v1455_v3 = vrot.slane %v1413_v14, 7  ;;  %v2062_v7 = vadd.f32 %v2014_v55, %v1949_v29  ;;  %v2064_v20 = vadd.f32 %v2019_v26, %v1951_v2 }
 0x22d   : > { %8606 = vst [vmem:[#allocation81_spill] sm:$0xff] %v6878_v25  ;;  %v2175_v23 = vrot.slane %v2139_v22, 2  ;;  %v2176_v12 = vrot.slane %v2141_v13, 2  ;;  %v2243_v59 = vmul.f32 %v8602_v61, %v6802_v8  ;;  %v8414_v60 = vrot.slane %v6885_v6, 2 }
 0x22e   : > { %v6888_v21 = vsel %vm1442_vm11, %v1449_v42, %v1453_v11  ;;  %v6891_v37 = vsel %vm1442_vm11, %v1453_v11, %v1457_v28  ;;  %v1456_v19 = vsel %vm1442_vm11, %v1451_v63, %v1455_v3  ;;  %v2245_v42 = vmul.f32 %v6283_v41, %v6843_v4 }
 0x22f   : > { %v1623_v55 = vmul.f32 %v6733_v53, %v6888_v21  ;;  %v2177_v29 = vsel %vm1841_vm15, %v2175_v23, %v2176_v12  ;;  %v1687_v22 = vrot.slane %v6875_v56, 1  ;;  %v2334_v13 = vmul.f32 %v2298_v30, %v6733_v53  ;;  %1498 = vst.msk [vmem:[#allocation3 + $0x48] sm:$0xff] %vm614_vm10, %v1456_v19 }
 0x230   : > { %v2225_v2 = vadd.f32 %v2177_v29, %v2062_v7  ;;  %v2361_v63 = vmul.f32 %v6790_v40, %v1621_v58  ;;  %v2182_v10 = vsel %vm1841_vm15, %v2176_v12, %v8414_v60  ;;  %v2266_v23 = vmul.f32 %v6786_v51, %v2243_v59 }
 0x231   : > { %v6911_v14 = vmul.f32 %v6790_v40, %v1623_v55  ;;  %v2497_v26 = vmul.f32 %v2461_v17, %v6738_v5  ;;  %v2227_v56 = vadd.f32 %v2182_v10, %v2064_v20  ;;  %v2268_v30 = vmul.f32 %v6786_v51, %v2245_v42 }
 0x232   : > { %v6914_v11 = vpop.f32.mrf.mxu3  ;;  %v2359_v58 = vmul.f32 %v6790_v40, %v2334_v13  ;;  %v2396_v7 = vrot.slane %v2361_v63, 1  ;;  %v2282_v38 = vadd.f32 %v2266_v23, %v2225_v2  ;;  %v2499_v59 = vmul.f32 %v6799_v9, %v6843_v4 }
 0x233   : > { %8607 = vst [vmem:[#allocation82_spill] sm:$0xff] %v6914_v11  ;;  %v8416_v19 = vrot.slane %v6914_v11, 7  ;;  %v1416_v29 = vpop.f32.mrf.mxu1  ;;  %v8417_v12 = vrot.slane %v6911_v14, 1  ;;  %v2284_v61 = vadd.f32 %v2268_v30, %v2227_v56  ;;  %v2501_v20 = vmul.f32 %v6772_v16, %v6888_v21 }
 0x234   : > { %v1459_v60 = vrot.slane %v1416_v29, 7  ;;  %v2395_v17 = vrot.slane %v2359_v58, 1  ;;  %v2522_v13 = vmul.f32 %v6817_v15, %v2497_v26  ;;  %v2524_v63 = vmul.f32 %v6817_v15, %v2499_v59 }
 0x235   : > { %v6927_v42 = vsel %vm1442_vm11, %v1457_v28, %v8416_v19  ;;  %v2402_v2 = vsel %vm1676_vm14, %v2396_v7, %v8417_v12  ;;  %v6937_v30 = vmul.f32 %v6817_v15, %v2501_v20  ;;  %v6940_v28 = vld [vmem:[#allocation3 + $0x38] sm:$0xff]  ;;  %v6943_v12 = vmul.f32 %v6729_v62, %v1623_v55 }
 0x236   : > { %v1460_v10 = vsel %vm1442_vm11, %v1455_v3, %v1459_v60  ;;  %v2397_v23 = vsel %vm1676_vm14, %v2395_v17, %v2396_v7  ;;  %v2447_v56 = vadd.f32 %v2402_v2, %v2284_v61  ;;  %8608 = vst [vmem:[#allocation83_spill] sm:$0xff] %v6940_v28  ;;  %v2558_v29 = vrot.slane %v2522_v13, 2  ;;  %v8609_v3 = vld [vmem:[#allocation44_spill] sm:$0xff] }
 0x237   : > { %1500 = vst.msk [vmem:[#allocation3 + $0x58] sm:$0xff] %vm614_vm10, %v1460_v10  ;;  %v2445_v58 = vadd.f32 %v2397_v23, %v2282_v38  ;;  %v2559_v19 = vrot.slane %v2524_v63, 2  ;;  %v8419_v26 = vrot.slane %v6937_v30, 2  ;;  %v1529_v59 = vmul.f32 %v8609_v3, %v6802_v8 }
 0x238   : > { %v1531_v61 = vmul.f32 %v6364_v46, %v6843_v4  ;;  %v6952_v7 = vmul.f32 %v6733_v53, %v6891_v37  ;;  %v6959_v55 = vmul.f32 %v6733_v53, %v6927_v42  ;;  %v6963_v8 = vmul.f32 %v6799_v9, %v6940_v28 }
 0x239   : > { %v2560_v38 = vsel %vm1841_vm15, %v2558_v29, %v2559_v19  ;;  %v2565_v2 = vsel %vm1841_vm15, %v2559_v19, %v8419_v26  ;;  %v8612_v63 = vrot.slane %v6823_v57, 1  ;;  %v1551_v17 = vmul.f32 %v6740_v43, %v1529_v59 }
 0x23a   : > { %8610 = vst [vmem:[#allocation84_spill] sm:$0xff] %v6963_v8  ;;  %v6968_v13 = vadd.f32 %v2560_v38, %v2445_v58  ;;  %v6975_v29 = vadd.f32 %v2565_v2, %v2447_v56  ;;  %v1553_v20 = vmul.f32 %v6740_v43, %v1531_v61  ;;  %v8615_v9 = vrot.slane %v6943_v12, 1  ;;  %v6998_v38 = vld [vmem:[#allocation3 + $0x48] sm:$0xff] }
 0x23b   : > { %v1688_v10 = vsel %vm1676_vm14, %v8612_v63, %v1687_v22  ;;  %v6973_v23 = vpop.f32.mrf.mxu1  ;;  %v6985_v58 = vmul.f32 %v6729_v62, %v6952_v7  ;;  %v6989_v57 = vmul.f32 %v6729_v62, %v6959_v55  ;;  %v8617_v56 = vrot.slane %v6370_v49, 6  ;;  %8619 = vst [vmem:[#allocation89_spill] sm:$0xff] %v6998_v38 }
 0x23c   : > { %8611 = vst [vmem:[#allocation85_spill] sm:$0xff] %v6968_v13  ;;  %v1692_v11 = vsel %vm1676_vm14, %v1687_v22, %v8615_v9  ;;  %v8422_v19 = vrot.slane %v6973_v23, 7  ;;  %v8618_v59 = vrot.slane %v6231_v45, 6  ;;  %v3235_v22 = vpack.c.bf16 %v6975_v29, %v6968_v13 }
 0x23d   : > { %8613 = vst [vmem:[#allocation86_spill] sm:$0xff] %v6973_v23  ;;  %v1731_v2 = vadd.f32 %v1688_v10, %v1551_v17  ;;  %v1733_v63 = vadd.f32 %v1692_v11, %v1553_v20  ;;  %v8423_v9 = vrot.slane %v6136_v35, 6  ;;  %v1916_v20 = vmul.f32 %v6364_v46, %v6888_v21 }
 0x23e   : > { %8614 = vst [vmem:[#allocation87_spill] sm:$0xff] %v6975_v29  ;;  %v6996_v61 = vsel %vm1755_vm12, %v8618_v59, %v8617_v56  ;;  %v1464_v26 = vsel %vm1442_vm11, %v1459_v60, %v8422_v19  ;;  %v1914_v59 = vmul.f32 %v8609_v3, %v6843_v4  ;;  %3247 = vrot.lane.b32.xlu2 %v3235_v22, %s5820_s2  ;;  %v8620_v60 = vrot.slane %v6370_v49, 6  ;;  %v7040_v45 = vld [vmem:[#allocation3 + $0x58] sm:$0xff] }
 0x23f   : > { %8616 = vst [vmem:[#allocation88_spill] sm:$0xff] %v6989_v57  ;;  %v1786_v62 = vmul.f32 %v6996_v61, %v6843_v4  ;;  %v1787_v56 = vmul.f32 %v6996_v61, %v6940_v28  ;;  %v1982_v4 = vmul.f32 %v6745_v24, %v6888_v21  ;;  %v1939_v17 = vmul.f32 %v6762_v33, %v1916_v20 }
 0x240   : > { %1502 = vst.msk [vmem:[#allocation3 + $0x68] sm:$0xff] %vm614_vm10, %v1464_v26  ;;  %v7020_v11 = vsel %vm1755_vm12, %v8620_v60, %v8423_v9  ;;  %v7038_v9 = vmul.f32 %v6745_v24, %v6891_v37  ;;  %v2120_v60 = vmul.f32 %v6996_v61, %v6888_v21  ;;  %v8621_v23 = vrot.slane %v6827_v18, 2 }
 0x241   : > { %v1788_v26 = vmul.f32 %v7020_v11, %v6888_v21  ;;  %v1789_v10 = vmul.f32 %v7020_v11, %v6998_v38  ;;  %v1811_v22 = vmul.f32 %v6731_v47, %v1786_v62  ;;  %v7032_v19 = vmul.f32 %v6760_v54, %v1787_v56 }
 0x242   : > { %v2022_v49 = vrot.slane %v1982_v4, 1  ;;  %v1937_v62 = vmul.f32 %v6762_v33, %v1914_v59  ;;  %v2121_v4 = vmul.f32 %v6996_v61, %v6998_v38  ;;  %v8622_v20 = vrot.slane %v6855_v44, 1 }
 0x243   : > { %v7043_v29 = vmul.f32 %v6731_v47, %v1788_v26  ;;  %v1852_v13 = vrot.slane %v1811_v22, 2  ;;  %v7048_v8 = vmul.f32 %v6760_v54, %v1789_v10  ;;  %v2122_v10 = vmul.f32 %v7020_v11, %v6891_v37 }
 0x244   : > { %v2023_v31 = vsel %vm1676_vm14, %v8622_v20, %v2022_v49  ;;  %v2123_v16 = vmul.f32 %v7020_v11, %v7040_v45  ;;  %v2145_v5 = vmul.f32 %v6781_v36, %v2120_v60  ;;  %v2247_v44 = vmul.f32 %v8609_v3, %v6888_v21 }
 0x245   : > { %v1853_v26 = vsel %vm1841_vm15, %v8621_v23, %v1852_v13  ;;  %v8441_v22 = vrot.slane %v7043_v29, 2  ;;  %v7072_v23 = vmul.f32 %v6784_v1, %v2121_v4  ;;  %v7075_v59 = vmul.f32 %v6781_v36, %v2122_v10 }
 0x246   : > { %v1896_v56 = vadd.f32 %v1853_v26, %v1731_v2  ;;  %v2185_v25 = vrot.slane %v2145_v5, 2  ;;  %v8623_v38 = vrot.slane %v7038_v9, 1  ;;  %v2249_v10 = vmul.f32 %v6364_v46, %v6891_v37 }
 0x247   : > { %v1857_v18 = vsel %vm1841_vm15, %v1852_v13, %v8441_v22  ;;  %v8448_v4 = vrot.slane %v7075_v59, 2  ;;  %v7088_v3 = vmul.f32 %v6784_v1, %v2123_v16  ;;  %v8643_v60 = vrot.slane %v7038_v9, 1 }
 0x248   : > { %v1898_v26 = vadd.f32 %v1857_v18, %v1733_v63  ;;  %v1953_v20 = vadd.f32 %v1937_v62, %v1896_v56  ;;  %v2027_v13 = vsel %vm1676_vm14, %v2022_v49, %v8623_v38  ;;  %v8624_v63 = vrot.slane %v6885_v6, 2 }
 0x249   : > { %v2190_v62 = vsel %vm1841_vm15, %v2185_v25, %v8448_v4  ;;  %v2270_v49 = vmul.f32 %v6786_v51, %v2247_v44  ;;  %v2365_v38 = vmul.f32 %v6790_v40, %v6952_v7  ;;  %v2272_v56 = vmul.f32 %v6786_v51, %v2249_v10  ;;  %v7226_v4 = vld [vmem:[#allocation3 + $0x18] sm:$0xff] }
 0x24a   : > { %v1955_v22 = vadd.f32 %v1939_v17, %v1898_v26  ;;  %v2066_v28 = vadd.f32 %v2023_v31, %v1953_v20  ;;  %v2186_v5 = vsel %vm1841_vm15, %v8624_v63, %v2185_v25  ;;  %v7101_v17 = vmul.f32 %v6790_v40, %v6959_v55 }
 0x24b   : > { %v2503_v6 = vmul.f32 %v6996_v61, %v6891_v37  ;;  %v2405_v18 = vrot.slane %v2365_v38, 1  ;;  %v2505_v25 = vmul.f32 %v7020_v11, %v6927_v42  ;;  %v1533_v7 = vmul.f32 %v6127_v32, %v6888_v21 }
 0x24c   : > { %8625 = vst [vmem:[#allocation90_spill] sm:$0xff] %v7101_v17  ;;  %v2068_v31 = vadd.f32 %v2027_v13, %v1955_v22  ;;  %v2229_v16 = vadd.f32 %v2186_v5, %v2066_v28  ;;  %v8445_v26 = vrot.slane %v7101_v17, 1  ;;  %v1535_v28 = vmul.f32 %v6310_v50, %v6891_v37 }
 0x24d   : > { %v2528_v55 = vmul.f32 %v6817_v15, %v2503_v6  ;;  %v8626_v10 = vrot.slane %v6911_v14, 1  ;;  %v7120_v5 = vmul.f32 %v6817_v15, %v2505_v25  ;;  %v8628_v6 = vrot.slane %v6985_v58, 1 }
 0x24e   : > { %v2231_v44 = vadd.f32 %v2190_v62, %v2068_v31  ;;  %v2286_v20 = vadd.f32 %v2270_v49, %v2229_v16  ;;  %v1555_v49 = vmul.f32 %v6740_v43, %v1533_v7  ;;  %v2410_v31 = vsel %vm1676_vm14, %v2405_v18, %v8445_v26 }
 0x24f   : > { %v2406_v63 = vsel %vm1676_vm14, %v8626_v10, %v2405_v18  ;;  %8627 = vst [vmem:[#allocation91_spill] sm:$0xff] %v7120_v5  ;;  %v2568_v62 = vrot.slane %v2528_v55, 2  ;;  %v8446_v16 = vrot.slane %v7120_v5, 2  ;;  %v8629_v14 = vrot.slane %v6943_v12, 1  ;;  %v7145_v12 = vld [vmem:[#allocation3 + $0x68] sm:$0xff] }
 0x250   : > { %v2288_v38 = vadd.f32 %v2272_v56, %v2231_v44  ;;  %v2449_v21 = vadd.f32 %v2406_v63, %v2286_v20  ;;  %v8630_v25 = vrot.slane %v6319_v39, 6  ;;  %v8631_v56 = vrot.slane %v6136_v35, 6  ;;  %v8654_v35 = vld [vmem:[#allocation64_spill] sm:$0xff] }
 0x251   : > { %v1696_v10 = vsel %vm1676_vm14, %v8629_v14, %v8628_v6  ;;  %v1557_v20 = vmul.f32 %v6740_v43, %v1535_v28  ;;  %v8633_v18 = vrot.slane %v6989_v57, 1  ;;  %v8634_v55 = vmov %v8628_v6 }
 0x252   : > { %v7137_v44 = vsel %vm1755_vm12, %v8631_v56, %v8630_v25  ;;  %v2451_v7 = vadd.f32 %v2410_v31, %v2288_v38  ;;  %v1735_v26 = vadd.f32 %v1696_v10, %v1555_v49  ;;  %v8635_v6 = vrot.slane %v6937_v30, 2 }
 0x253   : > { %8632 = vst [vmem:[#allocation92_spill] sm:$0xff] %v7137_v44  ;;  %v1700_v63 = vsel %vm1676_vm14, %v8634_v55, %v8633_v18  ;;  %v2573_v25 = vsel %vm1841_vm15, %v2568_v62, %v8446_v16  ;;  %v7154_v38 = vrot.slane %v6410_v27, 6  ;;  %v1790_v28 = vmul.f32 %v7137_v44, %v6891_v37 }
 0x254   : > { %v2569_v14 = vsel %vm1841_vm15, %v8635_v6, %v2568_v62  ;;  %v7160_v31 = vadd.f32 %v2573_v25, %v2451_v7  ;;  %v1791_v49 = vmul.f32 %v7137_v44, %v7040_v45  ;;  %v1918_v30 = vmul.f32 %v6127_v32, %v6891_v37 }
 0x255   : > { %v7158_v58 = vadd.f32 %v2569_v14, %v2449_v21  ;;  %v8638_v10 = vrot.slane %v6319_v39, 6  ;;  %v1815_v56 = vmul.f32 %v6731_v47, %v1790_v28  ;;  %v7175_v21 = vmul.f32 %v6745_v24, %v6927_v42 }
 0x256   : > { %8637 = vst [vmem:[#allocation94_spill] sm:$0xff] %v7160_v31  ;;  %v2124_v7 = vmul.f32 %v7137_v44, %v6927_v42  ;;  %v7186_v6 = vmul.f32 %v6760_v54, %v1791_v49  ;;  %v7190_v14 = vmul.f32 %v6996_v61, %v7040_v45  ;;  %v1920_v28 = vmul.f32 %v6310_v50, %v6927_v42 }
 0x257   : > { %8636 = vst [vmem:[#allocation93_spill] sm:$0xff] %v7158_v58  ;;  %v7170_v62 = vsel %vm1755_vm12, %v8638_v10, %v7154_v38  ;;  %v3236_v18 = vpack.c.bf16 %v7160_v31, %v7158_v58  ;;  %v1860_v25 = vrot.slane %v1815_v56, 2  ;;  %v8447_v10 = vrot.slane %v7175_v21, 1 }
 0x258   : > { %8639 = vst [vmem:[#allocation95_spill] sm:$0xff] %v7170_v62  ;;  %v1792_v37 = vmul.f32 %v7170_v62, %v6927_v42  ;;  %v1793_v55 = vmul.f32 %v7170_v62, %v7145_v12  ;;  %v1737_v16 = vadd.f32 %v1700_v63, %v1557_v20  ;;  %v2125_v49 = vmul.f32 %v7137_v44, %v7145_v12 }
 0x259   : > { %8640 = vst [vmem:[#allocation96_spill] sm:$0xff] %v7175_v21  ;;  %3249 = vrot.lane.b32.xlu0 %v3236_v18, %s5820_s2  ;;  %v8642_v61 = vrot.slane %v7043_v29, 2  ;;  %v2031_v18 = vsel %vm1676_vm14, %v8643_v60, %v8447_v10  ;;  %v7213_v20 = vmul.f32 %v6781_v36, %v2124_v7  ;;  %v2251_v63 = vmul.f32 %v6127_v32, %v6927_v42  ;;  %v1510_v10 = vld [vmem:[#allocation3 + $0x8] sm:$0xff] }
 0x25a   : > { %v7197_v13 = vmul.f32 %v6731_v47, %v1792_v37  ;;  %v7200_v22 = vmul.f32 %v6760_v54, %v1793_v55  ;;  %v1941_v2 = vmul.f32 %v6762_v33, %v1918_v30  ;;  %v7220_v29 = vmul.f32 %v6784_v1, %v2125_v49 }
 0x25b   : > { %v1861_v56 = vsel %vm1841_vm15, %v8642_v61, %v1860_v25  ;;  %8644 = vst [vmem:[#allocation98_spill] sm:$0xff] %v7213_v20  ;;  %v1943_v60 = vmul.f32 %v6762_v33, %v1920_v28  ;;  %v8452_v7 = vrot.slane %v7213_v20, 2  ;;  %v2274_v30 = vmul.f32 %v6786_v51, %v2251_v63  ;;  %v8658_v51 = vld [vmem:[#allocation81_spill] sm:$0xff] }
 0x25c   : > { %8641 = vst [vmem:[#allocation97_spill] sm:$0xff] %v7197_v13  ;;  %v8451_v37 = vrot.slane %v7197_v13, 2  ;;  %v1900_v55 = vadd.f32 %v1861_v56, %v1735_v26  ;;  %v7234_v49 = vmul.f32 %v6733_v53, %v7145_v12  ;;  %v8645_v28 = vrot.slane %v7075_v59, 2 }
 0x25d   : > { %v7243_v27 = vmul.f32 %v6407_v34, %v6927_v42  ;;  %v1528_v59 = vmul.f32 %v6283_v41, %v7226_v4  ;;  %v1618_v47 = vmul.f32 %v8654_v35, %v7226_v4  ;;  %v8655_v35 = vld [vmem:[#allocation68_spill] sm:$0xff]  ;;  %v8657_v40 = vrot.slane %v7032_v19, 2 }
 0x25e   : > { %v1865_v26 = vsel %vm1841_vm15, %v1860_v25, %v8451_v37  ;;  %v1957_v56 = vadd.f32 %v1941_v2, %v1900_v55  ;;  %v2194_v9 = vsel %vm1841_vm15, %v8645_v28, %v8452_v7  ;;  %v7247_v2 = vmul.f32 %v6407_v34, %v7145_v12  ;;  %v8649_v28 = vld [vmem:[#allocation83_spill] sm:$0xff]  ;;  %v8650_v7 = vld [vmem:[#allocation89_spill] sm:$0xff] }
 0x25f   : > { %v1902_v61 = vadd.f32 %v1865_v26, %v1737_v16  ;;  %v7251_v63 = vmul.f32 %v6758_v48, %v7234_v49  ;;  %v1526_v16 = vmul.f32 %v1510_v10, %v8591_v0  ;;  %v8648_v26 = vld [vmem:[#allocation44_spill] sm:$0xff]  ;;  %v1532_v37 = vmul.f32 %v6364_v46, %v8649_v28  ;;  %v8651_v0 = vld [vmem:[#allocation63_spill] sm:$0xff] }
 0x260   : > { %v2070_v25 = vadd.f32 %v2031_v18, %v1957_v56  ;;  %v1530_v42 = vmul.f32 %v8648_v26, %v6849_v52  ;;  %v1534_v18 = vmul.f32 %v6127_v32, %v8650_v7  ;;  %v1580_v56 = vld [vmem:[#allocation3 + $0x8] sm:$0xfe]  ;;  %v1536_v10 = vmul.f32 %v6310_v50, %v7040_v45 }
 0x261   : > { %8646 = vst [vmem:[#allocation99_spill] sm:$0xff] %v7251_v63  ;;  %v7256_v55 = vadd.f32 %v1943_v60, %v1902_v61  ;;  %v1548_v31 = vmul.f32 %v8651_v0, %v1526_v16  ;;  %v1550_v61 = vmul.f32 %v8651_v0, %v1528_v59  ;;  %v1554_v58 = vmul.f32 %v8651_v0, %v1532_v37 }
 0x262   : > { %v2233_v39 = vadd.f32 %v2194_v9, %v2070_v25  ;;  %v1552_v60 = vmul.f32 %v8651_v0, %v1530_v42  ;;  %v1556_v33 = vmul.f32 %v8651_v0, %v1534_v18  ;;  %v7275_v34 = vmul.f32 %v8651_v0, %v1536_v10  ;;  %v8653_v9 = vld [vmem:[#allocation59_spill] sm:$0xff] }
 0x263   : > { %8647 = vst [vmem:[#allocation100_spill] sm:$0xff] %v7256_v55  ;;  %v1616_v25 = vmul.f32 %v8653_v9, %v1580_v56  ;;  %v1620_v16 = vmul.f32 %v6733_v53, %v6849_v52  ;;  %v7284_v59 = vmul.f32 %v6733_v53, %v8649_v28  ;;  %v7288_v37 = vmul.f32 %v6733_v53, %v8650_v7  ;;  %v8656_v56 = vld [vmem:[#allocation77_spill] sm:$0xff] }
 0x264   : > { %v7272_v13 = vadd.f32 %v2274_v30, %v2233_v39  ;;  %v7292_v39 = vmul.f32 %v6733_v53, %v7040_v45  ;;  %v1643_v42 = vmul.f32 %v6758_v48, %v1618_v47  ;;  %v1783_v18 = vmul.f32 %v8655_v35, %v7226_v4 }
 0x265   : > { %v1641_v30 = vmul.f32 %v6758_v48, %v1616_v25  ;;  %v1806_v10 = vmul.f32 %v6760_v54, %v8656_v56  ;;  %v1645_v9 = vmul.f32 %v6758_v48, %v1620_v16  ;;  %v1647_v57 = vmul.f32 %v6758_v48, %v7284_v59 }
 0x266   : > { %8652 = vst [vmem:[#allocation83_spill] sm:$0xff] %v7272_v13  ;;  %v1649_v13 = vmul.f32 %v6758_v48, %v7288_v37  ;;  %v1651_v5 = vmul.f32 %v6758_v48, %v7292_v39  ;;  %v1681_v17 = vrot.slane %v1643_v42, 1  ;;  %v1808_v47 = vmul.f32 %v6760_v54, %v1783_v18 }
 0x267   : > { %v1680_v25 = vrot.slane %v1641_v30, 1  ;;  %v1845_v20 = vrot.slane %v1806_v10, 2  ;;  %v1685_v35 = vrot.slane %v1645_v9, 1  ;;  %v1689_v55 = vrot.slane %v1647_v57, 1 }
 0x268   : > { %v1693_v21 = vrot.slane %v1649_v13, 1  ;;  %v1697_v56 = vrot.slane %v1651_v5, 1  ;;  %v1846_v15 = vrot.slane %v1808_v47, 2  ;;  %v8659_v36 = vrot.slane %v8658_v51, 2 }
 0x269   : > { %v1682_v16 = vsel %vm1676_vm14, %v1680_v25, %v1681_v17  ;;  %v8660_v48 = vrot.slane %v7048_v8, 2  ;;  %v8661_v30 = vmov %v8657_v40  ;;  %v1686_v9 = vsel %vm1676_vm14, %v1681_v17, %v1685_v35 }
 0x26a   : > { %v1855_v44 = vsel %vm1841_vm15, %v8659_v36, %v8657_v40  ;;  %v1690_v57 = vsel %vm1676_vm14, %v1685_v35, %v1689_v55  ;;  %v1694_v13 = vsel %vm1676_vm14, %v1689_v55, %v1693_v21  ;;  %v1698_v5 = vsel %vm1676_vm14, %v1693_v21, %v1697_v56 }
 0x26b   : > { %v1859_v42 = vsel %vm1841_vm15, %v8661_v30, %v8660_v48  ;;  %v1728_v18 = vadd.f32 %v1682_v16, %v1548_v31  ;;  %v1730_v10 = vadd.f32 %v1686_v9, %v1550_v61  ;;  %v1732_v25 = vadd.f32 %v1690_v57, %v1552_v60  ;;  %v8662_v48 = vld [vmem:[#allocation33_spill] sm:$0xff]  ;;  %v1966_v30 = vld [vmem:[#allocation3 + $0x18] sm:$0xfe] }
 0x26c   : > { %v1734_v47 = vadd.f32 %v1694_v13, %v1554_v58  ;;  %v1736_v54 = vadd.f32 %v1698_v5, %v1556_v33  ;;  %v1847_v40 = vsel %vm1841_vm15, %v1845_v20, %v1846_v15  ;;  %v1851_v19 = vsel %vm1841_vm15, %v1846_v15, %v8659_v36  ;;  %v8665_v60 = vld [vmem:[#allocation70_spill] sm:$0xff]  ;;  %v8666_v16 = vld [vmem:[#allocation71_spill] sm:$0xff] }
 0x26d   : > { %v1911_v17 = vmul.f32 %v8662_v48, %v7226_v4  ;;  %v8663_v35 = vrot.slane %v7186_v6, 2  ;;  %v8664_v55 = vrot.slane %v7048_v8, 2  ;;  %v1893_v21 = vadd.f32 %v1847_v40, %v1728_v18  ;;  %v2079_v40 = vld [vmem:[#allocation3 + $0x18] sm:$0xfc] }
 0x26e   : > { %v1895_v61 = vadd.f32 %v1851_v19, %v1730_v10  ;;  %v1897_v58 = vadd.f32 %v1855_v44, %v1732_v25  ;;  %v1899_v33 = vadd.f32 %v1859_v42, %v1734_v47  ;;  %v1913_v20 = vmul.f32 %v6283_v41, %v6849_v52 }
 0x26f   : > { %v1863_v31 = vsel %vm1841_vm15, %v8664_v55, %v8663_v35  ;;  %v1915_v15 = vmul.f32 %v8648_v26, %v8649_v28  ;;  %v1917_v51 = vmul.f32 %v6364_v46, %v8650_v7  ;;  %v1919_v4 = vmul.f32 %v6127_v32, %v7040_v45 }
 0x270   : > { %v1934_v8 = vmul.f32 %v8665_v60, %v1911_v17  ;;  %v1977_v9 = vmul.f32 %v8666_v16, %v1966_v30  ;;  %v1979_v44 = vmul.f32 %v8666_v16, %v6849_v52  ;;  %v1901_v42 = vadd.f32 %v1863_v31, %v1736_v54 }
 0x271   : > { %v1936_v57 = vmul.f32 %v8665_v60, %v1913_v20  ;;  %v1938_v13 = vmul.f32 %v8665_v60, %v1915_v15  ;;  %v1940_v5 = vmul.f32 %v8665_v60, %v1917_v51  ;;  %v1942_v18 = vmul.f32 %v8665_v60, %v1919_v4  ;;  %v8668_v51 = vld [vmem:[#allocation62_spill] sm:$0xff] }
 0x272   : > { %v1950_v10 = vadd.f32 %v1934_v8, %v1893_v21  ;;  %v1981_v25 = vmul.f32 %v8666_v16, %v8649_v28  ;;  %v1983_v47 = vmul.f32 %v8666_v16, %v8650_v7  ;;  %v8667_v36 = vrot.slane %v7251_v63, 1  ;;  %v8669_v8 = vld [vmem:[#allocation69_spill] sm:$0xff] }
 0x273   : > { %v1952_v19 = vadd.f32 %v1936_v57, %v1895_v61  ;;  %v1954_v17 = vadd.f32 %v1938_v13, %v1897_v58  ;;  %v1956_v30 = vadd.f32 %v1940_v5, %v1899_v33  ;;  %v1985_v35 = vmul.f32 %v8666_v16, %v7040_v45 }
 0x274   : > { %v1702_v54 = vsel %vm1676_vm14, %v1697_v56, %v8667_v36  ;;  %v2015_v55 = vrot.slane %v1977_v9, 1  ;;  %v2016_v31 = vrot.slane %v1979_v44, 1  ;;  %v2020_v21 = vrot.slane %v1981_v25, 1 }
 0x275   : > { %v1738_v20 = vadd.f32 %v1702_v54, %v7275_v34  ;;  %v2024_v15 = vrot.slane %v1983_v47, 1  ;;  %v2115_v4 = vmul.f32 %v8668_v51, %v2079_v40  ;;  %v2119_v62 = vmul.f32 %v8669_v8, %v8649_v28 }
 0x276   : > { %v8670_v63 = vrot.slane %v7200_v22, 2  ;;  %v8671_v56 = vrot.slane %v7186_v6, 2  ;;  %v1921_v58 = vmul.f32 %v6310_v50, %v7145_v12  ;;  %v2017_v33 = vsel %vm1676_vm14, %v2015_v55, %v2016_v31 }
 0x277   : > { %v2021_v9 = vsel %vm1676_vm14, %v2016_v31, %v2020_v21  ;;  %v2025_v34 = vsel %vm1676_vm14, %v2020_v21, %v2024_v15  ;;  %v2028_v44 = vrot.slane %v1985_v35, 1  ;;  %v2063_v57 = vadd.f32 %v2017_v33, %v1950_v10  ;;  %v2299_v35 = vld [vmem:[#allocation3 + $0x28] sm:$0xfe]  ;;  %v8672_v21 = vld [vmem:[#allocation74_spill] sm:$0xff] }
 0x278   : > { %v1867_v61 = vsel %vm1841_vm15, %v8671_v56, %v8670_v63  ;;  %v2065_v13 = vadd.f32 %v2021_v9, %v1952_v19  ;;  %v2067_v5 = vadd.f32 %v2025_v34, %v1954_v17  ;;  %v2140_v25 = vmul.f32 %v6784_v1, %v2115_v4  ;;  %v8673_v4 = vld [vmem:[#allocation80_spill] sm:$0xff] }
 0x279   : > { %v2144_v47 = vmul.f32 %v6784_v1, %v2119_v62  ;;  %v2244_v6 = vmul.f32 %v8662_v48, %v6849_v52  ;;  %v1903_v63 = vadd.f32 %v1867_v61, %v1738_v20  ;;  %v1944_v40 = vmul.f32 %v8665_v60, %v1921_v58 }
 0x27a   : > { %v7380_v36 = vmul.f32 %v8666_v16, %v7145_v12  ;;  %v2029_v54 = vsel %vm1676_vm14, %v2024_v15, %v2028_v44  ;;  %v1958_v10 = vadd.f32 %v1942_v18, %v1901_v42  ;;  %v2178_v17 = vrot.slane %v2140_v25, 2 }
 0x27b   : > { %v2069_v19 = vadd.f32 %v2029_v54, %v1956_v30  ;;  %v2183_v55 = vrot.slane %v2144_v47, 2  ;;  %v2246_v62 = vmul.f32 %v6283_v41, %v8649_v28  ;;  %v2248_v52 = vmul.f32 %v8648_v26, %v8650_v7  ;;  %v8708_v41 = vld [vmem:[#allocation98_spill] sm:$0xff] }
 0x27c   : > { %v2250_v31 = vmul.f32 %v6364_v46, %v7040_v45  ;;  %v2267_v20 = vmul.f32 %v8672_v21, %v2244_v6  ;;  %v8674_v56 = vrot.slane %v8673_v4, 2  ;;  %v8676_v30 = vrot.slane %v7072_v23, 2  ;;  %v8707_v46 = vld [vmem:[#allocation100_spill] sm:$0xff] }
 0x27d   : > { %v2335_v61 = vmul.f32 %v2299_v35, %v6733_v53  ;;  %v8492_v58 = vrot.slane %v7380_v36, 1  ;;  %v8677_v45 = vrot.slane %v7088_v3, 2  ;;  %v2269_v54 = vmul.f32 %v8672_v21, %v2246_v62 }
 0x27e   : > { %v2180_v15 = vsel %vm1841_vm15, %v2178_v17, %v8674_v56  ;;  %v8675_v42 = vmov %v8674_v56  ;;  %v2188_v28 = vsel %vm1841_vm15, %v2183_v55, %v8676_v30  ;;  %v8678_v33 = vmov %v8676_v30 }
 0x27f   : > { %v2184_v18 = vsel %vm1841_vm15, %v8675_v42, %v2183_v55  ;;  %v2192_v9 = vsel %vm1841_vm15, %v8678_v33, %v8677_v45  ;;  %v2226_v34 = vadd.f32 %v2180_v15, %v2063_v57  ;;  %v2230_v47 = vadd.f32 %v2188_v28, %v2067_v5  ;;  %v5446_v33 = vld [vmem:[#allocation2] sm:$0xff] }
 0x280   : > { %v2228_v25 = vadd.f32 %v2184_v18, %v2065_v13  ;;  %v2232_v6 = vadd.f32 %v2192_v9, %v2069_v19  ;;  %v2271_v17 = vmul.f32 %v8672_v21, %v2248_v52  ;;  %v2033_v35 = vsel %vm1676_vm14, %v2028_v44, %v8492_v58  ;;  %v8679_v13 = vld [vmem:[#allocation76_spill] sm:$0xff]  ;;  %v2462_v19 = vld [vmem:[#allocation3 + $0x28] sm:$0xfc]  ;;  %624 = vst.msk [vmem:[#allocation3 + $0xa8] sm:$0x3] %vm623_vm0, %v5446_v33 }
 0x281   : > { %v2252_v55 = vmul.f32 %v6127_v32, %v7145_v12  ;;  %v2273_v4 = vmul.f32 %v8672_v21, %v2250_v31  ;;  %v2283_v23 = vadd.f32 %v2267_v20, %v2226_v34  ;;  %v2071_v56 = vadd.f32 %v2033_v35, %v1958_v10  ;;  %v8705_v58 = vld [vmem:[#allocation96_spill] sm:$0xff] }
 0x282   : > { %v2285_v42 = vadd.f32 %v2269_v54, %v2228_v25  ;;  %v2287_v57 = vadd.f32 %v2271_v17, %v2230_v47  ;;  %v2360_v5 = vmul.f32 %v8679_v13, %v2335_v61  ;;  %v8491_v62 = vrot.slane %v7220_v29, 2 }
 0x283   : > { %v2289_v15 = vadd.f32 %v2273_v4, %v2232_v6  ;;  %v2362_v52 = vmul.f32 %v8679_v13, %v7284_v59  ;;  %v2364_v44 = vmul.f32 %v8679_v13, %v7288_v37  ;;  %v7420_v18 = vadd.f32 %v1944_v40, %v1903_v63  ;;  %v1421_v40 = vpop.f32.mrf.mxu1 }
 0x284   : > { %v2275_v31 = vmul.f32 %v8672_v21, %v2252_v55  ;;  %v2366_v10 = vmul.f32 %v8679_v13, %v7292_v39  ;;  %v7427_v20 = vmul.f32 %v8679_v13, %v7234_v49  ;;  %v2398_v30 = vrot.slane %v2360_v5, 1  ;;  %v8684_v55 = vld [vmem:[#allocation86_spill] sm:$0xff] }
 0x285   : > { %v2399_v28 = vrot.slane %v2362_v52, 1  ;;  %v2403_v61 = vrot.slane %v2364_v44, 1  ;;  %v2498_v45 = vmul.f32 %v2462_v19, %v8668_v51  ;;  %v2502_v63 = vmul.f32 %v8669_v8, %v8650_v7  ;;  %v8682_v8 = vld [vmem:[#allocation79_spill] sm:$0xff]  ;;  %v8689_v52 = vld [vmem:[#allocation84_spill] sm:$0xff] }
 0x286   : > { %8680 = vst [vmem:[#allocation89_spill] sm:$0xff] %v7427_v20  ;;  %v2407_v59 = vrot.slane %v2366_v10, 1  ;;  %v8490_v37 = vrot.slane %v7427_v20, 1  ;;  %v8681_v49 = vrot.slane %v7088_v3, 2  ;;  %v2506_v34 = vmul.f32 %v7020_v11, %v7145_v12  ;;  %v8686_v19 = vld [vmem:[#allocation55_spill] sm:$0xff]  ;;  %v8721_v20 = vld [vmem:[#allocation32_spill] sm:$0xff] }
 0x287   : > { %v2400_v9 = vsel %vm1676_vm14, %v2398_v30, %v2399_v28  ;;  %v2404_v51 = vsel %vm1676_vm14, %v2399_v28, %v2403_v61  ;;  %v1467_v25 = vrot.slane %v1421_v40, 7  ;;  %v2523_v6 = vmul.f32 %v8682_v8, %v2498_v45  ;;  %v1392_v30 = vpop.f32.mrf.mxu3 }
 0x288   : > { %v2196_v39 = vsel %vm1841_vm15, %v8681_v49, %v8491_v62  ;;  %v2408_v7 = vsel %vm1676_vm14, %v2403_v61, %v2407_v59  ;;  %v2412_v54 = vsel %vm1676_vm14, %v2407_v59, %v8490_v37  ;;  %v2446_v3 = vadd.f32 %v2400_v9, %v2283_v23 }
 0x289   : > { %v2234_v47 = vadd.f32 %v2196_v39, %v2071_v56  ;;  %v2448_v17 = vadd.f32 %v2404_v51, %v2285_v42  ;;  %v7447_v35 = vadd.f32 %v2408_v7, %v2287_v57  ;;  %v8685_v4 = vrot.slane %v8684_v55, 7  ;;  %v8697_v55 = vld [vmem:[#allocation95_spill] sm:$0xff] }
 0x28a   : > { %v7453_v11 = vrot.slane %v8686_v19, 6  ;;  %v7457_v56 = vadd.f32 %v2412_v54, %v2289_v15  ;;  %v2525_v44 = vmul.f32 %v8682_v8, %v8689_v52  ;;  %v2527_v23 = vmul.f32 %v8682_v8, %v2502_v63 }
 0x28b   : > { %8683 = vst [vmem:[#allocation63_spill] sm:$0xff] %v7447_v35  ;;  %v1468_v5 = vsel %vm1442_vm11, %v8685_v4, %v1467_v25  ;;  %v7455_v12 = vadd.f32 %v2275_v31, %v2234_v47  ;;  %v2529_v42 = vmul.f32 %v8682_v8, %v7190_v14  ;;  %v7466_v57 = vmul.f32 %v8682_v8, %v2506_v34  ;;  %v1423_v40 = vpop.f32.mrf.mxu1 }
 0x28c   : > { %8688 = vst [vmem:[#allocation68_spill] sm:$0xff] %v7457_v56  ;;  %v2561_v10 = vrot.slane %v2523_v6, 2  ;;  %v2562_v28 = vrot.slane %v2525_v44, 2  ;;  %v2566_v31 = vrot.slane %v2527_v23, 2  ;;  %v1465_v45 = vrot.slane %v1392_v30, 7  ;;  %v8699_v23 = vld [vmem:[#allocation54_spill] sm:$0xff] }
 0x28d   : > { %8687 = vst [vmem:[#allocation64_spill] sm:$0xff] %v7455_v12  ;;  %v2570_v61 = vrot.slane %v2529_v42, 2  ;;  %v8489_v15 = vrot.slane %v7466_v57, 2  ;;  %v7471_v59 = vmul.f32 %v6740_v43, %v7243_v27  ;;  %v7475_v63 = vmul.f32 %v8651_v0, %v7247_v2  ;;  %v8693_v2 = vld [vmem:[#allocation82_spill] sm:$0xff]  ;;  %v8700_v30 = vld [vmem:[#allocation60_spill] sm:$0xff] }
 0x28e   : > { %1504 = vst.msk [vmem:[#allocation3 + $0x78] sm:$0xff] %vm614_vm10, %v1468_v5  ;;  %v7480_v14 = vsel %vm1755_vm12, %v7154_v38, %v7453_v11  ;;  %v2563_v33 = vsel %vm1841_vm15, %v2561_v10, %v2562_v28  ;;  %v2567_v49 = vsel %vm1841_vm15, %v2562_v28, %v2566_v31  ;;  %v8694_v9 = vrot.slane %v8693_v2, 7  ;;  %v8703_v2 = vld [vmem:[#allocation75_spill] sm:$0xff] }
 0x28f   : > { %8690 = vst [vmem:[#allocation77_spill] sm:$0xff] %v7466_v57  ;;  %v7485_v39 = vsel %vm1841_vm15, %v2566_v31, %v2570_v61  ;;  %v7490_v27 = vsel %vm1841_vm15, %v2570_v61, %v8489_v15  ;;  %v1471_v34 = vrot.slane %v1423_v40, 7  ;;  %v7497_v47 = vadd.f32 %v2563_v33, %v2446_v3  ;;  %v8701_v61 = vld [vmem:[#allocation72_spill] sm:$0xff]  ;;  %v8702_v33 = vld [vmem:[#allocation73_spill] sm:$0xff]  ;;  %v1394_v37 = vpop.f32.mrf.mxu3 }
 0x290   : > { %8691 = vst [vmem:[#allocation81_spill] sm:$0xff] %v7485_v39  ;;  %v7495_v51 = vsel %vm1442_vm11, %v8694_v9, %v1465_v45  ;;  %v7499_v7 = vadd.f32 %v2567_v49, %v2448_v17  ;;  %v8698_v17 = vld [vmem:[#allocation92_spill] sm:$0xff]  ;;  %v8706_v19 = vrot.slane %v8705_v58, 1  ;;  %v8709_v62 = vrot.slane %v8708_v41, 2 }
 0x291   : > { %8692 = vst [vmem:[#allocation70_spill] sm:$0xff] %v7490_v27  ;;  %v1629_v6 = vmul.f32 %v6733_v53, %v7495_v51  ;;  %v7505_v54 = vmul.f32 %v6745_v24, %v7495_v51  ;;  %v2126_v4 = vmul.f32 %v8697_v55, %v7495_v51  ;;  %v2253_v5 = vmul.f32 %v6310_v50, %v7495_v51  ;;  %v8720_v27 = vld [vmem:[#allocation66_spill] sm:$0xff] }
 0x292   : > { %8695 = vst [vmem:[#allocation71_spill] sm:$0xff] %v7497_v47  ;;  %v1472_v3 = vsel %vm1442_vm11, %v1467_v25, %v1471_v34  ;;  %v2507_v44 = vmul.f32 %v8698_v17, %v7495_v51  ;;  %v1539_v42 = vmul.f32 %v8699_v23, %v7495_v51  ;;  %v1794_v10 = vmul.f32 %v7480_v14, %v7495_v51 }
 0x293   : > { %8696 = vst [vmem:[#allocation62_spill] sm:$0xff] %v7499_v7  ;;  %v7523_v28 = vmul.f32 %v8700_v30, %v1629_v6  ;;  %v8501_v31 = vrot.slane %v7505_v54, 1  ;;  %v7529_v40 = vmul.f32 %v8701_v61, %v2126_v4  ;;  %v2276_v49 = vmul.f32 %v8702_v33, %v2253_v5 }
 0x294   : > { %1508 = vst.msk [vmem:[#allocation3 + $0x98] sm:$0x1] %vm617_vm13, %v1471_v34  ;;  %v2369_v9 = vmul.f32 %v8703_v2, %v1629_v6  ;;  %v8704_v34 = vld [vmem:[#allocation78_spill] sm:$0xff]  ;;  %v1469_v6 = vrot.slane %v1394_v37, 7  ;;  %v1922_v39 = vmul.f32 %v8721_v20, %v7495_v51 }
 0x295   : > { %v7511_v52 = vld [vmem:[#allocation3 + $0x78] sm:$0xff]  ;;  %1506 = vst.msk [vmem:[#allocation3 + $0x88] sm:$0xff] %vm614_vm10, %v1472_v3  ;;  %v2532_v15 = vmul.f32 %v8704_v34, %v2507_v44  ;;  %v2035_v32 = vsel %vm1676_vm14, %v8706_v19, %v8501_v31  ;;  %v8502_v5 = vrot.slane %v7529_v40, 2  ;;  %v7554_v19 = vmul.f32 %v6740_v43, %v1539_v42 }
 0x296   : > { %v2127_v25 = vmul.f32 %v8697_v55, %v7511_v52  ;;  %v1540_v3 = vmul.f32 %v8699_v23, %v7511_v52  ;;  %v2072_v44 = vadd.f32 %v2035_v32, %v8707_v46  ;;  %v2413_v26 = vrot.slane %v2369_v9, 1  ;;  %1507 = vst [vmem:[#allocation3 + $0x90] sm:$0x1] %v1469_v6  ;;  %v8710_v46 = vld [vmem:[#allocation90_spill] sm:$0xff]  ;;  %v8712_v9 = vld [vmem:[#allocation91_spill] sm:$0xff] }
 0x297   : > { %v2576_v48 = vrot.slane %v2532_v15, 2  ;;  %v2198_v7 = vsel %vm1841_vm15, %v8709_v62, %v8502_v5  ;;  %v7558_v31 = vsel %vm1442_vm11, %v1465_v45, %v1469_v6  ;;  %v8711_v37 = vrot.slane %v8710_v46, 1  ;;  %v8714_v42 = vld [vmem:[#allocation83_spill] sm:$0xff] }
 0x298   : > { %v7543_v4 = vmul.f32 %v6784_v1, %v2127_v25  ;;  %v1562_v25 = vmul.f32 %v8651_v0, %v1540_v3  ;;  %v2235_v32 = vadd.f32 %v2198_v7, %v2072_v44  ;;  %v8713_v41 = vrot.slane %v8712_v9, 2  ;;  %1505 = vst [vmem:[#allocation3 + $0x80] sm:$0xff] %v7558_v31 }
 0x299   : > { %v2414_v15 = vsel %vm1676_vm14, %v8711_v37, %v2413_v26  ;;  %v2346_v43 = vmul.f32 %v6733_v53, %v7558_v31  ;;  %v2509_v45 = vmul.f32 %v8697_v55, %v7558_v31  ;;  %v7574_v7 = vmul.f32 %v6733_v53, %v7511_v52  ;;  %v8716_v37 = vld [vmem:[#allocation88_spill] sm:$0xff] }
 0x29a   : > { %v2577_v62 = vsel %vm1841_vm15, %v8713_v41, %v2576_v48  ;;  %v2453_v0 = vadd.f32 %v2414_v15, %v8714_v42  ;;  %v2292_v44 = vadd.f32 %v2276_v49, %v2235_v32  ;;  %v8715_v46 = vrot.slane %v7523_v28, 1  ;;  %v8718_v15 = vld [vmem:[#allocation61_spill] sm:$0xff] }
 0x29b   : > { %v8717_v9 = vrot.slane %v8716_v37, 1  ;;  %v1795_v58 = vmul.f32 %v7480_v14, %v7511_v52  ;;  %v1819_v42 = vmul.f32 %v8718_v15, %v1794_v10  ;;  %v7586_v47 = vmul.f32 %v8703_v2, %v2346_v43  ;;  %v8719_v32 = vld [vmem:[#allocation65_spill] sm:$0xff] }
 0x29c   : > { %v1582_v3 = vld [vmem:[#allocation3 + $0x88] sm:$0x1]  ;;  %v7589_v57 = vmul.f32 %v8704_v34, %v2509_v45  ;;  %v7591_v49 = vadd.f32 %v2577_v62, %v2453_v0  ;;  %v1655_v37 = vmul.f32 %v8719_v32, %v7574_v7 }
 0x29d   : > { %v1746_v6 = vld [vmem:[#allocation3 + $0x88] sm:$0x3]  ;;  %v1704_v41 = vsel %vm1676_vm14, %v8717_v9, %v8715_v46  ;;  %v1632_v5 = vmul.f32 %v6733_v53, %v1582_v3  ;;  %v1820_v56 = vmul.f32 %v8720_v27, %v1795_v58  ;;  %v8505_v10 = vrot.slane %v7586_v47, 1 }
 0x29e   : > { %v1739_v46 = vadd.f32 %v1704_v41, %v7471_v59  ;;  %v1797_v9 = vmul.f32 %v7453_v11, %v1746_v6  ;;  %v2580_v3 = vrot.slane %v7589_v57, 2  ;;  %v1868_v12 = vrot.slane %v1819_v42, 2  ;;  %v8722_v41 = vld [vmem:[#allocation97_spill] sm:$0xff]  ;;  %v5362_v57 = vld [vmem:[#allocation12] ss:$0 sm:$0xff] }
 0x29f   : > { %v1657_v43 = vmul.f32 %v8719_v32, %v1632_v5  ;;  %v1705_v45 = vrot.slane %v1655_v37, 1  ;;  %v1870_v0 = vrot.slane %v1820_v56, 2  ;;  %v2418_v59 = vsel %vm1676_vm14, %v2413_v26, %v8505_v10  ;;  %v1581_v32 = vld [vmem:[#allocation3 + $0x80] sm:$0x1] }
 0x2a0   : > { %v1822_v62 = vmul.f32 %v8720_v27, %v1797_v9  ;;  %v2581_v58 = vsel %vm1841_vm15, %v2576_v48, %v2580_v3  ;;  %v8723_v35 = vrot.slane %v8722_v41, 2  ;;  %v2455_v42 = vadd.f32 %v2418_v59, %v2292_v44  ;;  %v8724_v27 = vld [vmem:[#allocation99_spill] sm:$0xff]  ;;  %v7623_v44 = vld [vmem:[#allocation3 + $0x88] sm:$0xff] }
 0x2a1   : > { %v1709_v6 = vrot.slane %v1657_v43, 1  ;;  %v8725_v56 = vrot.slane %v8724_v27, 1  ;;  %v1745_v51 = vld [vmem:[#allocation3 + $0x80] sm:$0x3]  ;;  %v8726_v9 = vrot.slane %v7200_v22, 2  ;;  %v1631_v17 = vmul.f32 %v6733_v53, %v1581_v32 }
 0x2a2   : > { %v1869_v5 = vsel %vm1841_vm15, %v8723_v35, %v1868_v12  ;;  %v1874_v10 = vrot.slane %v1822_v62, 2  ;;  %v1796_v35 = vmul.f32 %v7453_v11, %v1745_v51  ;;  %v7625_v59 = vadd.f32 %v2581_v58, %v2455_v42  ;;  %v1968_v32 = vld [vmem:[#allocation3 + $0x98] sm:$0x1] }
 0x2a3   : > { %v1706_v37 = vsel %vm1676_vm14, %v8725_v56, %v1705_v45  ;;  %v1871_v26 = vsel %vm1841_vm15, %v8726_v9, %v1870_v0  ;;  %v1710_v48 = vsel %vm1676_vm14, %v1705_v45, %v1709_v6  ;;  %v1904_v56 = vadd.f32 %v1869_v5, %v1739_v46 }
 0x2a4   : > { %v1740_v43 = vadd.f32 %v1706_v37, %v7475_v63  ;;  %v1742_v41 = vadd.f32 %v1710_v48, %v1562_v25  ;;  %v1875_v27 = vsel %vm1841_vm15, %v1870_v0, %v1874_v10  ;;  %v1656_v22 = vmul.f32 %v8700_v30, %v1631_v17  ;;  %v8727_v0 = vld [vmem:[#allocation67_spill] sm:$0xff] }
 0x2a5   : > { %v1821_v62 = vmul.f32 %v8718_v15, %v1796_v35  ;;  %v1923_v45 = vmul.f32 %v8721_v20, %v7511_v52  ;;  %v3237_v63 = vpack.c.bf16 %v7625_v59, %v7591_v49  ;;  %v1924_v58 = vmul.f32 %v8699_v23, %v7558_v31  ;;  %v1967_v15 = vld [vmem:[#allocation3 + $0x90] sm:$0x1] }
 0x2a6   : > { %v1905_v9 = vadd.f32 %v1871_v26, %v1740_v43  ;;  %v1907_v6 = vadd.f32 %v1875_v27, %v1742_v41  ;;  %v1925_v25 = vmul.f32 %v8699_v23, %v7623_v44  ;;  %v1707_v10 = vrot.slane %v1656_v22, 1 }
 0x2a7   : > { %v1872_v46 = vrot.slane %v1821_v62, 2  ;;  %v1945_v17 = vmul.f32 %v8727_v0, %v1922_v39  ;;  %v1946_v30 = vmul.f32 %v8665_v60, %v1923_v45  ;;  %3251 = vrot.lane.b32.xlu2 %v3237_v63, %s5820_s2  ;;  %v1947_v5 = vmul.f32 %v8727_v0, %v1924_v58  ;;  %v2080_v62 = vld [vmem:[#allocation3 + $0x90] sm:$0x3]  ;;  %v2081_v45 = vld [vmem:[#allocation3 + $0x98] sm:$0x3] }
 0x2a8   : > { %v1948_v42 = vmul.f32 %v8665_v60, %v1925_v25  ;;  %v7645_v37 = vmul.f32 %v8666_v16, %v7511_v52  ;;  %v1990_v51 = vmul.f32 %v6745_v24, %v7558_v31  ;;  %v8728_v26 = vrot.slane %v7523_v28, 1 }
 0x2a9   : > { %v1873_v48 = vsel %vm1841_vm15, %v1868_v12, %v1872_v46  ;;  %v1961_v43 = vadd.f32 %v1945_v17, %v1904_v56  ;;  %v1962_v35 = vadd.f32 %v1946_v30, %v1905_v9  ;;  %v1991_v60 = vmul.f32 %v8666_v16, %v7623_v44 }
 0x2aa   : > { %v1708_v39 = vsel %vm1676_vm14, %v8728_v26, %v1707_v10  ;;  %v1964_v27 = vadd.f32 %v1948_v42, %v1907_v6  ;;  %v1992_v22 = vmul.f32 %v6745_v24, %v1967_v15  ;;  %v1993_v63 = vmul.f32 %v8666_v16, %v1968_v32  ;;  %v2242_v26 = vld [vmem:[#allocation3 + $0x98] sm:$0xff] }
 0x2ab   : > { %v1741_v41 = vadd.f32 %v1708_v39, %v7554_v19  ;;  %v2036_v28 = vrot.slane %v7645_v37, 1  ;;  %v2038_v58 = vrot.slane %v1990_v51, 1  ;;  %v2128_v12 = vmul.f32 %v7480_v14, %v7558_v31  ;;  %v2241_v51 = vld [vmem:[#allocation3 + $0x90] sm:$0xff] }
 0x2ac   : > { %v2040_v9 = vrot.slane %v1991_v60, 1  ;;  %v2042_v25 = vrot.slane %v1992_v22, 1  ;;  %v2129_v19 = vmul.f32 %v7623_v44, %v7480_v14  ;;  %v8729_v6 = vrot.slane %v7505_v54, 1 }
 0x2ad   : > { %v1906_v56 = vadd.f32 %v1873_v48, %v1741_v41  ;;  %v2044_v10 = vrot.slane %v1993_v63, 1  ;;  %v2130_v46 = vmul.f32 %v2080_v62, %v7453_v11  ;;  %v2131_v16 = vmul.f32 %v2081_v45, %v7453_v11  ;;  %v8730_v45 = vld [vmem:[#allocation56_spill] sm:$0xff] }
 0x2ae   : > { %v2039_v24 = vsel %vm1676_vm14, %v8729_v6, %v2038_v58  ;;  %v2041_v17 = vsel %vm1676_vm14, %v2036_v28, %v2040_v9  ;;  %v2043_v30 = vsel %vm1676_vm14, %v2038_v58, %v2042_v25  ;;  %v2153_v54 = vmul.f32 %v8701_v61, %v2128_v12 }
 0x2af   : > { %v1963_v0 = vadd.f32 %v1947_v5, %v1906_v56  ;;  %v2074_v15 = vadd.f32 %v2039_v24, %v1961_v43  ;;  %v2045_v42 = vsel %vm1676_vm14, %v2040_v9, %v2044_v10  ;;  %v2075_v14 = vadd.f32 %v2041_v17, %v1962_v35 }
 0x2b0   : > { %v2154_v32 = vmul.f32 %v6784_v1, %v2129_v19  ;;  %v2077_v48 = vadd.f32 %v2045_v42, %v1964_v27  ;;  %v2155_v11 = vmul.f32 %v8701_v61, %v2130_v46  ;;  %v2156_v5 = vmul.f32 %v6784_v1, %v2131_v16  ;;  %v2300_v16 = vld [vmem:[#allocation3 + $0xa0] sm:$0x1] }
 0x2b1   : > { %v2076_v39 = vadd.f32 %v2043_v30, %v1963_v0  ;;  %v2201_v41 = vrot.slane %v2153_v54, 2  ;;  %v2255_v43 = vmul.f32 %v8721_v20, %v7558_v31  ;;  %v2256_v35 = vmul.f32 %v8721_v20, %v7623_v44  ;;  %v2301_v0 = vld [vmem:[#allocation3 + $0xa8] sm:$0x1]  ;;  %v8733_v42 = vld [vmem:[#allocation59_spill] sm:$0xff] }
 0x2b2   : > { %v2203_v60 = vrot.slane %v2154_v32, 2  ;;  %v2205_v22 = vrot.slane %v2155_v11, 2  ;;  %v2207_v62 = vrot.slane %v2156_v5, 2  ;;  %v2257_v63 = vmul.f32 %v2241_v51, %v8730_v45 }
 0x2b3   : > { %v2258_v58 = vmul.f32 %v2242_v26, %v8730_v45  ;;  %v8731_v27 = vrot.slane %v7529_v40, 2  ;;  %v8732_v1 = vrot.slane %v7543_v4, 2  ;;  %v2278_v56 = vmul.f32 %v8702_v33, %v2255_v43 }
 0x2b4   : > { %v2279_v31 = vmul.f32 %v8672_v21, %v2256_v35  ;;  %v2206_v9 = vsel %vm1841_vm15, %v2201_v41, %v2205_v22  ;;  %v2208_v25 = vsel %vm1841_vm15, %v2203_v60, %v2207_v62  ;;  %v2280_v40 = vmul.f32 %v8702_v33, %v2257_v63  ;;  %v2463_v22 = vld [vmem:[#allocation3 + $0xa0] sm:$0x3]  ;;  %v2464_v62 = vld [vmem:[#allocation3 + $0xa8] sm:$0x3] }
 0x2b5   : > { %v2202_v61 = vsel %vm1841_vm15, %v8731_v27, %v2201_v41  ;;  %v2204_v12 = vsel %vm1841_vm15, %v8732_v1, %v2203_v60  ;;  %v2239_v24 = vadd.f32 %v2206_v9, %v2076_v39  ;;  %v2240_v10 = vadd.f32 %v2208_v25, %v2077_v48  ;;  %v8734_v41 = vld [vmem:[#allocation57_spill] sm:$0xff] }
 0x2b6   : > { %v2237_v19 = vadd.f32 %v2202_v61, %v2074_v15  ;;  %v2238_v6 = vadd.f32 %v2204_v12, %v2075_v14  ;;  %v2281_v46 = vmul.f32 %v8672_v21, %v2258_v58  ;;  %v2324_v54 = vsel %vm1442_vm11, %v6733_v53, %v8733_v42 }
 0x2b7   : > { %v2347_v32 = vmul.f32 %v7623_v44, %v6733_v53  ;;  %v2296_v11 = vadd.f32 %v2280_v40, %v2239_v24  ;;  %v2348_v14 = vmul.f32 %v2324_v54, %v2241_v51  ;;  %v2349_v39 = vmul.f32 %v2324_v54, %v2242_v26 }
 0x2b8   : > { %v2294_v17 = vadd.f32 %v2278_v56, %v2237_v19  ;;  %v2295_v30 = vadd.f32 %v2279_v31, %v2238_v6  ;;  %v2297_v15 = vadd.f32 %v2281_v46, %v2240_v10  ;;  %v2350_v48 = vmul.f32 %v2300_v16, %v8733_v42 }
 0x2b9   : > { %v2351_v33 = vmul.f32 %v2301_v0, %v8733_v42  ;;  %v2372_v5 = vmul.f32 %v8679_v13, %v2347_v32  ;;  %v2486_v60 = vrot.slane %v8734_v41, 6  ;;  %v2373_v43 = vmul.f32 %v8703_v2, %v2348_v14 }
 0x2ba   : > { %v2374_v35 = vmul.f32 %v8679_v13, %v2349_v39  ;;  %v2510_v53 = vmul.f32 %v7623_v44, %v8697_v55  ;;  %v8735_v63 = vrot.slane %v7380_v36, 1  ;;  %v2375_v27 = vmul.f32 %v8703_v2, %v2350_v48 }
 0x2bb   : > { %v2376_v61 = vmul.f32 %v8679_v13, %v2351_v33  ;;  %v2419_v1 = vrot.slane %v2372_v5, 1  ;;  %v2487_v12 = vsel %vm1755_vm12, %v7154_v38, %v2486_v60  ;;  %v2421_v56 = vrot.slane %v2373_v43, 1 }
 0x2bc   : > { %v2037_v58 = vsel %vm1676_vm14, %v8735_v63, %v2036_v28  ;;  %v2423_v31 = vrot.slane %v2374_v35, 1  ;;  %v2511_v9 = vmul.f32 %v2487_v12, %v2241_v51  ;;  %v2512_v25 = vmul.f32 %v2487_v12, %v2242_v26  ;;  %v8739_v63 = vld [vmem:[#allocation92_spill] sm:$0xff] }
 0x2bd   : > { %v2425_v19 = vrot.slane %v2375_v27, 1  ;;  %v2427_v55 = vrot.slane %v2376_v61, 1  ;;  %v2513_v44 = vmul.f32 %v2486_v60, %v2463_v22  ;;  %v2514_v37 = vmul.f32 %v2486_v60, %v2464_v62 }
 0x2be   : > { %v8736_v36 = vrot.slane %v7586_v47, 1  ;;  %v2424_v2 = vsel %vm1676_vm14, %v2419_v1, %v2423_v31  ;;  %v2535_v6 = vmul.f32 %v8682_v8, %v2510_v53  ;;  %v2536_v24 = vmul.f32 %v8704_v34, %v2511_v9 }
 0x2bf   : > { %v2426_v38 = vsel %vm1676_vm14, %v2421_v56, %v2425_v19  ;;  %v2428_v10 = vsel %vm1676_vm14, %v2423_v31, %v2427_v55  ;;  %v2458_v26 = vadd.f32 %v2424_v2, %v2295_v30  ;;  %v2537_v16 = vmul.f32 %v8682_v8, %v2512_v25  ;;  %v8744_v19 = vld [vmem:[#allocation64_spill] sm:$0xff] }
 0x2c0   : > { %v2422_v28 = vsel %vm1676_vm14, %v8736_v36, %v2421_v56  ;;  %v2459_v40 = vadd.f32 %v2426_v38, %v2296_v11  ;;  %v2460_v46 = vadd.f32 %v2428_v10, %v2297_v15  ;;  %v2538_v47 = vmul.f32 %v8704_v34, %v2513_v44  ;;  %v8746_v36 = vld [vmem:[#allocation70_spill] sm:$0xff] }
 0x2c1   : > { %v2457_v51 = vadd.f32 %v2422_v28, %v2294_v17  ;;  %v2539_v0 = vmul.f32 %v8682_v8, %v2514_v37  ;;  %v2582_v42 = vrot.slane %v2535_v6, 2  ;;  %v2584_v54 = vrot.slane %v2536_v24, 2 }
 0x2c2   : > { %v2073_v32 = vadd.f32 %v2037_v58, %v7420_v18  ;;  %v2586_v14 = vrot.slane %v2537_v16, 2  ;;  %v2588_v39 = vrot.slane %v2538_v47, 2  ;;  %v8737_v48 = vrot.slane %v7543_v4, 2  ;;  %v8741_v58 = vld [vmem:[#allocation81_spill] sm:$0xff] }
 0x2c3   : > { %v8738_v33 = vrot.slane %v7220_v29, 2  ;;  %v2254_v30 = vmul.f32 %v6310_v50, %v7511_v52  ;;  %v2585_v34 = vsel %vm1841_vm15, %v2580_v3, %v2584_v54  ;;  %v2590_v11 = vrot.slane %v2539_v0, 2 }
 0x2c4   : > { %v2370_v18 = vmul.f32 %v8679_v13, %v7574_v7  ;;  %v2587_v5 = vsel %vm1841_vm15, %v2582_v42, %v2586_v14  ;;  %v2589_v4 = vsel %vm1841_vm15, %v2584_v54, %v2588_v39  ;;  %v7743_v60 = vadd.f32 %v2585_v34, %v2457_v51  ;;  %v8740_v7 = vld [vmem:[#allocation63_spill] sm:$0xff]  ;;  %v8747_v51 = vld [vmem:[#allocation77_spill] sm:$0xff] }
 0x2c5   : > { %v2200_v17 = vsel %vm1841_vm15, %v8738_v33, %v8737_v48  ;;  %v2277_v29 = vmul.f32 %v8672_v21, %v2254_v30  ;;  %v2591_v43 = vsel %vm1841_vm15, %v2586_v14, %v2590_v11  ;;  %v2621_v35 = vadd.f32 %v2587_v5, %v2458_v26  ;;  %v8742_v21 = vld [vmem:[#allocation89_spill] sm:$0xff] }
 0x2c6   : > { %v2236_v15 = vadd.f32 %v2200_v17, %v2073_v32  ;;  %v7747_v22 = vadd.f32 %v2589_v4, %v2459_v40  ;;  %v2415_v3 = vrot.slane %v2370_v18, 1  ;;  %v2623_v62 = vadd.f32 %v2591_v43, %v2460_v46  ;;  %v8749_v46 = vld [vmem:[#allocation71_spill] sm:$0xff]  ;;  %v8750_v32 = vld [vmem:[#allocation62_spill] sm:$0xff] }
 0x2c7   : > { %v2508_v13 = vmul.f32 %v8739_v63, %v7511_v52  ;;  %v2613_v27 = vadd.f32 %v8741_v58, %v8740_v7  ;;  %v2632_v61 = vadd.f32 %v5362_v57, %v2621_v35  ;;  %v8743_v56 = vrot.slane %v8742_v21, 1  ;;  %v8745_v52 = vld [vmem:[#allocation68_spill] sm:$0xff] }
 0x2c8   : > { %v2293_v53 = vadd.f32 %v2277_v29, %v2236_v15  ;;  %v3238_v12 = vpack.c.bf16 %v7747_v22, %v7743_v60  ;;  %v2420_v9 = vsel %vm1676_vm14, %v2415_v3, %v2419_v1  ;;  %v2633_v25 = vadd.f32 %v5362_v57, %v2623_v62 }
 0x2c9   : > { %v2416_v31 = vsel %vm1676_vm14, %v8743_v56, %v2415_v3  ;;  %v2533_v37 = vmul.f32 %v8682_v8, %v2508_v13  ;;  %v2615_v28 = vadd.f32 %v8746_v36, %v8745_v52  ;;  %v2628_v2 = vadd.f32 %v5362_v57, %v2613_v27 }
 0x2ca   : > { %v2454_v55 = vadd.f32 %v2416_v31, %v8744_v19  ;;  %v2456_v44 = vadd.f32 %v2420_v9, %v2293_v53  ;;  %3253 = vrot.lane.b32.xlu0 %v3238_v12, %s5820_s2  ;;  %v2642_v24 = vsel %vm614_vm10, %v2632_v61, -inf  ;;  %v2644_v1 = vsel %vm614_vm10, %v2633_v25, -inf }
 0x2cb   : > { %v2578_v6 = vrot.slane %v2533_v37, 2  ;;  %v2629_v38 = vadd.f32 %v5362_v57, %v2615_v28  ;;  %v2636_v10 = vsel %vm614_vm10, %v2628_v2, -inf  ;;  %v8748_v26 = vrot.slane %v8747_v51, 2 }
 0x2cc   : > { %v2626_v16 = vadd.f32 %v5362_v57, %v8749_v46  ;;  %v2643_v47 = vmax.f32 %v2636_v10, %v2642_v24  ;;  %v2627_v14 = vadd.f32 %v5362_v57, %v8750_v32 }
 0x2cd   : > { %v2579_v40 = vsel %vm1841_vm15, %v8748_v26, %v2578_v6  ;;  %v2583_v8 = vsel %vm1841_vm15, %v2578_v6, %v2582_v42  ;;  %v2637_v39 = vsel %vm614_vm10, %v2629_v38, -inf }
 0x2ce   : > { %v2617_v0 = vadd.f32 %v2579_v40, %v2454_v55  ;;  %v2619_v54 = vadd.f32 %v2583_v8, %v2456_v44  ;;  %v2645_v48 = vmax.f32 %v2637_v39, %v2644_v1  ;;  %v2634_v34 = vsel %vm614_vm10, %v2626_v16, -inf }
 0x2cf   : > { %v2635_v11 = vsel %vm614_vm10, %v2627_v14, -inf }
 0x2d0   : > { %v2630_v33 = vadd.f32 %v5362_v57, %v2617_v0  ;;  %v2631_v17 = vadd.f32 %v5362_v57, %v2619_v54  ;;  %v2647_v30 = vmax.f32 %v2643_v47, %v2645_v48 }
 0x2d2   : > { %v2638_v15 = vsel %vm614_vm10, %v2630_v33, -inf  ;;  %v2640_v42 = vsel %vm614_vm10, %v2631_v17, -inf }
 0x2d3   : > { %v2639_v18 = vmax.f32 %v2634_v34, %v2638_v15  ;;  %v2641_v5 = vmax.f32 %v2635_v11, %v2640_v42 }
 0x2d5   : > { %v2646_v4 = vmax.f32 %v2639_v18, %v2641_v5 }
 0x2d7   : > { %v2648_v29 = vmax.f32 %v2646_v4, %v2647_v30 }
 0x2d9   : > { %v2649_v43 = vrot.slane %v2648_v29, 4 }
 0x2db   : > { %v2650_v35 = vmax.f32 %v2648_v29, %v2649_v43 }
 0x2dd   : > { %v2651_v3 = vrot.slane %v2650_v35, 2 }
 0x2df   : > { %v2652_v62 = vmax.f32 %v2650_v35, %v2651_v3 }
 0x2e1   : > { %v2653_v53 = vrot.slane %v2652_v62, 1 }
 0x2e3   : > { %v2654_v63 = vmax.f32 %v2652_v62, %v2653_v53 }
 0x2e5   : > { %v2655_v57 = vsub.f32 %v2626_v16, %v2654_v63  ;;  %v2656_v13 = vsub.f32 %v2627_v14, %v2654_v63  ;;  %v2657_v7 = vsub.f32 %v2628_v2, %v2654_v63  ;;  %v2658_v58 = vsub.f32 %v2629_v38, %v2654_v63 }
 0x2e6   : > { %v2659_v27 = vsub.f32 %v2630_v33, %v2654_v63  ;;  %v2660_v12 = vsub.f32 %v2631_v17, %v2654_v63  ;;  %v2661_v21 = vsub.f32 %v2632_v61, %v2654_v63  ;;  %v2662_v56 = vsub.f32 %v2633_v25, %v2654_v63 }
 0x2e7   : > { %v2663_v31 = vmul.f32 1.442695, %v2655_v57  ;;  %v2665_v9 = vmul.f32 1.442695, %v2656_v13  ;;  %v2667_v19 = vmul.f32 1.442695, %v2657_v7 }
 0x2e8   : > { %v2669_v55 = vmul.f32 1.442695, %v2658_v58  ;;  %v2671_v44 = vmul.f32 1.442695, %v2659_v27  ;;  %v2673_v37 = vmul.f32 1.442695, %v2660_v12 }
 0x2e9   : > { %5395 = vpow2.f32 %v2663_v31  ;;  %v2675_v52 = vmul.f32 1.442695, %v2661_v21  ;;  %v2677_v2 = vmul.f32 1.442695, %v2662_v56  ;;  %v8751_v21 = vld [vmem:[#allocation85_spill] sm:$0xff]  ;;  %v8752_v31 = vld [vmem:[#allocation87_spill] sm:$0xff] }
 0x2ea   : > { %5397 = vpow2.f32 %v2665_v9 }
 0x2eb   : > { %5399 = vpow2.f32 %v2667_v19  ;;  %v8753_v19 = vld [vmem:[#allocation93_spill] sm:$0xff] }
 0x2ec   : > { %5401 = vpow2.f32 %v2669_v55 }
 0x2ed   : > { %5403 = vpow2.f32 %v2671_v44  ;;  %v8754_v44 = vld [vmem:[#allocation94_spill] sm:$0xff] }
 0x2ee   : > { %5405 = vpow2.f32 %v2673_v37 }
 0x2ef   : > { %v5396_v36 = vpop.eup %5395  ;;  %5407 = vpow2.f32 %v2675_v52 }
 0x2f0   : > { %v5398_v28 = vpop.eup %5397  ;;  %v2679_v6 = vsel %vm614_vm10, %v5396_v36, 0.0  ;;  %5409 = vpow2.f32 %v2677_v2 }
 0x2f1   : > { %v5400_v61 = vpop.eup %5399  ;;  %v2680_v25 = vsel %vm614_vm10, %v5398_v28, 0.0 }
 0x2f2   : > { %v5402_v24 = vpop.eup %5401  ;;  %v2681_v38 = vadd.f32 %v2680_v25, %v2679_v6  ;;  %v2682_v10 = vsel %vm614_vm10, %v5400_v61, 0.0 }
 0x2f3   : > { %v5404_v1 = vpop.eup %5403  ;;  %v2684_v26 = vsel %vm614_vm10, %v5402_v24, 0.0 }
 0x2f4   : > { %v2683_v51 = vadd.f32 %v2682_v10, %v2681_v38  ;;  %v5406_v40 = vpop.eup %5405  ;;  %v2686_v46 = vsel %vm614_vm10, %v5404_v1, 0.0 }
 0x2f5   : > { %v5408_v16 = vpop.eup %5407  ;;  %v2688_v0 = vsel %vm614_vm10, %v5406_v40, 0.0 }
 0x2f6   : > { %v2685_v8 = vadd.f32 %v2684_v26, %v2683_v51  ;;  %v5410_v54 = vpop.eup %5409  ;;  %v2690_v14 = vsel %vm614_vm10, %v5408_v16, 0.0  ;;  %v5114_v51 = vld [vmem:[#allocation13 + $0x74] sm:$0xf0]  ;;  %v5113_v26 = vld [vmem:[#allocation13 + $0x74] sm:$0xf] }
 0x2f7   : > { %v2692_v48 = vsel %vm614_vm10, %v5410_v54, 0.0 }
 0x2f8   : > { %v2687_v47 = vadd.f32 %v2686_v46, %v2685_v8  ;;  %v4772_v8 = vld [vmem:[#allocation13 + $0x78] sm:$0xf0]  ;;  %v4762_v46 = vld [vmem:[#allocation13 + $0x60] sm:$0xf] }
 0x2fa   : > { %v2689_v32 = vadd.f32 %v2688_v0, %v2687_v47  ;;  %v5111_v47 = vld [vmem:[#allocation13 + $0x64] sm:$0xf] }
 0x2fc   : > { %v2691_v39 = vadd.f32 %v2690_v14, %v2689_v32  ;;  %v4754_v32 = vld [vmem:[#allocation13 + $0x50] sm:$0xf]  ;;  %v5110_v14 = vld [vmem:[#allocation13 + $0x54] sm:$0xf0] }
 0x2fe   : > { %v2693_v33 = vadd.f32 %v2692_v48, %v2691_v39  ;;  %v5109_v39 = vld [vmem:[#allocation13 + $0x54] sm:$0xf]  ;;  %v4756_v48 = vld [vmem:[#allocation13 + $0x58] sm:$0xf0] }
 0x300   : > { %v2694_v17 = vrot.slane %v2693_v33, 4 }
 0x302   : > { %v2695_v30 = vadd.f32 %v2694_v17, %v2693_v33  ;;  %v4755_v33 = vor.u32 %v5110_v14, %v4754_v32  ;;  %v4759_v17 = vor.u32 %v5109_v39, %v4756_v48  ;;  %v5120_v32 = vld [vmem:[#allocation15 + $0x28] sm:$0xff] }
 0x304   : > { %v2696_v34 = vrot.slane %v2695_v30, 2 }
 0x306   : > { %v2697_v11 = vadd.f32 %v2696_v34, %v2695_v30  ;;  %v4746_v30 = vld [vmem:[#allocation13 + $0x40] sm:$0xf]  ;;  %v5108_v34 = vld [vmem:[#allocation13 + $0x44] sm:$0xf0] }
 0x308   : > { %v2698_v15 = vrot.slane %v2697_v11, 1 }
 0x30a   : > { %v2699_v42 = vadd.f32 %v2698_v15, %v2697_v11  ;;  %v5107_v11 = vld [vmem:[#allocation13 + $0x44] sm:$0xf]  ;;  %v4748_v15 = vld [vmem:[#allocation13 + $0x48] sm:$0xf0] }
 0x30c   : > { %5411 = vrcp.f32 %v2699_v42  ;;  %v2711_v29 = vand.u32 2147483648, %v2699_v42  ;;  %v2709_v35 = vand.u32 2147483647, %v2699_v42  ;;  %vm2705_vm2 = vweird.f32 %v2699_v42 }
 0x30e   : > { %v2712_v62 = vor.u32 1.1754944e-38, %v2711_v29  ;;  %vm2710_vm4 = vcmp.eq.f32.partialorder %v2709_v35, 8.507059e+37  ;;  %v5105_v29 = vld [vmem:[#allocation13 + $0x34] sm:$0xf] }
 0x312   : > { %v5412_v18 = vpop.eup %5411 }
 0x313   : > { %v2701_v5 = vmul.f32 %v5412_v18, %v2699_v42  ;;  %vm2706_vm1 = vweird.f32 %v5412_v18  ;;  %v4747_v42 = vor.u32 %v5108_v34, %v4746_v30 }
 0x314   : > { %vm2707_vm3 = vmor %vm2705_vm2, %vm2706_vm1 }
 0x315   : > { %v2702_v4 = vsub.f32 1.0, %v2701_v5  ;;  %v5106_v5 = vld [vmem:[#allocation13 + $0x34] sm:$0xf0] }
 0x317   : > { %v2703_v43 = vmul.f32 %v5412_v18, %v2702_v4  ;;  %v4751_v4 = vor.u32 %v5107_v11, %v4748_v15  ;;  %v5119_v15 = vld [vmem:[#allocation15 + $0x20] sm:$0xff] }
 0x319   : > { %v2704_v3 = vadd.f32 %v5412_v18, %v2703_v43  ;;  %v4740_v43 = vld [vmem:[#allocation13 + $0x38] sm:$0xf0] }
 0x31b   : > { %v2708_v53 = vsel %vm2707_vm3, %v5412_v18, %v2704_v3  ;;  %v4738_v18 = vld [vmem:[#allocation13 + $0x30] sm:$0xf] }
 0x31c   : > { %v2713_v63 = vsel %vm2710_vm4, %v2712_v62, %v2708_v53  ;;  %v4739_v3 = vor.u32 %v5106_v5, %v4738_v18  ;;  %v4743_v62 = vor.u32 %v5105_v29, %v4740_v43  ;;  %v5118_v18 = vld [vmem:[#allocation15 + $0x18] sm:$0xff] }
 0x31d   : > { %v2714_v57 = vmul.f32 %v5396_v36, %v2713_v63  ;;  %v2715_v13 = vmul.f32 %v5398_v28, %v2713_v63  ;;  %v2716_v7 = vmul.f32 %v5400_v61, %v2713_v63  ;;  %v2717_v58 = vmul.f32 %v5402_v24, %v2713_v63 }
 0x31e   : > { %v2718_v27 = vmul.f32 %v5404_v1, %v2713_v63  ;;  %v2719_v12 = vmul.f32 %v5406_v40, %v2713_v63  ;;  %v2720_v28 = vmul.f32 %v5408_v16, %v2713_v63  ;;  %v2721_v61 = vmul.f32 %v5410_v54, %v2713_v63  ;;  %v5112_v16 = vld [vmem:[#allocation13 + $0x64] sm:$0xf0]  ;;  %v4730_v63 = vld [vmem:[#allocation13 + $0x20] sm:$0xf] }
 0x31f   : > { %v2722_v56 = vmul.f32 %v2714_v57, %v8751_v21  ;;  %v2723_v9 = vmul.f32 %v2715_v13, %v8752_v31  ;;  %v2724_v55 = vmul.f32 %v2716_v7, %v8753_v19  ;;  %v2725_v37 = vmul.f32 %v2717_v58, %v8754_v44  ;;  %v5104_v57 = vld [vmem:[#allocation13 + $0x24] sm:$0xf0]  ;;  %v5103_v13 = vld [vmem:[#allocation13 + $0x24] sm:$0xf]  ;;  %v4732_v58 = vld [vmem:[#allocation13 + $0x28] sm:$0xf0] }
 0x320   : > { %v2726_v52 = vmul.f32 %v2718_v27, %v7591_v49  ;;  %v2727_v2 = vmul.f32 %v2719_v12, %v7625_v59  ;;  %v2728_v24 = vmul.f32 %v2720_v28, %v7743_v60  ;;  %v2729_v38 = vmul.f32 %v2721_v61, %v7747_v22  ;;  %v4770_v59 = vld [vmem:[#allocation13 + $0x70] sm:$0xf]  ;;  %v4764_v22 = vld [vmem:[#allocation13 + $0x68] sm:$0xf0]  ;;  %v5102_v12 = vld [vmem:[#allocation13 + $0x14] sm:$0xf0] }
 0x321   : > { %v2730_v6 = vpack.c.bf16 %v2723_v9, %v2722_v56  ;;  %v2731_v25 = vpack.c.bf16 %v2725_v37, %v2724_v55  ;;  %v4771_v40 = vor.u32 %v5114_v51, %v4770_v59  ;;  %v4775_v60 = vor.u32 %v5113_v26, %v4772_v8  ;;  %v4722_v27 = vld [vmem:[#allocation13 + $0x10] sm:$0xf]  ;;  %v5101_v56 = vld [vmem:[#allocation13 + $0x14] sm:$0xf]  ;;  %v4724_v31 = vld [vmem:[#allocation13 + $0x18] sm:$0xf0] }
 0x322   : > { %v2732_v36 = vpack.c.bf16 %v2727_v2, %v2726_v52  ;;  %v2733_v10 = vpack.c.bf16 %v2729_v38, %v2728_v24  ;;  %v4763_v0 = vor.u32 %v5112_v16, %v4762_v46  ;;  %v4767_v54 = vor.u32 %v5111_v47, %v4764_v22  ;;  %v4714_v55 = vld [vmem:[#allocation13] sm:$0xf]  ;;  %v5100_v44 = vld [vmem:[#allocation13 + $0x4] sm:$0xf0]  ;;  %v5099_v37 = vld [vmem:[#allocation13 + $0x4] sm:$0xf] }
 0x323   : > { %2734 = vxpose.xlu1.c.b16.start [1/4] (short) (narrow) %v2730_v6, 64  ;;  %2891 = vmatpush.bf16.msrb.mxu3 %v4771_v40  ;;  %v4731_v7 = vor.u32 %v5104_v57, %v4730_v63  ;;  %v4735_v21 = vor.u32 %v5103_v13, %v4732_v58  ;;  %v4723_v9 = vor.u32 %v5102_v12, %v4722_v27  ;;  %v4716_v2 = vld [vmem:[#allocation13 + $0x8] sm:$0xf0]  ;;  %v5122_v16 = vld [vmem:[#allocation15 + $0x38] sm:$0xff] }
 0x324   : > { %2920 = vmatpush.bf16.msrb.mxu2 %v4775_v60  ;;  %v4727_v19 = vor.u32 %v5101_v56, %v4724_v31  ;;  %v4715_v52 = vor.u32 %v5100_v44, %v4714_v55  ;;  %v4719_v6 = vor.u32 %v5099_v37, %v4716_v2  ;;  %3198 = vmatpush.bf16.msrb.mxu0 %v5122_v16  ;;  %v5117_v56 = vld [vmem:[#allocation15 + $0x10] sm:$0xff]  ;;  %v5116_v37 = vld [vmem:[#allocation15 + $0x8] sm:$0xff] }
 0x327   : > { %2892 = vmatpush.bf16.msrb.mxu3 %v4763_v0 }
 0x328   : > { %2921 = vmatpush.bf16.msrb.mxu2 %v4767_v54  ;;  %v5121_v54 = vld [vmem:[#allocation15 + $0x30] sm:$0xff] }
 0x329   : > { %3199 = vmatpush.bf16.msrb.mxu0 %v5121_v54 }
 0x32b   : > { %2893 = vmatpush.bf16.msrb.mxu3 %v4755_v33 }
 0x32c   : > { %2922 = vmatpush.bf16.msrb.mxu2 %v4759_v17 }
 0x32d   : > { %3200 = vmatpush.bf16.msrb.mxu0 %v5120_v32 }
 0x32f   : > { %2894 = vmatpush.bf16.msrb.mxu3 %v4747_v42 }
 0x330   : > { %2923 = vmatpush.bf16.msrb.mxu2 %v4751_v4 }
 0x331   : > { %3201 = vmatpush.bf16.msrb.mxu0 %v5119_v15 }
 0x333   : > { %2735 = vxpose.xlu1.c.b16.cont [2/4] (short) (narrow) %v2731_v25, 64  ;;  %2895 = vmatpush.bf16.msrb.mxu3 %v4739_v3 }
 0x334   : > { %2924 = vmatpush.bf16.msrb.mxu2 %v4743_v62 }
 0x335   : > { %3202 = vmatpush.bf16.msrb.mxu0 %v5118_v18 }
 0x337   : > { %2896 = vmatpush.bf16.msrb.mxu3 %v4731_v7 }
 0x338   : > { %2925 = vmatpush.bf16.msrb.mxu2 %v4735_v21 }
 0x339   : > { %3203 = vmatpush.bf16.msrb.mxu0 %v5117_v56 }
 0x33b   : > { %2897 = vmatpush.bf16.msrb.mxu3 %v4723_v9 }
 0x33c   : > { %2926 = vmatpush.bf16.msrb.mxu2 %v4727_v19 }
 0x33d   : > { %3204 = vmatpush.bf16.msrb.mxu0 %v5116_v37 }
 0x33f   : > { %2898 = vmatpush.bf16.msrb.mxu3 %v4715_v52 }
 0x340   : > { %2927 = vmatpush.bf16.msrb.mxu2 %v4719_v6 }
 0x343   : > { %2736 = vxpose.xlu1.c.b16.cont [3/4] (short) (narrow) %v2732_v36, 64 }
 0x353   : > { %2737 = vxpose.xlu1.c.b16.end [4/4] (short) (narrow) %v2733_v10, 64  ;;  %v2949_v10 = vld [vmem:[#allocation12 + $0x1] sm:$0x1] }
 0x354   : > { %5204 = vpush %v2949_v10 }
 0x385   : > { %s5205_s16 = spop %5204 }
 0x3cf   : > { %v2742_v1 = vpop.trf.xlu1 }
 0x3d0   : > { %4708 = vmatmul.msk.bf16.vlgmr.msra.gmra.mxu2 %vm614_vm10, %v2742_v1 }
 0x3df   : > { %v2743_v49 = vpop.trf.xlu1 }
 0x3e0   : > { %4709 = vmatmul.msk.bf16.gmra.mxu2 %vm614_vm10, %v2743_v49 }
 0x3ef   : > { %v2744_v35 = vpop.trf.xlu1 }
 0x3f0   : > { %4710 = vmatmul.msk.bf16.gmra.mxu2 %vm614_vm10, %v2744_v35 }
 0x3ff   : > { %v2745_v53 = vpop.trf.xlu1 }
 0x400   : > { %4711 = vmatmul.msk.bf16.gmra.mxu2 %vm614_vm10, %v2745_v53 }
 0x453   : > { %v2771_v25 = vpop.f32.mrf.mxu2 }
 0x45b   : > { %v2773_v36 = vpop.f32.mrf.mxu2 }
 0x45c   : > { %v2791_v28 = vpack.c.bf16 %v2773_v36, %v2771_v25 }
 0x45e   : > { %2899 = vmatmul.bf16.vlgmr.msrb.gmra.mxu3 %v2791_v28  ;;  %2928 = vmatmul.bf16.vlgmr.msrb.gmra.mxu2 %v2791_v28 }
 0x463   : > { %v2776_v61 = vpop.f32.mrf.mxu2 }
 0x46b   : > { %v2778_v24 = vpop.f32.mrf.mxu2 }
 0x46c   : > { %v2792_v38 = vpack.c.bf16 %v2778_v24, %v2776_v61  ;;  %v7820_v24 = vstv %s5205_s16  ;;  %s5738_s16 = scalar_lea.hbm %s8344_s13, 128 }
 0x46d   : > { %p5740_p4 = scmp.lt.s32.totalorder %s5738_s16, %s5734_s30 }
 0x46e   : > { %2904 = vmatmul.bf16.gmra.mxu3 %v2792_v38  ;;  %2933 = vmatmul.bf16.gmra.mxu2 %v2792_v38 }
 0x46f   : > { %p5741_p7 = por %p5740_p4, %p5739_p3 }
 0x471   : > { %p5742_p8 = pnand %p5741_p7, %p5737_p2 }
 0x473   : > { %v2781_v1 = vpop.f32.mrf.mxu2 }
 0x47b   : > { %v2783_v49 = vpop.f32.mrf.mxu2 }
 0x47c   : > { %v2793_v59 = vpack.c.bf16 %v2783_v49, %v2781_v1 }
 0x47e   : > { %2909 = vmatmul.bf16.gmra.mxu3 %v2793_v59  ;;  %2938 = vmatmul.bf16.gmra.mxu2 %v2793_v59  ;;  %v5115_v59 = vld [vmem:[#allocation15] sm:$0xff] }
 0x47f   : > { %3205 = vmatpush.bf16.msrb.mxu0 %v5115_v59 }
 0x483   : > { %v2786_v51 = vpop.f32.mrf.mxu2 }
 0x48b   : > { %v2788_v26 = vpop.f32.mrf.mxu2 }
 0x48c   : > { %v2794_v40 = vpack.c.bf16 %v2788_v26, %v2786_v51 }
 0x48e   : > { %2914 = vmatmul.bf16.gmra.mxu3 %v2794_v40  ;;  %2943 = vmatmul.bf16.gmra.mxu2 %v2794_v40 }
 0x4e1   : > { %v7798_v8 = vpop.f32.mrf.mxu2  ;;  %v7807_v17 = vpop.f32.mrf.mxu3 }
 0x4e2   : > { %v4776_v46 = vmul.f32 -1.442695, %v7798_v8 }
 0x4e4   : > { %5413 = vpow2.f32 %v4776_v46 }
 0x4e9   : > { %v7801_v60 = vpop.f32.mrf.mxu2  ;;  %v2902_v57 = vpop.f32.mrf.mxu3 }
 0x4ea   : > { %v5414_v47 = vpop.eup %5413  ;;  %v4777_v22 = vmul.f32 -1.442695, %v7801_v60 }
 0x4eb   : > { %v2974_v0 = vadd.f32 1.0, %v5414_v47 }
 0x4ec   : > { %5415 = vpow2.f32 %v4777_v22 }
 0x4ed   : > { %5417 = vrcp.f32 %v2974_v0  ;;  %v2993_v3 = vand.u32 2147483648, %v2974_v0  ;;  %vm2987_vm6 = vweird.f32 %v2974_v0  ;;  %v2991_v53 = vand.u32 2147483647, %v2974_v0 }
 0x4ef   : > { %v2994_v58 = vor.u32 1.1754944e-38, %v2993_v3  ;;  %vm2992_vm8 = vcmp.eq.f32.partialorder %v2991_v53, 8.507059e+37 }
 0x4f1   : > { %v7804_v14 = vpop.f32.mrf.mxu2  ;;  %v7823_v1 = vpop.f32.mrf.mxu3 }
 0x4f2   : > { %v5416_v39 = vpop.eup %5415  ;;  %v4778_v48 = vmul.f32 -1.442695, %v7804_v14 }
 0x4f3   : > { %v5418_v33 = vpop.eup %5417  ;;  %v2975_v30 = vadd.f32 1.0, %v5416_v39 }
 0x4f4   : > { %v2983_v34 = vmul.f32 %v5418_v33, %v2974_v0  ;;  %5419 = vpow2.f32 %v4778_v48  ;;  %vm2988_vm5 = vweird.f32 %v5418_v33 }
 0x4f5   : > { %5421 = vrcp.f32 %v2975_v30  ;;  %vm2989_vm7 = vmor %vm2987_vm6, %vm2988_vm5  ;;  %v3006_v27 = vand.u32 2147483647, %v2975_v30  ;;  %v3008_v12 = vand.u32 2147483648, %v2975_v30  ;;  %vm3002_vm11 = vweird.f32 %v2975_v30 }
 0x4f6   : > { %v2984_v11 = vsub.f32 1.0, %v2983_v34 }
 0x4f7   : > { %vm3007_vm13 = vcmp.eq.f32.partialorder %v3006_v27, 8.507059e+37  ;;  %v3009_v2 = vor.u32 1.1754944e-38, %v3008_v12 }
 0x4f8   : > { %v2985_v42 = vmul.f32 %v5418_v33, %v2984_v11 }
 0x4f9   : > { %v7809_v5 = vpop.f32.mrf.mxu2 }
 0x4fa   : > { %v5420_v4 = vpop.eup %5419  ;;  %v2986_v29 = vadd.f32 %v5418_v33, %v2985_v42  ;;  %v4779_v43 = vmul.f32 -1.442695, %v7809_v5 }
 0x4fb   : > { %v5422_v35 = vpop.eup %5421  ;;  %v7812_v62 = vadd.f32 1.0, %v5420_v4  ;;  %v2907_v4 = vpop.f32.mrf.mxu3 }
 0x4fc   : > { %v2998_v63 = vmul.f32 %v5422_v35, %v2975_v30  ;;  %5423 = vpow2.f32 %v4779_v43  ;;  %v2990_v13 = vsel %vm2989_vm7, %v5418_v33, %v2986_v29  ;;  %vm3003_vm9 = vweird.f32 %v5422_v35 }
 0x4fd   : > { %5425 = vrcp.f32 %v7812_v62  ;;  %v2995_v31 = vsel %vm2992_vm8, %v2994_v58, %v2990_v13  ;;  %vm3004_vm12 = vmor %vm3002_vm11, %vm3003_vm9  ;;  %vm3017_vm15 = vweird.f32 %v7812_v62  ;;  %v3023_v22 = vand.u32 2147483648, %v7812_v62 }
 0x4fe   : > { %v2999_v7 = vsub.f32 1.0, %v2998_v63  ;;  %v3102_v25 = vmul.f32 %v2995_v31, %v7798_v8  ;;  %v3021_v54 = vand.u32 2147483647, %v7812_v62 }
 0x4ff   : > { %v3024_v34 = vor.u32 1.1754944e-38, %v3023_v22 }
 0x500   : > { %v3000_v21 = vmul.f32 %v5422_v35, %v2999_v7  ;;  %v3114_v51 = vadd.f32 %v7820_v24, %v3102_v25  ;;  %vm3022_vm1 = vcmp.eq.f32.partialorder %v3021_v54, 8.507059e+37 }
 0x501   : > { %v7815_v9 = vpop.f32.mrf.mxu2 }
 0x502   : > { %v5424_v19 = vpop.eup %5423  ;;  %v3001_v55 = vadd.f32 %v5422_v35, %v3000_v21  ;;  %v4780_v44 = vmul.f32 -1.442695, %v7815_v9  ;;  %v3122_v39 = vmul.f32 %v3114_v51, %v7807_v17 }
 0x503   : > { %v5426_v52 = vpop.eup %5425  ;;  %v2977_v6 = vadd.f32 1.0, %v5424_v19 }
 0x504   : > { %v3005_v36 = vsel %vm3004_vm12, %v5422_v35, %v3001_v55  ;;  %v3013_v28 = vmul.f32 %v5426_v52, %v7812_v62  ;;  %5427 = vpow2.f32 %v4780_v44  ;;  %vm3018_vm14 = vweird.f32 %v5426_v52 }
 0x505   : > { %v3010_v61 = vsel %vm3007_vm13, %v3009_v2, %v3005_v36  ;;  %5429 = vrcp.f32 %v2977_v6  ;;  %vm3019_vm0 = vmor %vm3017_vm15, %vm3018_vm14  ;;  %v3036_v11 = vand.u32 2147483647, %v2977_v6  ;;  %v3038_v15 = vand.u32 2147483648, %v2977_v6 }
 0x506   : > { %v3103_v38 = vmul.f32 %v3010_v61, %v7801_v60  ;;  %v3014_v10 = vsub.f32 1.0, %v3013_v28  ;;  %vm3032_vm3 = vweird.f32 %v2977_v6 }
 0x507   : > { %vm3037_vm5 = vcmp.eq.f32.partialorder %v3036_v11, 8.507059e+37  ;;  %v3039_v62 = vor.u32 1.1754944e-38, %v3038_v15 }
 0x508   : > { %v3015_v49 = vmul.f32 %v5426_v52, %v3014_v10  ;;  %v3115_v26 = vadd.f32 %v7820_v24, %v3103_v38 }
 0x509   : > { %v7827_v40 = vpop.f32.mrf.mxu2 }
 0x50a   : > { %v5428_v8 = vpop.eup %5427  ;;  %v3016_v46 = vadd.f32 %v5426_v52, %v3015_v49  ;;  %v4781_v16 = vmul.f32 -1.442695, %v7827_v40  ;;  %v3123_v47 = vmul.f32 %v3115_v26, %v2902_v57 }
 0x50b   : > { %v5430_v60 = vpop.eup %5429  ;;  %v2978_v0 = vadd.f32 1.0, %v5428_v8 }
 0x50c   : > { %v3028_v32 = vmul.f32 %v5430_v60, %v2977_v6  ;;  %5431 = vpow2.f32 %v4781_v16  ;;  %v3020_v48 = vsel %vm3019_vm0, %v5426_v52, %v3016_v46  ;;  %v3130_v30 = vpack.c.bf16 %v3123_v47, %v3122_v39  ;;  %v2910_v6 = vpop.f32.mrf.mxu3 }
 0x50d   : > { %5433 = vrcp.f32 %v2978_v0  ;;  %vm3033_vm2 = vweird.f32 %v5430_v60  ;;  %v3025_v18 = vsel %vm3022_vm1, %v3024_v34, %v3020_v48  ;;  %vm3047_vm7 = vweird.f32 %v2978_v0 }
 0x50e   : > { %v3029_v33 = vsub.f32 1.0, %v3028_v32  ;;  %3206 = vmatmul.bf16.vlgmr.msrb.gmra.mxu0 %v3130_v30  ;;  %vm3034_vm4 = vmor %vm3032_vm3, %vm3033_vm2  ;;  %v3104_v63 = vmul.f32 %v3025_v18, %v7804_v14  ;;  %v3053_v31 = vand.u32 2147483648, %v2978_v0  ;;  %v3051_v44 = vand.u32 2147483647, %v2978_v0 }
 0x510   : > { %v3030_v42 = vmul.f32 %v5430_v60, %v3029_v33  ;;  %v3116_v21 = vadd.f32 %v7820_v24, %v3104_v63  ;;  %v3054_v61 = vor.u32 1.1754944e-38, %v3053_v31  ;;  %vm3052_vm9 = vcmp.eq.f32.partialorder %v3051_v44, 8.507059e+37 }
 0x511   : > { %v7834_v29 = vpop.f32.mrf.mxu2 }
 0x512   : > { %v5432_v43 = vpop.eup %5431  ;;  %v3031_v35 = vadd.f32 %v5430_v60, %v3030_v42  ;;  %v4782_v17 = vmul.f32 -1.442695, %v7834_v29  ;;  %v3124_v28 = vmul.f32 %v3116_v21, %v7823_v1 }
 0x513   : > { %v5434_v3 = vpop.eup %5433  ;;  %v2979_v53 = vadd.f32 1.0, %v5432_v43 }
 0x514   : > { %v3035_v57 = vsel %vm3034_vm4, %v5430_v60, %v3031_v35  ;;  %v3043_v13 = vmul.f32 %v5434_v3, %v2978_v0  ;;  %5435 = vpow2.f32 %v4782_v17  ;;  %vm3048_vm6 = vweird.f32 %v5434_v3  ;;  %v2912_v54 = vpop.f32.mrf.mxu3 }
 0x515   : > { %v3040_v7 = vsel %vm3037_vm5, %v3039_v62, %v3035_v57  ;;  %5437 = vrcp.f32 %v2979_v53  ;;  %vm3049_vm8 = vmor %vm3047_vm7, %vm3048_vm6  ;;  %v3068_v59 = vand.u32 2147483648, %v2979_v53  ;;  %v3066_v26 = vand.u32 2147483647, %v2979_v53 }
 0x516   : > { %v3105_v58 = vmul.f32 %v3040_v7, %v7809_v5  ;;  %v3044_v27 = vsub.f32 1.0, %v3043_v13  ;;  %vm3062_vm12 = vweird.f32 %v2979_v53 }
 0x517   : > { %v3069_v60 = vor.u32 1.1754944e-38, %v3068_v59  ;;  %vm3067_vm14 = vcmp.eq.f32.partialorder %v3066_v26, 8.507059e+37  ;;  %v3250_v59 = vpop.permute.xlu0 %3249 }
 0x518   : > { %v3045_v12 = vmul.f32 %v5434_v3, %v3044_v27  ;;  %v3117_v56 = vadd.f32 %v7820_v24, %v3105_v58 }
 0x519   : > { %v7841_v19 = vpop.f32.mrf.mxu2 }
 0x51a   : > { %v5436_v55 = vpop.eup %5435  ;;  %v3046_v14 = vadd.f32 %v5434_v3, %v3045_v12  ;;  %v4783_v37 = vmul.f32 -1.442695, %v7841_v19  ;;  %v3125_v52 = vmul.f32 %v3117_v56, %v2907_v4 }
 0x51b   : > { %v5438_v2 = vpop.eup %5437  ;;  %v2980_v5 = vadd.f32 1.0, %v5436_v55 }
 0x51c   : > { %v3050_v25 = vsel %vm3049_vm8, %v5434_v3, %v3046_v14  ;;  %v3058_v36 = vmul.f32 %v5438_v2, %v2979_v53  ;;  %5439 = vpow2.f32 %v4783_v37  ;;  %v3131_v10 = vpack.c.bf16 %v3125_v52, %v3124_v28 }
 0x51d   : > { %5441 = vrcp.f32 %v2980_v5  ;;  %v3055_v49 = vsel %vm3052_vm9, %v3054_v61, %v3050_v25  ;;  %vm3063_vm11 = vweird.f32 %v5438_v2  ;;  %vm3077_vm0 = vweird.f32 %v2980_v5 }
 0x51e   : > { %v3059_v38 = vsub.f32 1.0, %v3058_v36  ;;  %3211 = vmatmul.bf16.gmra.mxu0 %v3131_v10  ;;  %v3106_v46 = vmul.f32 %v3055_v49, %v7815_v9  ;;  %vm3064_vm13 = vmor %vm3062_vm12, %vm3063_vm11  ;;  %v3083_v34 = vand.u32 2147483648, %v2980_v5  ;;  %v3081_v15 = vand.u32 2147483647, %v2980_v5  ;;  %v3248_v49 = vpop.permute.xlu2 %3247 }
 0x51f   : > { %v3254_v26 = vpop.permute.xlu0 %3253 }
 0x520   : > { %v3060_v51 = vmul.f32 %v5438_v2, %v3059_v38  ;;  %v3118_v39 = vadd.f32 %v7820_v24, %v3106_v46  ;;  %v3084_v3 = vor.u32 1.1754944e-38, %v3083_v34  ;;  %vm3082_vm2 = vcmp.eq.f32.partialorder %v3081_v15, 8.507059e+37  ;;  %v4934_v46 = vld [vmem:[#allocation16 + $0xe0] sm:$0xf]  ;;  %v5149_v15 = vld [vmem:[#allocation16 + $0xcc] sm:$0xf0] }
 0x521   : > { %v4918_v34 = vld [vmem:[#allocation16 + $0xc0] sm:$0xf] }
 0x522   : > { %v5440_v8 = vpop.eup %5439  ;;  %v3061_v16 = vadd.f32 %v5438_v2, %v3060_v51  ;;  %v3126_v42 = vmul.f32 %v3118_v39, %v2910_v6 }
 0x523   : > { %v5442_v47 = vpop.eup %5441  ;;  %v2981_v1 = vadd.f32 1.0, %v5440_v8  ;;  %v7870_v8 = vld [vmem:[#allocation10 + $0x5] ss:$0 sm:$0xff] }
 0x524   : > { %v3065_v22 = vsel %vm3064_vm13, %v5438_v2, %v3061_v16  ;;  %v3073_v0 = vmul.f32 %v5442_v47, %v2980_v5  ;;  %vm3078_vm15 = vweird.f32 %v5442_v47  ;;  %v5153_v16 = vld [vmem:[#allocation16 + $0xec] sm:$0xf0] }
 0x525   : > { %v3070_v32 = vsel %vm3067_vm14, %v3069_v60, %v3065_v22  ;;  %5443 = vrcp.f32 %v2981_v1  ;;  %vm3079_vm1 = vmor %vm3077_vm0, %vm3078_vm15  ;;  %v3098_v63 = vand.u32 2147483648, %v2981_v1  ;;  %v3096_v13 = vand.u32 2147483647, %v2981_v1  ;;  %v4936_v22 = vld [vmem:[#allocation16 + $0xf0] sm:$0xf0] }
 0x526   : > { %v3107_v48 = vmul.f32 %v3070_v32, %v7827_v40  ;;  %v3074_v33 = vsub.f32 1.0, %v3073_v0  ;;  %v2915_v40 = vpop.f32.mrf.mxu3  ;;  %vm3092_vm4 = vweird.f32 %v2981_v1  ;;  %v3252_v51 = vpop.permute.xlu2 %3251  ;;  %v4942_v0 = vld [vmem:[#allocation16 + $0xe8] sm:$0xf] }
 0x527   : > { %v3099_v27 = vor.u32 1.1754944e-38, %v3098_v63  ;;  %vm3097_vm6 = vcmp.eq.f32.partialorder %v3096_v13, 8.507059e+37  ;;  %v8755_v32 = vld [vmem:[#allocation49_spill] sm:$0xff]  ;;  %v4902_v13 = vld [vmem:[#allocation16 + $0xa0] sm:$0xf] }
 0x528   : > { %v3119_v30 = vadd.f32 %v7820_v24, %v3107_v48  ;;  %v3075_v9 = vmul.f32 %v5442_v47, %v3074_v33 }
 0x52a   : > { %v3076_v11 = vadd.f32 %v5442_v47, %v3075_v9  ;;  %v3127_v18 = vmul.f32 %v3119_v30, %v2912_v54  ;;  %v5154_v54 = vld [vmem:[#allocation16 + $0xf4] sm:$0xf0]  ;;  %v5152_v30 = vld [vmem:[#allocation16 + $0xec] sm:$0xf]  ;;  %v4944_v9 = vld [vmem:[#allocation16 + $0xf8] sm:$0xf0] }
 0x52b   : > { %v5444_v4 = vpop.eup %5443  ;;  %v4943_v33 = vor.u32 %v5154_v54, %v4942_v0  ;;  %v4878_v0 = vld [vmem:[#allocation16 + $0x68] sm:$0xf]  ;;  %v8757_v54 = vld [vmem:[#allocation50_spill] sm:$0xff] }
 0x52c   : > { %v3080_v43 = vsel %vm3079_vm1, %v5442_v47, %v3076_v11  ;;  %v3088_v35 = vmul.f32 %v5444_v4, %v2981_v1  ;;  %v3132_v17 = vpack.c.bf16 %v3127_v18, %v3126_v42  ;;  %vm3093_vm3 = vweird.f32 %v5444_v4  ;;  %v5151_v47 = vld [vmem:[#allocation16 + $0xe4] sm:$0xf]  ;;  %v4920_v18 = vld [vmem:[#allocation16 + $0xd0] sm:$0xf0] }
 0x52d   : > { %v3085_v53 = vsel %vm3082_vm2, %v3084_v3, %v3080_v43  ;;  %vm3094_vm5 = vmor %vm3092_vm4, %vm3093_vm3  ;;  %v4935_v1 = vor.u32 %v5153_v16, %v4934_v46  ;;  %v4939_v48 = vor.u32 %v5151_v47, %v4936_v22  ;;  %v4947_v11 = vor.u32 %v5152_v30, %v4944_v9  ;;  %v5147_v42 = vld [vmem:[#allocation16 + $0xc4] sm:$0xf]  ;;  %3890 = vmatpush.bf16.msra.mxu0 %v4943_v33  ;;  %v5150_v3 = vld [vmem:[#allocation16 + $0xd4] sm:$0xf0] }
 0x52e   : > { %v3089_v62 = vsub.f32 1.0, %v3088_v35  ;;  %3216 = vmatmul.bf16.gmra.mxu0 %v3132_v17  ;;  %v3108_v7 = vmul.f32 %v3085_v53, %v7834_v29  ;;  %v2917_v14 = vpop.f32.mrf.mxu3  ;;  %v4919_v43 = vor.u32 %v5149_v15, %v4918_v34  ;;  %v4923_v35 = vor.u32 %v5147_v42, %v4920_v18  ;;  %v4926_v17 = vld [vmem:[#allocation16 + $0xc8] sm:$0xf]  ;;  %v4928_v53 = vld [vmem:[#allocation16 + $0xd8] sm:$0xf0] }
 0x52f   : > { %3832 = vmatpush.bf16.msra.mxu3 %v4935_v1  ;;  %3861 = vmatpush.bf16.msra.mxu2 %v4939_v48  ;;  %v4870_v46 = vld [vmem:[#allocation16 + $0x60] sm:$0xf]  ;;  %v5137_v16 = vld [vmem:[#allocation16 + $0x6c] sm:$0xf0]  ;;  %v5135_v1 = vld [vmem:[#allocation16 + $0x64] sm:$0xf] }
 0x530   : > { %v3090_v57 = vmul.f32 %v5444_v4, %v3089_v62  ;;  %v3120_v56 = vadd.f32 %v7820_v24, %v3108_v7  ;;  %v5148_v62 = vld [vmem:[#allocation16 + $0xcc] sm:$0xf]  ;;  %v5145_v7 = vld [vmem:[#allocation16 + $0xac] sm:$0xf0]  ;;  %v4872_v22 = vld [vmem:[#allocation16 + $0x70] sm:$0xf0] }
 0x531   : > { %v5138_v48 = vld [vmem:[#allocation16 + $0x74] sm:$0xf0]  ;;  %v5136_v33 = vld [vmem:[#allocation16 + $0x6c] sm:$0xf]  ;;  %v4880_v30 = vld [vmem:[#allocation16 + $0x78] sm:$0xf0] }
 0x532   : > { %v3091_v58 = vadd.f32 %v5444_v4, %v3090_v57  ;;  %v3128_v44 = vmul.f32 %v3120_v56, %v2915_v40  ;;  %v4927_v40 = vor.u32 %v5150_v3, %v4926_v17  ;;  %v4931_v57 = vor.u32 %v5148_v62, %v4928_v53  ;;  %v4910_v56 = vld [vmem:[#allocation16 + $0xa8] sm:$0xf]  ;;  %v5133_v15 = vld [vmem:[#allocation16 + $0x4c] sm:$0xf0]  ;;  %v5131_v42 = vld [vmem:[#allocation16 + $0x44] sm:$0xf] }
 0x533   : > { %3833 = vmatpush.bf16.msra.mxu3 %v4919_v43  ;;  %3862 = vmatpush.bf16.msra.mxu2 %v4923_v35  ;;  %v4879_v9 = vor.u32 %v5138_v48, %v4878_v0  ;;  %v4883_v34 = vor.u32 %v5136_v33, %v4880_v30  ;;  %v4856_v43 = vld [vmem:[#allocation16 + $0x50] sm:$0xf0]  ;;  %v4862_v35 = vld [vmem:[#allocation16 + $0x48] sm:$0xf]  ;;  %v5134_v17 = vld [vmem:[#allocation16 + $0x54] sm:$0xf0] }
 0x534   : > { %v3095_v12 = vsel %vm3094_vm5, %v5444_v4, %v3091_v58  ;;  %3891 = vmatpush.bf16.msra.mxu0 %v4927_v40  ;;  %v4859_v3 = vor.u32 %v5131_v42, %v4856_v43  ;;  %v4863_v62 = vor.u32 %v5134_v17, %v4862_v35  ;;  %v5132_v40 = vld [vmem:[#allocation16 + $0x4c] sm:$0xf]  ;;  %v4864_v53 = vld [vmem:[#allocation16 + $0x58] sm:$0xf0]  ;;  %v8761_v43 = vld [vmem:[#allocation52_spill] sm:$0xff] }
 0x535   : > { %v3100_v21 = vsel %vm3097_vm6, %v3099_v27, %v3095_v12  ;;  %v4903_v27 = vor.u32 %v5145_v7, %v4902_v13  ;;  %v5143_v12 = vld [vmem:[#allocation16 + $0xa4] sm:$0xf]  ;;  %v4867_v13 = vor.u32 %v5132_v40, %v4864_v53  ;;  %v4838_v7 = vld [vmem:[#allocation16 + $0x20] sm:$0xf]  ;;  %v7904_v30 = vld [vmem:[#allocation7 + $0x1] ss:$0 sm:$0xff] }
 0x536   : > { %v3109_v31 = vmul.f32 %v3100_v21, %v7841_v19  ;;  %v4904_v21 = vld [vmem:[#allocation16 + $0xb0] sm:$0xf0]  ;;  %v8762_v17 = vld [vmem:[#allocation33_spill] sm:$0xff]  ;;  %v7916_v40 = vld [vmem:[#allocation7 + $0x3] ss:$0 sm:$0xff] }
 0x537   : > { %3834 = vmatpush.bf16.msra.mxu3 %v4903_v27 }
 0x538   : > { %v3121_v55 = vadd.f32 %v7820_v24, %v3109_v31  ;;  %v8756_v31 = vld [vmem:[#allocation43_spill] sm:$0xff] }
 0x53a   : > { %v3129_v37 = vmul.f32 %v3121_v55, %v2917_v14  ;;  %v4907_v14 = vor.u32 %v5143_v12, %v4904_v21 }
 0x53c   : > { %v3133_v52 = vpack.c.bf16 %v3129_v37, %v3128_v44  ;;  %v5146_v44 = vld [vmem:[#allocation16 + $0xb4] sm:$0xf0]  ;;  %v5144_v37 = vld [vmem:[#allocation16 + $0xac] sm:$0xf]  ;;  %3863 = vmatpush.bf16.msra.mxu2 %v4907_v14 }
 0x53d   : > { %v8758_v14 = vld [vmem:[#allocation37_spill] sm:$0xff] }
 0x53e   : > { %3221 = vmatmul.bf16.gmra.mxu0 %v3133_v52  ;;  %v4912_v52 = vld [vmem:[#allocation16 + $0xb8] sm:$0xf0] }
 0x58b   : > { %v3207_v29 = vpop.f32.mrf.mxu0 }
 0x58c   : > { %3227 = vst [vmem:[%s7856_s27] sm:$0xff] %v3207_v29 }
 0x593   : > { %v3209_v24 = vpop.f32.mrf.mxu0 }
 0x594   : > { %3228 = vst [vmem:[%s7856_s27 + $0x8] sm:$0xff] %v3209_v24  ;;  %v3239_v10 = vpack.c.bf16 %v3209_v24, %v3207_v29  ;;  %v4911_v29 = vor.u32 %v5146_v44, %v4910_v56  ;;  %v4915_v24 = vor.u32 %v5144_v37, %v4912_v52  ;;  %v5127_v56 = vld [vmem:[#allocation16 + $0x24] sm:$0xf]  ;;  %v5130_v52 = vld [vmem:[#allocation16 + $0x34] sm:$0xf0] }
 0x596   : > { %3892 = vmatpush.bf16.msra.mxu0 %v4911_v29  ;;  %v5128_v29 = vld [vmem:[#allocation16 + $0x2c] sm:$0xf] }
 0x59b   : > { %v3212_v19 = vpop.f32.mrf.mxu0 }
 0x59c   : > { %3229 = vst [vmem:[%s7856_s27 + $0x10] sm:$0xff] %v3212_v19 }
 0x5a3   : > { %v3214_v2 = vpop.f32.mrf.mxu0 }
 0x5a4   : > { %3230 = vst [vmem:[%s7856_s27 + $0x18] sm:$0xff] %v3214_v2  ;;  %v3240_v38 = vpack.c.bf16 %v3214_v2, %v3212_v19  ;;  %v4886_v19 = vld [vmem:[#allocation16 + $0x80] sm:$0xf]  ;;  %v5141_v2 = vld [vmem:[#allocation16 + $0x8c] sm:$0xf0] }
 0x5ab   : > { %v3217_v6 = vpop.f32.mrf.mxu0 }
 0x5ac   : > { %3231 = vst [vmem:[%s7856_s27 + $0x20] sm:$0xff] %v3217_v6 }
 0x5b3   : > { %v3219_v5 = vpop.f32.mrf.mxu0 }
 0x5b4   : > { %3232 = vst [vmem:[%s7856_s27 + $0x28] sm:$0xff] %v3219_v5  ;;  %v3241_v61 = vpack.c.bf16 %v3219_v5, %v3217_v6  ;;  %v5139_v6 = vld [vmem:[#allocation16 + $0x84] sm:$0xf] }
 0x5bb   : > { %v3222_v25 = vpop.f32.mrf.mxu0 }
 0x5bc   : > { %3233 = vst [vmem:[%s7856_s27 + $0x30] sm:$0xff] %v3222_v25 }
 0x5c3   : > { %v3224_v36 = vpop.f32.mrf.mxu0 }
 0x5c4   : > { %3234 = vst [vmem:[%s7856_s27 + $0x38] sm:$0xff] %v3224_v36  ;;  %v3242_v28 = vpack.c.bf16 %v3224_v36, %v3222_v25  ;;  %v4887_v25 = vor.u32 %v5141_v2, %v4886_v19  ;;  %v4888_v36 = vld [vmem:[#allocation16 + $0x90] sm:$0xf0] }
 0x5c6   : > { %3271 = vmatpush.bf16.msrb.mxu1 %v3242_v28  ;;  %v4894_v28 = vld [vmem:[#allocation16 + $0x88] sm:$0xf]  ;;  %3835 = vmatpush.bf16.msra.mxu3 %v4887_v25  ;;  %v5123_v25 = vld [vmem:[#allocation16 + $0x4] sm:$0xf] }
 0x5ca   : > { %3272 = vmatpush.bf16.msrb.mxu1 %v3241_v61  ;;  %v5142_v61 = vld [vmem:[#allocation16 + $0x94] sm:$0xf0] }
 0x5ce   : > { %3273 = vmatpush.bf16.msrb.mxu1 %v3240_v38  ;;  %v4891_v38 = vor.u32 %v5139_v6, %v4888_v36  ;;  %v4822_v6 = vld [vmem:[#allocation16] sm:$0xf] }
 0x5d0   : > { %3864 = vmatpush.bf16.msra.mxu2 %v4891_v38  ;;  %v4830_v38 = vld [vmem:[#allocation16 + $0x8] sm:$0xf] }
 0x5d2   : > { %3274 = vmatpush.bf16.msrb.mxu1 %v3239_v10  ;;  %v4895_v10 = vor.u32 %v5142_v61, %v4894_v28  ;;  %v4824_v61 = vld [vmem:[#allocation16 + $0x10] sm:$0xf0] }
 0x5d4   : > { %3893 = vmatpush.bf16.msra.mxu0 %v4895_v10  ;;  %v5126_v10 = vld [vmem:[#allocation16 + $0x14] sm:$0xf0] }
 0x5d5   : > { %4816 = vmatmul.msk.bf16.vlgmr.msrb.gmra.mxu1 %vm614_vm10, %v3248_v49  ;;  %v5140_v49 = vld [vmem:[#allocation16 + $0x8c] sm:$0xf] }
 0x5d6   : > { %3919 = vmatpush.bf16.msra.mxu1 %v4947_v11  ;;  %v4854_v11 = vld [vmem:[#allocation16 + $0x40] sm:$0xf] }
 0x5d8   : > { %3894 = vmatpush.bf16.msra.mxu0 %v4879_v9 }
 0x5da   : > { %3920 = vmatpush.bf16.msra.mxu1 %v4931_v57 }
 0x5dc   : > { %3895 = vmatpush.bf16.msra.mxu0 %v4863_v62 }
 0x5de   : > { %3921 = vmatpush.bf16.msra.mxu1 %v4915_v24  ;;  %v4848_v24 = vld [vmem:[#allocation16 + $0x38] sm:$0xf0] }
 0x5df   : > { %v4851_v2 = vor.u32 %v5128_v29, %v4848_v24 }
 0x5e5   : > { %4817 = vmatmul.msk.bf16.gmra.mxu1 %vm614_vm10, %v3250_v59  ;;  %v4896_v59 = vld [vmem:[#allocation16 + $0x98] sm:$0xf0] }
 0x5f5   : > { %4818 = vmatmul.msk.bf16.gmra.mxu1 %vm614_vm10, %v3252_v51 }
 0x605   : > { %4819 = vmatmul.msk.bf16.gmra.mxu1 %vm614_vm10, %v3254_v26  ;;  %v4899_v26 = vor.u32 %v5140_v49, %v4896_v59  ;;  %v7892_v49 = vld [vmem:[#allocation2] sm:$0xff]  ;;  %v8759_v59 = vld [vmem:[#allocation34_spill] sm:$0xff] }
 0x607   : > { %3922 = vmatpush.bf16.msra.mxu1 %v4899_v26  ;;  %v3337_v26 = vmul.f32 %v7892_v49, %v8759_v59 }
 0x60b   : > { %3923 = vmatpush.bf16.msra.mxu1 %v4883_v34 }
 0x60f   : > { %3924 = vmatpush.bf16.msra.mxu1 %v4867_v13 }
 0x613   : > { %3925 = vmatpush.bf16.msra.mxu1 %v4851_v2 }
 0x652   : > { %v3276_v60 = vpop.f32.mrf.mxu1 }
 0x653   : > { %v3296_v39 = vsub.f32 %v3276_v60, %v8755_v32  ;;  %v4871_v60 = vor.u32 %v5137_v16, %v4870_v46  ;;  %v4827_v46 = vor.u32 %v5123_v25, %v4824_v61  ;;  %v4831_v16 = vor.u32 %v5126_v10, %v4830_v38 }
 0x655   : > { %v3305_v4 = vmul.f32 %v7870_v8, %v3296_v39  ;;  %v4875_v39 = vor.u32 %v5135_v1, %v4872_v22  ;;  %3836 = vmatpush.bf16.msra.mxu3 %v4871_v60  ;;  %v4832_v60 = vld [vmem:[#allocation16 + $0x18] sm:$0xf0]  ;;  %v8760_v1 = vld [vmem:[#allocation46_spill] sm:$0xff] }
 0x657   : > { %v7875_v63 = vadd.f32 %v3305_v4, %v8755_v32  ;;  %3865 = vmatpush.bf16.msra.mxu2 %v4875_v39  ;;  %v4855_v4 = vor.u32 %v5133_v15, %v4854_v11  ;;  %v3363_v39 = vld [vmem:[#allocation2 + $0x1] sm:$0xff] }
 0x658   : > { %v3371_v33 = vmul.f32 0.0, %v3363_v39 }
 0x659   : > { %3321 = vst [vmem:[#allocation2 + $0x9] sm:$0xff] %v7875_v63  ;;  %3837 = vmatpush.bf16.msra.mxu3 %v4855_v4  ;;  %v7910_v4 = vld [vmem:[#allocation7 + $0x2] ss:$0 sm:$0xff]  ;;  %v3382_v53 = vmul.f32 %v7904_v30, %v7875_v63 }
 0x65a   : > { %v3278_v58 = vpop.f32.mrf.mxu1 }
 0x65b   : > { %v3297_v55 = vsub.f32 %v3278_v58, %v8756_v31  ;;  %3866 = vmatpush.bf16.msra.mxu2 %v4859_v3  ;;  %v5129_v58 = vld [vmem:[#allocation16 + $0x2c] sm:$0xf0] }
 0x65c   : > { %v4839_v21 = vor.u32 %v5129_v58, %v4838_v7  ;;  %v8763_v7 = vld [vmem:[#allocation38_spill] sm:$0xff] }
 0x65d   : > { %v3306_v5 = vmul.f32 %v7870_v8, %v3297_v55  ;;  %v4846_v55 = vld [vmem:[#allocation16 + $0x28] sm:$0xf] }
 0x65e   : > { %3838 = vmatpush.bf16.msra.mxu3 %v4839_v21  ;;  %v4847_v19 = vor.u32 %v5130_v52, %v4846_v55 }
 0x65f   : > { %v7881_v51 = vadd.f32 %v3306_v5, %v8756_v31  ;;  %v4840_v31 = vld [vmem:[#allocation16 + $0x30] sm:$0xf0]  ;;  %v5125_v5 = vld [vmem:[#allocation16 + $0xc] sm:$0xf0] }
 0x660   : > { %v3330_v27 = vld [vmem:[#allocation2 + $0x8] sm:$0xff]  ;;  %v4843_v37 = vor.u32 %v5127_v56, %v4840_v31  ;;  %v4823_v28 = vor.u32 %v5125_v5, %v4822_v6  ;;  %3896 = vmatpush.bf16.msra.mxu0 %v4847_v19  ;;  %v7923_v31 = vld [vmem:[#allocation7 + $0x4] ss:$0 sm:$0xff] }
 0x661   : > { %3322 = vst [vmem:[#allocation2 + $0x11] sm:$0xff] %v7881_v51  ;;  %v3338_v22 = vmul.f32 %v8760_v1, %v3330_v27  ;;  %v3397_v34 = vld [vmem:[#allocation2 + $0x2] sm:$0xff]  ;;  %v3432_v3 = vmul.f32 %v8762_v17, %v3330_v27  ;;  %v8765_v5 = vld [vmem:[#allocation36_spill] sm:$0xff] }
 0x662   : > { %v3281_v47 = vpop.f32.mrf.mxu1  ;;  %3867 = vmatpush.bf16.msra.mxu2 %v4843_v37  ;;  %3839 = vmatpush.bf16.msra.mxu3 %v4823_v28  ;;  %v3405_v58 = vmul.f32 %v3397_v34, %v8763_v7  ;;  %v7929_v37 = vld [vmem:[#allocation7 + $0x5] ss:$0 sm:$0xff]  ;;  %v3462_v28 = vmul.f32 %v7923_v31, %v7881_v51 }
 0x663   : > { %v3298_v32 = vsub.f32 %v3281_v47, %v8757_v54  ;;  %v5124_v47 = vld [vmem:[#allocation16 + $0xc] sm:$0xf]  ;;  %v3442_v24 = vmul.f32 %v7916_v40, %v3432_v3 }
 0x664   : > { %3897 = vmatpush.bf16.msra.mxu0 %v4831_v16  ;;  %v3415_v27 = vmul.f32 %v7910_v4, %v3405_v58 }
 0x665   : > { %v3307_v18 = vmul.f32 %v7870_v8, %v3298_v32  ;;  %v7900_v32 = vld [vmem:[#allocation7] ss:$0 sm:$0xff] }
 0x666   : > { %3868 = vmatpush.bf16.msra.mxu2 %v4827_v46  ;;  %v3347_v9 = vmul.f32 %v7900_v32, %v3337_v26  ;;  %v3348_v42 = vmul.f32 %v7900_v32, %v3338_v22  ;;  %v8766_v22 = vld [vmem:[#allocation41_spill] sm:$0xff] }
 0x667   : > { %v7887_v57 = vadd.f32 %v3307_v18, %v8757_v54  ;;  %v4835_v54 = vor.u32 %v5124_v47, %v4832_v60  ;;  %v3381_v18 = vmul.f32 %v7904_v30, %v3371_v33  ;;  %v7953_v60 = vld [vmem:[#allocation7 + $0x6] ss:$0 sm:$0xff]  ;;  %v7957_v33 = vld [vmem:[#allocation7 + $0x7] ss:$0 sm:$0xff] }
 0x668   : > { %v7902_v48 = vld [vmem:[#allocation2 + $0x10] sm:$0xff]  ;;  %v3390_v55 = vadd.f32 %v3382_v53, %v3348_v42  ;;  %v7963_v42 = vld [vmem:[#allocation7 + $0x8] ss:$0 sm:$0xff] }
 0x669   : > { %3323 = vst [vmem:[#allocation2 + $0x19] sm:$0xff] %v7887_v57  ;;  %v3398_v11 = vld [vmem:[#allocation2 + $0xa] sm:$0xff]  ;;  %3926 = vmatpush.bf16.msra.mxu1 %v4835_v54  ;;  %v3433_v62 = vmul.f32 %v8760_v1, %v7902_v48  ;;  %v3389_v13 = vadd.f32 %v3381_v18, %v3347_v9  ;;  %v3505_v38 = vmul.f32 %v8762_v17, %v7902_v48 }
 0x66a   : > { %v3283_v12 = vpop.f32.mrf.mxu1  ;;  %v3478_v25 = vmul.f32 %v8765_v5, %v3398_v11  ;;  %v3543_v53 = vmul.f32 %v7957_v33, %v7887_v57 }
 0x66b   : > { %v3299_v44 = vsub.f32 %v3283_v12, %v8758_v14  ;;  %v8764_v12 = vld [vmem:[#allocation47_spill] sm:$0xff]  ;;  %v3423_v19 = vadd.f32 %v3415_v27, %v3389_v13  ;;  %v3443_v6 = vmul.f32 %v7916_v40, %v3433_v62  ;;  %v3542_v62 = vmul.f32 %v7957_v33, %v7881_v51  ;;  %v7978_v27 = vld [vmem:[#allocation10 + $0x3] ss:$0 sm:$0xff] }
 0x66c   : > { %v3406_v21 = vmul.f32 %v8764_v12, %v3398_v11  ;;  %v3488_v16 = vmul.f32 %v7929_v37, %v3478_v25 }
 0x66d   : > { %v3308_v36 = vmul.f32 %v7870_v8, %v3299_v44  ;;  %v3450_v26 = vadd.f32 %v3442_v24, %v3423_v19 }
 0x66e   : > { %v3416_v44 = vmul.f32 %v7910_v4, %v3406_v21 }
 0x66f   : > { %v7898_v0 = vadd.f32 %v3308_v36, %v8758_v14  ;;  %v3461_v36 = vmul.f32 %v7923_v31, %v7875_v63 }
 0x670   : > { %v7925_v14 = vld [vmem:[#allocation2 + $0x12] sm:$0xff]  ;;  %v3424_v2 = vadd.f32 %v3416_v44, %v3390_v55 }
 0x671   : > { %3324 = vst [vmem:[#allocation2 + $0x21] sm:$0xff] %v7898_v0  ;;  %v7934_v29 = vld [vmem:[#allocation2 + $0x18] sm:$0xff]  ;;  %v3479_v61 = vmul.f32 %v8764_v12, %v7925_v14  ;;  %v3469_v9 = vadd.f32 %v3461_v36, %v3450_v26  ;;  %v3566_v11 = vmul.f32 %v8765_v5, %v7925_v14  ;;  %v7984_v36 = vld [vmem:[#allocation10 + $0x6] ss:$0 sm:$0xff] }
 0x672   : > { %v3286_v15 = vpop.f32.mrf.mxu1  ;;  %v3451_v46 = vadd.f32 %v3443_v6, %v3424_v2  ;;  %v3506_v47 = vmul.f32 %v8760_v1, %v7934_v29  ;;  %v8767_v44 = vld [vmem:[#allocation39_spill] sm:$0xff] }
 0x673   : > { %v3300_v35 = vsub.f32 %v3286_v15, %v8761_v43  ;;  %v3489_v39 = vmul.f32 %v7929_v37, %v3479_v61  ;;  %v3496_v18 = vadd.f32 %v3488_v16, %v3469_v9  ;;  %v3576_v58 = vmul.f32 %v7963_v42, %v3566_v11  ;;  %v8768_v61 = vld [vmem:[#allocation44_spill] sm:$0xff] }
 0x674   : > { %v3470_v34 = vadd.f32 %v3462_v28, %v3451_v46  ;;  %v3516_v17 = vmul.f32 %v7953_v60, %v3506_v47 }
 0x675   : > { %v3309_v56 = vmul.f32 %v7870_v8, %v3300_v35  ;;  %v3515_v35 = vmul.f32 %v7953_v60, %v3505_v38  ;;  %v3339_v38 = vmul.f32 %v8768_v61, %v7902_v48 }
 0x677   : > { %v7932_v52 = vadd.f32 %v3309_v56, %v8761_v43  ;;  %v3497_v43 = vadd.f32 %v3489_v39, %v3470_v34  ;;  %v3523_v13 = vadd.f32 %v3515_v35, %v3496_v18  ;;  %v8770_v39 = vld [vmem:[#allocation58_spill] sm:$0xff]  ;;  %v3349_v34 = vmul.f32 %v7900_v32, %v3339_v38 }
 0x678   : > { %v7948_v10 = vld [vmem:[#allocation2 + $0x1a] sm:$0xff]  ;;  %v3383_v18 = vmul.f32 %v7904_v30, %v7881_v51 }
 0x679   : > { %3325 = vst [vmem:[#allocation2 + $0x29] sm:$0xff] %v7932_v52  ;;  %v3567_v15 = vmul.f32 %v8764_v12, %v7948_v10  ;;  %v3524_v7 = vadd.f32 %v3516_v17, %v3497_v43  ;;  %v3550_v56 = vadd.f32 %v3542_v62, %v3523_v13  ;;  %v3384_v43 = vmul.f32 %v7904_v30, %v7887_v57  ;;  %v8773_v62 = vld [vmem:[#allocation45_spill] sm:$0xff] }
 0x67a   : > { %v3288_v59 = vpop.f32.mrf.mxu1  ;;  %v3539_v17 = vmul.f32 0.0, %v7892_v49  ;;  %v3391_v13 = vadd.f32 %v3383_v18, %v3349_v34  ;;  %v8776_v34 = vld [vmem:[#allocation42_spill] sm:$0xff] }
 0x67b   : > { %v3301_v54 = vsub.f32 %v3288_v59, %v8766_v22  ;;  %v3577_v12 = vmul.f32 %v7963_v42, %v3567_v15  ;;  %v3551_v55 = vadd.f32 %v3543_v53, %v3524_v7  ;;  %v3584_v19 = vadd.f32 %v3576_v58, %v3550_v56  ;;  %v8769_v59 = vld [vmem:[#allocation51_spill] sm:$0xff] }
 0x67c   : > { %v3340_v26 = vmul.f32 %v8769_v59, %v7934_v29  ;;  %v3434_v58 = vmul.f32 %v8768_v61, %v7934_v29  ;;  %v8030_v56 = vmul.f32 %v7957_v33, %v3539_v17  ;;  %v8775_v29 = vld [vmem:[#allocation53_spill] sm:$0xff]  ;;  %v3480_v17 = vmul.f32 %v8773_v62, %v7948_v10 }
 0x67d   : > { %v3310_v1 = vmul.f32 %v7870_v8, %v3301_v54  ;;  %v3585_v2 = vadd.f32 %v3577_v12, %v3551_v55  ;;  %v3593_v5 = vadd.f32 %v7978_v27, %v3584_v19  ;;  %v3463_v12 = vmul.f32 %v7923_v31, %v7887_v57  ;;  %v8774_v55 = vld [vmem:[#allocation40_spill] sm:$0xff] }
 0x67e   : > { %v3350_v48 = vmul.f32 %v7900_v32, %v3340_v26  ;;  %v3408_v19 = vmul.f32 %v8775_v29, %v7948_v10 }
 0x67f   : > { %v7969_v3 = vadd.f32 %v3310_v1, %v8766_v22  ;;  %v3594_v25 = vadd.f32 %v7978_v27, %v3585_v2  ;;  %v3601_v46 = vsub.f32 %v3593_v5, %v7875_v63 }
 0x680   : > { %v3392_v7 = vadd.f32 %v3384_v43, %v3350_v48  ;;  %v3401_v5 = vld [vmem:[#allocation2 + $0x22] sm:$0xff] }
 0x681   : > { %3326 = vst [vmem:[#allocation2 + $0x31] sm:$0xff] %v7969_v3  ;;  %v3602_v16 = vsub.f32 %v3594_v25, %v7881_v51  ;;  %v3610_v47 = vmul.f32 %v7984_v36, %v3601_v46  ;;  %v3385_v46 = vmul.f32 %v7904_v30, %v7898_v0  ;;  %v3409_v48 = vmul.f32 %v8776_v34, %v3401_v5 }
 0x682   : > { %v3291_v21 = vpop.f32.mrf.mxu1 }
 0x683   : > { %v3302_v24 = vsub.f32 %v3291_v21, %v8767_v44  ;;  %v3611_v22 = vmul.f32 %v7984_v36, %v3602_v16  ;;  %v8002_v11 = vadd.f32 %v3610_v47, %v7875_v63  ;;  %v3407_v63 = vmul.f32 %v8773_v62, %v7925_v14  ;;  %v3333_v14 = vld [vmem:[#allocation2 + $0x20] sm:$0xff]  ;;  %v3334_v21 = vld [vmem:[#allocation2 + $0x28] sm:$0xff] }
 0x684   : > { %v3435_v38 = vmul.f32 %v8769_v59, %v3333_v14  ;;  %v3386_v16 = vmul.f32 %v7904_v30, %v7932_v52  ;;  %v3418_v47 = vmul.f32 %v7910_v4, %v3408_v19  ;;  %v3436_v43 = vmul.f32 %v8774_v55, %v3334_v21 }
 0x685   : > { %v3311_v6 = vmul.f32 %v7870_v8, %v3302_v24  ;;  %8771 = vst [vmem:[#allocation69_spill] sm:$0xff] %v8002_v11  ;;  %v8005_v15 = vadd.f32 %v3611_v22, %v7881_v51  ;;  %v3565_v51 = vld [vmem:[#allocation2 + $0x4a] sm:$0xff]  ;;  %v3342_v24 = vmul.f32 %v6310_v50, %v3334_v21  ;;  %v3417_v25 = vmul.f32 %v7910_v4, %v3407_v63 }
 0x686   : > { %v3445_v18 = vmul.f32 %v7916_v40, %v3435_v38  ;;  %v3481_v63 = vmul.f32 %v8775_v29, %v3401_v5 }
 0x687   : > { %v7987_v28 = vadd.f32 %v3311_v6, %v8767_v44  ;;  %8772 = vst [vmem:[#allocation74_spill] sm:$0xff] %v8005_v15  ;;  %v3626_v35 = vpack.c.bf16 %v8005_v15, %v8002_v11  ;;  %v3341_v44 = vmul.f32 %v8774_v55, %v3333_v14  ;;  %v8039_v6 = vmul.f32 %v3565_v51, %v8734_v41 }
 0x688   : > { %v3490_v15 = vmul.f32 %v7929_v37, %v3480_v17  ;;  %v3568_v17 = vmul.f32 %v8773_v62, %v3401_v5 }
 0x689   : > { %3327 = vst [vmem:[#allocation2 + $0x39] sm:$0xff] %v7987_v28  ;;  %3840 = vmatmul.bf16.vlgmr.msra.gmra.mxu3 %v3626_v35  ;;  %3869 = vmatmul.bf16.vlgmr.msra.gmra.mxu2 %v3626_v35  ;;  %v3388_v2 = vmul.f32 %v7904_v30, %v7987_v28  ;;  %v3351_v22 = vmul.f32 %v7900_v32, %v3341_v44 }
 0x68a   : > { %v3293_v54 = vpop.f32.mrf.mxu1  ;;  %3898 = vmatmul.bf16.vlgmr.msra.gmra.mxu0 %v3626_v35  ;;  %3927 = vmatmul.bf16.vlgmr.msra.gmra.mxu1 %v3626_v35  ;;  %v3507_v44 = vmul.f32 %v8768_v61, %v3333_v14  ;;  %v3544_v14 = vmul.f32 %v7957_v33, %v7898_v0 }
 0x68b   : > { %v3303_v9 = vsub.f32 %v3293_v54, %v8770_v39  ;;  %v3425_v54 = vadd.f32 %v3417_v25, %v3391_v13  ;;  %v8777_v25 = vld [vmem:[#allocation55_spill] sm:$0xff] }
 0x68d   : > { %v3312_v1 = vmul.f32 %v7870_v8, %v3303_v9  ;;  %v3352_v9 = vmul.f32 %v7900_v32, %v3342_v24  ;;  %v3508_v24 = vmul.f32 %v8769_v59, %v3334_v21  ;;  %v3335_v21 = vld [vmem:[#allocation2 + $0x30] sm:$0xff] }
 0x68f   : > { %v8018_v53 = vadd.f32 %v3312_v1, %v8770_v39  ;;  %v3444_v39 = vmul.f32 %v7916_v40, %v3434_v58  ;;  %v3426_v1 = vadd.f32 %v3418_v47, %v3392_v7  ;;  %v3464_v7 = vmul.f32 %v7923_v31, %v7898_v0 }
 0x690   : > { %v8020_v8 = vld [vmem:[#allocation2 + $0x38] sm:$0xff]  ;;  %v3393_v47 = vadd.f32 %v3385_v46, %v3351_v22  ;;  %v3394_v59 = vadd.f32 %v3386_v16, %v3352_v9  ;;  %v3518_v46 = vmul.f32 %v7953_v60, %v3508_v24  ;;  %v3545_v9 = vmul.f32 %v7957_v33, %v7932_v52 }
 0x691   : > { %3328 = vst [vmem:[#allocation2 + $0x41] sm:$0xff] %v8018_v53  ;;  %v3344_v49 = vmul.f32 %v8699_v23, %v8020_v8  ;;  %v8045_v26 = vmul.f32 %v7923_v31, %v8018_v53  ;;  %v3452_v35 = vadd.f32 %v3444_v39, %v3425_v54  ;;  %v8778_v24 = vld [vmem:[#allocation48_spill] sm:$0xff] }
 0x693   : > { %v3354_v41 = vmul.f32 %v7900_v32, %v3344_v49  ;;  %v3453_v49 = vadd.f32 %v3445_v18, %v3426_v1  ;;  %v3471_v54 = vadd.f32 %v3463_v12, %v3452_v35  ;;  %v3491_v1 = vmul.f32 %v7929_v37, %v3481_v63  ;;  %v3561_v18 = vld [vmem:[#allocation2 + $0x2a] sm:$0xff] }
 0x694   : > { %v3517_v12 = vmul.f32 %v7953_v60, %v3507_v44  ;;  %v3569_v63 = vmul.f32 %v8775_v29, %v3561_v18  ;;  %v3578_v44 = vmul.f32 %v7963_v42, %v3568_v17  ;;  %v3482_v17 = vmul.f32 %v8776_v34, %v3561_v18 }
 0x695   : > { %v3396_v19 = vadd.f32 %v3388_v2, %v3354_v41  ;;  %v3472_v39 = vadd.f32 %v3464_v7, %v3453_v49  ;;  %v3498_v2 = vadd.f32 %v3490_v15, %v3471_v54  ;;  %v3343_v15 = vmul.f32 %v8721_v20, %v3335_v21 }
 0x696   : > { %v3465_v7 = vmul.f32 %v7923_v31, %v7932_v52 }
 0x697   : > { %v3525_v49 = vadd.f32 %v3517_v12, %v3498_v2  ;;  %v3387_v12 = vmul.f32 %v7904_v30, %v7969_v3  ;;  %v3466_v30 = vmul.f32 %v7923_v31, %v7969_v3 }
 0x698   : > { %v8062_v51 = vld [vmem:[#allocation2 + $0x3a] sm:$0xff]  ;;  %v8066_v58 = vld [vmem:[#allocation2 + $0x42] sm:$0xff] }
 0x699   : > { %v8064_v13 = vld [vmem:[#allocation2 + $0x40] sm:$0xff]  ;;  %v3412_v10 = vmul.f32 %v8777_v25, %v8062_v51  ;;  %v3485_v61 = vmul.f32 %v8777_v25, %v8066_v58  ;;  %v3504_v35 = vld [vmem:[#allocation2 + $0x48] sm:$0xff]  ;;  %v3552_v29 = vadd.f32 %v3544_v14, %v3525_v49  ;;  %v3446_v14 = vmul.f32 %v7916_v40, %v3436_v43 }
 0x69a   : > { %v3439_v38 = vmul.f32 %v8699_v23, %v8064_v13  ;;  %v3499_v23 = vadd.f32 %v3491_v1, %v3472_v39  ;;  %v3512_v62 = vmul.f32 %v3504_v35, %v8730_v45  ;;  %v3437_v39 = vmul.f32 %v6310_v50, %v3335_v21 }
 0x69b   : > { %v3422_v11 = vmul.f32 %v7910_v4, %v3412_v10  ;;  %v3495_v10 = vmul.f32 %v7929_v37, %v3485_v61  ;;  %v3586_v1 = vadd.f32 %v3578_v44, %v3552_v29  ;;  %v3492_v49 = vmul.f32 %v7929_v37, %v3482_v17 }
 0x69c   : > { %v3449_v22 = vmul.f32 %v7916_v40, %v3439_v38  ;;  %v3526_v16 = vadd.f32 %v3518_v46, %v3499_v23  ;;  %v3419_v38 = vmul.f32 %v7910_v4, %v3409_v48  ;;  %v3353_v23 = vmul.f32 %v7900_v32, %v3343_v15  ;;  %v3403_v46 = vld [vmem:[#allocation2 + $0x32] sm:$0xff] }
 0x69d   : > { %v3430_v41 = vadd.f32 %v3422_v11, %v3396_v19  ;;  %v3579_v11 = vmul.f32 %v7963_v42, %v3569_v63  ;;  %v3410_v19 = vmul.f32 %v8778_v24, %v3561_v18  ;;  %v3447_v61 = vmul.f32 %v7916_v40, %v3437_v39 }
 0x69e   : > { %v3553_v5 = vadd.f32 %v3545_v9, %v3526_v16  ;;  %v8779_v16 = vld [vmem:[#allocation35_spill] sm:$0xff]  ;;  %v3510_v29 = vmul.f32 %v6310_v50, %v8020_v8  ;;  %v3547_v50 = vmul.f32 %v7957_v33, %v7987_v28 }
 0x69f   : > { %v3457_v25 = vadd.f32 %v3449_v22, %v3430_v41  ;;  %v3420_v54 = vmul.f32 %v7910_v4, %v3410_v19  ;;  %v3427_v41 = vadd.f32 %v3419_v38, %v3393_v47  ;;  %v3595_v22 = vadd.f32 %v7978_v27, %v3586_v1 }
 0x6a0   : > { %v3587_v2 = vadd.f32 %v3579_v11, %v3553_v5  ;;  %v3483_v47 = vmul.f32 %v8778_v24, %v3403_v46  ;;  %v3411_v9 = vmul.f32 %v8779_v16, %v3403_v46  ;;  %v3546_v1 = vmul.f32 %v7957_v33, %v7969_v3 }
 0x6a1   : > { %v3428_v45 = vadd.f32 %v3420_v54, %v3394_v59  ;;  %v3476_v48 = vadd.f32 %v8045_v26, %v3457_v25  ;;  %v3454_v63 = vadd.f32 %v3446_v14, %v3427_v41  ;;  %v3603_v59 = vsub.f32 %v3595_v22, %v7887_v57 }
 0x6a2   : > { %v3596_v35 = vadd.f32 %v7978_v27, %v3587_v2  ;;  %v3509_v26 = vmul.f32 %v8774_v55, %v3335_v21  ;;  %v3493_v18 = vmul.f32 %v7929_v37, %v3483_v47  ;;  %v3395_v25 = vadd.f32 %v3387_v12, %v3353_v23  ;;  %v5170_v47 = vld [vmem:[#allocation18 + $0x78] sm:$0xff] }
 0x6a3   : > { %v3455_v32 = vadd.f32 %v3447_v61, %v3428_v45  ;;  %v3473_v15 = vadd.f32 %v3465_v7, %v3454_v63  ;;  %v3612_v11 = vmul.f32 %v7984_v36, %v3603_v59  ;;  %v3503_v5 = vadd.f32 %v3495_v10, %v3476_v48  ;;  %v5177_v59 = vld [vmem:[#allocation18 + $0xb0] sm:$0xff]  ;;  %4282 = vmatpush.bf16.msrb.mxu2 %v5170_v47 }
 0x6a4   : > { %v3604_v43 = vsub.f32 %v3596_v35, %v7898_v0  ;;  %v3519_v39 = vmul.f32 %v7953_v60, %v3509_v26  ;;  %v3520_v7 = vmul.f32 %v7953_v60, %v3510_v29  ;;  %v3570_v10 = vmul.f32 %v8776_v34, %v3403_v46  ;;  %v5178_v35 = vld [vmem:[#allocation18 + $0xb8] sm:$0xff]  ;;  %v5161_v26 = vld [vmem:[#allocation18 + $0x30] sm:$0xff]  ;;  %v5160_v29 = vld [vmem:[#allocation18 + $0x28] sm:$0xff] }
 0x6a5   : > { %v3474_v44 = vadd.f32 %v3466_v30, %v3455_v32  ;;  %v3500_v38 = vadd.f32 %v3492_v49, %v3473_v15  ;;  %v8125_v55 = vadd.f32 %v3612_v11, %v7887_v57  ;;  %v3571_v23 = vmul.f32 %v8778_v24, %v8062_v51  ;;  %4311 = vmatpush.bf16.msrb.mxu0 %v5178_v35 }
 0x6a6   : > { %v3613_v19 = vmul.f32 %v7984_v36, %v3604_v43  ;;  %v3438_v41 = vmul.f32 %v8721_v20, %v8020_v8  ;;  %v3522_v45 = vmul.f32 %v7953_v60, %v3512_v62  ;;  %v3580_v61 = vmul.f32 %v7963_v42, %v3570_v10  ;;  %v5162_v62 = vld [vmem:[#allocation18 + $0x38] sm:$0xff] }
 0x6a7   : > { %v3501_v54 = vadd.f32 %v3493_v18, %v3474_v44  ;;  %v3527_v2 = vadd.f32 %v3519_v39, %v3500_v38  ;;  %v3581_v48 = vmul.f32 %v7963_v42, %v3571_v23  ;;  %v3467_v8 = vmul.f32 %v7923_v31, %v7987_v28  ;;  %4253 = vmatpush.bf16.msrb.mxu3 %v5162_v62  ;;  %v5168_v38 = vld [vmem:[#allocation18 + $0x68] sm:$0xff]  ;;  %v5175_v39 = vld [vmem:[#allocation18 + $0xa0] sm:$0xff] }
 0x6a8   : > { %v8128_v21 = vadd.f32 %v3613_v19, %v7898_v0  ;;  %v3421_v0 = vmul.f32 %v7910_v4, %v3411_v9  ;;  %v3448_v46 = vmul.f32 %v7916_v40, %v3438_v41  ;;  %v3530_v22 = vadd.f32 %v3522_v45, %v3503_v5  ;;  %v5176_v19 = vld [vmem:[#allocation18 + $0xa8] sm:$0xff]  ;;  %v5167_v41 = vld [vmem:[#allocation18 + $0x60] sm:$0xff]  ;;  %v5185_v45 = vld [vmem:[#allocation18 + $0xf0] sm:$0xff] }
 0x6a9   : > { %v3528_v12 = vadd.f32 %v3520_v7, %v3501_v54  ;;  %v3554_v14 = vadd.f32 %v3546_v1, %v3527_v2  ;;  %v3484_v32 = vmul.f32 %v8779_v16, %v8062_v51  ;;  %v3511_v30 = vmul.f32 %v8721_v20, %v8064_v13  ;;  %v5169_v20 = vld [vmem:[#allocation18 + $0x70] sm:$0xff]  ;;  %4312 = vmatpush.bf16.msrb.mxu0 %v5177_v59 }
 0x6aa   : > { %v3627_v57 = vpack.c.bf16 %v8128_v21, %v8125_v55  ;;  %v3429_v24 = vadd.f32 %v3421_v0, %v3395_v25  ;;  %v3557_v9 = vadd.f32 %v8030_v56, %v3530_v22  ;;  %v3583_v51 = vmul.f32 %v7963_v42, %v8039_v6  ;;  %4283 = vmatpush.bf16.msrb.mxu2 %v5169_v20  ;;  %v5159_v0 = vld [vmem:[#allocation18 + $0x20] sm:$0xff]  ;;  %v5156_v22 = vld [vmem:[#allocation18 + $0x8] sm:$0xff] }
 0x6ab   : > { %v3555_v34 = vadd.f32 %v3547_v50, %v3528_v12  ;;  %v3588_v4 = vadd.f32 %v3580_v61, %v3554_v14  ;;  %v3494_v31 = vmul.f32 %v7929_v37, %v3484_v32  ;;  %v3521_v18 = vmul.f32 %v7953_v60, %v3511_v30  ;;  %4254 = vmatpush.bf16.msrb.mxu3 %v5161_v26  ;;  %v5186_v12 = vld [vmem:[#allocation18 + $0xf8] sm:$0xff]  ;;  %v5172_v14 = vld [vmem:[#allocation18 + $0x88] sm:$0xff]  ;;  %v5163_v32 = vld [vmem:[#allocation18 + $0x40] sm:$0xff] }
 0x6ac   : > { %3845 = vmatmul.bf16.gmra.mxu3 %v3627_v57  ;;  %3874 = vmatmul.bf16.gmra.mxu2 %v3627_v57  ;;  %v3456_v63 = vadd.f32 %v3448_v46, %v3429_v24  ;;  %v3572_v11 = vmul.f32 %v8779_v16, %v8066_v58  ;;  %v3548_v6 = vmul.f32 %v7957_v33, %v8018_v53  ;;  %v5184_v61 = vld [vmem:[#allocation18 + $0xe8] sm:$0xff]  ;;  %v5171_v24 = vld [vmem:[#allocation18 + $0x80] sm:$0xff] }
 0x6ad   : > { %3903 = vmatmul.bf16.gmra.mxu0 %v3627_v57  ;;  %3932 = vmatmul.bf16.gmra.mxu1 %v3627_v57  ;;  %v3589_v17 = vadd.f32 %v3581_v48, %v3555_v34  ;;  %v3597_v40 = vadd.f32 %v7978_v27, %v3588_v4  ;;  %v3591_v5 = vadd.f32 %v3583_v51, %v3557_v9  ;;  %v5157_v48 = vld [vmem:[#allocation18 + $0x10] sm:$0xff]  ;;  %v5183_v46 = vld [vmem:[#allocation18 + $0xe0] sm:$0xff]  ;;  %v5164_v4 = vld [vmem:[#allocation18 + $0x48] sm:$0xff] }
 0x6ae   : > { %v3475_v49 = vadd.f32 %v3467_v8, %v3456_v63  ;;  %v3582_v54 = vmul.f32 %v7963_v42, %v3572_v11  ;;  %4313 = vmatpush.bf16.msrb.mxu0 %v5176_v19  ;;  %4284 = vmatpush.bf16.msrb.mxu2 %v5168_v38  ;;  %v5165_v34 = vld [vmem:[#allocation18 + $0x50] sm:$0xff]  ;;  %v3662_v8 = vld [vmem:[%s8341_s10] sm:$0xf] }
 0x6af   : > { %v3598_v43 = vadd.f32 %v7978_v27, %v3589_v17  ;;  %v3605_v15 = vsub.f32 %v3597_v40, %v7932_v52  ;;  %4255 = vmatpush.bf16.msrb.mxu3 %v5160_v29  ;;  %v3600_v1 = vadd.f32 %v7978_v27, %v3591_v5  ;;  %5196 = vmatpush.bf16.msrb.mxu1 %v5186_v12  ;;  %v5182_v17 = vld [vmem:[#allocation18 + $0xd8] sm:$0xff]  ;;  %v5155_v63 = vld [vmem:[#allocation18] sm:$0xff]  ;;  %v8194_v30 = vperm.slane %v3662_v8, 2  ;;  %v5181_v40 = vld [vmem:[#allocation18 + $0xd0] sm:$0xff] }
 0x6b0   : > { %v3502_v44 = vadd.f32 %v3494_v31, %v3475_v49  ;;  %v8196_v47 = vperm.slane %v3662_v8, 3  ;;  %v8200_v26 = vperm.slane %v3662_v8, 0  ;;  %v8202_v9 = vperm.slane %v3662_v8, 1  ;;  %v5180_v19 = vld [vmem:[#allocation18 + $0xc8] sm:$0xff] }
 0x6b1   : > { %v3606_v13 = vsub.f32 %v3598_v43, %v7969_v3  ;;  %v3614_v37 = vmul.f32 %v7984_v36, %v3605_v15 }
 0x6b2   : > { %v3529_v25 = vadd.f32 %v3521_v18, %v3502_v44  ;;  %4314 = vmatpush.bf16.msrb.mxu0 %v5175_v39  ;;  %4285 = vmatpush.bf16.msrb.mxu2 %v5167_v41 }
 0x6b3   : > { %v3615_v56 = vmul.f32 %v7984_v36, %v3606_v13  ;;  %v8169_v60 = vadd.f32 %v3614_v37, %v7932_v52  ;;  %4256 = vmatpush.bf16.msrb.mxu3 %v5159_v0  ;;  %5197 = vmatpush.bf16.msrb.mxu1 %v5185_v45 }
 0x6b4   : > { %v3556_v16 = vadd.f32 %v3548_v6, %v3529_v25 }
 0x6b5   : > { %v8172_v58 = vadd.f32 %v3615_v56, %v7969_v3  ;;  %v3608_v3 = vsub.f32 %v3600_v1, %v8018_v53 }
 0x6b6   : > { %v3590_v33 = vadd.f32 %v3582_v54, %v3556_v16  ;;  %v5179_v16 = vld [vmem:[#allocation18 + $0xc0] sm:$0xff] }
 0x6b7   : > { %v3628_v7 = vpack.c.bf16 %v8172_v58, %v8169_v60  ;;  %v3617_v2 = vmul.f32 %v7984_v36, %v3608_v3  ;;  %5198 = vmatpush.bf16.msrb.mxu1 %v5184_v61 }
 0x6b8   : > { %v3599_v52 = vadd.f32 %v7978_v27, %v3590_v33  ;;  %v5174_v27 = vld [vmem:[#allocation18 + $0x98] sm:$0xff] }
 0x6b9   : > { %v8184_v10 = vadd.f32 %v3617_v2, %v8018_v53  ;;  %4315 = vmatpush.bf16.msrb.mxu0 %v5174_v27  ;;  %v5158_v53 = vld [vmem:[#allocation18 + $0x18] sm:$0xff] }
 0x6ba   : > { %v3607_v42 = vsub.f32 %v3599_v52, %v7987_v28  ;;  %4257 = vmatpush.bf16.msrb.mxu3 %v5158_v53 }
 0x6bb   : > { %5199 = vmatpush.bf16.msrb.mxu1 %v5183_v46 }
 0x6bc   : > { %3850 = vmatmul.bf16.gmra.mxu3 %v3628_v7  ;;  %3879 = vmatmul.bf16.gmra.mxu2 %v3628_v7  ;;  %v3616_v50 = vmul.f32 %v7984_v36, %v3607_v42  ;;  %v5173_v36 = vld [vmem:[#allocation18 + $0x90] sm:$0xff] }
 0x6bd   : > { %3908 = vmatmul.bf16.gmra.mxu0 %v3628_v7  ;;  %3937 = vmatmul.bf16.gmra.mxu1 %v3628_v7 }
 0x6be   : > { %v8187_v23 = vadd.f32 %v3616_v50, %v7987_v28  ;;  %v5166_v28 = vld [vmem:[#allocation18 + $0x58] sm:$0xff]  ;;  %4316 = vmatpush.bf16.msrb.mxu0 %v5173_v36  ;;  %4258 = vmatpush.bf16.msrb.mxu3 %v5157_v48 }
 0x6bf   : > { %4286 = vmatpush.bf16.msrb.mxu2 %v5166_v28  ;;  %5200 = vmatpush.bf16.msrb.mxu1 %v5182_v17 }
 0x6c0   : > { %v3629_v57 = vpack.c.bf16 %v8184_v10, %v8187_v23 }
 0x6c2   : > { %4317 = vmatpush.bf16.msrb.mxu0 %v5172_v14  ;;  %4259 = vmatpush.bf16.msrb.mxu3 %v5156_v22 }
 0x6c3   : > { %4287 = vmatpush.bf16.msrb.mxu2 %v5165_v34  ;;  %5201 = vmatpush.bf16.msrb.mxu1 %v5181_v40 }
 0x6c6   : > { %4318 = vmatpush.bf16.msrb.mxu0 %v5171_v24  ;;  %4260 = vmatpush.bf16.msrb.mxu3 %v5155_v63 }
 0x6c7   : > { %4288 = vmatpush.bf16.msrb.mxu2 %v5164_v4  ;;  %5202 = vmatpush.bf16.msrb.mxu1 %v5180_v19 }
 0x6ca   : > { %4340 = vmatpush.bf16.msra.mxu0 %v5186_v12 }
 0x6cb   : > { %4289 = vmatpush.bf16.msrb.mxu2 %v5163_v32  ;;  %5203 = vmatpush.bf16.msrb.mxu1 %v5179_v16 }
 0x6cc   : > { %3855 = vmatmul.bf16.gmra.mxu3 %v3629_v57  ;;  %3884 = vmatmul.bf16.gmra.mxu2 %v3629_v57 }
 0x6cd   : > { %3913 = vmatmul.bf16.gmra.mxu0 %v3629_v57  ;;  %3942 = vmatmul.bf16.gmra.mxu1 %v3629_v57 }
 0x6ce   : > { %4341 = vmatpush.bf16.msra.mxu0 %v5185_v45 }
 0x6d2   : > { %4342 = vmatpush.bf16.msra.mxu0 %v5184_v61 }
 0x6d6   : > { %4343 = vmatpush.bf16.msra.mxu0 %v5183_v46 }
 0x6da   : > { %4344 = vmatpush.bf16.msra.mxu0 %v5182_v17 }
 0x6de   : > { %4345 = vmatpush.bf16.msra.mxu0 %v5181_v40 }
 0x6e2   : > { %4346 = vmatpush.bf16.msra.mxu0 %v5180_v19 }
 0x6e6   : > { %4347 = vmatpush.bf16.msra.mxu0 %v5179_v16 }
 0x707   : > { %v3899_v35 = vpop.f32.mrf.mxu0  ;;  %v3928_v62 = vpop.f32.mrf.mxu1 }
 0x708   : > { %v3900_v49 = vadd.f32 %v3899_v35, %v8194_v30  ;;  %v3929_v31 = vadd.f32 %v3928_v62, %v8196_v47 }
 0x70a   : > { %v3950_v44 = vmax.f32 %v3900_v49, 0.0  ;;  %v3951_v18 = vmax.f32 %v3929_v31, 0.0 }
 0x70c   : > { %v3841_v59 = vpop.f32.mrf.mxu3  ;;  %v3870_v43 = vpop.f32.mrf.mxu2 }
 0x70d   : > { %v3842_v56 = vadd.f32 %v3841_v59, %v8200_v26  ;;  %v3871_v25 = vadd.f32 %v3870_v43, %v8202_v9 }
 0x70f   : > { %v3901_v51 = vpop.f32.mrf.mxu0  ;;  %v3930_v15 = vpop.f32.mrf.mxu1  ;;  %v3948_v7 = vmax.f32 %v3842_v56, 0.0  ;;  %v3949_v33 = vmax.f32 %v3871_v25, 0.0 }
 0x710   : > { %v3902_v20 = vadd.f32 %v3901_v51, %v8194_v30  ;;  %v3931_v13 = vadd.f32 %v3930_v15, %v8196_v47 }
 0x712   : > { %v3954_v11 = vmax.f32 %v3902_v20, 0.0  ;;  %v3955_v37 = vmax.f32 %v3931_v13, 0.0 }
 0x714   : > { %v3982_v6 = vpack.c.bf16 %v3954_v11, %v3950_v44  ;;  %v8208_v29 = vpack.c.bf16 %v3955_v37, %v3951_v18  ;;  %v3843_v5 = vpop.f32.mrf.mxu3  ;;  %v3872_v38 = vpop.f32.mrf.mxu2 }
 0x715   : > { %v3844_v54 = vadd.f32 %v3843_v5, %v8200_v26  ;;  %v3873_v39 = vadd.f32 %v3872_v38, %v8202_v9 }
 0x716   : > { %4319 = vmatmul.bf16.vlgmr.msrb.gmra.mxu0 %v3982_v6 }
 0x717   : > { %v3952_v1 = vmax.f32 %v3844_v54, 0.0  ;;  %v3953_v52 = vmax.f32 %v3873_v39, 0.0 }
 0x719   : > { %v3980_v3 = vpack.c.bf16 %v3952_v1, %v3948_v7  ;;  %v3981_v42 = vpack.c.bf16 %v3953_v52, %v3949_v33 }
 0x71b   : > { %4261 = vmatmul.bf16.vlgmr.msrb.gmra.mxu3 %v3980_v3  ;;  %4290 = vmatmul.bf16.vlgmr.msrb.gmra.mxu2 %v3981_v42 }
 0x72a   : > { %v3904_v2 = vpop.f32.mrf.mxu0  ;;  %v3933_v50 = vpop.f32.mrf.mxu1 }
 0x72b   : > { %v3905_v12 = vadd.f32 %v3904_v2, %v8194_v30  ;;  %v3934_v0 = vadd.f32 %v3933_v50, %v8196_v47 }
 0x72d   : > { %v3958_v28 = vmax.f32 %v3905_v12, 0.0  ;;  %v3959_v14 = vmax.f32 %v3934_v0, 0.0 }
 0x72f   : > { %v3846_v57 = vpop.f32.mrf.mxu3  ;;  %v3875_v27 = vpop.f32.mrf.mxu2 }
 0x730   : > { %v3847_v34 = vadd.f32 %v3846_v57, %v8200_v26  ;;  %v3876_v24 = vadd.f32 %v3875_v27, %v8202_v9 }
 0x732   : > { %v3906_v41 = vpop.f32.mrf.mxu0  ;;  %v3935_v36 = vpop.f32.mrf.mxu1  ;;  %v3956_v17 = vmax.f32 %v3847_v34, 0.0  ;;  %v3957_v63 = vmax.f32 %v3876_v24, 0.0 }
 0x733   : > { %v3907_v45 = vadd.f32 %v3906_v41, %v8194_v30  ;;  %v3936_v53 = vadd.f32 %v3935_v36, %v8196_v47 }
 0x735   : > { %v3962_v61 = vmax.f32 %v3907_v45, 0.0  ;;  %v3963_v48 = vmax.f32 %v3936_v53, 0.0 }
 0x737   : > { %v3987_v46 = vpack.c.bf16 %v3963_v48, %v3959_v14  ;;  %v3848_v22 = vpop.f32.mrf.mxu3  ;;  %v3877_v4 = vpop.f32.mrf.mxu2  ;;  %v3986_v8 = vpack.c.bf16 %v3962_v61, %v3958_v28 }
 0x738   : > { %v3849_v35 = vadd.f32 %v3848_v22, %v8200_v26  ;;  %v3878_v62 = vadd.f32 %v3877_v4, %v8202_v9 }
 0x739   : > { %4324 = vmatmul.bf16.gmra.mxu0 %v3986_v8  ;;  %4353 = vmatmul.bf16.vlgmr.msrb.gmra.mxu1 %v3987_v46 }
 0x73a   : > { %v3960_v32 = vmax.f32 %v3849_v35, 0.0  ;;  %v3961_v40 = vmax.f32 %v3878_v62, 0.0  ;;  %v3909_v59 = vpop.f32.mrf.mxu0  ;;  %v3938_v43 = vpop.f32.mrf.mxu1 }
 0x73b   : > { %v3910_v20 = vadd.f32 %v3909_v59, %v8194_v30  ;;  %v3939_v13 = vadd.f32 %v3938_v43, %v8196_v47 }
 0x73c   : > { %v3985_v49 = vpack.c.bf16 %v3961_v40, %v3957_v63  ;;  %v3984_v31 = vpack.c.bf16 %v3960_v32, %v3956_v17 }
 0x73d   : > { %v3966_v19 = vmax.f32 %v3910_v20, 0.0  ;;  %v3967_v56 = vmax.f32 %v3939_v13, 0.0 }
 0x73e   : > { %4266 = vmatmul.bf16.gmra.mxu3 %v3984_v31  ;;  %4295 = vmatmul.bf16.gmra.mxu2 %v3985_v49 }
 0x73f   : > { %v3851_v51 = vpop.f32.mrf.mxu3  ;;  %v3880_v15 = vpop.f32.mrf.mxu2 }
 0x740   : > { %v3852_v5 = vadd.f32 %v3851_v51, %v8200_v26  ;;  %v3881_v38 = vadd.f32 %v3880_v15, %v8202_v9 }
 0x742   : > { %v3911_v44 = vpop.f32.mrf.mxu0  ;;  %v3940_v18 = vpop.f32.mrf.mxu1  ;;  %v3964_v52 = vmax.f32 %v3852_v5, 0.0  ;;  %v3965_v3 = vmax.f32 %v3881_v38, 0.0 }
 0x743   : > { %v3912_v11 = vadd.f32 %v3911_v44, %v8194_v30  ;;  %v3941_v37 = vadd.f32 %v3940_v18, %v8196_v47 }
 0x745   : > { %v3970_v25 = vmax.f32 %v3912_v11, 0.0  ;;  %v3971_v6 = vmax.f32 %v3941_v37, 0.0 }
 0x747   : > { %v3990_v16 = vpack.c.bf16 %v3970_v25, %v3966_v19  ;;  %v3991_v54 = vpack.c.bf16 %v3971_v6, %v3967_v56  ;;  %v3853_v39 = vpop.f32.mrf.mxu3  ;;  %v3882_v7 = vpop.f32.mrf.mxu2 }
 0x748   : > { %v3854_v33 = vadd.f32 %v3853_v39, %v8200_v26  ;;  %v3883_v1 = vadd.f32 %v3882_v7, %v8202_v9 }
 0x749   : > { %4329 = vmatmul.bf16.gmra.mxu0 %v3990_v16  ;;  %4358 = vmatmul.bf16.gmra.mxu1 %v3991_v54 }
 0x74a   : > { %v3968_v42 = vmax.f32 %v3854_v33, 0.0  ;;  %v3969_v2 = vmax.f32 %v3883_v1, 0.0  ;;  %v3914_v50 = vpop.f32.mrf.mxu0  ;;  %v3943_v57 = vpop.f32.mrf.mxu1 }
 0x74b   : > { %v3915_v36 = vadd.f32 %v3914_v50, %v8194_v30  ;;  %v3944_v45 = vadd.f32 %v3943_v57, %v8196_v47 }
 0x74c   : > { %v3988_v27 = vpack.c.bf16 %v3968_v42, %v3964_v52  ;;  %v3989_v12 = vpack.c.bf16 %v3969_v2, %v3965_v3 }
 0x74d   : > { %v3974_v48 = vmax.f32 %v3915_v36, 0.0  ;;  %v3975_v34 = vmax.f32 %v3944_v45, 0.0 }
 0x74e   : > { %4271 = vmatmul.bf16.gmra.mxu3 %v3988_v27  ;;  %4300 = vmatmul.bf16.gmra.mxu2 %v3989_v12 }
 0x74f   : > { %v3856_v0 = vpop.f32.mrf.mxu3  ;;  %v3885_v41 = vpop.f32.mrf.mxu2 }
 0x750   : > { %v3857_v22 = vadd.f32 %v3856_v0, %v8200_v26  ;;  %v3886_v4 = vadd.f32 %v3885_v41, %v8202_v9 }
 0x752   : > { %v3916_v53 = vpop.f32.mrf.mxu0  ;;  %v3945_v28 = vpop.f32.mrf.mxu1  ;;  %v3973_v32 = vmax.f32 %v3886_v4, 0.0 }
 0x753   : > { %v3917_v14 = vadd.f32 %v3916_v53, %v8194_v30  ;;  %v3946_v61 = vadd.f32 %v3945_v28, %v8196_v47  ;;  %v3972_v47 = vmax.f32 %v3857_v22, 0.0 }
 0x755   : > { %v3978_v24 = vmax.f32 %v3917_v14, 0.0  ;;  %v3979_v46 = vmax.f32 %v3946_v61, 0.0 }
 0x757   : > { %v3994_v8 = vpack.c.bf16 %v3978_v24, %v3974_v48  ;;  %v3995_v35 = vpack.c.bf16 %v3979_v46, %v3975_v34  ;;  %v3858_v62 = vpop.f32.mrf.mxu3  ;;  %v3887_v17 = vpop.f32.mrf.mxu2 }
 0x758   : > { %v3859_v63 = vadd.f32 %v3858_v62, %v8200_v26  ;;  %v3888_v30 = vadd.f32 %v3887_v17, %v8202_v9 }
 0x759   : > { %4334 = vmatmul.bf16.gmra.mxu0 %v3994_v8  ;;  %4363 = vmatmul.bf16.gmra.mxu1 %v3995_v35 }
 0x75a   : > { %v3976_v40 = vmax.f32 %v3859_v63, 0.0  ;;  %v3977_v59 = vmax.f32 %v3888_v30, 0.0 }
 0x75c   : > { %v3992_v43 = vpack.c.bf16 %v3976_v40, %v3972_v47  ;;  %v3993_v49 = vpack.c.bf16 %v3977_v59, %v3973_v32 }
 0x75e   : > { %4276 = vmatmul.bf16.gmra.mxu3 %v3992_v43  ;;  %4305 = vmatmul.bf16.gmra.mxu2 %v3993_v49 }
 0x769   : > { %4348 = vmatmul.bf16.vlgmr.msra.gmra.mxu0 %v8208_v29 }
 0x76a   : > { %5745 = shalt.err (!%p5742_p8)
}
 0x76b   : > { %s5821_s23 = smov 128   ;;  %s5822_s27 = smov 8   ;;  %v8260_v18 = vld [vmem:[#allocation10 + $0x8] ss:$0 sm:$0xff]  ;;  %v8263_v16 = vld [vmem:[#allocation10 + $0x7] ss:$0 sm:$0xff] }
 0x76c   : > { %5242 = dma.vmem_to_hbm [thread:$0]  (%p5931_p5), %s4424_s25, 1024, %s4426_s14, %s4408_s19, %s5821_s23, %s5821_s23, %s5822_s27  }
 0x76d   : > { %s8273_s9 = scalar_lea.vmem %s8343_s12, %s5081_s20 }
 0x793   : > { %v8254_v26 = vpop.f32.mrf.mxu0 }
 0x79b   : > { %v8256_v9 = vpop.f32.mrf.mxu0 }
 0x79e   : > { %v4262_v29 = vpop.f32.mrf.mxu3  ;;  %v4291_v31 = vpop.f32.mrf.mxu2 }
 0x79f   : > { %v4263_v8 = vadd.f32 %v8260_v18, %v4262_v29 }
 0x7a1   : > { %v4292_v63 = vadd.f32 %v4291_v31, %v4263_v8 }
 0x7a6   : > { %v4264_v15 = vpop.f32.mrf.mxu3  ;;  %v8258_v20 = vpop.f32.mrf.mxu2 }
 0x7a7   : > { %v4265_v49 = vadd.f32 %v8260_v18, %v4264_v15 }
 0x7b6   : > { %v4325_v51 = vpop.f32.mrf.mxu0  ;;  %v4354_v13 = vpop.f32.mrf.mxu1 }
 0x7be   : > { %v4327_v44 = vpop.f32.mrf.mxu0  ;;  %v4356_v25 = vpop.f32.mrf.mxu1 }
 0x7c1   : > { %v4267_v11 = vpop.f32.mrf.mxu3  ;;  %v4296_v37 = vpop.f32.mrf.mxu2 }
 0x7c2   : > { %v4268_v19 = vadd.f32 %v8260_v18, %v4267_v11 }
 0x7c4   : > { %v4297_v56 = vadd.f32 %v4296_v37, %v4268_v19  ;;  %v4294_v37 = vadd.f32 %v8258_v20, %v4265_v49  ;;  %v8780_v19 = vld [vmem:[#allocation69_spill] sm:$0xff] }
 0x7c6   : > { %v4326_v6 = vadd.f32 %v4325_v51, %v4297_v56  ;;  %v4330_v5 = vpop.f32.mrf.mxu0  ;;  %v4359_v50 = vpop.f32.mrf.mxu1 }
 0x7c8   : > { %v4355_v38 = vadd.f32 %v4354_v13, %v4326_v6 }
 0x7c9   : > { %v4269_v54 = vpop.f32.mrf.mxu3  ;;  %v4298_v39 = vpop.f32.mrf.mxu2 }
 0x7ca   : > { %v4371_v7 = vsub.f32 %v4355_v38, %v8125_v55  ;;  %v4270_v33 = vadd.f32 %v8260_v18, %v4269_v54 }
 0x7cc   : > { %v4380_v1 = vmul.f32 %v8263_v16, %v4371_v7  ;;  %v4299_v52 = vadd.f32 %v4298_v39, %v4270_v33  ;;  %v4323_v39 = vadd.f32 %v8256_v9, %v4294_v37 }
 0x7ce   : > { %v4388_v3 = vadd.f32 %v4380_v1, %v8125_v55  ;;  %v4328_v42 = vadd.f32 %v4327_v44, %v4299_v52  ;;  %v4332_v2 = vpop.f32.mrf.mxu0  ;;  %v4361_v46 = vpop.f32.mrf.mxu1 }
 0x7d0   : > { %4396 = vst [vmem:[%s8273_s9 + $0x10] sm:$0xff] %v4388_v3  ;;  %v4357_v57 = vadd.f32 %v4356_v25, %v4328_v42  ;;  %v8781_v3 = vld [vmem:[#allocation74_spill] sm:$0xff] }
 0x7d1   : > { %v4272_v27 = vpop.f32.mrf.mxu3  ;;  %v4301_v12 = vpop.f32.mrf.mxu2 }
 0x7d2   : > { %v4372_v0 = vsub.f32 %v4357_v57, %v8128_v21  ;;  %v4273_v41 = vadd.f32 %v8260_v18, %v4272_v27 }
 0x7d4   : > { %v4381_v36 = vmul.f32 %v8263_v16, %v4372_v0  ;;  %v4302_v45 = vadd.f32 %v4301_v12, %v4273_v41 }
 0x7d6   : > { %v4389_v53 = vadd.f32 %v4381_v36, %v8128_v21  ;;  %v4331_v28 = vadd.f32 %v4330_v5, %v4302_v45  ;;  %v4335_v14 = vpop.f32.mrf.mxu0  ;;  %v4364_v29 = vpop.f32.mrf.mxu1 }
 0x7d8   : > { %4397 = vst [vmem:[%s8273_s9 + $0x18] sm:$0xff] %v4389_v53  ;;  %v4360_v55 = vadd.f32 %v4359_v50, %v4331_v28 }
 0x7d9   : > { %v4274_v61 = vpop.f32.mrf.mxu3  ;;  %v4303_v48 = vpop.f32.mrf.mxu2 }
 0x7da   : > { %v4373_v34 = vsub.f32 %v4360_v55, %v8169_v60  ;;  %v4275_v24 = vadd.f32 %v8260_v18, %v4274_v61 }
 0x7dc   : > { %v4382_v22 = vmul.f32 %v8263_v16, %v4373_v34  ;;  %v4304_v4 = vadd.f32 %v4303_v48, %v4275_v24 }
 0x7de   : > { %v4390_v35 = vadd.f32 %v4382_v22, %v8169_v60  ;;  %v4333_v21 = vadd.f32 %v4332_v2, %v4304_v4  ;;  %v4337_v62 = vpop.f32.mrf.mxu0  ;;  %v4321_v60 = vadd.f32 %v8254_v26, %v4292_v63  ;;  %v4366_v1 = vpop.f32.mrf.mxu1 }
 0x7e0   : > { %4398 = vst [vmem:[%s8273_s9 + $0x20] sm:$0xff] %v4390_v35  ;;  %v4362_v17 = vadd.f32 %v4361_v46, %v4333_v21 }
 0x7e1   : > { %v4277_v30 = vpop.f32.mrf.mxu3  ;;  %v4306_v47 = vpop.f32.mrf.mxu2 }
 0x7e2   : > { %v4374_v32 = vsub.f32 %v4362_v17, %v8172_v58  ;;  %v4278_v40 = vadd.f32 %v8260_v18, %v4277_v30 }
 0x7e4   : > { %v4383_v59 = vmul.f32 %v8263_v16, %v4374_v32  ;;  %v4307_v43 = vadd.f32 %v4306_v47, %v4278_v40 }
 0x7e6   : > { %v4391_v51 = vadd.f32 %v4383_v59, %v8172_v58  ;;  %v4336_v13 = vadd.f32 %v4335_v14, %v4307_v43  ;;  %v4349_v44 = vpop.f32.mrf.mxu0 }
 0x7e7   : > { %v4350_v11 = vadd.f32 %v4349_v44, %v4321_v60 }
 0x7e8   : > { %4399 = vst [vmem:[%s8273_s9 + $0x28] sm:$0xff] %v4391_v51  ;;  %v4365_v31 = vadd.f32 %v4364_v29, %v4336_v13 }
 0x7e9   : > { %v4369_v56 = vsub.f32 %v4350_v11, %v8780_v19  ;;  %v4279_v25 = vpop.f32.mrf.mxu3  ;;  %v4308_v5 = vpop.f32.mrf.mxu2 }
 0x7ea   : > { %v4375_v6 = vsub.f32 %v4365_v31, %v8187_v23  ;;  %v4280_v15 = vadd.f32 %v8260_v18, %v4279_v25 }
 0x7eb   : > { %v4378_v26 = vmul.f32 %v8263_v16, %v4369_v56 }
 0x7ec   : > { %v4384_v58 = vmul.f32 %v8263_v16, %v4375_v6  ;;  %v4309_v38 = vadd.f32 %v4308_v5, %v4280_v15 }
 0x7ed   : > { %v4386_v54 = vadd.f32 %v4378_v26, %v8780_v19 }
 0x7ee   : > { %v4392_v20 = vadd.f32 %v4384_v58, %v8187_v23  ;;  %v4338_v7 = vadd.f32 %v4337_v62, %v4309_v38  ;;  %v4351_v33 = vpop.f32.mrf.mxu0 }
 0x7ef   : > { %4394 = vst [vmem:[%s8273_s9] sm:$0xff] %v4386_v54  ;;  %v4352_v52 = vadd.f32 %v4351_v33, %v4323_v39 }
 0x7f0   : > { %4400 = vst [vmem:[%s8273_s9 + $0x30] sm:$0xff] %v4392_v20  ;;  %v4367_v18 = vadd.f32 %v4366_v1, %v4338_v7 }
 0x7f1   : > { %v4370_v42 = vsub.f32 %v4352_v52, %v8781_v3 }
 0x7f2   : > { %v4376_v2 = vsub.f32 %v4367_v18, %v8184_v10 }
 0x7f3   : > { %v4379_v50 = vmul.f32 %v8263_v16, %v4370_v42 }
 0x7f4   : > { %v4385_v57 = vmul.f32 %v8263_v16, %v4376_v2 }
 0x7f5   : > { %v4387_v9 = vadd.f32 %v4379_v50, %v8781_v3 }
 0x7f6   : > { %v4393_v27 = vadd.f32 %v4385_v57, %v8184_v10 }
 0x7f7   : > { %4395 = vst [vmem:[%s8273_s9 + $0x8] sm:$0xff] %v4387_v9 }
 0x7f8   : > { %4401 = vst [vmem:[%s8273_s9 + $0x38] sm:$0xff] %v4393_v27 }
 0x7f9 PF: > { %s8782_s1 = sld [smem:[#allocation28_spill]] }
 0x7fa   : > { %s8783_s20 = sld [smem:[#allocation26_spill]] }
 0x7ff   : > { %p5294_p5 = scmp.ge.s32.totalorder %s8782_s1, 2 }
 0x800   : > { %s4448_s28 = sand.u32 1, %s8783_s20  }
 0x801   : > { %p5273_p9 = pnand %p5294_p5, %p5935_p6  ;;  %s4449_s21 = scalar_lea.sflag [#allocation6], %s4448_s28 }
 0x803   : > { %p5274_p10 = pneg %p5273_p9 }
 0x805   : > { %5783 = dma.done.wait (%p5274_p10), %s4449_s21, 1024  }
 0x806   : > { %5785 = vsyncadd (%p5274_p10), %s4449_s21, 4294966272  ;;  %s8785_s28 = sld [smem:[#allocation29_spill]]  ;;  %s8788_s25 = smov %s5792_s26 }
 0x807   : > { %s8786_s22 = sld [smem:[#allocation27_spill]] }
 0x808   : > { %s8787_s27 = sld [smem:[#allocation30_spill]] }
 0x80c   : > { %p29_p11 = scmp.ge.s32.totalorder %s8785_s28, 4  }
 0x80d   : > { %s8789_s26 = smov %s8786_s22 }
 0x80e   :  { %31 = sbr.rel (!%p29_p11) target bundleno = 14 (0xe), region = 160 }
 0x813   :  { %4455 = vsyncpa [#allocation5], 1 }
 0x814   :  { %4457 = vsyncpa [#allocation5 + $0x1], 1 }
 0x815   :  { %4458 = vsyncpa [#allocation8], 1 }
 0x816   :  { %4459 = vsyncpa [#allocation11], 1 }
 0x817   :  { %4460 = vsyncpa [#allocation14], 1 }
 0x818   :  { %4461 = vsyncpa [#allocation17], 1 }
 0x819   :  { %4462 = vsyncpa [#allocation6], 1 }
 0x81a   :  { %4464 = vsyncpa [#allocation6 + $0x1], 1 }

</bundles_post_ra>
